<compile_context>
chip_gen: v7x
topology: tpu7x:2x2x1
jax: 0.10.0
libtpu: 0.0.40
codegen_flags: <defaults>
</compile_context>

<pallas_src>
import functools

import jax
import jax.numpy as jnp
from jax.experimental import pallas as pl
from jax.experimental.pallas import tpu as pltpu

# Leave headroom under v7x's 64 MiB physical VMEM; above the 32 MiB default.
VMEM_LIMIT_BYTES = 48 * 1024 * 1024


def _compiler_params():
    return pltpu.CompilerParams(
        dimension_semantics=("parallel",),      # batch items are independent
        vmem_limit_bytes=VMEM_LIMIT_BYTES)


# ---------------------------------------------------------------------------
# Kernels
# ---------------------------------------------------------------------------
def _conv1_bn_relu_mask_kernel(len_ref, x_ref, w_ref, scale_ref, shift_ref,
                               o_ref, xp_ref, acc_ref, *, H, W, C):
    """3x3 conv (Cin=1 -> C, stride 1, pad 1) + eval-BN + ReLU + time mask.

    x_ref:     (1, H, W, 1)  f32   raw features for one batch item
    w_ref:     (3, 3, 1, C)  f32
    scale_ref: (1, C) f32          gamma / sqrt(var + eps)
    shift_ref: (1, C) f32          beta - mean * scale
    o_ref:     (1, H*W, C)   bf16  flat NHWC output
    xp_ref:    (H+2, W+2, 1) f32   zero-bordered scratch (in-kernel padding)
    acc_ref:   (H*W, C)      f32   accumulator scratch
    len_ref:   (B,) int32 in SMEM  valid time length per batch item
    """
    b = pl.program_id(0)
    length = len_ref[b]

    # In-kernel zero padding (replaces a jnp.pad HBM round trip).
    xp_ref[...] = jnp.zeros_like(xp_ref)
    xp_ref[1:H + 1, 1:W + 1, :] = x_ref[0]

    # Cin == 1: 9 VPU broadcast multiply-adds; an MXU dot with K=1 would only
    # waste the systolic array.
    acc_ref[...] = jnp.zeros_like(acc_ref)
    for dh in range(3):
        for dw in range(3):
            xs = xp_ref[dh:dh + H, dw:dw + W, :].reshape(H * W, 1)
            acc_ref[...] += xs * w_ref[dh, dw]            # (H*W,1)*(1,C)

    y = acc_ref[...] * scale_ref[...] + shift_ref[...]    # BatchNorm2d (eval)
    y = jnp.maximum(y, 0.0)                                # ReLU
    widx = jax.lax.broadcasted_iota(jnp.int32, (H, W, 1), 1).reshape(H * W, 1)
    y = jnp.where(widx < length, y, 0.0)                   # MaskCNN time mask
    o_ref[0] = y.astype(o_ref.dtype)


def _conv_bn_relu_mask_kernel(len_ref, x_ref, w_ref, scale_ref, shift_ref,
                              o_ref, xp_ref, acc_ref, *, H, W, Cin, Cout):
    """3x3 conv (stride 1, pad 1) + eval-BN + ReLU + time mask (MXU path).

    x_ref: (1, H, W, Cin) bf16;  w_ref: (3, 3, Cin, Cout) bf16
    o_ref: (1, H*W, Cout) bf16;  xp_ref/acc_ref: VMEM scratch.
    """
    b = pl.program_id(0)
    length = len_ref[b]

    xp_ref[...] = jnp.zeros_like(xp_ref)
    xp_ref[1:H + 1, 1:W + 1, :] = x_ref[0]

    # 9 MXU dots of shape (H*W, Cin) x (Cin, Cout) with f32 accumulation.
    acc_ref[...] = jnp.zeros_like(acc_ref)
    for dh in range(3):
        for dw in range(3):
            xs = xp_ref[dh:dh + H, dw:dw + W, :].reshape(H * W, Cin)
            acc_ref[...] += jnp.dot(xs, w_ref[dh, dw],
                                    preferred_element_type=jnp.float32)

    y = acc_ref[...] * scale_ref[...] + shift_ref[...]
    y = jnp.maximum(y, 0.0)
    widx = jax.lax.broadcasted_iota(jnp.int32, (H, W, 1), 1).reshape(H * W, 1)
    y = jnp.where(widx < length, y, 0.0)
    o_ref[0] = y.astype(o_ref.dtype)


def _conv_bn_relu_pool_mask_kernel(len_ref, x_ref, w_ref, scale_ref, shift_ref,
                                   o_ref, xp_ref, acc_ref, m_ref,
                                   *, H, W, Cin, Cout):
    """3x3 conv + eval-BN + ReLU + fused 2x2 maxpool + time mask.

    len_ref holds the *already halved* (post-pool) lengths.
    o_ref: (1, (H//2)*(W//2), Cout) flat pooled output.
    m_ref: ((H//2)*W, Cout) f32 scratch holding the H-pooled rows.
    """
    b = pl.program_id(0)
    length = len_ref[b]
    Ho, Wo = H // 2, W // 2

    xp_ref[...] = jnp.zeros_like(xp_ref)
    xp_ref[1:H + 1, 1:W + 1, :] = x_ref[0]

    acc_ref[...] = jnp.zeros_like(acc_ref)
    for dh in range(3):
        for dw in range(3):
            xs = xp_ref[dh:dh + H, dw:dw + W, :].reshape(H * W, Cin)
            acc_ref[...] += jnp.dot(xs, w_ref[dh, dw],
                                    preferred_element_type=jnp.float32)

    y = acc_ref[...] * scale_ref[...] + shift_ref[...]
    y = jnp.maximum(y, 0.0)

    # 2x2 max-pool, H (feature) direction first: pair adjacent h rows.
    y4 = y.reshape(Ho, 2, W, Cout)
    m = jnp.maximum(y4[:, 0], y4[:, 1])                     # (Ho, W, Cout)
    # Time mask before the W-direction pool; threshold 2*length is equivalent
    # to masking the pooled output at `length` (masked region is zero anyway).
    widx = jax.lax.broadcasted_iota(jnp.int32, (Ho, W, 1), 1)
    m = jnp.where(widx < 2 * length, m, 0.0)
    m_ref[...] = m.reshape(Ho * W, Cout)
    # W (time) direction: pairs are adjacent rows of the flat scratch.
    pooled = jnp.maximum(m_ref[pl.ds(0, Ho * Wo, stride=2), :],
                         m_ref[pl.ds(1, Ho * Wo, stride=2), :])
    o_ref[0] = pooled.astype(o_ref.dtype)


# ---------------------------------------------------------------------------
# Wrappers (pallas_call glue)
# ---------------------------------------------------------------------------
def conv1_bn_relu_mask(x, w, scale, shift, lengths):
    """x: (B, H, W, 1) f32; w: (3,3,1,C) f32; returns flat (B, H*W, C) bf16."""
    B, H, W, Cin = x.shape
    C = w.shape[-1]
    assert Cin == 1 and W % 8 == 0
    kernel = functools.partial(_conv1_bn_relu_mask_kernel, H=H, W=W, C=C)
    return pl.pallas_call(
        kernel,
        out_shape=jax.ShapeDtypeStruct((B, H * W, C), jnp.bfloat16),
        grid_spec=pltpu.PrefetchScalarGridSpec(
            num_scalar_prefetch=1,
            grid=(B,),
            in_specs=[
                pl.BlockSpec((1, H, W, 1), lambda b, lens: (b, 0, 0, 0)),
                pl.BlockSpec((3, 3, 1, C), lambda b, lens: (0, 0, 0, 0)),
                pl.BlockSpec((1, C), lambda b, lens: (0, 0)),
                pl.BlockSpec((1, C), lambda b, lens: (0, 0)),
            ],
            out_specs=pl.BlockSpec((1, H * W, C), lambda b, lens: (b, 0, 0)),
            scratch_shapes=[
                pltpu.VMEM((H + 2, W + 2, 1), jnp.float32),
                pltpu.VMEM((H * W, C), jnp.float32),
            ],
        ),
        compiler_params=_compiler_params(),
    )(lengths, x, w,
      scale.reshape(1, C).astype(jnp.float32),
      shift.reshape(1, C).astype(jnp.float32))


def conv_bn_relu_mask(x, w, scale, shift, lengths):
    """x: (B, H, W, Cin) bf16; w: (3,3,Cin,Cout) bf16 -> flat (B, H*W, Cout)."""
    B, H, W, Cin = x.shape
    Cout = w.shape[-1]
    assert W % 8 == 0
    kernel = functools.partial(_conv_bn_relu_mask_kernel,
                               H=H, W=W, Cin=Cin, Cout=Cout)
    return pl.pallas_call(
        kernel,
        out_shape=jax.ShapeDtypeStruct((B, H * W, Cout), jnp.bfloat16),
        grid_spec=pltpu.PrefetchScalarGridSpec(
            num_scalar_prefetch=1,
            grid=(B,),
            in_specs=[
                pl.BlockSpec((1, H, W, Cin), lambda b, lens: (b, 0, 0, 0)),
                pl.BlockSpec((3, 3, Cin, Cout), lambda b, lens: (0, 0, 0, 0)),
                pl.BlockSpec((1, Cout), lambda b, lens: (0, 0)),
                pl.BlockSpec((1, Cout), lambda b, lens: (0, 0)),
            ],
            out_specs=pl.BlockSpec((1, H * W, Cout), lambda b, lens: (b, 0, 0)),
            scratch_shapes=[
                pltpu.VMEM((H + 2, W + 2, Cin), x.dtype),
                pltpu.VMEM((H * W, Cout), jnp.float32),
            ],
        ),
        compiler_params=_compiler_params(),
    )(lengths, x, w,
      scale.reshape(1, Cout).astype(jnp.float32),
      shift.reshape(1, Cout).astype(jnp.float32))


def conv_bn_relu_pool_mask(x, w, scale, shift, pooled_lengths, *, out_dtype):
    """conv + BN + ReLU + fused 2x2 maxpool + mask; pooled_lengths = len >> 1.

    x: (B, H, W, Cin); returns flat (B, (H//2)*(W//2), Cout) in `out_dtype`.
    """
    B, H, W, Cin = x.shape
    Cout = w.shape[-1]
    assert H % 2 == 0 and W % 2 == 0 and W % 8 == 0
    Ho, Wo = H // 2, W // 2
    kernel = functools.partial(_conv_bn_relu_pool_mask_kernel,
                               H=H, W=W, Cin=Cin, Cout=Cout)
    return pl.pallas_call(
        kernel,
        out_shape=jax.ShapeDtypeStruct((B, Ho * Wo, Cout), out_dtype),
        grid_spec=pltpu.PrefetchScalarGridSpec(
            num_scalar_prefetch=1,
            grid=(B,),
            in_specs=[
                pl.BlockSpec((1, H, W, Cin), lambda b, lens: (b, 0, 0, 0)),
                pl.BlockSpec((3, 3, Cin, Cout), lambda b, lens: (0, 0, 0, 0)),
                pl.BlockSpec((1, Cout), lambda b, lens: (0, 0)),
                pl.BlockSpec((1, Cout), lambda b, lens: (0, 0)),
            ],
            out_specs=pl.BlockSpec((1, Ho * Wo, Cout),
                                   lambda b, lens: (b, 0, 0)),
            scratch_shapes=[
                pltpu.VMEM((H + 2, W + 2, Cin), x.dtype),
                pltpu.VMEM((H * W, Cout), jnp.float32),
                pltpu.VMEM((Ho * W, Cout), jnp.float32),
            ],
        ),
        compiler_params=_compiler_params(),
    )(pooled_lengths, x, w,
      scale.reshape(1, Cout).astype(jnp.float32),
      shift.reshape(1, Cout).astype(jnp.float32))


# ---------------------------------------------------------------------------
# Params & forward
# ---------------------------------------------------------------------------
def init_params(key, in_channels=1, out_channels=(64, 128)):
    c1, c2 = out_channels
    ks = jax.random.split(key, 8)

    def bn_params(k, c):
        kg, kb, km, kv = jax.random.split(k, 4)
        gamma = 1.0 + 0.1 * jax.random.normal(kg, (c,), jnp.float32)
        beta = 0.1 * jax.random.normal(kb, (c,), jnp.float32)
        mean = 0.1 * jax.random.normal(km, (c,), jnp.float32)
        var = 0.5 + 0.1 * jnp.abs(jax.random.normal(kv, (c,), jnp.float32))
        scale = gamma / jnp.sqrt(var + 1e-5)
        shift = beta - mean * scale
        return scale, shift

    # Conv weights stored as (kh, kw, Cin, Cout).  conv2-4 in bf16 (MXU),
    # conv1 in f32 (VPU path, Cin=1).
    w1 = 0.1 * jax.random.normal(ks[0], (3, 3, in_channels, c1), jnp.float32)
    s1, b1 = bn_params(ks[1], c1)
    w2 = (0.1 * jax.random.normal(ks[2], (3, 3, c1, c1), jnp.float32)
          ).astype(jnp.bfloat16)
    s2, b2 = bn_params(ks[3], c1)
    w3 = (0.1 * jax.random.normal(ks[4], (3, 3, c1, c2), jnp.float32)
          ).astype(jnp.bfloat16)
    s3, b3 = bn_params(ks[5], c2)
    w4 = (0.1 * jax.random.normal(ks[6], (3, 3, c2, c2), jnp.float32)
          ).astype(jnp.bfloat16)
    s4, b4 = bn_params(ks[7], c2)
    return dict(w1=w1, s1=s1, b1=b1, w2=w2, s2=s2, b2=b2,
                w3=w3, s3=s3, b3=b3, w4=w4, s4=s4, b4=b4)


@jax.jit
def mask_cnn_forward(inputs, input_lengths, params):
    """inputs: (B, T, D) f32; input_lengths: (B,) int32.

    Returns (outputs (B, T//4, 128*(D//4)), output_lengths (B,)) -- matching
    the torch VGG conv stack wrapped in MaskCNN, followed by the usual
    permute(0, 3, 1, 2).view(B, T', C*H') flattening.
    """
    B, T, D = inputs.shape
    lengths = input_lengths.astype(jnp.int32)

    # torch: inputs.unsqueeze(1).transpose(2,3) -> NCHW (B, 1, D, T)
    # ours:  NHWC (B, H=D, W=T, C=1); Cin stays 1 (no lane zero-pad in HBM).
    x = jnp.transpose(inputs, (0, 2, 1))[..., None]

    h, w = D, T
    y = conv1_bn_relu_mask(x, params["w1"], params["s1"], params["b1"], lengths)
    y = y.reshape(B, h, w, -1)                       # (B, D, T, 64) bf16

    l1 = lengths >> 1
    y = conv_bn_relu_pool_mask(y, params["w2"], params["s2"], params["b2"],
                               l1, out_dtype=jnp.bfloat16)
    h, w = h // 2, w // 2
    y = y.reshape(B, h, w, -1)                       # (B, D/2, T/2, 64)

    y = conv_bn_relu_mask(y, params["w3"], params["s3"], params["b3"], l1)
    y = y.reshape(B, h, w, -1)                       # (B, D/2, T/2, 128)

    l2 = lengths >> 2
    y = conv_bn_relu_pool_mask(y, params["w4"], params["s4"], params["b4"],
                               l2, out_dtype=jnp.float32)
    h, w = h // 2, w // 2
    y = y.reshape(B, h, w, -1)                       # (B, D/4, T/4, 128)

    # torch: (B, C, H', T').permute(0,3,1,2).view(B, T', C*H')
    Bo, Hp, Wp, C = y.shape
    outputs = jnp.transpose(y, (0, 2, 3, 1)).reshape(Bo, Wp, C * Hp)
    return outputs.astype(jnp.float32), lengths >> 2


if __name__ == "__main__":
    key = jax.random.PRNGKey(0)
    k_in, k_par = jax.random.split(key)

    B, T, D = 2, 16, 8   # batch, time, input_dim
    inputs = jax.random.normal(k_in, (B, T, D), jnp.float32)
    input_lengths = jnp.array([16, 11], jnp.int32)
    params = init_params(k_par)

    outputs, output_lengths = mask_cnn_forward(inputs, input_lengths, params)
    outputs = jax.block_until_ready(outputs)
    output_lengths = jax.block_until_ready(output_lengths)

    assert outputs.shape == (B, T // 4, 128 * (D // 4)), outputs.shape
    assert output_lengths.shape == (B,)
    assert int(output_lengths[0]) == 16 >> 2 and int(output_lengths[1]) == 11 >> 2
    print("KERNEL_OK")
</pallas_src>

<mosaic_0001>
module attributes {stable_mosaic.version = 11 : i64} {
  func.func @_conv1_bn_relu_mask_kernel(%arg0: i32, %arg1: memref<2xi32, #tpu.memory_space<smem>>, %arg2: memref<1x8x16x1xf32, #tpu.memory_space<vmem>>, %arg3: memref<3x3x1x64xf32, #tpu.memory_space<vmem>>, %arg4: memref<1x64xf32, #tpu.memory_space<vmem>>, %arg5: memref<1x64xf32, #tpu.memory_space<vmem>>, %arg6: memref<1x128x64xbf16, #tpu.memory_space<vmem>>, %arg7: memref<10x18x1xf32, #tpu.memory_space<vmem>>, %arg8: memref<128x64xf32, #tpu.memory_space<vmem>>) attributes {dimension_semantics = [#tpu.dimension_semantics<parallel>], iteration_bounds = array<i64: 2>, scalar_prefetch = 1 : i64, scratch_operands = 2 : i64, tpu.core_type = #tpu.core_type<tc>, window_params = [{transform_indices = @transform_0, window_bounds = array<i64: 1, 8, 16, 1>}, {pipeline_mode = #tpu.pipeline_mode<synchronous>, transform_indices = @transform_1, window_bounds = array<i64: 3, 3, 1, 64>}, {pipeline_mode = #tpu.pipeline_mode<synchronous>, transform_indices = @transform_2, window_bounds = array<i64: 1, 64>}, {pipeline_mode = #tpu.pipeline_mode<synchronous>, transform_indices = @transform_3, window_bounds = array<i64: 1, 64>}, {transform_indices = @transform_4, window_bounds = array<i64: 1, 128, 64>}]} {
    %0 = arith.index_cast %arg0 : i32 to index
    %1 = memref.load %arg1[%0] : memref<2xi32, #tpu.memory_space<smem>>
    %cst = arith.constant 0.000000e+00 : f32
    %2 = vector.broadcast %cst : f32 to vector<10x18x1xf32>
    %c0 = arith.constant 0 : index
    %c0_0 = arith.constant 0 : index
    %c0_1 = arith.constant 0 : index
    %3 = vector.load %arg7[%c0, %c0_0, %c0_1] : memref<10x18x1xf32, #tpu.memory_space<vmem>>, vector<10x18x1xf32>
    tpu.vector_store %arg7[%c0, %c0_0, %c0_1], %2 {strides = array<i32>} : memref<10x18x1xf32, #tpu.memory_space<vmem>>, vector<10x18x1xf32>,
    %c0_2 = arith.constant 0 : index
    %c0_3 = arith.constant 0 : index
    %c0_4 = arith.constant 0 : index
    %c0_5 = arith.constant 0 : index
    %4 = vector.load %arg2[%c0_2, %c0_3, %c0_4, %c0_5] : memref<1x8x16x1xf32, #tpu.memory_space<vmem>>, vector<1x8x16x1xf32>
    %5 = vector.shape_cast %4 : vector<1x8x16x1xf32> to vector<8x16x1xf32>
    %c1 = arith.constant 1 : index
    %c1_6 = arith.constant 1 : index
    %c0_7 = arith.constant 0 : index
    %6 = vector.load %arg7[%c1, %c1_6, %c0_7] : memref<10x18x1xf32, #tpu.memory_space<vmem>>, vector<8x16x1xf32>
    tpu.vector_store %arg7[%c1, %c1_6, %c0_7], %5 {strides = array<i32>} : memref<10x18x1xf32, #tpu.memory_space<vmem>>, vector<8x16x1xf32>,
    %cst_8 = arith.constant 0.000000e+00 : f32
    %7 = vector.broadcast %cst_8 : f32 to vector<128x64xf32>
    %c0_9 = arith.constant 0 : index
    %c0_10 = arith.constant 0 : index
    %8 = vector.load %arg8[%c0_9, %c0_10] : memref<128x64xf32, #tpu.memory_space<vmem>>, vector<128x64xf32>
    tpu.vector_store %arg8[%c0_9, %c0_10], %7 {strides = array<i32>} : memref<128x64xf32, #tpu.memory_space<vmem>>, vector<128x64xf32>,
    %c0_11 = arith.constant 0 : index
    %c0_12 = arith.constant 0 : index
    %c0_13 = arith.constant 0 : index
    %9 = vector.load %arg7[%c0_11, %c0_12, %c0_13] : memref<10x18x1xf32, #tpu.memory_space<vmem>>, vector<8x16x1xf32>
    %10 = vector.shape_cast %9 : vector<8x16x1xf32> to vector<128x1xf32>
    %c0_14 = arith.constant 0 : index
    %c0_15 = arith.constant 0 : index
    %11 = vector.load %arg8[%c0_14, %c0_15] : memref<128x64xf32, #tpu.memory_space<vmem>>, vector<128x64xf32>
    %c0_16 = arith.constant 0 : index
    %c0_17 = arith.constant 0 : index
    %c0_18 = arith.constant 0 : index
    %c0_19 = arith.constant 0 : index
    %12 = vector.load %arg3[%c0_16, %c0_17, %c0_18, %c0_19] : memref<3x3x1x64xf32, #tpu.memory_space<vmem>>, vector<1x1x1x64xf32>
    %13 = vector.shape_cast %12 : vector<1x1x1x64xf32> to vector<1x64xf32>
    %14 = vector.broadcast %10 : vector<128x1xf32> to vector<128x64xf32>
    %15 = vector.broadcast %13 : vector<1x64xf32> to vector<128x64xf32>
    %16 = arith.mulf %14, %15 : vector<128x64xf32>
    %17 = arith.addf %11, %16 : vector<128x64xf32>
    %c0_20 = arith.constant 0 : index
    %c0_21 = arith.constant 0 : index
    %18 = vector.load %arg8[%c0_20, %c0_21] : memref<128x64xf32, #tpu.memory_space<vmem>>, vector<128x64xf32>
    tpu.vector_store %arg8[%c0_20, %c0_21], %17 {strides = array<i32>} : memref<128x64xf32, #tpu.memory_space<vmem>>, vector<128x64xf32>,
    %c0_22 = arith.constant 0 : index
    %c1_23 = arith.constant 1 : index
    %c0_24 = arith.constant 0 : index
    %19 = vector.load %arg7[%c0_22, %c1_23, %c0_24] : memref<10x18x1xf32, #tpu.memory_space<vmem>>, vector<8x16x1xf32>
    %20 = vector.shape_cast %19 : vector<8x16x1xf32> to vector<128x1xf32>
    %c0_25 = arith.constant 0 : index
    %c0_26 = arith.constant 0 : index
    %21 = vector.load %arg8[%c0_25, %c0_26] : memref<128x64xf32, #tpu.memory_space<vmem>>, vector<128x64xf32>
    %c0_27 = arith.constant 0 : index
    %c1_28 = arith.constant 1 : index
    %c0_29 = arith.constant 0 : index
    %c0_30 = arith.constant 0 : index
    %22 = vector.load %arg3[%c0_27, %c1_28, %c0_29, %c0_30] : memref<3x3x1x64xf32, #tpu.memory_space<vmem>>, vector<1x1x1x64xf32>
    %23 = vector.shape_cast %22 : vector<1x1x1x64xf32> to vector<1x64xf32>
    %24 = vector.broadcast %20 : vector<128x1xf32> to vector<128x64xf32>
    %25 = vector.broadcast %23 : vector<1x64xf32> to vector<128x64xf32>
    %26 = arith.mulf %24, %25 : vector<128x64xf32>
    %27 = arith.addf %21, %26 : vector<128x64xf32>
    %c0_31 = arith.constant 0 : index
    %c0_32 = arith.constant 0 : index
    %28 = vector.load %arg8[%c0_31, %c0_32] : memref<128x64xf32, #tpu.memory_space<vmem>>, vector<128x64xf32>
    tpu.vector_store %arg8[%c0_31, %c0_32], %27 {strides = array<i32>} : memref<128x64xf32, #tpu.memory_space<vmem>>, vector<128x64xf32>,
    %c0_33 = arith.constant 0 : index
    %c2 = arith.constant 2 : index
    %c0_34 = arith.constant 0 : index
    %29 = vector.load %arg7[%c0_33, %c2, %c0_34] : memref<10x18x1xf32, #tpu.memory_space<vmem>>, vector<8x16x1xf32>
    %30 = vector.shape_cast %29 : vector<8x16x1xf32> to vector<128x1xf32>
    %c0_35 = arith.constant 0 : index
    %c0_36 = arith.constant 0 : index
    %31 = vector.load %arg8[%c0_35, %c0_36] : memref<128x64xf32, #tpu.memory_space<vmem>>, vector<128x64xf32>
    %c0_37 = arith.constant 0 : index
    %c2_38 = arith.constant 2 : index
    %c0_39 = arith.constant 0 : index
    %c0_40 = arith.constant 0 : index
    %32 = vector.load %arg3[%c0_37, %c2_38, %c0_39, %c0_40] : memref<3x3x1x64xf32, #tpu.memory_space<vmem>>, vector<1x1x1x64xf32>
    %33 = vector.shape_cast %32 : vector<1x1x1x64xf32> to vector<1x64xf32>
    %34 = vector.broadcast %30 : vector<128x1xf32> to vector<128x64xf32>
    %35 = vector.broadcast %33 : vector<1x64xf32> to vector<128x64xf32>
    %36 = arith.mulf %34, %35 : vector<128x64xf32>
    %37 = arith.addf %31, %36 : vector<128x64xf32>
    %c0_41 = arith.constant 0 : index
    %c0_42 = arith.constant 0 : index
    %38 = vector.load %arg8[%c0_41, %c0_42] : memref<128x64xf32, #tpu.memory_space<vmem>>, vector<128x64xf32>
    tpu.vector_store %arg8[%c0_41, %c0_42], %37 {strides = array<i32>} : memref<128x64xf32, #tpu.memory_space<vmem>>, vector<128x64xf32>,
    %c1_43 = arith.constant 1 : index
    %c0_44 = arith.constant 0 : index
    %c0_45 = arith.constant 0 : index
    %39 = vector.load %arg7[%c1_43, %c0_44, %c0_45] : memref<10x18x1xf32, #tpu.memory_space<vmem>>, vector<8x16x1xf32>
    %40 = vector.shape_cast %39 : vector<8x16x1xf32> to vector<128x1xf32>
    %c0_46 = arith.constant 0 : index
    %c0_47 = arith.constant 0 : index
    %41 = vector.load %arg8[%c0_46, %c0_47] : memref<128x64xf32, #tpu.memory_space<vmem>>, vector<128x64xf32>
    %c1_48 = arith.constant 1 : index
    %c0_49 = arith.constant 0 : index
    %c0_50 = arith.constant 0 : index
    %c0_51 = arith.constant 0 : index
    %42 = vector.load %arg3[%c1_48, %c0_49, %c0_50, %c0_51] : memref<3x3x1x64xf32, #tpu.memory_space<vmem>>, vector<1x1x1x64xf32>
    %43 = vector.shape_cast %42 : vector<1x1x1x64xf32> to vector<1x64xf32>
    %44 = vector.broadcast %40 : vector<128x1xf32> to vector<128x64xf32>
    %45 = vector.broadcast %43 : vector<1x64xf32> to vector<128x64xf32>
    %46 = arith.mulf %44, %45 : vector<128x64xf32>
    %47 = arith.addf %41, %46 : vector<128x64xf32>
    %c0_52 = arith.constant 0 : index
    %c0_53 = arith.constant 0 : index
    %48 = vector.load %arg8[%c0_52, %c0_53] : memref<128x64xf32, #tpu.memory_space<vmem>>, vector<128x64xf32>
    tpu.vector_store %arg8[%c0_52, %c0_53], %47 {strides = array<i32>} : memref<128x64xf32, #tpu.memory_space<vmem>>, vector<128x64xf32>,
    %c1_54 = arith.constant 1 : index
    %c1_55 = arith.constant 1 : index
    %c0_56 = arith.constant 0 : index
    %49 = vector.load %arg7[%c1_54, %c1_55, %c0_56] : memref<10x18x1xf32, #tpu.memory_space<vmem>>, vector<8x16x1xf32>
    %50 = vector.shape_cast %49 : vector<8x16x1xf32> to vector<128x1xf32>
    %c0_57 = arith.constant 0 : index
    %c0_58 = arith.constant 0 : index
    %51 = vector.load %arg8[%c0_57, %c0_58] : memref<128x64xf32, #tpu.memory_space<vmem>>, vector<128x64xf32>
    %c1_59 = arith.constant 1 : index
    %c1_60 = arith.constant 1 : index
    %c0_61 = arith.constant 0 : index
    %c0_62 = arith.constant 0 : index
    %52 = vector.load %arg3[%c1_59, %c1_60, %c0_61, %c0_62] : memref<3x3x1x64xf32, #tpu.memory_space<vmem>>, vector<1x1x1x64xf32>
    %53 = vector.shape_cast %52 : vector<1x1x1x64xf32> to vector<1x64xf32>
    %54 = vector.broadcast %50 : vector<128x1xf32> to vector<128x64xf32>
    %55 = vector.broadcast %53 : vector<1x64xf32> to vector<128x64xf32>
    %56 = arith.mulf %54, %55 : vector<128x64xf32>
    %57 = arith.addf %51, %56 : vector<128x64xf32>
    %c0_63 = arith.constant 0 : index
    %c0_64 = arith.constant 0 : index
    %58 = vector.load %arg8[%c0_63, %c0_64] : memref<128x64xf32, #tpu.memory_space<vmem>>, vector<128x64xf32>
    tpu.vector_store %arg8[%c0_63, %c0_64], %57 {strides = array<i32>} : memref<128x64xf32, #tpu.memory_space<vmem>>, vector<128x64xf32>,
    %c1_65 = arith.constant 1 : index
    %c2_66 = arith.constant 2 : index
    %c0_67 = arith.constant 0 : index
    %59 = vector.load %arg7[%c1_65, %c2_66, %c0_67] : memref<10x18x1xf32, #tpu.memory_space<vmem>>, vector<8x16x1xf32>
    %60 = vector.shape_cast %59 : vector<8x16x1xf32> to vector<128x1xf32>
    %c0_68 = arith.constant 0 : index
    %c0_69 = arith.constant 0 : index
    %61 = vector.load %arg8[%c0_68, %c0_69] : memref<128x64xf32, #tpu.memory_space<vmem>>, vector<128x64xf32>
    %c1_70 = arith.constant 1 : index
    %c2_71 = arith.constant 2 : index
    %c0_72 = arith.constant 0 : index
    %c0_73 = arith.constant 0 : index
    %62 = vector.load %arg3[%c1_70, %c2_71, %c0_72, %c0_73] : memref<3x3x1x64xf32, #tpu.memory_space<vmem>>, vector<1x1x1x64xf32>
    %63 = vector.shape_cast %62 : vector<1x1x1x64xf32> to vector<1x64xf32>
    %64 = vector.broadcast %60 : vector<128x1xf32> to vector<128x64xf32>
    %65 = vector.broadcast %63 : vector<1x64xf32> to vector<128x64xf32>
    %66 = arith.mulf %64, %65 : vector<128x64xf32>
    %67 = arith.addf %61, %66 : vector<128x64xf32>
    %c0_74 = arith.constant 0 : index
    %c0_75 = arith.constant 0 : index
    %68 = vector.load %arg8[%c0_74, %c0_75] : memref<128x64xf32, #tpu.memory_space<vmem>>, vector<128x64xf32>
    tpu.vector_store %arg8[%c0_74, %c0_75], %67 {strides = array<i32>} : memref<128x64xf32, #tpu.memory_space<vmem>>, vector<128x64xf32>,
    %c2_76 = arith.constant 2 : index
    %c0_77 = arith.constant 0 : index
    %c0_78 = arith.constant 0 : index
    %69 = vector.load %arg7[%c2_76, %c0_77, %c0_78] : memref<10x18x1xf32, #tpu.memory_space<vmem>>, vector<8x16x1xf32>
    %70 = vector.shape_cast %69 : vector<8x16x1xf32> to vector<128x1xf32>
    %c0_79 = arith.constant 0 : index
    %c0_80 = arith.constant 0 : index
    %71 = vector.load %arg8[%c0_79, %c0_80] : memref<128x64xf32, #tpu.memory_space<vmem>>, vector<128x64xf32>
    %c2_81 = arith.constant 2 : index
    %c0_82 = arith.constant 0 : index
    %c0_83 = arith.constant 0 : index
    %c0_84 = arith.constant 0 : index
    %72 = vector.load %arg3[%c2_81, %c0_82, %c0_83, %c0_84] : memref<3x3x1x64xf32, #tpu.memory_space<vmem>>, vector<1x1x1x64xf32>
    %73 = vector.shape_cast %72 : vector<1x1x1x64xf32> to vector<1x64xf32>
    %74 = vector.broadcast %70 : vector<128x1xf32> to vector<128x64xf32>
    %75 = vector.broadcast %73 : vector<1x64xf32> to vector<128x64xf32>
    %76 = arith.mulf %74, %75 : vector<128x64xf32>
    %77 = arith.addf %71, %76 : vector<128x64xf32>
    %c0_85 = arith.constant 0 : index
    %c0_86 = arith.constant 0 : index
    %78 = vector.load %arg8[%c0_85, %c0_86] : memref<128x64xf32, #tpu.memory_space<vmem>>, vector<128x64xf32>
    tpu.vector_store %arg8[%c0_85, %c0_86], %77 {strides = array<i32>} : memref<128x64xf32, #tpu.memory_space<vmem>>, vector<128x64xf32>,
    %c2_87 = arith.constant 2 : index
    %c1_88 = arith.constant 1 : index
    %c0_89 = arith.constant 0 : index
    %79 = vector.load %arg7[%c2_87, %c1_88, %c0_89] : memref<10x18x1xf32, #tpu.memory_space<vmem>>, vector<8x16x1xf32>
    %80 = vector.shape_cast %79 : vector<8x16x1xf32> to vector<128x1xf32>
    %c0_90 = arith.constant 0 : index
    %c0_91 = arith.constant 0 : index
    %81 = vector.load %arg8[%c0_90, %c0_91] : memref<128x64xf32, #tpu.memory_space<vmem>>, vector<128x64xf32>
    %c2_92 = arith.constant 2 : index
    %c1_93 = arith.constant 1 : index
    %c0_94 = arith.constant 0 : index
    %c0_95 = arith.constant 0 : index
    %82 = vector.load %arg3[%c2_92, %c1_93, %c0_94, %c0_95] : memref<3x3x1x64xf32, #tpu.memory_space<vmem>>, vector<1x1x1x64xf32>
    %83 = vector.shape_cast %82 : vector<1x1x1x64xf32> to vector<1x64xf32>
    %84 = vector.broadcast %80 : vector<128x1xf32> to vector<128x64xf32>
    %85 = vector.broadcast %83 : vector<1x64xf32> to vector<128x64xf32>
    %86 = arith.mulf %84, %85 : vector<128x64xf32>
    %87 = arith.addf %81, %86 : vector<128x64xf32>
    %c0_96 = arith.constant 0 : index
    %c0_97 = arith.constant 0 : index
    %88 = vector.load %arg8[%c0_96, %c0_97] : memref<128x64xf32, #tpu.memory_space<vmem>>, vector<128x64xf32>
    tpu.vector_store %arg8[%c0_96, %c0_97], %87 {strides = array<i32>} : memref<128x64xf32, #tpu.memory_space<vmem>>, vector<128x64xf32>,
    %c2_98 = arith.constant 2 : index
    %c2_99 = arith.constant 2 : index
    %c0_100 = arith.constant 0 : index
    %89 = vector.load %arg7[%c2_98, %c2_99, %c0_100] : memref<10x18x1xf32, #tpu.memory_space<vmem>>, vector<8x16x1xf32>
    %90 = vector.shape_cast %89 : vector<8x16x1xf32> to vector<128x1xf32>
    %c0_101 = arith.constant 0 : index
    %c0_102 = arith.constant 0 : index
    %91 = vector.load %arg8[%c0_101, %c0_102] : memref<128x64xf32, #tpu.memory_space<vmem>>, vector<128x64xf32>
    %c2_103 = arith.constant 2 : index
    %c2_104 = arith.constant 2 : index
    %c0_105 = arith.constant 0 : index
    %c0_106 = arith.constant 0 : index
    %92 = vector.load %arg3[%c2_103, %c2_104, %c0_105, %c0_106] : memref<3x3x1x64xf32, #tpu.memory_space<vmem>>, vector<1x1x1x64xf32>
    %93 = vector.shape_cast %92 : vector<1x1x1x64xf32> to vector<1x64xf32>
    %94 = vector.broadcast %90 : vector<128x1xf32> to vector<128x64xf32>
    %95 = vector.broadcast %93 : vector<1x64xf32> to vector<128x64xf32>
    %96 = arith.mulf %94, %95 : vector<128x64xf32>
    %97 = arith.addf %91, %96 : vector<128x64xf32>
    %c0_107 = arith.constant 0 : index
    %c0_108 = arith.constant 0 : index
    %98 = vector.load %arg8[%c0_107, %c0_108] : memref<128x64xf32, #tpu.memory_space<vmem>>, vector<128x64xf32>
    tpu.vector_store %arg8[%c0_107, %c0_108], %97 {strides = array<i32>} : memref<128x64xf32, #tpu.memory_space<vmem>>, vector<128x64xf32>,
    %c0_109 = arith.constant 0 : index
    %c0_110 = arith.constant 0 : index
    %99 = vector.load %arg8[%c0_109, %c0_110] : memref<128x64xf32, #tpu.memory_space<vmem>>, vector<128x64xf32>
    %c0_111 = arith.constant 0 : index
    %c0_112 = arith.constant 0 : index
    %100 = vector.load %arg4[%c0_111, %c0_112] : memref<1x64xf32, #tpu.memory_space<vmem>>, vector<1x64xf32>
    %101 = vector.broadcast %100 : vector<1x64xf32> to vector<128x64xf32>
    %102 = arith.mulf %99, %101 : vector<128x64xf32>
    %c0_113 = arith.constant 0 : index
    %c0_114 = arith.constant 0 : index
    %103 = vector.load %arg5[%c0_113, %c0_114] : memref<1x64xf32, #tpu.memory_space<vmem>>, vector<1x64xf32>
    %104 = vector.broadcast %103 : vector<1x64xf32> to vector<128x64xf32>
    %105 = arith.addf %102, %104 : vector<128x64xf32>
    %cst_115 = arith.constant 0.000000e+00 : f32
    %106 = vector.broadcast %cst_115 : f32 to vector<128x64xf32>
    %107 = arith.maximumf %105, %106 : vector<128x64xf32>
    %108 = tpu.iota {dimensions = array<i32: 1>} : vector<8x16x1xi32>
    %109 = vector.shape_cast %108 : vector<8x16x1xi32> to vector<128x1xi32>
    %110 = vector.broadcast %1 : i32 to vector<128x1xi32>
    %111 = arith.cmpi slt, %109, %110 : vector<128x1xi32>
    %cst_116 = arith.constant 0.000000e+00 : f32
    %112 = vector.shape_cast %111 : vector<128x1xi1> to vector<128x1xi1>
    %113 = vector.broadcast %112 : vector<128x1xi1> to vector<128x64xi1>
    %114 = vector.broadcast %cst_116 : f32 to vector<128x64xf32>
    %115 = arith.select %113, %107, %114 : vector<128x64xi1>, vector<128x64xf32>
    %116 = arith.truncf %115 : vector<128x64xf32> to vector<128x64xbf16>
    %c0_117 = arith.constant 0 : index
    %c0_118 = arith.constant 0 : index
    %c0_119 = arith.constant 0 : index
    %117 = vector.load %arg6[%c0_117, %c0_118, %c0_119] : memref<1x128x64xbf16, #tpu.memory_space<vmem>>, vector<1x128x64xbf16>
    %118 = vector.shape_cast %117 : vector<1x128x64xbf16> to vector<128x64xbf16>
    %119 = vector.shape_cast %116 : vector<128x64xbf16> to vector<1x128x64xbf16>
    tpu.vector_store %arg6[%c0_117, %c0_118, %c0_119], %119 {strides = array<i32>} : memref<1x128x64xbf16, #tpu.memory_space<vmem>>, vector<1x128x64xbf16>,
    return
  }
  func.func @transform_0(%arg0: i32, %arg1: memref<2xi32, #tpu.memory_space<smem>>) -> (i32, i32, i32, i32) {
    %c0_i32 = arith.constant 0 : i32
    %c0_i32_0 = arith.constant 0 : i32
    %c0_i32_1 = arith.constant 0 : i32
    %c0_i32_2 = arith.constant 0 : i32
    return %arg0, %c0_i32, %c0_i32_0, %c0_i32_1 : i32, i32, i32, i32
  }
  func.func @transform_1(%arg0: i32, %arg1: memref<2xi32, #tpu.memory_space<smem>>) -> (i32, i32, i32, i32) {
    %c0_i32 = arith.constant 0 : i32
    %c0_i32_0 = arith.constant 0 : i32
    %c0_i32_1 = arith.constant 0 : i32
    %c0_i32_2 = arith.constant 0 : i32
    %c0_i32_3 = arith.constant 0 : i32
    return %c0_i32, %c0_i32_0, %c0_i32_1, %c0_i32_2 : i32, i32, i32, i32
  }
  func.func @transform_2(%arg0: i32, %arg1: memref<2xi32, #tpu.memory_space<smem>>) -> (i32, i32) {
    %c0_i32 = arith.constant 0 : i32
    %c0_i32_0 = arith.constant 0 : i32
    %c0_i32_1 = arith.constant 0 : i32
    return %c0_i32, %c0_i32_0 : i32, i32
  }
  func.func @transform_3(%arg0: i32, %arg1: memref<2xi32, #tpu.memory_space<smem>>) -> (i32, i32) {
    %c0_i32 = arith.constant 0 : i32
    %c0_i32_0 = arith.constant 0 : i32
    %c0_i32_1 = arith.constant 0 : i32
    return %c0_i32, %c0_i32_0 : i32, i32
  }
  func.func @transform_4(%arg0: i32, %arg1: memref<2xi32, #tpu.memory_space<smem>>) -> (i32, i32, i32) {
    %c0_i32 = arith.constant 0 : i32
    %c0_i32_0 = arith.constant 0 : i32
    %c0_i32_1 = arith.constant 0 : i32
    return %arg0, %c0_i32, %c0_i32_0 : i32, i32, i32
  }
}

module attributes {stable_mosaic.version = 11 : i64} {
  func.func @_conv_bn_relu_pool_mask_kernel(%arg0: i32, %arg1: memref<2xi32, #tpu.memory_space<smem>>, %arg2: memref<1x8x16x64xbf16, #tpu.memory_space<vmem>>, %arg3: memref<3x3x64x64xbf16, #tpu.memory_space<vmem>>, %arg4: memref<1x64xf32, #tpu.memory_space<vmem>>, %arg5: memref<1x64xf32, #tpu.memory_space<vmem>>, %arg6: memref<1x32x64xbf16, #tpu.memory_space<vmem>>, %arg7: memref<10x18x64xbf16, #tpu.memory_space<vmem>>, %arg8: memref<128x64xf32, #tpu.memory_space<vmem>>, %arg9: memref<64x64xf32, #tpu.memory_space<vmem>>) attributes {dimension_semantics = [#tpu.dimension_semantics<parallel>], iteration_bounds = array<i64: 2>, scalar_prefetch = 1 : i64, scratch_operands = 3 : i64, tpu.core_type = #tpu.core_type<tc>, window_params = [{transform_indices = @transform_0, window_bounds = array<i64: 1, 8, 16, 64>}, {pipeline_mode = #tpu.pipeline_mode<synchronous>, transform_indices = @transform_1, window_bounds = array<i64: 3, 3, 64, 64>}, {pipeline_mode = #tpu.pipeline_mode<synchronous>, transform_indices = @transform_2, window_bounds = array<i64: 1, 64>}, {pipeline_mode = #tpu.pipeline_mode<synchronous>, transform_indices = @transform_3, window_bounds = array<i64: 1, 64>}, {transform_indices = @transform_4, window_bounds = array<i64: 1, 32, 64>}]} {
    %0 = arith.index_cast %arg0 : i32 to index
    %1 = memref.load %arg1[%0] : memref<2xi32, #tpu.memory_space<smem>>
    %cst = arith.constant 0.000000e+00 : bf16
    %2 = vector.broadcast %cst : bf16 to vector<10x18x64xbf16>
    %c0 = arith.constant 0 : index
    %c0_0 = arith.constant 0 : index
    %c0_1 = arith.constant 0 : index
    %3 = vector.load %arg7[%c0, %c0_0, %c0_1] : memref<10x18x64xbf16, #tpu.memory_space<vmem>>, vector<10x18x64xbf16>
    tpu.vector_store %arg7[%c0, %c0_0, %c0_1], %2 {strides = array<i32>} : memref<10x18x64xbf16, #tpu.memory_space<vmem>>, vector<10x18x64xbf16>,
    %c0_2 = arith.constant 0 : index
    %c0_3 = arith.constant 0 : index
    %c0_4 = arith.constant 0 : index
    %c0_5 = arith.constant 0 : index
    %4 = vector.load %arg2[%c0_2, %c0_3, %c0_4, %c0_5] : memref<1x8x16x64xbf16, #tpu.memory_space<vmem>>, vector<1x8x16x64xbf16>
    %5 = vector.shape_cast %4 : vector<1x8x16x64xbf16> to vector<8x16x64xbf16>
    %c1 = arith.constant 1 : index
    %c1_6 = arith.constant 1 : index
    %c0_7 = arith.constant 0 : index
    %6 = vector.load %arg7[%c1, %c1_6, %c0_7] : memref<10x18x64xbf16, #tpu.memory_space<vmem>>, vector<8x16x64xbf16>
    tpu.vector_store %arg7[%c1, %c1_6, %c0_7], %5 {strides = array<i32>} : memref<10x18x64xbf16, #tpu.memory_space<vmem>>, vector<8x16x64xbf16>,
    %cst_8 = arith.constant 0.000000e+00 : f32
    %7 = vector.broadcast %cst_8 : f32 to vector<128x64xf32>
    %c0_9 = arith.constant 0 : index
    %c0_10 = arith.constant 0 : index
    %8 = vector.load %arg8[%c0_9, %c0_10] : memref<128x64xf32, #tpu.memory_space<vmem>>, vector<128x64xf32>
    tpu.vector_store %arg8[%c0_9, %c0_10], %7 {strides = array<i32>} : memref<128x64xf32, #tpu.memory_space<vmem>>, vector<128x64xf32>,
    %c0_11 = arith.constant 0 : index
    %c0_12 = arith.constant 0 : index
    %c0_13 = arith.constant 0 : index
    %9 = vector.load %arg7[%c0_11, %c0_12, %c0_13] : memref<10x18x64xbf16, #tpu.memory_space<vmem>>, vector<8x16x64xbf16>
    %10 = vector.shape_cast %9 : vector<8x16x64xbf16> to vector<128x64xbf16>
    %c0_14 = arith.constant 0 : index
    %c0_15 = arith.constant 0 : index
    %11 = vector.load %arg8[%c0_14, %c0_15] : memref<128x64xf32, #tpu.memory_space<vmem>>, vector<128x64xf32>
    %c0_16 = arith.constant 0 : index
    %c0_17 = arith.constant 0 : index
    %c0_18 = arith.constant 0 : index
    %c0_19 = arith.constant 0 : index
    %12 = vector.load %arg3[%c0_16, %c0_17, %c0_18, %c0_19] : memref<3x3x64x64xbf16, #tpu.memory_space<vmem>>, vector<1x1x64x64xbf16>
    %13 = vector.shape_cast %12 : vector<1x1x64x64xbf16> to vector<64x64xbf16>
    %cst_20 = arith.constant dense<0.000000e+00> : vector<128x64xf32>
    %14 = tpu.matmul %10, %13, %cst_20 {dimension_numbers = #tpu.dot_dimension_numbers<[1], [0], [0], [1], [0, 0, 1, 1], [], []>} : vector<128x64xbf16>, vector<64x64xbf16>, vector<128x64xf32> -> vector<128x64xf32>
    %15 = arith.addf %11, %14 : vector<128x64xf32>
    %c0_21 = arith.constant 0 : index
    %c0_22 = arith.constant 0 : index
    %16 = vector.load %arg8[%c0_21, %c0_22] : memref<128x64xf32, #tpu.memory_space<vmem>>, vector<128x64xf32>
    tpu.vector_store %arg8[%c0_21, %c0_22], %15 {strides = array<i32>} : memref<128x64xf32, #tpu.memory_space<vmem>>, vector<128x64xf32>,
    %c0_23 = arith.constant 0 : index
    %c1_24 = arith.constant 1 : index
    %c0_25 = arith.constant 0 : index
    %17 = vector.load %arg7[%c0_23, %c1_24, %c0_25] : memref<10x18x64xbf16, #tpu.memory_space<vmem>>, vector<8x16x64xbf16>
    %18 = vector.shape_cast %17 : vector<8x16x64xbf16> to vector<128x64xbf16>
    %c0_26 = arith.constant 0 : index
    %c0_27 = arith.constant 0 : index
    %19 = vector.load %arg8[%c0_26, %c0_27] : memref<128x64xf32, #tpu.memory_space<vmem>>, vector<128x64xf32>
    %c0_28 = arith.constant 0 : index
    %c1_29 = arith.constant 1 : index
    %c0_30 = arith.constant 0 : index
    %c0_31 = arith.constant 0 : index
    %20 = vector.load %arg3[%c0_28, %c1_29, %c0_30, %c0_31] : memref<3x3x64x64xbf16, #tpu.memory_space<vmem>>, vector<1x1x64x64xbf16>
    %21 = vector.shape_cast %20 : vector<1x1x64x64xbf16> to vector<64x64xbf16>
    %cst_32 = arith.constant dense<0.000000e+00> : vector<128x64xf32>
    %22 = tpu.matmul %18, %21, %cst_32 {dimension_numbers = #tpu.dot_dimension_numbers<[1], [0], [0], [1], [0, 0, 1, 1], [], []>} : vector<128x64xbf16>, vector<64x64xbf16>, vector<128x64xf32> -> vector<128x64xf32>
    %23 = arith.addf %19, %22 : vector<128x64xf32>
    %c0_33 = arith.constant 0 : index
    %c0_34 = arith.constant 0 : index
    %24 = vector.load %arg8[%c0_33, %c0_34] : memref<128x64xf32, #tpu.memory_space<vmem>>, vector<128x64xf32>
    tpu.vector_store %arg8[%c0_33, %c0_34], %23 {strides = array<i32>} : memref<128x64xf32, #tpu.memory_space<vmem>>, vector<128x64xf32>,
    %c0_35 = arith.constant 0 : index
    %c2 = arith.constant 2 : index
    %c0_36 = arith.constant 0 : index
    %25 = vector.load %arg7[%c0_35, %c2, %c0_36] : memref<10x18x64xbf16, #tpu.memory_space<vmem>>, vector<8x16x64xbf16>
    %26 = vector.shape_cast %25 : vector<8x16x64xbf16> to vector<128x64xbf16>
    %c0_37 = arith.constant 0 : index
    %c0_38 = arith.constant 0 : index
    %27 = vector.load %arg8[%c0_37, %c0_38] : memref<128x64xf32, #tpu.memory_space<vmem>>, vector<128x64xf32>
    %c0_39 = arith.constant 0 : index
    %c2_40 = arith.constant 2 : index
    %c0_41 = arith.constant 0 : index
    %c0_42 = arith.constant 0 : index
    %28 = vector.load %arg3[%c0_39, %c2_40, %c0_41, %c0_42] : memref<3x3x64x64xbf16, #tpu.memory_space<vmem>>, vector<1x1x64x64xbf16>
    %29 = vector.shape_cast %28 : vector<1x1x64x64xbf16> to vector<64x64xbf16>
    %cst_43 = arith.constant dense<0.000000e+00> : vector<128x64xf32>
    %30 = tpu.matmul %26, %29, %cst_43 {dimension_numbers = #tpu.dot_dimension_numbers<[1], [0], [0], [1], [0, 0, 1, 1], [], []>} : vector<128x64xbf16>, vector<64x64xbf16>, vector<128x64xf32> -> vector<128x64xf32>
    %31 = arith.addf %27, %30 : vector<128x64xf32>
    %c0_44 = arith.constant 0 : index
    %c0_45 = arith.constant 0 : index
    %32 = vector.load %arg8[%c0_44, %c0_45] : memref<128x64xf32, #tpu.memory_space<vmem>>, vector<128x64xf32>
    tpu.vector_store %arg8[%c0_44, %c0_45], %31 {strides = array<i32>} : memref<128x64xf32, #tpu.memory_space<vmem>>, vector<128x64xf32>,
    %c1_46 = arith.constant 1 : index
    %c0_47 = arith.constant 0 : index
    %c0_48 = arith.constant 0 : index
    %33 = vector.load %arg7[%c1_46, %c0_47, %c0_48] : memref<10x18x64xbf16, #tpu.memory_space<vmem>>, vector<8x16x64xbf16>
    %34 = vector.shape_cast %33 : vector<8x16x64xbf16> to vector<128x64xbf16>
    %c0_49 = arith.constant 0 : index
    %c0_50 = arith.constant 0 : index
    %35 = vector.load %arg8[%c0_49, %c0_50] : memref<128x64xf32, #tpu.memory_space<vmem>>, vector<128x64xf32>
    %c1_51 = arith.constant 1 : index
    %c0_52 = arith.constant 0 : index
    %c0_53 = arith.constant 0 : index
    %c0_54 = arith.constant 0 : index
    %36 = vector.load %arg3[%c1_51, %c0_52, %c0_53, %c0_54] : memref<3x3x64x64xbf16, #tpu.memory_space<vmem>>, vector<1x1x64x64xbf16>
    %37 = vector.shape_cast %36 : vector<1x1x64x64xbf16> to vector<64x64xbf16>
    %cst_55 = arith.constant dense<0.000000e+00> : vector<128x64xf32>
    %38 = tpu.matmul %34, %37, %cst_55 {dimension_numbers = #tpu.dot_dimension_numbers<[1], [0], [0], [1], [0, 0, 1, 1], [], []>} : vector<128x64xbf16>, vector<64x64xbf16>, vector<128x64xf32> -> vector<128x64xf32>
    %39 = arith.addf %35, %38 : vector<128x64xf32>
    %c0_56 = arith.constant 0 : index
    %c0_57 = arith.constant 0 : index
    %40 = vector.load %arg8[%c0_56, %c0_57] : memref<128x64xf32, #tpu.memory_space<vmem>>, vector<128x64xf32>
    tpu.vector_store %arg8[%c0_56, %c0_57], %39 {strides = array<i32>} : memref<128x64xf32, #tpu.memory_space<vmem>>, vector<128x64xf32>,
    %c1_58 = arith.constant 1 : index
    %c1_59 = arith.constant 1 : index
    %c0_60 = arith.constant 0 : index
    %41 = vector.load %arg7[%c1_58, %c1_59, %c0_60] : memref<10x18x64xbf16, #tpu.memory_space<vmem>>, vector<8x16x64xbf16>
    %42 = vector.shape_cast %41 : vector<8x16x64xbf16> to vector<128x64xbf16>
    %c0_61 = arith.constant 0 : index
    %c0_62 = arith.constant 0 : index
    %43 = vector.load %arg8[%c0_61, %c0_62] : memref<128x64xf32, #tpu.memory_space<vmem>>, vector<128x64xf32>
    %c1_63 = arith.constant 1 : index
    %c1_64 = arith.constant 1 : index
    %c0_65 = arith.constant 0 : index
    %c0_66 = arith.constant 0 : index
    %44 = vector.load %arg3[%c1_63, %c1_64, %c0_65, %c0_66] : memref<3x3x64x64xbf16, #tpu.memory_space<vmem>>, vector<1x1x64x64xbf16>
    %45 = vector.shape_cast %44 : vector<1x1x64x64xbf16> to vector<64x64xbf16>
    %cst_67 = arith.constant dense<0.000000e+00> : vector<128x64xf32>
    %46 = tpu.matmul %42, %45, %cst_67 {dimension_numbers = #tpu.dot_dimension_numbers<[1], [0], [0], [1], [0, 0, 1, 1], [], []>} : vector<128x64xbf16>, vector<64x64xbf16>, vector<128x64xf32> -> vector<128x64xf32>
    %47 = arith.addf %43, %46 : vector<128x64xf32>
    %c0_68 = arith.constant 0 : index
    %c0_69 = arith.constant 0 : index
    %48 = vector.load %arg8[%c0_68, %c0_69] : memref<128x64xf32, #tpu.memory_space<vmem>>, vector<128x64xf32>
    tpu.vector_store %arg8[%c0_68, %c0_69], %47 {strides = array<i32>} : memref<128x64xf32, #tpu.memory_space<vmem>>, vector<128x64xf32>,
    %c1_70 = arith.constant 1 : index
    %c2_71 = arith.constant 2 : index
    %c0_72 = arith.constant 0 : index
    %49 = vector.load %arg7[%c1_70, %c2_71, %c0_72] : memref<10x18x64xbf16, #tpu.memory_space<vmem>>, vector<8x16x64xbf16>
    %50 = vector.shape_cast %49 : vector<8x16x64xbf16> to vector<128x64xbf16>
    %c0_73 = arith.constant 0 : index
    %c0_74 = arith.constant 0 : index
    %51 = vector.load %arg8[%c0_73, %c0_74] : memref<128x64xf32, #tpu.memory_space<vmem>>, vector<128x64xf32>
    %c1_75 = arith.constant 1 : index
    %c2_76 = arith.constant 2 : index
    %c0_77 = arith.constant 0 : index
    %c0_78 = arith.constant 0 : index
    %52 = vector.load %arg3[%c1_75, %c2_76, %c0_77, %c0_78] : memref<3x3x64x64xbf16, #tpu.memory_space<vmem>>, vector<1x1x64x64xbf16>
    %53 = vector.shape_cast %52 : vector<1x1x64x64xbf16> to vector<64x64xbf16>
    %cst_79 = arith.constant dense<0.000000e+00> : vector<128x64xf32>
    %54 = tpu.matmul %50, %53, %cst_79 {dimension_numbers = #tpu.dot_dimension_numbers<[1], [0], [0], [1], [0, 0, 1, 1], [], []>} : vector<128x64xbf16>, vector<64x64xbf16>, vector<128x64xf32> -> vector<128x64xf32>
    %55 = arith.addf %51, %54 : vector<128x64xf32>
    %c0_80 = arith.constant 0 : index
    %c0_81 = arith.constant 0 : index
    %56 = vector.load %arg8[%c0_80, %c0_81] : memref<128x64xf32, #tpu.memory_space<vmem>>, vector<128x64xf32>
    tpu.vector_store %arg8[%c0_80, %c0_81], %55 {strides = array<i32>} : memref<128x64xf32, #tpu.memory_space<vmem>>, vector<128x64xf32>,
    %c2_82 = arith.constant 2 : index
    %c0_83 = arith.constant 0 : index
    %c0_84 = arith.constant 0 : index
    %57 = vector.load %arg7[%c2_82, %c0_83, %c0_84] : memref<10x18x64xbf16, #tpu.memory_space<vmem>>, vector<8x16x64xbf16>
    %58 = vector.shape_cast %57 : vector<8x16x64xbf16> to vector<128x64xbf16>
    %c0_85 = arith.constant 0 : index
    %c0_86 = arith.constant 0 : index
    %59 = vector.load %arg8[%c0_85, %c0_86] : memref<128x64xf32, #tpu.memory_space<vmem>>, vector<128x64xf32>
    %c2_87 = arith.constant 2 : index
    %c0_88 = arith.constant 0 : index
    %c0_89 = arith.constant 0 : index
    %c0_90 = arith.constant 0 : index
    %60 = vector.load %arg3[%c2_87, %c0_88, %c0_89, %c0_90] : memref<3x3x64x64xbf16, #tpu.memory_space<vmem>>, vector<1x1x64x64xbf16>
    %61 = vector.shape_cast %60 : vector<1x1x64x64xbf16> to vector<64x64xbf16>
    %cst_91 = arith.constant dense<0.000000e+00> : vector<128x64xf32>
    %62 = tpu.matmul %58, %61, %cst_91 {dimension_numbers = #tpu.dot_dimension_numbers<[1], [0], [0], [1], [0, 0, 1, 1], [], []>} : vector<128x64xbf16>, vector<64x64xbf16>, vector<128x64xf32> -> vector<128x64xf32>
    %63 = arith.addf %59, %62 : vector<128x64xf32>
    %c0_92 = arith.constant 0 : index
    %c0_93 = arith.constant 0 : index
    %64 = vector.load %arg8[%c0_92, %c0_93] : memref<128x64xf32, #tpu.memory_space<vmem>>, vector<128x64xf32>
    tpu.vector_store %arg8[%c0_92, %c0_93], %63 {strides = array<i32>} : memref<128x64xf32, #tpu.memory_space<vmem>>, vector<128x64xf32>,
    %c2_94 = arith.constant 2 : index
    %c1_95 = arith.constant 1 : index
    %c0_96 = arith.constant 0 : index
    %65 = vector.load %arg7[%c2_94, %c1_95, %c0_96] : memref<10x18x64xbf16, #tpu.memory_space<vmem>>, vector<8x16x64xbf16>
    %66 = vector.shape_cast %65 : vector<8x16x64xbf16> to vector<128x64xbf16>
    %c0_97 = arith.constant 0 : index
    %c0_98 = arith.constant 0 : index
    %67 = vector.load %arg8[%c0_97, %c0_98] : memref<128x64xf32, #tpu.memory_space<vmem>>, vector<128x64xf32>
    %c2_99 = arith.constant 2 : index
    %c1_100 = arith.constant 1 : index
    %c0_101 = arith.constant 0 : index
    %c0_102 = arith.constant 0 : index
    %68 = vector.load %arg3[%c2_99, %c1_100, %c0_101, %c0_102] : memref<3x3x64x64xbf16, #tpu.memory_space<vmem>>, vector<1x1x64x64xbf16>
    %69 = vector.shape_cast %68 : vector<1x1x64x64xbf16> to vector<64x64xbf16>
    %cst_103 = arith.constant dense<0.000000e+00> : vector<128x64xf32>
    %70 = tpu.matmul %66, %69, %cst_103 {dimension_numbers = #tpu.dot_dimension_numbers<[1], [0], [0], [1], [0, 0, 1, 1], [], []>} : vector<128x64xbf16>, vector<64x64xbf16>, vector<128x64xf32> -> vector<128x64xf32>
    %71 = arith.addf %67, %70 : vector<128x64xf32>
    %c0_104 = arith.constant 0 : index
    %c0_105 = arith.constant 0 : index
    %72 = vector.load %arg8[%c0_104, %c0_105] : memref<128x64xf32, #tpu.memory_space<vmem>>, vector<128x64xf32>
    tpu.vector_store %arg8[%c0_104, %c0_105], %71 {strides = array<i32>} : memref<128x64xf32, #tpu.memory_space<vmem>>, vector<128x64xf32>,
    %c2_106 = arith.constant 2 : index
    %c2_107 = arith.constant 2 : index
    %c0_108 = arith.constant 0 : index
    %73 = vector.load %arg7[%c2_106, %c2_107, %c0_108] : memref<10x18x64xbf16, #tpu.memory_space<vmem>>, vector<8x16x64xbf16>
    %74 = vector.shape_cast %73 : vector<8x16x64xbf16> to vector<128x64xbf16>
    %c0_109 = arith.constant 0 : index
    %c0_110 = arith.constant 0 : index
    %75 = vector.load %arg8[%c0_109, %c0_110] : memref<128x64xf32, #tpu.memory_space<vmem>>, vector<128x64xf32>
    %c2_111 = arith.constant 2 : index
    %c2_112 = arith.constant 2 : index
    %c0_113 = arith.constant 0 : index
    %c0_114 = arith.constant 0 : index
    %76 = vector.load %arg3[%c2_111, %c2_112, %c0_113, %c0_114] : memref<3x3x64x64xbf16, #tpu.memory_space<vmem>>, vector<1x1x64x64xbf16>
    %77 = vector.shape_cast %76 : vector<1x1x64x64xbf16> to vector<64x64xbf16>
    %cst_115 = arith.constant dense<0.000000e+00> : vector<128x64xf32>
    %78 = tpu.matmul %74, %77, %cst_115 {dimension_numbers = #tpu.dot_dimension_numbers<[1], [0], [0], [1], [0, 0, 1, 1], [], []>} : vector<128x64xbf16>, vector<64x64xbf16>, vector<128x64xf32> -> vector<128x64xf32>
    %79 = arith.addf %75, %78 : vector<128x64xf32>
    %c0_116 = arith.constant 0 : index
    %c0_117 = arith.constant 0 : index
    %80 = vector.load %arg8[%c0_116, %c0_117] : memref<128x64xf32, #tpu.memory_space<vmem>>, vector<128x64xf32>
    tpu.vector_store %arg8[%c0_116, %c0_117], %79 {strides = array<i32>} : memref<128x64xf32, #tpu.memory_space<vmem>>, vector<128x64xf32>,
    %c0_118 = arith.constant 0 : index
    %c0_119 = arith.constant 0 : index
    %81 = vector.load %arg8[%c0_118, %c0_119] : memref<128x64xf32, #tpu.memory_space<vmem>>, vector<128x64xf32>
    %c0_120 = arith.constant 0 : index
    %c0_121 = arith.constant 0 : index
    %82 = vector.load %arg4[%c0_120, %c0_121] : memref<1x64xf32, #tpu.memory_space<vmem>>, vector<1x64xf32>
    %83 = vector.broadcast %82 : vector<1x64xf32> to vector<128x64xf32>
    %84 = arith.mulf %81, %83 : vector<128x64xf32>
    %c0_122 = arith.constant 0 : index
    %c0_123 = arith.constant 0 : index
    %85 = vector.load %arg5[%c0_122, %c0_123] : memref<1x64xf32, #tpu.memory_space<vmem>>, vector<1x64xf32>
    %86 = vector.broadcast %85 : vector<1x64xf32> to vector<128x64xf32>
    %87 = arith.addf %84, %86 : vector<128x64xf32>
    %cst_124 = arith.constant 0.000000e+00 : f32
    %88 = vector.broadcast %cst_124 : f32 to vector<128x64xf32>
    %89 = arith.maximumf %87, %88 : vector<128x64xf32>
    %90 = vector.shape_cast %89 : vector<128x64xf32> to vector<4x2x16x64xf32>
    %91 = vector.extract_strided_slice %90 {offsets = [0, 0, 0, 0], sizes = [4, 1, 16, 64], strides = [1, 1, 1, 1]} : vector<4x2x16x64xf32> to vector<4x1x16x64xf32>
    %92 = vector.shape_cast %91 : vector<4x1x16x64xf32> to vector<4x16x64xf32>
    %93 = vector.extract_strided_slice %90 {offsets = [0, 1, 0, 0], sizes = [4, 1, 16, 64], strides = [1, 1, 1, 1]} : vector<4x2x16x64xf32> to vector<4x1x16x64xf32>
    %94 = vector.shape_cast %93 : vector<4x1x16x64xf32> to vector<4x16x64xf32>
    %95 = arith.maximumf %92, %94 : vector<4x16x64xf32>
    %96 = tpu.iota {dimensions = array<i32: 1>} : vector<4x16x1xi32>
    %c2_i32 = arith.constant 2 : i32
    %97 = arith.muli %c2_i32, %1 : i32
    %98 = vector.broadcast %97 : i32 to vector<4x16x1xi32>
    %99 = arith.cmpi slt, %96, %98 : vector<4x16x1xi32>
    %cst_125 = arith.constant 0.000000e+00 : f32
    %100 = vector.shape_cast %99 : vector<4x16x1xi1> to vector<4x16x1xi1>
    %101 = vector.broadcast %100 : vector<4x16x1xi1> to vector<4x16x64xi1>
    %102 = vector.broadcast %cst_125 : f32 to vector<4x16x64xf32>
    %103 = arith.select %101, %95, %102 : vector<4x16x64xi1>, vector<4x16x64xf32>
    %104 = vector.shape_cast %103 : vector<4x16x64xf32> to vector<64x64xf32>
    %c0_126 = arith.constant 0 : index
    %c0_127 = arith.constant 0 : index
    %105 = vector.load %arg9[%c0_126, %c0_127] : memref<64x64xf32, #tpu.memory_space<vmem>>, vector<64x64xf32>
    tpu.vector_store %arg9[%c0_126, %c0_127], %104 {strides = array<i32>} : memref<64x64xf32, #tpu.memory_space<vmem>>, vector<64x64xf32>,
    %c0_128 = arith.constant 0 : index
    %c0_129 = arith.constant 0 : index
    %106 = tpu.strided_load %arg9[%c0_128, %c0_129] {strides = array<i32: 2, 1>} : memref<64x64xf32, #tpu.memory_space<vmem>>, vector<32x64xf32>
    %c1_130 = arith.constant 1 : index
    %c0_131 = arith.constant 0 : index
    %107 = tpu.strided_load %arg9[%c1_130, %c0_131] {strides = array<i32: 2, 1>} : memref<64x64xf32, #tpu.memory_space<vmem>>, vector<32x64xf32>
    %108 = arith.maximumf %106, %107 : vector<32x64xf32>
    %109 = arith.truncf %108 : vector<32x64xf32> to vector<32x64xbf16>
    %c0_132 = arith.constant 0 : index
    %c0_133 = arith.constant 0 : index
    %c0_134 = arith.constant 0 : index
    %110 = vector.load %arg6[%c0_132, %c0_133, %c0_134] : memref<1x32x64xbf16, #tpu.memory_space<vmem>>, vector<1x32x64xbf16>
    %111 = vector.shape_cast %110 : vector<1x32x64xbf16> to vector<32x64xbf16>
    %112 = vector.shape_cast %109 : vector<32x64xbf16> to vector<1x32x64xbf16>
    tpu.vector_store %arg6[%c0_132, %c0_133, %c0_134], %112 {strides = array<i32>} : memref<1x32x64xbf16, #tpu.memory_space<vmem>>, vector<1x32x64xbf16>,
    return
  }
  func.func @transform_0(%arg0: i32, %arg1: memref<2xi32, #tpu.memory_space<smem>>) -> (i32, i32, i32, i32) {
    %c0_i32 = arith.constant 0 : i32
    %c0_i32_0 = arith.constant 0 : i32
    %c0_i32_1 = arith.constant 0 : i32
    %c0_i32_2 = arith.constant 0 : i32
    return %arg0, %c0_i32, %c0_i32_0, %c0_i32_1 : i32, i32, i32, i32
  }
  func.func @transform_1(%arg0: i32, %arg1: memref<2xi32, #tpu.memory_space<smem>>) -> (i32, i32, i32, i32) {
    %c0_i32 = arith.constant 0 : i32
    %c0_i32_0 = arith.constant 0 : i32
    %c0_i32_1 = arith.constant 0 : i32
    %c0_i32_2 = arith.constant 0 : i32
    %c0_i32_3 = arith.constant 0 : i32
    return %c0_i32, %c0_i32_0, %c0_i32_1, %c0_i32_2 : i32, i32, i32, i32
  }
  func.func @transform_2(%arg0: i32, %arg1: memref<2xi32, #tpu.memory_space<smem>>) -> (i32, i32) {
    %c0_i32 = arith.constant 0 : i32
    %c0_i32_0 = arith.constant 0 : i32
    %c0_i32_1 = arith.constant 0 : i32
    return %c0_i32, %c0_i32_0 : i32, i32
  }
  func.func @transform_3(%arg0: i32, %arg1: memref<2xi32, #tpu.memory_space<smem>>) -> (i32, i32) {
    %c0_i32 = arith.constant 0 : i32
    %c0_i32_0 = arith.constant 0 : i32
    %c0_i32_1 = arith.constant 0 : i32
    return %c0_i32, %c0_i32_0 : i32, i32
  }
  func.func @transform_4(%arg0: i32, %arg1: memref<2xi32, #tpu.memory_space<smem>>) -> (i32, i32, i32) {
    %c0_i32 = arith.constant 0 : i32
    %c0_i32_0 = arith.constant 0 : i32
    %c0_i32_1 = arith.constant 0 : i32
    return %arg0, %c0_i32, %c0_i32_0 : i32, i32, i32
  }
}

module attributes {stable_mosaic.version = 11 : i64} {
  func.func @_conv_bn_relu_mask_kernel(%arg0: i32, %arg1: memref<2xi32, #tpu.memory_space<smem>>, %arg2: memref<1x4x8x64xbf16, #tpu.memory_space<vmem>>, %arg3: memref<3x3x64x128xbf16, #tpu.memory_space<vmem>>, %arg4: memref<1x128xf32, #tpu.memory_space<vmem>>, %arg5: memref<1x128xf32, #tpu.memory_space<vmem>>, %arg6: memref<1x32x128xbf16, #tpu.memory_space<vmem>>, %arg7: memref<6x10x64xbf16, #tpu.memory_space<vmem>>, %arg8: memref<32x128xf32, #tpu.memory_space<vmem>>) attributes {dimension_semantics = [#tpu.dimension_semantics<parallel>], iteration_bounds = array<i64: 2>, scalar_prefetch = 1 : i64, scratch_operands = 2 : i64, tpu.core_type = #tpu.core_type<tc>, window_params = [{transform_indices = @transform_0, window_bounds = array<i64: 1, 4, 8, 64>}, {pipeline_mode = #tpu.pipeline_mode<synchronous>, transform_indices = @transform_1, window_bounds = array<i64: 3, 3, 64, 128>}, {pipeline_mode = #tpu.pipeline_mode<synchronous>, transform_indices = @transform_2, window_bounds = array<i64: 1, 128>}, {pipeline_mode = #tpu.pipeline_mode<synchronous>, transform_indices = @transform_3, window_bounds = array<i64: 1, 128>}, {transform_indices = @transform_4, window_bounds = array<i64: 1, 32, 128>}]} {
    %0 = arith.index_cast %arg0 : i32 to index
    %1 = memref.load %arg1[%0] : memref<2xi32, #tpu.memory_space<smem>>
    %cst = arith.constant 0.000000e+00 : bf16
    %2 = vector.broadcast %cst : bf16 to vector<6x10x64xbf16>
    %c0 = arith.constant 0 : index
    %c0_0 = arith.constant 0 : index
    %c0_1 = arith.constant 0 : index
    %3 = vector.load %arg7[%c0, %c0_0, %c0_1] : memref<6x10x64xbf16, #tpu.memory_space<vmem>>, vector<6x10x64xbf16>
    tpu.vector_store %arg7[%c0, %c0_0, %c0_1], %2 {strides = array<i32>} : memref<6x10x64xbf16, #tpu.memory_space<vmem>>, vector<6x10x64xbf16>,
    %c0_2 = arith.constant 0 : index
    %c0_3 = arith.constant 0 : index
    %c0_4 = arith.constant 0 : index
    %c0_5 = arith.constant 0 : index
    %4 = vector.load %arg2[%c0_2, %c0_3, %c0_4, %c0_5] : memref<1x4x8x64xbf16, #tpu.memory_space<vmem>>, vector<1x4x8x64xbf16>
    %5 = vector.shape_cast %4 : vector<1x4x8x64xbf16> to vector<4x8x64xbf16>
    %c1 = arith.constant 1 : index
    %c1_6 = arith.constant 1 : index
    %c0_7 = arith.constant 0 : index
    %6 = vector.load %arg7[%c1, %c1_6, %c0_7] : memref<6x10x64xbf16, #tpu.memory_space<vmem>>, vector<4x8x64xbf16>
    tpu.vector_store %arg7[%c1, %c1_6, %c0_7], %5 {strides = array<i32>} : memref<6x10x64xbf16, #tpu.memory_space<vmem>>, vector<4x8x64xbf16>,
    %cst_8 = arith.constant 0.000000e+00 : f32
    %7 = vector.broadcast %cst_8 : f32 to vector<32x128xf32>
    %c0_9 = arith.constant 0 : index
    %c0_10 = arith.constant 0 : index
    %8 = vector.load %arg8[%c0_9, %c0_10] : memref<32x128xf32, #tpu.memory_space<vmem>>, vector<32x128xf32>
    tpu.vector_store %arg8[%c0_9, %c0_10], %7 {strides = array<i32>} : memref<32x128xf32, #tpu.memory_space<vmem>>, vector<32x128xf32>,
    %c0_11 = arith.constant 0 : index
    %c0_12 = arith.constant 0 : index
    %c0_13 = arith.constant 0 : index
    %9 = vector.load %arg7[%c0_11, %c0_12, %c0_13] : memref<6x10x64xbf16, #tpu.memory_space<vmem>>, vector<4x8x64xbf16>
    %10 = vector.shape_cast %9 : vector<4x8x64xbf16> to vector<32x64xbf16>
    %c0_14 = arith.constant 0 : index
    %c0_15 = arith.constant 0 : index
    %11 = vector.load %arg8[%c0_14, %c0_15] : memref<32x128xf32, #tpu.memory_space<vmem>>, vector<32x128xf32>
    %c0_16 = arith.constant 0 : index
    %c0_17 = arith.constant 0 : index
    %c0_18 = arith.constant 0 : index
    %c0_19 = arith.constant 0 : index
    %12 = vector.load %arg3[%c0_16, %c0_17, %c0_18, %c0_19] : memref<3x3x64x128xbf16, #tpu.memory_space<vmem>>, vector<1x1x64x128xbf16>
    %13 = vector.shape_cast %12 : vector<1x1x64x128xbf16> to vector<64x128xbf16>
    %cst_20 = arith.constant dense<0.000000e+00> : vector<32x128xf32>
    %14 = tpu.matmul %10, %13, %cst_20 {dimension_numbers = #tpu.dot_dimension_numbers<[1], [0], [0], [1], [0, 0, 1, 1], [], []>} : vector<32x64xbf16>, vector<64x128xbf16>, vector<32x128xf32> -> vector<32x128xf32>
    %15 = arith.addf %11, %14 : vector<32x128xf32>
    %c0_21 = arith.constant 0 : index
    %c0_22 = arith.constant 0 : index
    %16 = vector.load %arg8[%c0_21, %c0_22] : memref<32x128xf32, #tpu.memory_space<vmem>>, vector<32x128xf32>
    tpu.vector_store %arg8[%c0_21, %c0_22], %15 {strides = array<i32>} : memref<32x128xf32, #tpu.memory_space<vmem>>, vector<32x128xf32>,
    %c0_23 = arith.constant 0 : index
    %c1_24 = arith.constant 1 : index
    %c0_25 = arith.constant 0 : index
    %17 = vector.load %arg7[%c0_23, %c1_24, %c0_25] : memref<6x10x64xbf16, #tpu.memory_space<vmem>>, vector<4x8x64xbf16>
    %18 = vector.shape_cast %17 : vector<4x8x64xbf16> to vector<32x64xbf16>
    %c0_26 = arith.constant 0 : index
    %c0_27 = arith.constant 0 : index
    %19 = vector.load %arg8[%c0_26, %c0_27] : memref<32x128xf32, #tpu.memory_space<vmem>>, vector<32x128xf32>
    %c0_28 = arith.constant 0 : index
    %c1_29 = arith.constant 1 : index
    %c0_30 = arith.constant 0 : index
    %c0_31 = arith.constant 0 : index
    %20 = vector.load %arg3[%c0_28, %c1_29, %c0_30, %c0_31] : memref<3x3x64x128xbf16, #tpu.memory_space<vmem>>, vector<1x1x64x128xbf16>
    %21 = vector.shape_cast %20 : vector<1x1x64x128xbf16> to vector<64x128xbf16>
    %cst_32 = arith.constant dense<0.000000e+00> : vector<32x128xf32>
    %22 = tpu.matmul %18, %21, %cst_32 {dimension_numbers = #tpu.dot_dimension_numbers<[1], [0], [0], [1], [0, 0, 1, 1], [], []>} : vector<32x64xbf16>, vector<64x128xbf16>, vector<32x128xf32> -> vector<32x128xf32>
    %23 = arith.addf %19, %22 : vector<32x128xf32>
    %c0_33 = arith.constant 0 : index
    %c0_34 = arith.constant 0 : index
    %24 = vector.load %arg8[%c0_33, %c0_34] : memref<32x128xf32, #tpu.memory_space<vmem>>, vector<32x128xf32>
    tpu.vector_store %arg8[%c0_33, %c0_34], %23 {strides = array<i32>} : memref<32x128xf32, #tpu.memory_space<vmem>>, vector<32x128xf32>,
    %c0_35 = arith.constant 0 : index
    %c2 = arith.constant 2 : index
    %c0_36 = arith.constant 0 : index
    %25 = vector.load %arg7[%c0_35, %c2, %c0_36] : memref<6x10x64xbf16, #tpu.memory_space<vmem>>, vector<4x8x64xbf16>
    %26 = vector.shape_cast %25 : vector<4x8x64xbf16> to vector<32x64xbf16>
    %c0_37 = arith.constant 0 : index
    %c0_38 = arith.constant 0 : index
    %27 = vector.load %arg8[%c0_37, %c0_38] : memref<32x128xf32, #tpu.memory_space<vmem>>, vector<32x128xf32>
    %c0_39 = arith.constant 0 : index
    %c2_40 = arith.constant 2 : index
    %c0_41 = arith.constant 0 : index
    %c0_42 = arith.constant 0 : index
    %28 = vector.load %arg3[%c0_39, %c2_40, %c0_41, %c0_42] : memref<3x3x64x128xbf16, #tpu.memory_space<vmem>>, vector<1x1x64x128xbf16>
    %29 = vector.shape_cast %28 : vector<1x1x64x128xbf16> to vector<64x128xbf16>
    %cst_43 = arith.constant dense<0.000000e+00> : vector<32x128xf32>
    %30 = tpu.matmul %26, %29, %cst_43 {dimension_numbers = #tpu.dot_dimension_numbers<[1], [0], [0], [1], [0, 0, 1, 1], [], []>} : vector<32x64xbf16>, vector<64x128xbf16>, vector<32x128xf32> -> vector<32x128xf32>
    %31 = arith.addf %27, %30 : vector<32x128xf32>
    %c0_44 = arith.constant 0 : index
    %c0_45 = arith.constant 0 : index
    %32 = vector.load %arg8[%c0_44, %c0_45] : memref<32x128xf32, #tpu.memory_space<vmem>>, vector<32x128xf32>
    tpu.vector_store %arg8[%c0_44, %c0_45], %31 {strides = array<i32>} : memref<32x128xf32, #tpu.memory_space<vmem>>, vector<32x128xf32>,
    %c1_46 = arith.constant 1 : index
    %c0_47 = arith.constant 0 : index
    %c0_48 = arith.constant 0 : index
    %33 = vector.load %arg7[%c1_46, %c0_47, %c0_48] : memref<6x10x64xbf16, #tpu.memory_space<vmem>>, vector<4x8x64xbf16>
    %34 = vector.shape_cast %33 : vector<4x8x64xbf16> to vector<32x64xbf16>
    %c0_49 = arith.constant 0 : index
    %c0_50 = arith.constant 0 : index
    %35 = vector.load %arg8[%c0_49, %c0_50] : memref<32x128xf32, #tpu.memory_space<vmem>>, vector<32x128xf32>
    %c1_51 = arith.constant 1 : index
    %c0_52 = arith.constant 0 : index
    %c0_53 = arith.constant 0 : index
    %c0_54 = arith.constant 0 : index
    %36 = vector.load %arg3[%c1_51, %c0_52, %c0_53, %c0_54] : memref<3x3x64x128xbf16, #tpu.memory_space<vmem>>, vector<1x1x64x128xbf16>
    %37 = vector.shape_cast %36 : vector<1x1x64x128xbf16> to vector<64x128xbf16>
    %cst_55 = arith.constant dense<0.000000e+00> : vector<32x128xf32>
    %38 = tpu.matmul %34, %37, %cst_55 {dimension_numbers = #tpu.dot_dimension_numbers<[1], [0], [0], [1], [0, 0, 1, 1], [], []>} : vector<32x64xbf16>, vector<64x128xbf16>, vector<32x128xf32> -> vector<32x128xf32>
    %39 = arith.addf %35, %38 : vector<32x128xf32>
    %c0_56 = arith.constant 0 : index
    %c0_57 = arith.constant 0 : index
    %40 = vector.load %arg8[%c0_56, %c0_57] : memref<32x128xf32, #tpu.memory_space<vmem>>, vector<32x128xf32>
    tpu.vector_store %arg8[%c0_56, %c0_57], %39 {strides = array<i32>} : memref<32x128xf32, #tpu.memory_space<vmem>>, vector<32x128xf32>,
    %c1_58 = arith.constant 1 : index
    %c1_59 = arith.constant 1 : index
    %c0_60 = arith.constant 0 : index
    %41 = vector.load %arg7[%c1_58, %c1_59, %c0_60] : memref<6x10x64xbf16, #tpu.memory_space<vmem>>, vector<4x8x64xbf16>
    %42 = vector.shape_cast %41 : vector<4x8x64xbf16> to vector<32x64xbf16>
    %c0_61 = arith.constant 0 : index
    %c0_62 = arith.constant 0 : index
    %43 = vector.load %arg8[%c0_61, %c0_62] : memref<32x128xf32, #tpu.memory_space<vmem>>, vector<32x128xf32>
    %c1_63 = arith.constant 1 : index
    %c1_64 = arith.constant 1 : index
    %c0_65 = arith.constant 0 : index
    %c0_66 = arith.constant 0 : index
    %44 = vector.load %arg3[%c1_63, %c1_64, %c0_65, %c0_66] : memref<3x3x64x128xbf16, #tpu.memory_space<vmem>>, vector<1x1x64x128xbf16>
    %45 = vector.shape_cast %44 : vector<1x1x64x128xbf16> to vector<64x128xbf16>
    %cst_67 = arith.constant dense<0.000000e+00> : vector<32x128xf32>
    %46 = tpu.matmul %42, %45, %cst_67 {dimension_numbers = #tpu.dot_dimension_numbers<[1], [0], [0], [1], [0, 0, 1, 1], [], []>} : vector<32x64xbf16>, vector<64x128xbf16>, vector<32x128xf32> -> vector<32x128xf32>
    %47 = arith.addf %43, %46 : vector<32x128xf32>
    %c0_68 = arith.constant 0 : index
    %c0_69 = arith.constant 0 : index
    %48 = vector.load %arg8[%c0_68, %c0_69] : memref<32x128xf32, #tpu.memory_space<vmem>>, vector<32x128xf32>
    tpu.vector_store %arg8[%c0_68, %c0_69], %47 {strides = array<i32>} : memref<32x128xf32, #tpu.memory_space<vmem>>, vector<32x128xf32>,
    %c1_70 = arith.constant 1 : index
    %c2_71 = arith.constant 2 : index
    %c0_72 = arith.constant 0 : index
    %49 = vector.load %arg7[%c1_70, %c2_71, %c0_72] : memref<6x10x64xbf16, #tpu.memory_space<vmem>>, vector<4x8x64xbf16>
    %50 = vector.shape_cast %49 : vector<4x8x64xbf16> to vector<32x64xbf16>
    %c0_73 = arith.constant 0 : index
    %c0_74 = arith.constant 0 : index
    %51 = vector.load %arg8[%c0_73, %c0_74] : memref<32x128xf32, #tpu.memory_space<vmem>>, vector<32x128xf32>
    %c1_75 = arith.constant 1 : index
    %c2_76 = arith.constant 2 : index
    %c0_77 = arith.constant 0 : index
    %c0_78 = arith.constant 0 : index
    %52 = vector.load %arg3[%c1_75, %c2_76, %c0_77, %c0_78] : memref<3x3x64x128xbf16, #tpu.memory_space<vmem>>, vector<1x1x64x128xbf16>
    %53 = vector.shape_cast %52 : vector<1x1x64x128xbf16> to vector<64x128xbf16>
    %cst_79 = arith.constant dense<0.000000e+00> : vector<32x128xf32>
    %54 = tpu.matmul %50, %53, %cst_79 {dimension_numbers = #tpu.dot_dimension_numbers<[1], [0], [0], [1], [0, 0, 1, 1], [], []>} : vector<32x64xbf16>, vector<64x128xbf16>, vector<32x128xf32> -> vector<32x128xf32>
    %55 = arith.addf %51, %54 : vector<32x128xf32>
    %c0_80 = arith.constant 0 : index
    %c0_81 = arith.constant 0 : index
    %56 = vector.load %arg8[%c0_80, %c0_81] : memref<32x128xf32, #tpu.memory_space<vmem>>, vector<32x128xf32>
    tpu.vector_store %arg8[%c0_80, %c0_81], %55 {strides = array<i32>} : memref<32x128xf32, #tpu.memory_space<vmem>>, vector<32x128xf32>,
    %c2_82 = arith.constant 2 : index
    %c0_83 = arith.constant 0 : index
    %c0_84 = arith.constant 0 : index
    %57 = vector.load %arg7[%c2_82, %c0_83, %c0_84] : memref<6x10x64xbf16, #tpu.memory_space<vmem>>, vector<4x8x64xbf16>
    %58 = vector.shape_cast %57 : vector<4x8x64xbf16> to vector<32x64xbf16>
    %c0_85 = arith.constant 0 : index
    %c0_86 = arith.constant 0 : index
    %59 = vector.load %arg8[%c0_85, %c0_86] : memref<32x128xf32, #tpu.memory_space<vmem>>, vector<32x128xf32>
    %c2_87 = arith.constant 2 : index
    %c0_88 = arith.constant 0 : index
    %c0_89 = arith.constant 0 : index
    %c0_90 = arith.constant 0 : index
    %60 = vector.load %arg3[%c2_87, %c0_88, %c0_89, %c0_90] : memref<3x3x64x128xbf16, #tpu.memory_space<vmem>>, vector<1x1x64x128xbf16>
    %61 = vector.shape_cast %60 : vector<1x1x64x128xbf16> to vector<64x128xbf16>
    %cst_91 = arith.constant dense<0.000000e+00> : vector<32x128xf32>
    %62 = tpu.matmul %58, %61, %cst_91 {dimension_numbers = #tpu.dot_dimension_numbers<[1], [0], [0], [1], [0, 0, 1, 1], [], []>} : vector<32x64xbf16>, vector<64x128xbf16>, vector<32x128xf32> -> vector<32x128xf32>
    %63 = arith.addf %59, %62 : vector<32x128xf32>
    %c0_92 = arith.constant 0 : index
    %c0_93 = arith.constant 0 : index
    %64 = vector.load %arg8[%c0_92, %c0_93] : memref<32x128xf32, #tpu.memory_space<vmem>>, vector<32x128xf32>
    tpu.vector_store %arg8[%c0_92, %c0_93], %63 {strides = array<i32>} : memref<32x128xf32, #tpu.memory_space<vmem>>, vector<32x128xf32>,
    %c2_94 = arith.constant 2 : index
    %c1_95 = arith.constant 1 : index
    %c0_96 = arith.constant 0 : index
    %65 = vector.load %arg7[%c2_94, %c1_95, %c0_96] : memref<6x10x64xbf16, #tpu.memory_space<vmem>>, vector<4x8x64xbf16>
    %66 = vector.shape_cast %65 : vector<4x8x64xbf16> to vector<32x64xbf16>
    %c0_97 = arith.constant 0 : index
    %c0_98 = arith.constant 0 : index
    %67 = vector.load %arg8[%c0_97, %c0_98] : memref<32x128xf32, #tpu.memory_space<vmem>>, vector<32x128xf32>
    %c2_99 = arith.constant 2 : index
    %c1_100 = arith.constant 1 : index
    %c0_101 = arith.constant 0 : index
    %c0_102 = arith.constant 0 : index
    %68 = vector.load %arg3[%c2_99, %c1_100, %c0_101, %c0_102] : memref<3x3x64x128xbf16, #tpu.memory_space<vmem>>, vector<1x1x64x128xbf16>
    %69 = vector.shape_cast %68 : vector<1x1x64x128xbf16> to vector<64x128xbf16>
    %cst_103 = arith.constant dense<0.000000e+00> : vector<32x128xf32>
    %70 = tpu.matmul %66, %69, %cst_103 {dimension_numbers = #tpu.dot_dimension_numbers<[1], [0], [0], [1], [0, 0, 1, 1], [], []>} : vector<32x64xbf16>, vector<64x128xbf16>, vector<32x128xf32> -> vector<32x128xf32>
    %71 = arith.addf %67, %70 : vector<32x128xf32>
    %c0_104 = arith.constant 0 : index
    %c0_105 = arith.constant 0 : index
    %72 = vector.load %arg8[%c0_104, %c0_105] : memref<32x128xf32, #tpu.memory_space<vmem>>, vector<32x128xf32>
    tpu.vector_store %arg8[%c0_104, %c0_105], %71 {strides = array<i32>} : memref<32x128xf32, #tpu.memory_space<vmem>>, vector<32x128xf32>,
    %c2_106 = arith.constant 2 : index
    %c2_107 = arith.constant 2 : index
    %c0_108 = arith.constant 0 : index
    %73 = vector.load %arg7[%c2_106, %c2_107, %c0_108] : memref<6x10x64xbf16, #tpu.memory_space<vmem>>, vector<4x8x64xbf16>
    %74 = vector.shape_cast %73 : vector<4x8x64xbf16> to vector<32x64xbf16>
    %c0_109 = arith.constant 0 : index
    %c0_110 = arith.constant 0 : index
    %75 = vector.load %arg8[%c0_109, %c0_110] : memref<32x128xf32, #tpu.memory_space<vmem>>, vector<32x128xf32>
    %c2_111 = arith.constant 2 : index
    %c2_112 = arith.constant 2 : index
    %c0_113 = arith.constant 0 : index
    %c0_114 = arith.constant 0 : index
    %76 = vector.load %arg3[%c2_111, %c2_112, %c0_113, %c0_114] : memref<3x3x64x128xbf16, #tpu.memory_space<vmem>>, vector<1x1x64x128xbf16>
    %77 = vector.shape_cast %76 : vector<1x1x64x128xbf16> to vector<64x128xbf16>
    %cst_115 = arith.constant dense<0.000000e+00> : vector<32x128xf32>
    %78 = tpu.matmul %74, %77, %cst_115 {dimension_numbers = #tpu.dot_dimension_numbers<[1], [0], [0], [1], [0, 0, 1, 1], [], []>} : vector<32x64xbf16>, vector<64x128xbf16>, vector<32x128xf32> -> vector<32x128xf32>
    %79 = arith.addf %75, %78 : vector<32x128xf32>
    %c0_116 = arith.constant 0 : index
    %c0_117 = arith.constant 0 : index
    %80 = vector.load %arg8[%c0_116, %c0_117] : memref<32x128xf32, #tpu.memory_space<vmem>>, vector<32x128xf32>
    tpu.vector_store %arg8[%c0_116, %c0_117], %79 {strides = array<i32>} : memref<32x128xf32, #tpu.memory_space<vmem>>, vector<32x128xf32>,
    %c0_118 = arith.constant 0 : index
    %c0_119 = arith.constant 0 : index
    %81 = vector.load %arg8[%c0_118, %c0_119] : memref<32x128xf32, #tpu.memory_space<vmem>>, vector<32x128xf32>
    %c0_120 = arith.constant 0 : index
    %c0_121 = arith.constant 0 : index
    %82 = vector.load %arg4[%c0_120, %c0_121] : memref<1x128xf32, #tpu.memory_space<vmem>>, vector<1x128xf32>
    %83 = vector.broadcast %82 : vector<1x128xf32> to vector<32x128xf32>
    %84 = arith.mulf %81, %83 : vector<32x128xf32>
    %c0_122 = arith.constant 0 : index
    %c0_123 = arith.constant 0 : index
    %85 = vector.load %arg5[%c0_122, %c0_123] : memref<1x128xf32, #tpu.memory_space<vmem>>, vector<1x128xf32>
    %86 = vector.broadcast %85 : vector<1x128xf32> to vector<32x128xf32>
    %87 = arith.addf %84, %86 : vector<32x128xf32>
    %cst_124 = arith.constant 0.000000e+00 : f32
    %88 = vector.broadcast %cst_124 : f32 to vector<32x128xf32>
    %89 = arith.maximumf %87, %88 : vector<32x128xf32>
    %90 = tpu.iota {dimensions = array<i32: 1>} : vector<4x8x1xi32>
    %91 = vector.shape_cast %90 : vector<4x8x1xi32> to vector<32x1xi32>
    %92 = vector.broadcast %1 : i32 to vector<32x1xi32>
    %93 = arith.cmpi slt, %91, %92 : vector<32x1xi32>
    %cst_125 = arith.constant 0.000000e+00 : f32
    %94 = vector.shape_cast %93 : vector<32x1xi1> to vector<32x1xi1>
    %95 = vector.broadcast %94 : vector<32x1xi1> to vector<32x128xi1>
    %96 = vector.broadcast %cst_125 : f32 to vector<32x128xf32>
    %97 = arith.select %95, %89, %96 : vector<32x128xi1>, vector<32x128xf32>
    %98 = arith.truncf %97 : vector<32x128xf32> to vector<32x128xbf16>
    %c0_126 = arith.constant 0 : index
    %c0_127 = arith.constant 0 : index
    %c0_128 = arith.constant 0 : index
    %99 = vector.load %arg6[%c0_126, %c0_127, %c0_128] : memref<1x32x128xbf16, #tpu.memory_space<vmem>>, vector<1x32x128xbf16>
    %100 = vector.shape_cast %99 : vector<1x32x128xbf16> to vector<32x128xbf16>
    %101 = vector.shape_cast %98 : vector<32x128xbf16> to vector<1x32x128xbf16>
    tpu.vector_store %arg6[%c0_126, %c0_127, %c0_128], %101 {strides = array<i32>} : memref<1x32x128xbf16, #tpu.memory_space<vmem>>, vector<1x32x128xbf16>,
    return
  }
  func.func @transform_0(%arg0: i32, %arg1: memref<2xi32, #tpu.memory_space<smem>>) -> (i32, i32, i32, i32) {
    %c0_i32 = arith.constant 0 : i32
    %c0_i32_0 = arith.constant 0 : i32
    %c0_i32_1 = arith.constant 0 : i32
    %c0_i32_2 = arith.constant 0 : i32
    return %arg0, %c0_i32, %c0_i32_0, %c0_i32_1 : i32, i32, i32, i32
  }
  func.func @transform_1(%arg0: i32, %arg1: memref<2xi32, #tpu.memory_space<smem>>) -> (i32, i32, i32, i32) {
    %c0_i32 = arith.constant 0 : i32
    %c0_i32_0 = arith.constant 0 : i32
    %c0_i32_1 = arith.constant 0 : i32
    %c0_i32_2 = arith.constant 0 : i32
    %c0_i32_3 = arith.constant 0 : i32
    return %c0_i32, %c0_i32_0, %c0_i32_1, %c0_i32_2 : i32, i32, i32, i32
  }
  func.func @transform_2(%arg0: i32, %arg1: memref<2xi32, #tpu.memory_space<smem>>) -> (i32, i32) {
    %c0_i32 = arith.constant 0 : i32
    %c0_i32_0 = arith.constant 0 : i32
    %c0_i32_1 = arith.constant 0 : i32
    return %c0_i32, %c0_i32_0 : i32, i32
  }
  func.func @transform_3(%arg0: i32, %arg1: memref<2xi32, #tpu.memory_space<smem>>) -> (i32, i32) {
    %c0_i32 = arith.constant 0 : i32
    %c0_i32_0 = arith.constant 0 : i32
    %c0_i32_1 = arith.constant 0 : i32
    return %c0_i32, %c0_i32_0 : i32, i32
  }
  func.func @transform_4(%arg0: i32, %arg1: memref<2xi32, #tpu.memory_space<smem>>) -> (i32, i32, i32) {
    %c0_i32 = arith.constant 0 : i32
    %c0_i32_0 = arith.constant 0 : i32
    %c0_i32_1 = arith.constant 0 : i32
    return %arg0, %c0_i32, %c0_i32_0 : i32, i32, i32
  }
}

module attributes {stable_mosaic.version = 11 : i64} {
  func.func @_conv_bn_relu_pool_mask_kernel(%arg0: i32, %arg1: memref<2xi32, #tpu.memory_space<smem>>, %arg2: memref<1x4x8x128xbf16, #tpu.memory_space<vmem>>, %arg3: memref<3x3x128x128xbf16, #tpu.memory_space<vmem>>, %arg4: memref<1x128xf32, #tpu.memory_space<vmem>>, %arg5: memref<1x128xf32, #tpu.memory_space<vmem>>, %arg6: memref<1x8x128xf32, #tpu.memory_space<vmem>>, %arg7: memref<6x10x128xbf16, #tpu.memory_space<vmem>>, %arg8: memref<32x128xf32, #tpu.memory_space<vmem>>, %arg9: memref<16x128xf32, #tpu.memory_space<vmem>>) attributes {dimension_semantics = [#tpu.dimension_semantics<parallel>], iteration_bounds = array<i64: 2>, scalar_prefetch = 1 : i64, scratch_operands = 3 : i64, tpu.core_type = #tpu.core_type<tc>, window_params = [{transform_indices = @transform_0, window_bounds = array<i64: 1, 4, 8, 128>}, {pipeline_mode = #tpu.pipeline_mode<synchronous>, transform_indices = @transform_1, window_bounds = array<i64: 3, 3, 128, 128>}, {pipeline_mode = #tpu.pipeline_mode<synchronous>, transform_indices = @transform_2, window_bounds = array<i64: 1, 128>}, {pipeline_mode = #tpu.pipeline_mode<synchronous>, transform_indices = @transform_3, window_bounds = array<i64: 1, 128>}, {transform_indices = @transform_4, window_bounds = array<i64: 1, 8, 128>}]} {
    %0 = arith.index_cast %arg0 : i32 to index
    %1 = memref.load %arg1[%0] : memref<2xi32, #tpu.memory_space<smem>>
    %cst = arith.constant 0.000000e+00 : bf16
    %2 = vector.broadcast %cst : bf16 to vector<6x10x128xbf16>
    %c0 = arith.constant 0 : index
    %c0_0 = arith.constant 0 : index
    %c0_1 = arith.constant 0 : index
    %3 = vector.load %arg7[%c0, %c0_0, %c0_1] : memref<6x10x128xbf16, #tpu.memory_space<vmem>>, vector<6x10x128xbf16>
    tpu.vector_store %arg7[%c0, %c0_0, %c0_1], %2 {strides = array<i32>} : memref<6x10x128xbf16, #tpu.memory_space<vmem>>, vector<6x10x128xbf16>,
    %c0_2 = arith.constant 0 : index
    %c0_3 = arith.constant 0 : index
    %c0_4 = arith.constant 0 : index
    %c0_5 = arith.constant 0 : index
    %4 = vector.load %arg2[%c0_2, %c0_3, %c0_4, %c0_5] : memref<1x4x8x128xbf16, #tpu.memory_space<vmem>>, vector<1x4x8x128xbf16>
    %5 = vector.shape_cast %4 : vector<1x4x8x128xbf16> to vector<4x8x128xbf16>
    %c1 = arith.constant 1 : index
    %c1_6 = arith.constant 1 : index
    %c0_7 = arith.constant 0 : index
    %6 = vector.load %arg7[%c1, %c1_6, %c0_7] : memref<6x10x128xbf16, #tpu.memory_space<vmem>>, vector<4x8x128xbf16>
    tpu.vector_store %arg7[%c1, %c1_6, %c0_7], %5 {strides = array<i32>} : memref<6x10x128xbf16, #tpu.memory_space<vmem>>, vector<4x8x128xbf16>,
    %cst_8 = arith.constant 0.000000e+00 : f32
    %7 = vector.broadcast %cst_8 : f32 to vector<32x128xf32>
    %c0_9 = arith.constant 0 : index
    %c0_10 = arith.constant 0 : index
    %8 = vector.load %arg8[%c0_9, %c0_10] : memref<32x128xf32, #tpu.memory_space<vmem>>, vector<32x128xf32>
    tpu.vector_store %arg8[%c0_9, %c0_10], %7 {strides = array<i32>} : memref<32x128xf32, #tpu.memory_space<vmem>>, vector<32x128xf32>,
    %c0_11 = arith.constant 0 : index
    %c0_12 = arith.constant 0 : index
    %c0_13 = arith.constant 0 : index
    %9 = vector.load %arg7[%c0_11, %c0_12, %c0_13] : memref<6x10x128xbf16, #tpu.memory_space<vmem>>, vector<4x8x128xbf16>
    %10 = vector.shape_cast %9 : vector<4x8x128xbf16> to vector<32x128xbf16>
    %c0_14 = arith.constant 0 : index
    %c0_15 = arith.constant 0 : index
    %11 = vector.load %arg8[%c0_14, %c0_15] : memref<32x128xf32, #tpu.memory_space<vmem>>, vector<32x128xf32>
    %c0_16 = arith.constant 0 : index
    %c0_17 = arith.constant 0 : index
    %c0_18 = arith.constant 0 : index
    %c0_19 = arith.constant 0 : index
    %12 = vector.load %arg3[%c0_16, %c0_17, %c0_18, %c0_19] : memref<3x3x128x128xbf16, #tpu.memory_space<vmem>>, vector<1x1x128x128xbf16>
    %13 = vector.shape_cast %12 : vector<1x1x128x128xbf16> to vector<128x128xbf16>
    %cst_20 = arith.constant dense<0.000000e+00> : vector<32x128xf32>
    %14 = tpu.matmul %10, %13, %cst_20 {dimension_numbers = #tpu.dot_dimension_numbers<[1], [0], [0], [1], [0, 0, 1, 1], [], []>} : vector<32x128xbf16>, vector<128x128xbf16>, vector<32x128xf32> -> vector<32x128xf32>
    %15 = arith.addf %11, %14 : vector<32x128xf32>
    %c0_21 = arith.constant 0 : index
    %c0_22 = arith.constant 0 : index
    %16 = vector.load %arg8[%c0_21, %c0_22] : memref<32x128xf32, #tpu.memory_space<vmem>>, vector<32x128xf32>
    tpu.vector_store %arg8[%c0_21, %c0_22], %15 {strides = array<i32>} : memref<32x128xf32, #tpu.memory_space<vmem>>, vector<32x128xf32>,
    %c0_23 = arith.constant 0 : index
    %c1_24 = arith.constant 1 : index
    %c0_25 = arith.constant 0 : index
    %17 = vector.load %arg7[%c0_23, %c1_24, %c0_25] : memref<6x10x128xbf16, #tpu.memory_space<vmem>>, vector<4x8x128xbf16>
    %18 = vector.shape_cast %17 : vector<4x8x128xbf16> to vector<32x128xbf16>
    %c0_26 = arith.constant 0 : index
    %c0_27 = arith.constant 0 : index
    %19 = vector.load %arg8[%c0_26, %c0_27] : memref<32x128xf32, #tpu.memory_space<vmem>>, vector<32x128xf32>
    %c0_28 = arith.constant 0 : index
    %c1_29 = arith.constant 1 : index
    %c0_30 = arith.constant 0 : index
    %c0_31 = arith.constant 0 : index
    %20 = vector.load %arg3[%c0_28, %c1_29, %c0_30, %c0_31] : memref<3x3x128x128xbf16, #tpu.memory_space<vmem>>, vector<1x1x128x128xbf16>
    %21 = vector.shape_cast %20 : vector<1x1x128x128xbf16> to vector<128x128xbf16>
    %cst_32 = arith.constant dense<0.000000e+00> : vector<32x128xf32>
    %22 = tpu.matmul %18, %21, %cst_32 {dimension_numbers = #tpu.dot_dimension_numbers<[1], [0], [0], [1], [0, 0, 1, 1], [], []>} : vector<32x128xbf16>, vector<128x128xbf16>, vector<32x128xf32> -> vector<32x128xf32>
    %23 = arith.addf %19, %22 : vector<32x128xf32>
    %c0_33 = arith.constant 0 : index
    %c0_34 = arith.constant 0 : index
    %24 = vector.load %arg8[%c0_33, %c0_34] : memref<32x128xf32, #tpu.memory_space<vmem>>, vector<32x128xf32>
    tpu.vector_store %arg8[%c0_33, %c0_34], %23 {strides = array<i32>} : memref<32x128xf32, #tpu.memory_space<vmem>>, vector<32x128xf32>,
    %c0_35 = arith.constant 0 : index
    %c2 = arith.constant 2 : index
    %c0_36 = arith.constant 0 : index
    %25 = vector.load %arg7[%c0_35, %c2, %c0_36] : memref<6x10x128xbf16, #tpu.memory_space<vmem>>, vector<4x8x128xbf16>
    %26 = vector.shape_cast %25 : vector<4x8x128xbf16> to vector<32x128xbf16>
    %c0_37 = arith.constant 0 : index
    %c0_38 = arith.constant 0 : index
    %27 = vector.load %arg8[%c0_37, %c0_38] : memref<32x128xf32, #tpu.memory_space<vmem>>, vector<32x128xf32>
    %c0_39 = arith.constant 0 : index
    %c2_40 = arith.constant 2 : index
    %c0_41 = arith.constant 0 : index
    %c0_42 = arith.constant 0 : index
    %28 = vector.load %arg3[%c0_39, %c2_40, %c0_41, %c0_42] : memref<3x3x128x128xbf16, #tpu.memory_space<vmem>>, vector<1x1x128x128xbf16>
    %29 = vector.shape_cast %28 : vector<1x1x128x128xbf16> to vector<128x128xbf16>
    %cst_43 = arith.constant dense<0.000000e+00> : vector<32x128xf32>
    %30 = tpu.matmul %26, %29, %cst_43 {dimension_numbers = #tpu.dot_dimension_numbers<[1], [0], [0], [1], [0, 0, 1, 1], [], []>} : vector<32x128xbf16>, vector<128x128xbf16>, vector<32x128xf32> -> vector<32x128xf32>
    %31 = arith.addf %27, %30 : vector<32x128xf32>
    %c0_44 = arith.constant 0 : index
    %c0_45 = arith.constant 0 : index
    %32 = vector.load %arg8[%c0_44, %c0_45] : memref<32x128xf32, #tpu.memory_space<vmem>>, vector<32x128xf32>
    tpu.vector_store %arg8[%c0_44, %c0_45], %31 {strides = array<i32>} : memref<32x128xf32, #tpu.memory_space<vmem>>, vector<32x128xf32>,
    %c1_46 = arith.constant 1 : index
    %c0_47 = arith.constant 0 : index
    %c0_48 = arith.constant 0 : index
    %33 = vector.load %arg7[%c1_46, %c0_47, %c0_48] : memref<6x10x128xbf16, #tpu.memory_space<vmem>>, vector<4x8x128xbf16>
    %34 = vector.shape_cast %33 : vector<4x8x128xbf16> to vector<32x128xbf16>
    %c0_49 = arith.constant 0 : index
    %c0_50 = arith.constant 0 : index
    %35 = vector.load %arg8[%c0_49, %c0_50] : memref<32x128xf32, #tpu.memory_space<vmem>>, vector<32x128xf32>
    %c1_51 = arith.constant 1 : index
    %c0_52 = arith.constant 0 : index
    %c0_53 = arith.constant 0 : index
    %c0_54 = arith.constant 0 : index
    %36 = vector.load %arg3[%c1_51, %c0_52, %c0_53, %c0_54] : memref<3x3x128x128xbf16, #tpu.memory_space<vmem>>, vector<1x1x128x128xbf16>
    %37 = vector.shape_cast %36 : vector<1x1x128x128xbf16> to vector<128x128xbf16>
    %cst_55 = arith.constant dense<0.000000e+00> : vector<32x128xf32>
    %38 = tpu.matmul %34, %37, %cst_55 {dimension_numbers = #tpu.dot_dimension_numbers<[1], [0], [0], [1], [0, 0, 1, 1], [], []>} : vector<32x128xbf16>, vector<128x128xbf16>, vector<32x128xf32> -> vector<32x128xf32>
    %39 = arith.addf %35, %38 : vector<32x128xf32>
    %c0_56 = arith.constant 0 : index
    %c0_57 = arith.constant 0 : index
    %40 = vector.load %arg8[%c0_56, %c0_57] : memref<32x128xf32, #tpu.memory_space<vmem>>, vector<32x128xf32>
    tpu.vector_store %arg8[%c0_56, %c0_57], %39 {strides = array<i32>} : memref<32x128xf32, #tpu.memory_space<vmem>>, vector<32x128xf32>,
    %c1_58 = arith.constant 1 : index
    %c1_59 = arith.constant 1 : index
    %c0_60 = arith.constant 0 : index
    %41 = vector.load %arg7[%c1_58, %c1_59, %c0_60] : memref<6x10x128xbf16, #tpu.memory_space<vmem>>, vector<4x8x128xbf16>
    %42 = vector.shape_cast %41 : vector<4x8x128xbf16> to vector<32x128xbf16>
    %c0_61 = arith.constant 0 : index
    %c0_62 = arith.constant 0 : index
    %43 = vector.load %arg8[%c0_61, %c0_62] : memref<32x128xf32, #tpu.memory_space<vmem>>, vector<32x128xf32>
    %c1_63 = arith.constant 1 : index
    %c1_64 = arith.constant 1 : index
    %c0_65 = arith.constant 0 : index
    %c0_66 = arith.constant 0 : index
    %44 = vector.load %arg3[%c1_63, %c1_64, %c0_65, %c0_66] : memref<3x3x128x128xbf16, #tpu.memory_space<vmem>>, vector<1x1x128x128xbf16>
    %45 = vector.shape_cast %44 : vector<1x1x128x128xbf16> to vector<128x128xbf16>
    %cst_67 = arith.constant dense<0.000000e+00> : vector<32x128xf32>
    %46 = tpu.matmul %42, %45, %cst_67 {dimension_numbers = #tpu.dot_dimension_numbers<[1], [0], [0], [1], [0, 0, 1, 1], [], []>} : vector<32x128xbf16>, vector<128x128xbf16>, vector<32x128xf32> -> vector<32x128xf32>
    %47 = arith.addf %43, %46 : vector<32x128xf32>
    %c0_68 = arith.constant 0 : index
    %c0_69 = arith.constant 0 : index
    %48 = vector.load %arg8[%c0_68, %c0_69] : memref<32x128xf32, #tpu.memory_space<vmem>>, vector<32x128xf32>
    tpu.vector_store %arg8[%c0_68, %c0_69], %47 {strides = array<i32>} : memref<32x128xf32, #tpu.memory_space<vmem>>, vector<32x128xf32>,
    %c1_70 = arith.constant 1 : index
    %c2_71 = arith.constant 2 : index
    %c0_72 = arith.constant 0 : index
    %49 = vector.load %arg7[%c1_70, %c2_71, %c0_72] : memref<6x10x128xbf16, #tpu.memory_space<vmem>>, vector<4x8x128xbf16>
    %50 = vector.shape_cast %49 : vector<4x8x128xbf16> to vector<32x128xbf16>
    %c0_73 = arith.constant 0 : index
    %c0_74 = arith.constant 0 : index
    %51 = vector.load %arg8[%c0_73, %c0_74] : memref<32x128xf32, #tpu.memory_space<vmem>>, vector<32x128xf32>
    %c1_75 = arith.constant 1 : index
    %c2_76 = arith.constant 2 : index
    %c0_77 = arith.constant 0 : index
    %c0_78 = arith.constant 0 : index
    %52 = vector.load %arg3[%c1_75, %c2_76, %c0_77, %c0_78] : memref<3x3x128x128xbf16, #tpu.memory_space<vmem>>, vector<1x1x128x128xbf16>
    %53 = vector.shape_cast %52 : vector<1x1x128x128xbf16> to vector<128x128xbf16>
    %cst_79 = arith.constant dense<0.000000e+00> : vector<32x128xf32>
    %54 = tpu.matmul %50, %53, %cst_79 {dimension_numbers = #tpu.dot_dimension_numbers<[1], [0], [0], [1], [0, 0, 1, 1], [], []>} : vector<32x128xbf16>, vector<128x128xbf16>, vector<32x128xf32> -> vector<32x128xf32>
    %55 = arith.addf %51, %54 : vector<32x128xf32>
    %c0_80 = arith.constant 0 : index
    %c0_81 = arith.constant 0 : index
    %56 = vector.load %arg8[%c0_80, %c0_81] : memref<32x128xf32, #tpu.memory_space<vmem>>, vector<32x128xf32>
    tpu.vector_store %arg8[%c0_80, %c0_81], %55 {strides = array<i32>} : memref<32x128xf32, #tpu.memory_space<vmem>>, vector<32x128xf32>,
    %c2_82 = arith.constant 2 : index
    %c0_83 = arith.constant 0 : index
    %c0_84 = arith.constant 0 : index
    %57 = vector.load %arg7[%c2_82, %c0_83, %c0_84] : memref<6x10x128xbf16, #tpu.memory_space<vmem>>, vector<4x8x128xbf16>
    %58 = vector.shape_cast %57 : vector<4x8x128xbf16> to vector<32x128xbf16>
    %c0_85 = arith.constant 0 : index
    %c0_86 = arith.constant 0 : index
    %59 = vector.load %arg8[%c0_85, %c0_86] : memref<32x128xf32, #tpu.memory_space<vmem>>, vector<32x128xf32>
    %c2_87 = arith.constant 2 : index
    %c0_88 = arith.constant 0 : index
    %c0_89 = arith.constant 0 : index
    %c0_90 = arith.constant 0 : index
    %60 = vector.load %arg3[%c2_87, %c0_88, %c0_89, %c0_90] : memref<3x3x128x128xbf16, #tpu.memory_space<vmem>>, vector<1x1x128x128xbf16>
    %61 = vector.shape_cast %60 : vector<1x1x128x128xbf16> to vector<128x128xbf16>
    %cst_91 = arith.constant dense<0.000000e+00> : vector<32x128xf32>
    %62 = tpu.matmul %58, %61, %cst_91 {dimension_numbers = #tpu.dot_dimension_numbers<[1], [0], [0], [1], [0, 0, 1, 1], [], []>} : vector<32x128xbf16>, vector<128x128xbf16>, vector<32x128xf32> -> vector<32x128xf32>
    %63 = arith.addf %59, %62 : vector<32x128xf32>
    %c0_92 = arith.constant 0 : index
    %c0_93 = arith.constant 0 : index
    %64 = vector.load %arg8[%c0_92, %c0_93] : memref<32x128xf32, #tpu.memory_space<vmem>>, vector<32x128xf32>
    tpu.vector_store %arg8[%c0_92, %c0_93], %63 {strides = array<i32>} : memref<32x128xf32, #tpu.memory_space<vmem>>, vector<32x128xf32>,
    %c2_94 = arith.constant 2 : index
    %c1_95 = arith.constant 1 : index
    %c0_96 = arith.constant 0 : index
    %65 = vector.load %arg7[%c2_94, %c1_95, %c0_96] : memref<6x10x128xbf16, #tpu.memory_space<vmem>>, vector<4x8x128xbf16>
    %66 = vector.shape_cast %65 : vector<4x8x128xbf16> to vector<32x128xbf16>
    %c0_97 = arith.constant 0 : index
    %c0_98 = arith.constant 0 : index
    %67 = vector.load %arg8[%c0_97, %c0_98] : memref<32x128xf32, #tpu.memory_space<vmem>>, vector<32x128xf32>
    %c2_99 = arith.constant 2 : index
    %c1_100 = arith.constant 1 : index
    %c0_101 = arith.constant 0 : index
    %c0_102 = arith.constant 0 : index
    %68 = vector.load %arg3[%c2_99, %c1_100, %c0_101, %c0_102] : memref<3x3x128x128xbf16, #tpu.memory_space<vmem>>, vector<1x1x128x128xbf16>
    %69 = vector.shape_cast %68 : vector<1x1x128x128xbf16> to vector<128x128xbf16>
    %cst_103 = arith.constant dense<0.000000e+00> : vector<32x128xf32>
    %70 = tpu.matmul %66, %69, %cst_103 {dimension_numbers = #tpu.dot_dimension_numbers<[1], [0], [0], [1], [0, 0, 1, 1], [], []>} : vector<32x128xbf16>, vector<128x128xbf16>, vector<32x128xf32> -> vector<32x128xf32>
    %71 = arith.addf %67, %70 : vector<32x128xf32>
    %c0_104 = arith.constant 0 : index
    %c0_105 = arith.constant 0 : index
    %72 = vector.load %arg8[%c0_104, %c0_105] : memref<32x128xf32, #tpu.memory_space<vmem>>, vector<32x128xf32>
    tpu.vector_store %arg8[%c0_104, %c0_105], %71 {strides = array<i32>} : memref<32x128xf32, #tpu.memory_space<vmem>>, vector<32x128xf32>,
    %c2_106 = arith.constant 2 : index
    %c2_107 = arith.constant 2 : index
    %c0_108 = arith.constant 0 : index
    %73 = vector.load %arg7[%c2_106, %c2_107, %c0_108] : memref<6x10x128xbf16, #tpu.memory_space<vmem>>, vector<4x8x128xbf16>
    %74 = vector.shape_cast %73 : vector<4x8x128xbf16> to vector<32x128xbf16>
    %c0_109 = arith.constant 0 : index
    %c0_110 = arith.constant 0 : index
    %75 = vector.load %arg8[%c0_109, %c0_110] : memref<32x128xf32, #tpu.memory_space<vmem>>, vector<32x128xf32>
    %c2_111 = arith.constant 2 : index
    %c2_112 = arith.constant 2 : index
    %c0_113 = arith.constant 0 : index
    %c0_114 = arith.constant 0 : index
    %76 = vector.load %arg3[%c2_111, %c2_112, %c0_113, %c0_114] : memref<3x3x128x128xbf16, #tpu.memory_space<vmem>>, vector<1x1x128x128xbf16>
    %77 = vector.shape_cast %76 : vector<1x1x128x128xbf16> to vector<128x128xbf16>
    %cst_115 = arith.constant dense<0.000000e+00> : vector<32x128xf32>
    %78 = tpu.matmul %74, %77, %cst_115 {dimension_numbers = #tpu.dot_dimension_numbers<[1], [0], [0], [1], [0, 0, 1, 1], [], []>} : vector<32x128xbf16>, vector<128x128xbf16>, vector<32x128xf32> -> vector<32x128xf32>
    %79 = arith.addf %75, %78 : vector<32x128xf32>
    %c0_116 = arith.constant 0 : index
    %c0_117 = arith.constant 0 : index
    %80 = vector.load %arg8[%c0_116, %c0_117] : memref<32x128xf32, #tpu.memory_space<vmem>>, vector<32x128xf32>
    tpu.vector_store %arg8[%c0_116, %c0_117], %79 {strides = array<i32>} : memref<32x128xf32, #tpu.memory_space<vmem>>, vector<32x128xf32>,
    %c0_118 = arith.constant 0 : index
    %c0_119 = arith.constant 0 : index
    %81 = vector.load %arg8[%c0_118, %c0_119] : memref<32x128xf32, #tpu.memory_space<vmem>>, vector<32x128xf32>
    %c0_120 = arith.constant 0 : index
    %c0_121 = arith.constant 0 : index
    %82 = vector.load %arg4[%c0_120, %c0_121] : memref<1x128xf32, #tpu.memory_space<vmem>>, vector<1x128xf32>
    %83 = vector.broadcast %82 : vector<1x128xf32> to vector<32x128xf32>
    %84 = arith.mulf %81, %83 : vector<32x128xf32>
    %c0_122 = arith.constant 0 : index
    %c0_123 = arith.constant 0 : index
    %85 = vector.load %arg5[%c0_122, %c0_123] : memref<1x128xf32, #tpu.memory_space<vmem>>, vector<1x128xf32>
    %86 = vector.broadcast %85 : vector<1x128xf32> to vector<32x128xf32>
    %87 = arith.addf %84, %86 : vector<32x128xf32>
    %cst_124 = arith.constant 0.000000e+00 : f32
    %88 = vector.broadcast %cst_124 : f32 to vector<32x128xf32>
    %89 = arith.maximumf %87, %88 : vector<32x128xf32>
    %90 = vector.shape_cast %89 : vector<32x128xf32> to vector<2x2x8x128xf32>
    %91 = vector.extract_strided_slice %90 {offsets = [0, 0, 0, 0], sizes = [2, 1, 8, 128], strides = [1, 1, 1, 1]} : vector<2x2x8x128xf32> to vector<2x1x8x128xf32>
    %92 = vector.shape_cast %91 : vector<2x1x8x128xf32> to vector<2x8x128xf32>
    %93 = vector.extract_strided_slice %90 {offsets = [0, 1, 0, 0], sizes = [2, 1, 8, 128], strides = [1, 1, 1, 1]} : vector<2x2x8x128xf32> to vector<2x1x8x128xf32>
    %94 = vector.shape_cast %93 : vector<2x1x8x128xf32> to vector<2x8x128xf32>
    %95 = arith.maximumf %92, %94 : vector<2x8x128xf32>
    %96 = tpu.iota {dimensions = array<i32: 1>} : vector<2x8x1xi32>
    %c2_i32 = arith.constant 2 : i32
    %97 = arith.muli %c2_i32, %1 : i32
    %98 = vector.broadcast %97 : i32 to vector<2x8x1xi32>
    %99 = arith.cmpi slt, %96, %98 : vector<2x8x1xi32>
    %cst_125 = arith.constant 0.000000e+00 : f32
    %100 = vector.shape_cast %99 : vector<2x8x1xi1> to vector<2x8x1xi1>
    %101 = vector.broadcast %100 : vector<2x8x1xi1> to vector<2x8x128xi1>
    %102 = vector.broadcast %cst_125 : f32 to vector<2x8x128xf32>
    %103 = arith.select %101, %95, %102 : vector<2x8x128xi1>, vector<2x8x128xf32>
    %104 = vector.shape_cast %103 : vector<2x8x128xf32> to vector<16x128xf32>
    %c0_126 = arith.constant 0 : index
    %c0_127 = arith.constant 0 : index
    %105 = vector.load %arg9[%c0_126, %c0_127] : memref<16x128xf32, #tpu.memory_space<vmem>>, vector<16x128xf32>
    tpu.vector_store %arg9[%c0_126, %c0_127], %104 {strides = array<i32>} : memref<16x128xf32, #tpu.memory_space<vmem>>, vector<16x128xf32>,
    %c0_128 = arith.constant 0 : index
    %c0_129 = arith.constant 0 : index
    %106 = tpu.strided_load %arg9[%c0_128, %c0_129] {strides = array<i32: 2, 1>} : memref<16x128xf32, #tpu.memory_space<vmem>>, vector<8x128xf32>
    %c1_130 = arith.constant 1 : index
    %c0_131 = arith.constant 0 : index
    %107 = tpu.strided_load %arg9[%c1_130, %c0_131] {strides = array<i32: 2, 1>} : memref<16x128xf32, #tpu.memory_space<vmem>>, vector<8x128xf32>
    %108 = arith.maximumf %106, %107 : vector<8x128xf32>
    %c0_132 = arith.constant 0 : index
    %c0_133 = arith.constant 0 : index
    %c0_134 = arith.constant 0 : index
    %109 = vector.load %arg6[%c0_132, %c0_133, %c0_134] : memref<1x8x128xf32, #tpu.memory_space<vmem>>, vector<1x8x128xf32>
    %110 = vector.shape_cast %109 : vector<1x8x128xf32> to vector<8x128xf32>
    %111 = vector.shape_cast %108 : vector<8x128xf32> to vector<1x8x128xf32>
    tpu.vector_store %arg6[%c0_132, %c0_133, %c0_134], %111 {strides = array<i32>} : memref<1x8x128xf32, #tpu.memory_space<vmem>>, vector<1x8x128xf32>,
    return
  }
  func.func @transform_0(%arg0: i32, %arg1: memref<2xi32, #tpu.memory_space<smem>>) -> (i32, i32, i32, i32) {
    %c0_i32 = arith.constant 0 : i32
    %c0_i32_0 = arith.constant 0 : i32
    %c0_i32_1 = arith.constant 0 : i32
    %c0_i32_2 = arith.constant 0 : i32
    return %arg0, %c0_i32, %c0_i32_0, %c0_i32_1 : i32, i32, i32, i32
  }
  func.func @transform_1(%arg0: i32, %arg1: memref<2xi32, #tpu.memory_space<smem>>) -> (i32, i32, i32, i32) {
    %c0_i32 = arith.constant 0 : i32
    %c0_i32_0 = arith.constant 0 : i32
    %c0_i32_1 = arith.constant 0 : i32
    %c0_i32_2 = arith.constant 0 : i32
    %c0_i32_3 = arith.constant 0 : i32
    return %c0_i32, %c0_i32_0, %c0_i32_1, %c0_i32_2 : i32, i32, i32, i32
  }
  func.func @transform_2(%arg0: i32, %arg1: memref<2xi32, #tpu.memory_space<smem>>) -> (i32, i32) {
    %c0_i32 = arith.constant 0 : i32
    %c0_i32_0 = arith.constant 0 : i32
    %c0_i32_1 = arith.constant 0 : i32
    return %c0_i32, %c0_i32_0 : i32, i32
  }
  func.func @transform_3(%arg0: i32, %arg1: memref<2xi32, #tpu.memory_space<smem>>) -> (i32, i32) {
    %c0_i32 = arith.constant 0 : i32
    %c0_i32_0 = arith.constant 0 : i32
    %c0_i32_1 = arith.constant 0 : i32
    return %c0_i32, %c0_i32_0 : i32, i32
  }
  func.func @transform_4(%arg0: i32, %arg1: memref<2xi32, #tpu.memory_space<smem>>) -> (i32, i32, i32) {
    %c0_i32 = arith.constant 0 : i32
    %c0_i32_0 = arith.constant 0 : i32
    %c0_i32_1 = arith.constant 0 : i32
    return %arg0, %c0_i32, %c0_i32_0 : i32, i32, i32
  }
}

</mosaic_0001>

<bundles_post_ra>
// kernel: mask_cnn_forward.4
= control target key start
LH: loop header
LB: loop body
LE: loop exit
PB: predicated region body
PF: predicated region fallthrough
CT: control target
= control target key end

     0   :  { %s2996_s0 = inlined_call_operand.vmem [shape: s32[2], index: 0, kind: input, shape index: {}]   ;;  %s2997_s1 = inlined_call_operand.vmem [shape: f32[2,8,16,1], index: 1, kind: input, shape index: {}]   ;;  %s2998_s2 = inlined_call_operand.vmem [shape: f32[3,3,1,64], index: 2, kind: input, shape index: {}]   ;;  %s2999_s3 = inlined_call_operand.vmem [shape: f32[1,64], index: 3, kind: input, shape index: {}]   ;;  %s3000_s4 = inlined_call_operand.vmem [shape: f32[1,64], index: 4, kind: input, shape index: {}]   ;;  %s3001_s5 = inlined_call_operand.vmem [shape: bf16[2,128,64], index: 5, kind: output, shape index: {}]  }
   0x1   :  { %s10_s20 = sshll.u32 %s2996_s0, 4  ;;  %s11_s20 = int_to_ptr.vmem [resolvable:$true] %s10_s20 }
   0x2   :  { %s2117_s21 = scalar_lea.vmem %s11_s20, 16  ;;  %p2122_p1 = scmp.lt.s32.totalorder %s11_s20, %s11_s20 }
   0x3   :  { %p2118_p0 = scmp.ne.s32.totalorder %s11_s20, %s2117_s21  ;;  %p2123_p2 = scmp.lt.s32.totalorder %s2117_s21, %s2117_s21 }
   0x5   :  { %p2124_p3 = por %p2123_p2, %p2122_p1 }
   0x7   :  { %p2125_p4 = pnand %p2124_p3, %p2118_p0 }
   0x9   :  { %2128 = shalt.err (!%p2125_p4)  }
   0xa   :  { %s2139_s22 = smov [#allocation5]  }
   0xb   :  { %13 = dma.vmem_to_smem %s11_s20, 16, %s2139_s22, [#allocation4] }
   0xc   :  { %2133 = dma.done.wait [#allocation4], 16 }
   0xd   :  { %2134 = vsyncadd [#allocation4], 4294967280 }
   0xe   :  { %15 = sfence }
   0xf   :  { %s2175_s23 = smov 0  }
  0x10 LB: > { %s2181_s0 = sadd.s32 4294967295, %s2137_s23   ;;  %p2044_p5 = scmp.ge.s32.totalorder %s2137_s23, 1  ;;  %s2137_s23 = sphi %s2175_s23, %s21_s23  }
  0x11   : > { %p169_p6 = scmp.lt.s32.totalorder %s2137_s23, 3 }
  0x13   : > { %p170_p7 = pnand %p2044_p5, %p169_p6 }
  0x14   : > { %vm206_vm0 = vcmask (!%p170_p7), 7168   ;;  %p195_p8 = scmp.lt.s32.totalorder (!%p170_p7), %s2181_s0, 1  ;;  %vm209_vm1 = vcmask (!%p170_p7), 1024   ;;  %v2140_v0 = vmov (!%p170_p7), 0   ;;  %v2141_v1 = vmov (!%p170_p7), 0.0   ;;  %s2838_s22 = sld [smem:[#allocation5 + %s2181_s0]] (!%p170_p7) }
  0x15   : > { %173 = sbr.rel (%p170_p7) target bundleno = 478 (0x1de), region = 36  ;;  %2115 = vset.pattern.permute.xlu0 (!%p170_p7), %v2140_v0  ;;  %207 = vst.msk [vmem:[#allocation2] sm:$0xff] (!%p170_p7), %vm206_vm0, %v2141_v1  ;;  %208 = vst.msk [vmem:[#allocation2 + $0x8] sm:$0xff] (!%p170_p7), %vm206_vm0, %v2141_v1  ;;  %2116 = vset.pattern.permute.xlu1 (!%p170_p7), %v2140_v0  ;;  %vm271_vm2 = vcmask (!%p170_p7), 523264   ;;  %vm1968_vm4 = vcmask (!%p170_p7), 519168  }
  0x16   : > { %211 = vst.msk [vmem:[#allocation2 + $0x18] sm:$0xff] (!%p170_p7), %vm206_vm0, %v2141_v1  ;;  %212 = vst.msk [vmem:[#allocation2 + $0x20] sm:$0xff] (!%p170_p7), %vm206_vm0, %v2141_v1 }
  0x17   : > { %214 = vst.msk [vmem:[#allocation2 + $0x30] sm:$0xff] (!%p170_p7), %vm206_vm0, %v2141_v1  ;;  %215 = vst.msk [vmem:[#allocation2 + $0x38] sm:$0xff] (!%p170_p7), %vm206_vm0, %v2141_v1 }
  0x18   : > { %217 = vst.msk [vmem:[#allocation2 + $0x48] sm:$0xff] (!%p170_p7), %vm206_vm0, %v2141_v1  ;;  %218 = vst.msk [vmem:[#allocation2 + $0x50] sm:$0xff] (!%p170_p7), %vm206_vm0, %v2141_v1 }
  0x19   : > { %220 = vst.msk [vmem:[#allocation2 + $0x60] sm:$0xff] (!%p170_p7), %vm206_vm0, %v2141_v1  ;;  %221 = vst.msk [vmem:[#allocation2 + $0x68] sm:$0xff] (!%p170_p7), %vm206_vm0, %v2141_v1 }
  0x1a   : > { %223 = vst.msk [vmem:[#allocation2 + $0x78] sm:$0xff] (!%p170_p7), %vm206_vm0, %v2141_v1  ;;  %224 = vst.msk [vmem:[#allocation2 + $0x80] sm:$0xff] (!%p170_p7), %vm206_vm0, %v2141_v1 }
  0x1b   : > { %226 = vst.msk [vmem:[#allocation2 + $0x90] sm:$0xff] (!%p170_p7), %vm206_vm0, %v2141_v1  ;;  %227 = vst.msk [vmem:[#allocation2 + $0x98] sm:$0xff] (!%p170_p7), %vm206_vm0, %v2141_v1 }
  0x1c   : > { %229 = vst.msk [vmem:[#allocation2 + $0xa8] sm:$0xff] %vm206_vm0, %v2141_v1  ;;  %230 = vst.msk [vmem:[#allocation2 + $0xb0] sm:$0xff] %vm206_vm0, %v2141_v1  ;;  %s2249_s24 = scalar_select %p195_p8, %s2181_s0, 1  ;;  %v288_v8 = vld [vmem:[#allocation2] sm:$0xff]  ;;  %v289_v9 = vld [vmem:[#allocation2 + $0x8] sm:$0xff] }
  0x1d   : > { %232 = vst.msk [vmem:[#allocation2 + $0xc0] sm:$0xff] %vm206_vm0, %v2141_v1  ;;  %233 = vst.msk [vmem:[#allocation2 + $0xc8] sm:$0xff] %vm206_vm0, %v2141_v1  ;;  %323 = vperm.xlu0 %2115, %v288_v8   ;;  %v455_v33 = vld [vmem:[#allocation2 + $0x1] sm:$0xff] }
  0x1e   : > { %235 = vst.msk [vmem:[#allocation2 + $0xd8] sm:$0xff] %vm206_vm0, %v2141_v1  ;;  %236 = vst.msk [vmem:[#allocation2 + $0xe0] sm:$0xff] %vm206_vm0, %v2141_v1  ;;  %s2086_s25 = sshll.u32 %s2249_s24, 7  ;;  %v623_v49 = vld [vmem:[#allocation2 + $0x2] sm:$0xff] }
  0x1f   : > { %213 = vst.msk [vmem:[#allocation2 + $0x28] sm:$0x3] %vm209_vm1, %v2141_v1  ;;  %210 = vst.msk [vmem:[#allocation2 + $0x10] sm:$0x3] %vm209_vm1, %v2141_v1  ;;  %s2255_s28 = scalar_lea.vmem %s2997_s1, %s2086_s25 }
  0x20   : > { %216 = vst.msk [vmem:[#allocation2 + $0x40] sm:$0x3] %vm209_vm1, %v2141_v1  ;;  %219 = vst.msk [vmem:[#allocation2 + $0x58] sm:$0x3] %vm209_vm1, %v2141_v1  ;;  %v238_v2 = vld [vmem:[%s2255_s28] sm:$0xff]  ;;  %v240_v3 = vld [vmem:[%s2255_s28 + $0x10] sm:$0xff] }
  0x21   : > { %222 = vst.msk [vmem:[#allocation2 + $0x70] sm:$0x3] %vm209_vm1, %v2141_v1  ;;  %225 = vst.msk [vmem:[#allocation2 + $0x88] sm:$0x3] %vm209_vm1, %v2141_v1  ;;  %v239_v4 = vld [vmem:[%s2255_s28 + $0x8] sm:$0xff]  ;;  %v242_v5 = vld [vmem:[%s2255_s28 + $0x20] sm:$0xff]  ;;  %328 = vperm.xlu0 %2115, %v289_v9  }
  0x22   : > { %228 = vst.msk [vmem:[#allocation2 + $0xa0] sm:$0x3] %vm209_vm1, %v2141_v1  ;;  %231 = vst.msk [vmem:[#allocation2 + $0xb8] sm:$0x3] %vm209_vm1, %v2141_v1  ;;  %v241_v6 = vld [vmem:[%s2255_s28 + $0x18] sm:$0xff]  ;;  %v244_v7 = vld [vmem:[%s2255_s28 + $0x30] sm:$0xff] }
  0x23   : > { %234 = vst.msk [vmem:[#allocation2 + $0xd0] sm:$0x3] %vm209_vm1, %v2141_v1  ;;  %237 = vst.msk [vmem:[#allocation2 + $0xe8] sm:$0x3] %vm209_vm1, %v2141_v1  ;;  %v243_v10 = vld [vmem:[%s2255_s28 + $0x28] sm:$0xff]  ;;  %v246_v11 = vld [vmem:[%s2255_s28 + $0x40] sm:$0xff] }
  0x24   : > { %255 = vst.msk [vmem:[#allocation2 + $0x19] sm:$0xff] %vm206_vm0, %v238_v2  ;;  %257 = vst.msk [vmem:[#allocation2 + $0x31] sm:$0xff] %vm206_vm0, %v240_v3  ;;  %v245_v12 = vld [vmem:[%s2255_s28 + $0x38] sm:$0xff]  ;;  %v248_v13 = vld [vmem:[%s2255_s28 + $0x50] sm:$0xff] }
  0x25   : > { %256 = vst.msk [vmem:[#allocation2 + $0x21] sm:$0xff] %vm206_vm0, %v239_v4  ;;  %259 = vst.msk [vmem:[#allocation2 + $0x49] sm:$0xff] %vm206_vm0, %v242_v5  ;;  %v247_v14 = vld [vmem:[%s2255_s28 + $0x48] sm:$0xff]  ;;  %v250_v15 = vld [vmem:[%s2255_s28 + $0x60] sm:$0xff] }
  0x26   : > { %258 = vst.msk [vmem:[#allocation2 + $0x39] sm:$0xff] %vm206_vm0, %v241_v6  ;;  %261 = vst.msk [vmem:[#allocation2 + $0x61] sm:$0xff] %vm206_vm0, %v244_v7  ;;  %v249_v16 = vld [vmem:[%s2255_s28 + $0x58] sm:$0xff]  ;;  %v251_v17 = vld [vmem:[%s2255_s28 + $0x68] sm:$0xff] }
  0x27   : > { %272 = vst.msk [vmem:[#allocation3] sm:$0xff] %vm271_vm2, %v2141_v1  ;;  %273 = vst.msk [vmem:[#allocation3 + $0x8] sm:$0xff] %vm271_vm2, %v2141_v1  ;;  %v252_v18 = vld [vmem:[%s2255_s28 + $0x70] sm:$0xff]  ;;  %v253_v19 = vld [vmem:[%s2255_s28 + $0x78] sm:$0xff]  ;;  %s2087_s28 = sshll.u32 %s2249_s24, 6 }
  0x28   : > { %274 = vst.msk [vmem:[#allocation3 + $0x10] sm:$0xff] %vm271_vm2, %v2141_v1  ;;  %275 = vst.msk [vmem:[#allocation3 + $0x18] sm:$0xff] %vm271_vm2, %v2141_v1  ;;  %v456_v36 = vld [vmem:[#allocation2 + $0x9] sm:$0xff]  ;;  %v2466_v3 = vld [vmem:[%s2998_s2] ss:$0 sm:$0xff]  ;;  %s2876_s30 = scalar_lea.vmem %s3001_s5, %s2087_s28 }
  0x29   : > { %276 = vst.msk [vmem:[#allocation3 + $0x20] sm:$0xff] %vm271_vm2, %v2141_v1  ;;  %277 = vst.msk [vmem:[#allocation3 + $0x28] sm:$0xff] %vm271_vm2, %v2141_v1  ;;  %v624_v52 = vld [vmem:[#allocation2 + $0xa] sm:$0xff] }
  0x2a   : > { %278 = vst.msk [vmem:[#allocation3 + $0x30] sm:$0xff] %vm271_vm2, %v2141_v1  ;;  %279 = vst.msk [vmem:[#allocation3 + $0x38] sm:$0xff] %vm271_vm2, %v2141_v1 }
  0x2b   : > { %280 = vst.msk [vmem:[#allocation3 + $0x40] sm:$0xff] %vm271_vm2, %v2141_v1  ;;  %281 = vst.msk [vmem:[#allocation3 + $0x48] sm:$0xff] %vm271_vm2, %v2141_v1  ;;  %v2320_v20 = vld [vmem:[#allocation2 + $0x18] sm:$0xff]  ;;  %v2322_v21 = vld [vmem:[#allocation2 + $0x30] sm:$0xff] }
  0x2c   : > { %282 = vst.msk [vmem:[#allocation3 + $0x50] sm:$0xff] %vm271_vm2, %v2141_v1  ;;  %283 = vst.msk [vmem:[#allocation3 + $0x58] sm:$0xff] %vm271_vm2, %v2141_v1  ;;  %333 = vperm.xlu1 %2116, %v2320_v20   ;;  %v2326_v22 = vld [vmem:[#allocation2 + $0x20] sm:$0xff]  ;;  %343 = vperm.xlu0 %2115, %v2322_v21   ;;  %v2329_v23 = vld [vmem:[#allocation2 + $0x48] sm:$0xff] }
  0x2d   : > { %284 = vst.msk [vmem:[#allocation3 + $0x60] sm:$0xff] %vm271_vm2, %v2141_v1  ;;  %285 = vst.msk [vmem:[#allocation3 + $0x68] sm:$0xff] %vm271_vm2, %v2141_v1  ;;  %v2332_v24 = vld [vmem:[#allocation2 + $0x38] sm:$0xff]  ;;  %v2335_v25 = vld [vmem:[#allocation2 + $0x60] sm:$0xff] }
  0x2e   : > { %286 = vst.msk [vmem:[#allocation3 + $0x70] sm:$0xff] %vm271_vm2, %v2141_v1  ;;  %287 = vst.msk [vmem:[#allocation3 + $0x78] sm:$0xff] %vm271_vm2, %v2141_v1  ;;  %v2362_v35 = vld [vmem:[#allocation2 + $0x19] sm:$0xff]  ;;  %v2366_v37 = vld [vmem:[#allocation2 + $0x31] sm:$0xff] }
  0x2f   : > { %260 = vst.msk [vmem:[#allocation2 + $0x51] sm:$0xff] %vm206_vm0, %v243_v10  ;;  %263 = vst.msk [vmem:[#allocation2 + $0x79] sm:$0xff] %vm206_vm0, %v246_v11  ;;  %v2368_v38 = vld [vmem:[#allocation2 + $0x21] sm:$0xff]  ;;  %v2371_v39 = vld [vmem:[#allocation2 + $0x49] sm:$0xff] }
  0x30   : > { %262 = vst.msk [vmem:[#allocation2 + $0x69] sm:$0xff] %vm206_vm0, %v245_v12  ;;  %265 = vst.msk [vmem:[#allocation2 + $0x91] sm:$0xff] %vm206_vm0, %v248_v13  ;;  %338 = vperm.xlu1 %2116, %v2326_v22   ;;  %353 = vperm.xlu0 %2115, %v2329_v23   ;;  %v2374_v40 = vld [vmem:[#allocation2 + $0x39] sm:$0xff]  ;;  %v2377_v41 = vld [vmem:[#allocation2 + $0x61] sm:$0xff] }
  0x31   : > { %264 = vst.msk [vmem:[#allocation2 + $0x81] sm:$0xff] %vm206_vm0, %v247_v14  ;;  %267 = vst.msk [vmem:[#allocation2 + $0xa9] sm:$0xff] %vm206_vm0, %v250_v15  ;;  %v2404_v51 = vld [vmem:[#allocation2 + $0x1a] sm:$0xff]  ;;  %v2408_v53 = vld [vmem:[#allocation2 + $0x32] sm:$0xff] }
  0x32   : > { %266 = vst.msk [vmem:[#allocation2 + $0x99] sm:$0xff] %vm206_vm0, %v249_v16  ;;  %268 = vst.msk [vmem:[#allocation2 + $0xb1] sm:$0xff] %vm206_vm0, %v251_v17  ;;  %v2410_v54 = vld [vmem:[#allocation2 + $0x22] sm:$0xff]  ;;  %v2416_v56 = vld [vmem:[#allocation2 + $0x3a] sm:$0xff] }
  0x33   : > { %269 = vst.msk [vmem:[#allocation2 + $0xc1] sm:$0xff] %vm206_vm0, %v252_v18  ;;  %270 = vst.msk [vmem:[#allocation2 + $0xc9] sm:$0xff] %vm206_vm0, %v253_v19  ;;  %v304_v4 = vld [vmem:[#allocation3] sm:$0xff]  ;;  %v305_v9 = vld [vmem:[#allocation3 + $0x8] sm:$0xff] }
  0x34   : > { %348 = vperm.xlu1 %2116, %v2332_v24   ;;  %363 = vperm.xlu0 %2115, %v2335_v25   ;;  %v306_v12 = vld [vmem:[#allocation3 + $0x10] sm:$0xff]  ;;  %v308_v16 = vld [vmem:[#allocation3 + $0x20] sm:$0xff] }
  0x36   : > { %v2338_v26 = vld [vmem:[#allocation2 + $0x50] sm:$0xff]  ;;  %v2341_v27 = vld [vmem:[#allocation2 + $0x78] sm:$0xff] }
  0x37   : > { %v2344_v28 = vld [vmem:[#allocation2 + $0x68] sm:$0xff]  ;;  %v2347_v29 = vld [vmem:[#allocation2 + $0x90] sm:$0xff]  ;;  %v2383_v43 = vld [vmem:[#allocation2 + $0x79] sm:$0xff] }
  0x38   : > { %358 = vperm.xlu1 %2116, %v2338_v26   ;;  %373 = vperm.xlu0 %2115, %v2341_v27   ;;  %v2350_v30 = vld [vmem:[#allocation2 + $0x80] sm:$0xff]  ;;  %v2353_v31 = vld [vmem:[#allocation2 + $0xa8] sm:$0xff]  ;;  %v2380_v42 = vld [vmem:[#allocation2 + $0x51] sm:$0xff] }
  0x39   : > { %v2356_v32 = vld [vmem:[#allocation2 + $0x98] sm:$0xff]  ;;  %v2360_v34 = vld [vmem:[#allocation2 + $0xb0] sm:$0xff]  ;;  %v2392_v46 = vld [vmem:[#allocation2 + $0x81] sm:$0xff] }
  0x3a   : > { %v2386_v44 = vld [vmem:[#allocation2 + $0x69] sm:$0xff]  ;;  %v2389_v45 = vld [vmem:[#allocation2 + $0x91] sm:$0xff]  ;;  %v2398_v48 = vld [vmem:[#allocation2 + $0x99] sm:$0xff] }
  0x3b   : > { %v2395_v47 = vld [vmem:[#allocation2 + $0xa9] sm:$0xff]  ;;  %v2402_v50 = vld [vmem:[#allocation2 + $0xb1] sm:$0xff]  ;;  %v2425_v59 = vld [vmem:[#allocation2 + $0x7a] sm:$0xff] }
  0x3c   : > { %368 = vperm.xlu1 %2116, %v2344_v28   ;;  %383 = vperm.xlu0 %2115, %v2347_v29   ;;  %v2413_v55 = vld [vmem:[#allocation2 + $0x4a] sm:$0xff]  ;;  %v2419_v57 = vld [vmem:[#allocation2 + $0x62] sm:$0xff]  ;;  %v2422_v58 = vld [vmem:[#allocation2 + $0x52] sm:$0xff] }
  0x3d   : > { %v2428_v60 = vld [vmem:[#allocation2 + $0x6a] sm:$0xff]  ;;  %v2431_v61 = vld [vmem:[#allocation2 + $0x92] sm:$0xff]  ;;  %v2434_v62 = vld [vmem:[#allocation2 + $0x82] sm:$0xff] }
  0x3e   : > { %v2437_v63 = vld [vmem:[#allocation2 + $0xaa] sm:$0xff]  ;;  %v2440_v0 = vld [vmem:[#allocation2 + $0x9a] sm:$0xff]  ;;  %v2444_v1 = vld [vmem:[#allocation2 + $0xb2] sm:$0xff] }
  0x3f   : > { %v2459_v2 = vld [vmem:[#allocation2 + $0xc0] sm:$0xff]  ;;  %v2469_v6 = vld [vmem:[#allocation2 + $0xc8] sm:$0xff] }
  0x40   : > { %378 = vperm.xlu1 %2116, %v2350_v30   ;;  %393 = vperm.xlu0 %2115, %v2353_v31  }
  0x44   : > { %388 = vperm.xlu1 %2116, %v2356_v32   ;;  %491 = vperm.xlu0 %2115, %v455_v33  }
  0x48   : > { %398 = vperm.xlu1 %2116, %v2360_v34   ;;  %501 = vperm.xlu0 %2115, %v2362_v35  }
  0x4c   : > { %496 = vperm.xlu1 %2116, %v456_v36   ;;  %511 = vperm.xlu0 %2115, %v2366_v37   ;;  %v310_v36 = vld [vmem:[#allocation3 + $0x30] sm:$0xff] }
  0x50   : > { %506 = vperm.xlu1 %2116, %v2368_v38   ;;  %521 = vperm.xlu0 %2115, %v2371_v39  }
  0x54   : > { %516 = vperm.xlu1 %2116, %v2374_v40   ;;  %531 = vperm.xlu0 %2115, %v2377_v41  }
  0x58   : > { %526 = vperm.xlu1 %2116, %v2380_v42   ;;  %541 = vperm.xlu0 %2115, %v2383_v43  }
  0x5c   : > { %536 = vperm.xlu1 %2116, %v2386_v44   ;;  %551 = vperm.xlu0 %2115, %v2389_v45  }
  0x60   : > { %546 = vperm.xlu1 %2116, %v2392_v46   ;;  %561 = vperm.xlu0 %2115, %v2395_v47  }
  0x64   : > { %556 = vperm.xlu1 %2116, %v2398_v48   ;;  %659 = vperm.xlu0 %2115, %v623_v49  }
  0x68   : > { %566 = vperm.xlu1 %2116, %v2402_v50   ;;  %669 = vperm.xlu0 %2115, %v2404_v51  }
  0x6c   : > { %664 = vperm.xlu1 %2116, %v624_v52   ;;  %679 = vperm.xlu0 %2115, %v2408_v53  }
  0x70   : > { %674 = vperm.xlu1 %2116, %v2410_v54   ;;  %689 = vperm.xlu0 %2115, %v2413_v55  }
  0x74   : > { %684 = vperm.xlu1 %2116, %v2416_v56   ;;  %699 = vperm.xlu0 %2115, %v2419_v57  }
  0x78   : > { %694 = vperm.xlu1 %2116, %v2422_v58   ;;  %709 = vperm.xlu0 %2115, %v2425_v59  }
  0x7c   : > { %704 = vperm.xlu1 %2116, %v2428_v60   ;;  %719 = vperm.xlu0 %2115, %v2431_v61  }
  0x80   : > { %714 = vperm.xlu1 %2116, %v2434_v62   ;;  %729 = vperm.xlu0 %2115, %v2437_v63  }
  0x84   : > { %724 = vperm.xlu1 %2116, %v2440_v0   ;;  %827 = vperm.xlu0 %2115, %v2320_v20   ;;  %v307_v20 = vld [vmem:[#allocation3 + $0x18] sm:$0xff] }
  0x88   : > { %734 = vperm.xlu1 %2116, %v2444_v1   ;;  %837 = vperm.xlu0 %2115, %v2322_v21  }
  0x8c   : > { %832 = vperm.xlu1 %2116, %v2326_v22   ;;  %847 = vperm.xlu0 %2115, %v2329_v23  }
  0x90   : > { %842 = vperm.xlu1 %2116, %v2332_v24   ;;  %857 = vperm.xlu0 %2115, %v2335_v25  }
  0x94   : > { %852 = vperm.xlu1 %2116, %v2338_v26   ;;  %867 = vperm.xlu0 %2115, %v2341_v27  }
  0x98   : > { %862 = vperm.xlu1 %2116, %v2344_v28   ;;  %877 = vperm.xlu0 %2115, %v2347_v29  }
  0x9c   : > { %872 = vperm.xlu1 %2116, %v2350_v30   ;;  %887 = vperm.xlu0 %2115, %v2353_v31   ;;  %v324_v5 = vpop.permute.xlu0 %323 }
  0x9d   : > { %v407_v7 = vmul.f32 %v2466_v3, %v324_v5 }
  0x9f   : > { %v423_v8 = vadd.f32 %v407_v7, %v304_v4  ;;  %v309_v4 = vld [vmem:[#allocation3 + $0x28] sm:$0xff] }
  0xa0   : > { %882 = vperm.xlu1 %2116, %v2356_v32   ;;  %897 = vperm.xlu0 %2115, %v2459_v2   ;;  %v329_v10 = vpop.permute.xlu0 %328 }
  0xa1   : > { %439 = vst.msk [vmem:[#allocation3] sm:$0xff] %vm271_vm2, %v423_v8  ;;  %v408_v11 = vmul.f32 %v2466_v3, %v329_v10 }
  0xa3   : > { %v424_v14 = vadd.f32 %v408_v11, %v305_v9  ;;  %v312_v9 = vld [vmem:[#allocation3 + $0x40] sm:$0xff] }
  0xa4   : > { %892 = vperm.xlu1 %2116, %v2360_v34   ;;  %995 = vperm.xlu0 %2115, %v2362_v35  }
  0xa5   : > { %440 = vst.msk [vmem:[#allocation3 + $0x8] sm:$0xff] %vm271_vm2, %v424_v14 }
  0xa8   : > { %902 = vperm.xlu1 %2116, %v2469_v6   ;;  %1005 = vperm.xlu0 %2115, %v2366_v37  }
  0xab   : > { %v334_v13 = vpop.permute.xlu1 %333  ;;  %v344_v17 = vpop.permute.xlu0 %343 }
  0xac   : > { %v409_v15 = vmul.f32 %v2466_v3, %v334_v13  ;;  %1000 = vperm.xlu1 %2116, %v2368_v38   ;;  %v411_v19 = vmul.f32 %v2466_v3, %v344_v17  ;;  %1015 = vperm.xlu0 %2115, %v2371_v39   ;;  %v311_v13 = vld [vmem:[#allocation3 + $0x38] sm:$0xff]  ;;  %v314_v17 = vld [vmem:[#allocation3 + $0x50] sm:$0xff] }
  0xae   : > { %v425_v18 = vadd.f32 %v409_v15, %v306_v12  ;;  %v427_v33 = vadd.f32 %v411_v19, %v308_v16 }
  0xaf   : > { %v339_v22 = vpop.permute.xlu1 %338  ;;  %v354_v38 = vpop.permute.xlu0 %353 }
  0xb0   : > { %441 = vst.msk [vmem:[#allocation3 + $0x10] sm:$0xff] %vm271_vm2, %v425_v18  ;;  %v410_v35 = vmul.f32 %v2466_v3, %v339_v22  ;;  %1010 = vperm.xlu1 %2116, %v2374_v40   ;;  %443 = vst.msk [vmem:[#allocation3 + $0x20] sm:$0xff] %vm271_vm2, %v427_v33  ;;  %v413_v52 = vmul.f32 %v2466_v3, %v354_v38  ;;  %1025 = vperm.xlu0 %2115, %v2377_v41   ;;  %v313_v22 = vld [vmem:[#allocation3 + $0x48] sm:$0xff]  ;;  %v316_v38 = vld [vmem:[#allocation3 + $0x60] sm:$0xff] }
  0xb2   : > { %v426_v49 = vadd.f32 %v410_v35, %v307_v20  ;;  %v429_v7 = vadd.f32 %v413_v52, %v310_v36 }
  0xb3   : > { %v349_v5 = vpop.permute.xlu1 %348  ;;  %v364_v10 = vpop.permute.xlu0 %363 }
  0xb4   : > { %442 = vst.msk [vmem:[#allocation3 + $0x18] sm:$0xff] %vm271_vm2, %v426_v49  ;;  %v412_v8 = vmul.f32 %v2466_v3, %v349_v5  ;;  %1020 = vperm.xlu1 %2116, %v2380_v42   ;;  %445 = vst.msk [vmem:[#allocation3 + $0x30] sm:$0xff] %vm271_vm2, %v429_v7  ;;  %v415_v12 = vmul.f32 %v2466_v3, %v364_v10  ;;  %1035 = vperm.xlu0 %2115, %v2383_v43   ;;  %v315_v5 = vld [vmem:[#allocation3 + $0x58] sm:$0xff] }
  0xb6   : > { %v428_v11 = vadd.f32 %v412_v8, %v309_v4  ;;  %v431_v15 = vadd.f32 %v415_v12, %v312_v9  ;;  %v2506_v8 = vld [vmem:[#allocation2 + $0xc1] sm:$0xff] }
  0xb7   : > { %v359_v14 = vpop.permute.xlu1 %358  ;;  %v374_v18 = vpop.permute.xlu0 %373 }
  0xb8   : > { %444 = vst.msk [vmem:[#allocation3 + $0x28] sm:$0xff] %vm271_vm2, %v428_v11  ;;  %v414_v16 = vmul.f32 %v2466_v3, %v359_v14  ;;  %1030 = vperm.xlu1 %2116, %v2386_v44   ;;  %447 = vst.msk [vmem:[#allocation3 + $0x40] sm:$0xff] %vm271_vm2, %v431_v15  ;;  %v417_v20 = vmul.f32 %v2466_v3, %v374_v18  ;;  %1045 = vperm.xlu0 %2115, %v2389_v45   ;;  %v318_v11 = vld [vmem:[#allocation3 + $0x70] sm:$0xff]  ;;  %v317_v15 = vld [vmem:[#allocation3 + $0x68] sm:$0xff] }
  0xba   : > { %v430_v19 = vadd.f32 %v414_v16, %v311_v13  ;;  %v433_v35 = vadd.f32 %v417_v20, %v314_v17  ;;  %v2517_v17 = vld [vmem:[%s2998_s2 + $0x1] ss:$0 sm:$0xff] }
  0xbb   : > { %v369_v33 = vpop.permute.xlu1 %368  ;;  %v384_v49 = vpop.permute.xlu0 %383 }
  0xbc   : > { %446 = vst.msk [vmem:[#allocation3 + $0x38] sm:$0xff] %vm271_vm2, %v430_v19  ;;  %v416_v36 = vmul.f32 %v2466_v3, %v369_v33  ;;  %1040 = vperm.xlu1 %2116, %v2392_v46   ;;  %449 = vst.msk [vmem:[#allocation3 + $0x50] sm:$0xff] %vm271_vm2, %v433_v35  ;;  %v419_v4 = vmul.f32 %v2466_v3, %v384_v49  ;;  %1055 = vperm.xlu0 %2115, %v2395_v47  }
  0xbe   : > { %v432_v52 = vadd.f32 %v416_v36, %v313_v22  ;;  %v435_v9 = vadd.f32 %v419_v4, %v316_v38  ;;  %v2522_v22 = vld [vmem:[#allocation2 + $0xc9] sm:$0xff] }
  0xbf   : > { %v379_v7 = vpop.permute.xlu1 %378  ;;  %v394_v12 = vpop.permute.xlu0 %393  ;;  %v471_v36 = vld [vmem:[#allocation3] sm:$0xff]  ;;  %v319_v38 = vld [vmem:[#allocation3 + $0x78] sm:$0xff] }
  0xc0   : > { %448 = vst.msk [vmem:[#allocation3 + $0x48] sm:$0xff] %vm271_vm2, %v432_v52  ;;  %v418_v10 = vmul.f32 %v2466_v3, %v379_v7  ;;  %1050 = vperm.xlu1 %2116, %v2398_v48   ;;  %451 = vst.msk [vmem:[#allocation3 + $0x60] sm:$0xff] %vm271_vm2, %v435_v9  ;;  %v421_v14 = vmul.f32 %v2466_v3, %v394_v12  ;;  %1065 = vperm.xlu0 %2115, %v2506_v8   ;;  %v473_v9 = vld [vmem:[#allocation3 + $0x10] sm:$0xff] }
  0xc2   : > { %v434_v13 = vadd.f32 %v418_v10, %v315_v5  ;;  %v437_v18 = vadd.f32 %v421_v14, %v318_v11 }
  0xc3   : > { %v389_v16 = vpop.permute.xlu1 %388  ;;  %v492_v20 = vpop.permute.xlu0 %491 }
  0xc4   : > { %450 = vst.msk [vmem:[#allocation3 + $0x58] sm:$0xff] %vm271_vm2, %v434_v13  ;;  %v420_v19 = vmul.f32 %v2466_v3, %v389_v16  ;;  %1060 = vperm.xlu1 %2116, %v2402_v50   ;;  %453 = vst.msk [vmem:[#allocation3 + $0x70] sm:$0xff] %vm271_vm2, %v437_v18  ;;  %v575_v35 = vmul.f32 %v2517_v17, %v492_v20  ;;  %1163 = vperm.xlu0 %2115, %v2404_v51  }
  0xc6   : > { %v436_v33 = vadd.f32 %v420_v19, %v317_v15  ;;  %v591_v52 = vadd.f32 %v575_v35, %v471_v36  ;;  %v475_v15 = vld [vmem:[#allocation3 + $0x20] sm:$0xff]  ;;  %v474_v19 = vld [vmem:[#allocation3 + $0x18] sm:$0xff]  ;;  %v477_v35 = vld [vmem:[#allocation3 + $0x30] sm:$0xff] }
  0xc7   : > { %v399_v49 = vpop.permute.xlu1 %398  ;;  %v502_v50 = vpop.permute.xlu0 %501 }
  0xc8   : > { %452 = vst.msk [vmem:[#allocation3 + $0x68] sm:$0xff] %vm271_vm2, %v436_v33  ;;  %v422_v4 = vmul.f32 %v2466_v3, %v399_v49  ;;  %1070 = vperm.xlu1 %2116, %v2522_v22   ;;  %607 = vst.msk [vmem:[#allocation3] sm:$0xff] %vm271_vm2, %v591_v52  ;;  %v577_v7 = vmul.f32 %v2517_v17, %v502_v50  ;;  %1173 = vperm.xlu0 %2115, %v2408_v53   ;;  %v472_v3 = vld [vmem:[#allocation3 + $0x8] sm:$0xff]  ;;  %v479_v50 = vld [vmem:[#allocation3 + $0x40] sm:$0xff] }
  0xc9   : > { %v476_v49 = vld [vmem:[#allocation3 + $0x28] sm:$0xff] }
  0xca   : > { %v438_v5 = vadd.f32 %v422_v4, %v319_v38  ;;  %v593_v10 = vadd.f32 %v577_v7, %v473_v9  ;;  %v478_v9 = vld [vmem:[#allocation3 + $0x38] sm:$0xff] }
  0xcb   : > { %v497_v51 = vpop.permute.xlu1 %496  ;;  %v512_v12 = vpop.permute.xlu0 %511 }
  0xcc   : > { %454 = vst.msk [vmem:[#allocation3 + $0x78] sm:$0xff] %vm271_vm2, %v438_v5  ;;  %v576_v11 = vmul.f32 %v2517_v17, %v497_v51  ;;  %1168 = vperm.xlu1 %2116, %v2410_v54   ;;  %609 = vst.msk [vmem:[#allocation3 + $0x10] sm:$0xff] %vm271_vm2, %v593_v10  ;;  %v579_v14 = vmul.f32 %v2517_v17, %v512_v12  ;;  %1183 = vperm.xlu0 %2115, %v2413_v55  }
  0xce   : > { %v592_v13 = vadd.f32 %v576_v11, %v472_v3  ;;  %v595_v16 = vadd.f32 %v579_v14, %v475_v15  ;;  %v481_v11 = vld [vmem:[#allocation3 + $0x50] sm:$0xff] }
  0xcf   : > { %v507_v53 = vpop.permute.xlu1 %506  ;;  %v522_v54 = vpop.permute.xlu0 %521 }
  0xd0   : > { %608 = vst.msk [vmem:[#allocation3 + $0x8] sm:$0xff] %vm271_vm2, %v592_v13  ;;  %v578_v18 = vmul.f32 %v2517_v17, %v507_v53  ;;  %1178 = vperm.xlu1 %2116, %v2416_v56   ;;  %611 = vst.msk [vmem:[#allocation3 + $0x20] sm:$0xff] %vm271_vm2, %v595_v16  ;;  %v581_v33 = vmul.f32 %v2517_v17, %v522_v54  ;;  %1193 = vperm.xlu0 %2115, %v2419_v57   ;;  %v480_v13 = vld [vmem:[#allocation3 + $0x48] sm:$0xff]  ;;  %v483_v53 = vld [vmem:[#allocation3 + $0x60] sm:$0xff] }
  0xd1   : > { %v2563_v16 = vld [vmem:[#allocation2 + $0xc2] sm:$0xff] }
  0xd2   : > { %v594_v20 = vadd.f32 %v578_v18, %v474_v19  ;;  %v597_v36 = vadd.f32 %v581_v33, %v477_v35 }
  0xd3   : > { %v517_v55 = vpop.permute.xlu1 %516  ;;  %v532_v56 = vpop.permute.xlu0 %531 }
  0xd4   : > { %610 = vst.msk [vmem:[#allocation3 + $0x18] sm:$0xff] %vm271_vm2, %v594_v20  ;;  %v580_v38 = vmul.f32 %v2517_v17, %v517_v55  ;;  %1188 = vperm.xlu1 %2116, %v2422_v58   ;;  %613 = vst.msk [vmem:[#allocation3 + $0x30] sm:$0xff] %vm271_vm2, %v597_v36  ;;  %v583_v4 = vmul.f32 %v2517_v17, %v532_v56  ;;  %1203 = vperm.xlu0 %2115, %v2425_v59   ;;  %v2574_v55 = vld [vmem:[%s2998_s2 + $0x2] ss:$0 sm:$0xff]  ;;  %v2579_v56 = vld [vmem:[#allocation2 + $0xca] sm:$0xff] }
  0xd6   : > { %v596_v52 = vadd.f32 %v580_v38, %v476_v49  ;;  %v599_v5 = vadd.f32 %v583_v4, %v479_v50  ;;  %v484_v38 = vld [vmem:[#allocation3 + $0x68] sm:$0xff]  ;;  %v639_v50 = vld [vmem:[#allocation3] sm:$0xff] }
  0xd7   : > { %v527_v57 = vpop.permute.xlu1 %526  ;;  %v542_v58 = vpop.permute.xlu0 %541 }
  0xd8   : > { %612 = vst.msk [vmem:[#allocation3 + $0x28] sm:$0xff] %vm271_vm2, %v596_v52  ;;  %v582_v7 = vmul.f32 %v2517_v17, %v527_v57  ;;  %1198 = vperm.xlu1 %2116, %v2428_v60   ;;  %615 = vst.msk [vmem:[#allocation3 + $0x40] sm:$0xff] %vm271_vm2, %v599_v5  ;;  %v585_v10 = vmul.f32 %v2517_v17, %v542_v58  ;;  %1213 = vperm.xlu0 %2115, %v2431_v61  }
  0xda   : > { %v598_v51 = vadd.f32 %v582_v7, %v478_v9  ;;  %v601_v3 = vadd.f32 %v585_v10, %v481_v11  ;;  %v641_v10 = vld [vmem:[#allocation3 + $0x10] sm:$0xff] }
  0xdb   : > { %v537_v59 = vpop.permute.xlu1 %536  ;;  %v552_v60 = vpop.permute.xlu0 %551 }
  0xdc   : > { %614 = vst.msk [vmem:[#allocation3 + $0x38] sm:$0xff] %vm271_vm2, %v598_v51  ;;  %v584_v12 = vmul.f32 %v2517_v17, %v537_v59  ;;  %1208 = vperm.xlu1 %2116, %v2434_v62   ;;  %617 = vst.msk [vmem:[#allocation3 + $0x50] sm:$0xff] %vm271_vm2, %v601_v3  ;;  %v587_v15 = vmul.f32 %v2517_v17, %v552_v60  ;;  %1223 = vperm.xlu0 %2115, %v2437_v63   ;;  %v482_v62 = vld [vmem:[#allocation3 + $0x58] sm:$0xff]  ;;  %v485_v63 = vld [vmem:[#allocation3 + $0x70] sm:$0xff] }
  0xdd   : > { %v643_v60 = vld [vmem:[#allocation3 + $0x20] sm:$0xff] }
  0xde   : > { %v600_v14 = vadd.f32 %v584_v12, %v480_v13  ;;  %v603_v18 = vadd.f32 %v587_v15, %v483_v53  ;;  %v642_v53 = vld [vmem:[#allocation3 + $0x18] sm:$0xff] }
  0xdf   : > { %v547_v61 = vpop.permute.xlu1 %546  ;;  %v562_v54 = vpop.permute.xlu0 %561 }
  0xe0   : > { %616 = vst.msk [vmem:[#allocation3 + $0x48] sm:$0xff] %vm271_vm2, %v600_v14  ;;  %v586_v19 = vmul.f32 %v2517_v17, %v547_v61  ;;  %1218 = vperm.xlu1 %2116, %v2440_v0   ;;  %619 = vst.msk [vmem:[#allocation3 + $0x60] sm:$0xff] %vm271_vm2, %v603_v18  ;;  %v589_v33 = vmul.f32 %v2517_v17, %v562_v54  ;;  %1233 = vperm.xlu0 %2115, %v2563_v16  }
  0xe2   : > { %v602_v20 = vadd.f32 %v586_v19, %v482_v62  ;;  %v605_v36 = vadd.f32 %v589_v33, %v485_v63  ;;  %v645_v19 = vld [vmem:[#allocation3 + $0x30] sm:$0xff] }
  0xe3   : > { %v557_v35 = vpop.permute.xlu1 %556  ;;  %v660_v49 = vpop.permute.xlu0 %659 }
  0xe4   : > { %618 = vst.msk [vmem:[#allocation3 + $0x58] sm:$0xff] %vm271_vm2, %v602_v20  ;;  %v588_v0 = vmul.f32 %v2517_v17, %v557_v35  ;;  %1228 = vperm.xlu1 %2116, %v2444_v1   ;;  %621 = vst.msk [vmem:[#allocation3 + $0x70] sm:$0xff] %vm271_vm2, %v605_v36  ;;  %v743_v4 = vmul.f32 %v2574_v55, %v660_v49  ;;  %1332 = vperm.xlu0 %2115, %v2322_v21   ;;  %v486_v1 = vld [vmem:[#allocation3 + $0x78] sm:$0xff]  ;;  %v644_v20 = vld [vmem:[#allocation3 + $0x28] sm:$0xff] }
  0xe5   : > { %v647_v35 = vld [vmem:[#allocation3 + $0x40] sm:$0xff] }
  0xe6   : > { %v604_v52 = vadd.f32 %v588_v0, %v484_v38  ;;  %v759_v5 = vadd.f32 %v743_v4, %v639_v50  ;;  %v646_v38 = vld [vmem:[#allocation3 + $0x38] sm:$0xff]  ;;  %v649_v4 = vld [vmem:[#allocation3 + $0x50] sm:$0xff] }
  0xe7   : > { %v567_v57 = vpop.permute.xlu1 %566  ;;  %v670_v9 = vpop.permute.xlu0 %669 }
  0xe8   : > { %620 = vst.msk [vmem:[#allocation3 + $0x68] sm:$0xff] %vm271_vm2, %v604_v52  ;;  %v590_v7 = vmul.f32 %v2517_v17, %v567_v57  ;;  %1238 = vperm.xlu1 %2116, %v2579_v56   ;;  %775 = vst.msk [vmem:[#allocation3] sm:$0xff] %vm271_vm2, %v759_v5  ;;  %v745_v51 = vmul.f32 %v2574_v55, %v670_v9  ;;  %1342 = vperm.xlu0 %2115, %v2329_v23   ;;  %v640_v17 = vld [vmem:[#allocation3 + $0x8] sm:$0xff]  ;;  %v651_v9 = vld [vmem:[#allocation3 + $0x60] sm:$0xff] }
  0xe9   : > { %v648_v5 = vld [vmem:[#allocation3 + $0x48] sm:$0xff] }
  0xea   : > { %v606_v58 = vadd.f32 %v590_v7, %v486_v1  ;;  %v761_v11 = vadd.f32 %v745_v51, %v641_v10 }
  0xeb   : > { %v665_v21 = vpop.permute.xlu1 %664  ;;  %v680_v3 = vpop.permute.xlu0 %679 }
  0xec   : > { %622 = vst.msk [vmem:[#allocation3 + $0x78] sm:$0xff] %vm271_vm2, %v606_v58  ;;  %v744_v59 = vmul.f32 %v2574_v55, %v665_v21  ;;  %1337 = vperm.xlu1 %2116, %v2332_v24   ;;  %777 = vst.msk [vmem:[#allocation3 + $0x10] sm:$0xff] %vm271_vm2, %v761_v11  ;;  %v747_v13 = vmul.f32 %v2574_v55, %v680_v3  ;;  %1352 = vperm.xlu0 %2115, %v2335_v25   ;;  %v1310_v58 = vld [vmem:[#allocation2 + $0xd8] sm:$0xff]  ;;  %v2628_v3 = vld [vmem:[%s2998_s2 + $0x3] ss:$0 sm:$0xff] }
  0xee   : > { %v760_v12 = vadd.f32 %v744_v59, %v640_v17  ;;  %v763_v14 = vadd.f32 %v747_v13, %v643_v60  ;;  %v653_v17 = vld [vmem:[#allocation3 + $0x70] sm:$0xff] }
  0xef   : > { %v675_v23 = vpop.permute.xlu1 %674  ;;  %v690_v24 = vpop.permute.xlu0 %689  ;;  %v652_v13 = vld [vmem:[#allocation3 + $0x68] sm:$0xff] }
  0xf0   : > { %776 = vst.msk [vmem:[#allocation3 + $0x8] sm:$0xff] %vm271_vm2, %v760_v12  ;;  %v746_v15 = vmul.f32 %v2574_v55, %v675_v23  ;;  %1347 = vperm.xlu1 %2116, %v2338_v26   ;;  %779 = vst.msk [vmem:[#allocation3 + $0x20] sm:$0xff] %vm271_vm2, %v763_v14  ;;  %v749_v18 = vmul.f32 %v2574_v55, %v690_v24  ;;  %1362 = vperm.xlu0 %2115, %v2341_v27   ;;  %v1311_v23 = vld [vmem:[#allocation2 + $0xe0] sm:$0xff] }
  0xf2   : > { %v762_v61 = vadd.f32 %v746_v15, %v642_v53  ;;  %v765_v62 = vadd.f32 %v749_v18, %v645_v19  ;;  %v807_v53 = vld [vmem:[#allocation3] sm:$0xff] }
  0xf3   : > { %v685_v25 = vpop.permute.xlu1 %684  ;;  %v700_v26 = vpop.permute.xlu0 %699  ;;  %v654_v19 = vld [vmem:[#allocation3 + $0x78] sm:$0xff] }
  0xf4   : > { %778 = vst.msk [vmem:[#allocation3 + $0x18] sm:$0xff] %vm271_vm2, %v762_v61  ;;  %v748_v54 = vmul.f32 %v2574_v55, %v685_v25  ;;  %1357 = vperm.xlu1 %2116, %v2344_v28   ;;  %781 = vst.msk [vmem:[#allocation3 + $0x30] sm:$0xff] %vm271_vm2, %v765_v62  ;;  %v751_v63 = vmul.f32 %v2574_v55, %v700_v26  ;;  %1372 = vperm.xlu0 %2115, %v2347_v29  }
  0xf6   : > { %v764_v33 = vadd.f32 %v748_v54, %v644_v20  ;;  %v767_v36 = vadd.f32 %v751_v63, %v647_v35  ;;  %v809_v54 = vld [vmem:[#allocation3 + $0x10] sm:$0xff] }
  0xf7   : > { %v695_v27 = vpop.permute.xlu1 %694  ;;  %v710_v28 = vpop.permute.xlu0 %709 }
  0xf8   : > { %780 = vst.msk [vmem:[#allocation3 + $0x28] sm:$0xff] %vm271_vm2, %v764_v33  ;;  %v750_v0 = vmul.f32 %v2574_v55, %v695_v27  ;;  %1367 = vperm.xlu1 %2116, %v2350_v30   ;;  %783 = vst.msk [vmem:[#allocation3 + $0x40] sm:$0xff] %vm271_vm2, %v767_v36  ;;  %v753_v52 = vmul.f32 %v2574_v55, %v710_v28  ;;  %1382 = vperm.xlu0 %2115, %v2353_v31   ;;  %v811_v27 = vld [vmem:[#allocation3 + $0x20] sm:$0xff] }
  0xfa   : > { %v766_v49 = vadd.f32 %v750_v0, %v646_v38  ;;  %v769_v50 = vadd.f32 %v753_v52, %v649_v4 }
  0xfb   : > { %v705_v29 = vpop.permute.xlu1 %704  ;;  %v720_v30 = vpop.permute.xlu0 %719  ;;  %v810_v38 = vld [vmem:[#allocation3 + $0x18] sm:$0xff]  ;;  %v813_v52 = vld [vmem:[#allocation3 + $0x30] sm:$0xff] }
  0xfc   : > { %782 = vst.msk [vmem:[#allocation3 + $0x38] sm:$0xff] %vm271_vm2, %v766_v49  ;;  %v752_v57 = vmul.f32 %v2574_v55, %v705_v29  ;;  %1377 = vperm.xlu1 %2116, %v2356_v32   ;;  %785 = vst.msk [vmem:[#allocation3 + $0x50] sm:$0xff] %vm271_vm2, %v769_v50  ;;  %v755_v1 = vmul.f32 %v2574_v55, %v720_v30  ;;  %1392 = vperm.xlu0 %2115, %v2459_v2   ;;  %v650_v32 = vld [vmem:[#allocation3 + $0x58] sm:$0xff] }
  0xfe   : > { %v768_v7 = vadd.f32 %v752_v57, %v648_v5  ;;  %v771_v51 = vadd.f32 %v755_v1, %v651_v9 }
  0xff   : > { %v715_v31 = vpop.permute.xlu1 %714  ;;  %v730_v21 = vpop.permute.xlu0 %729  ;;  %v812_v50 = vld [vmem:[#allocation3 + $0x28] sm:$0xff]  ;;  %v815_v30 = vld [vmem:[#allocation3 + $0x40] sm:$0xff] }
 0x100   : > { %784 = vst.msk [vmem:[#allocation3 + $0x48] sm:$0xff] %vm271_vm2, %v768_v7  ;;  %v754_v10 = vmul.f32 %v2574_v55, %v715_v31  ;;  %1387 = vperm.xlu1 %2116, %v2360_v34   ;;  %787 = vst.msk [vmem:[#allocation3 + $0x60] sm:$0xff] %vm271_vm2, %v771_v51  ;;  %v757_v59 = vmul.f32 %v2574_v55, %v730_v21  ;;  %1402 = vperm.xlu0 %2115, %v1310_v58  }
 0x102   : > { %v770_v11 = vadd.f32 %v754_v10, %v650_v32  ;;  %v773_v12 = vadd.f32 %v757_v59, %v653_v17 }
 0x103   : > { %v725_v2 = vpop.permute.xlu1 %724  ;;  %v828_v60 = vpop.permute.xlu0 %827  ;;  %v814_v9 = vld [vmem:[#allocation3 + $0x38] sm:$0xff]  ;;  %v817_v51 = vld [vmem:[#allocation3 + $0x50] sm:$0xff] }
 0x104   : > { %786 = vst.msk [vmem:[#allocation3 + $0x58] sm:$0xff] %vm271_vm2, %v770_v11  ;;  %v756_v34 = vmul.f32 %v2574_v55, %v725_v2  ;;  %1397 = vperm.xlu1 %2116, %v2469_v6   ;;  %789 = vst.msk [vmem:[#allocation3 + $0x70] sm:$0xff] %vm271_vm2, %v773_v12  ;;  %v911_v15 = vmul.f32 %v2628_v3, %v828_v60  ;;  %1500 = vperm.xlu0 %2115, %v2366_v37   ;;  %v1475_v11 = vld [vmem:[#allocation2 + $0xb1] sm:$0xff]  ;;  %v1478_v12 = vld [vmem:[#allocation2 + $0xd9] sm:$0xff] }
 0x106   : > { %v772_v14 = vadd.f32 %v756_v34, %v652_v13  ;;  %v927_v61 = vadd.f32 %v911_v15, %v807_v53 }
 0x107   : > { %v735_v24 = vpop.permute.xlu1 %734  ;;  %v838_v6 = vpop.permute.xlu0 %837  ;;  %v816_v21 = vld [vmem:[#allocation3 + $0x48] sm:$0xff] }
 0x108   : > { %788 = vst.msk [vmem:[#allocation3 + $0x68] sm:$0xff] %vm271_vm2, %v772_v14  ;;  %v758_v18 = vmul.f32 %v2574_v55, %v735_v24  ;;  %1407 = vperm.xlu1 %2116, %v1311_v23   ;;  %943 = vst.msk [vmem:[#allocation3] sm:$0xff] %vm271_vm2, %v927_v61  ;;  %v913_v62 = vmul.f32 %v2628_v3, %v838_v6  ;;  %1510 = vperm.xlu0 %2115, %v2371_v39   ;;  %v808_v55 = vld [vmem:[#allocation3 + $0x8] sm:$0xff] }
 0x109   : > { %v1632_v24 = vld [vmem:[#allocation2 + $0x32] sm:$0xff] }
 0x10a   : > { %v774_v25 = vadd.f32 %v758_v18, %v654_v19  ;;  %v929_v37 = vadd.f32 %v913_v62, %v809_v54 }
 0x10b   : > { %v833_v20 = vpop.permute.xlu1 %832  ;;  %v848_v33 = vpop.permute.xlu0 %847  ;;  %v821_v15 = vld [vmem:[#allocation3 + $0x70] sm:$0xff] }
 0x10c   : > { %790 = vst.msk [vmem:[#allocation3 + $0x78] sm:$0xff] %vm271_vm2, %v774_v25  ;;  %v912_v26 = vmul.f32 %v2628_v3, %v833_v20  ;;  %1505 = vperm.xlu1 %2116, %v2374_v40   ;;  %945 = vst.msk [vmem:[#allocation3 + $0x10] sm:$0xff] %vm271_vm2, %v929_v37  ;;  %v915_v35 = vmul.f32 %v2628_v3, %v848_v33  ;;  %1520 = vperm.xlu0 %2115, %v2377_v41   ;;  %v1479_v25 = vld [vmem:[#allocation2 + $0xe1] sm:$0xff] }
 0x10e   : > { %v928_v63 = vadd.f32 %v912_v26, %v808_v55  ;;  %v931_v36 = vadd.f32 %v915_v35, %v811_v27  ;;  %v1634_v26 = vld [vmem:[#allocation2 + $0x4a] sm:$0xff]  ;;  %v1633_v35 = vld [vmem:[#allocation2 + $0x3a] sm:$0xff] }
 0x10f   : > { %v843_v39 = vpop.permute.xlu1 %842  ;;  %v858_v40 = vpop.permute.xlu0 %857  ;;  %v820_v19 = vld [vmem:[#allocation3 + $0x68] sm:$0xff]  ;;  %v975_v20 = vld [vmem:[#allocation3] sm:$0xff] }
 0x110   : > { %944 = vst.msk [vmem:[#allocation3 + $0x8] sm:$0xff] %vm271_vm2, %v928_v63  ;;  %v914_v0 = vmul.f32 %v2628_v3, %v843_v39  ;;  %1515 = vperm.xlu1 %2116, %v2380_v42   ;;  %947 = vst.msk [vmem:[#allocation3 + $0x20] sm:$0xff] %vm271_vm2, %v931_v36  ;;  %v917_v49 = vmul.f32 %v2628_v3, %v858_v40  ;;  %1530 = vperm.xlu0 %2115, %v2383_v43  }
 0x112   : > { %v930_v28 = vadd.f32 %v914_v0, %v810_v38  ;;  %v933_v4 = vadd.f32 %v917_v49, %v813_v52  ;;  %v1636_v38 = vld [vmem:[#allocation2 + $0x62] sm:$0xff]  ;;  %v1635_v52 = vld [vmem:[#allocation2 + $0x52] sm:$0xff] }
 0x113   : > { %v853_v41 = vpop.permute.xlu1 %852  ;;  %v868_v42 = vpop.permute.xlu0 %867  ;;  %v822_v63 = vld [vmem:[#allocation3 + $0x78] sm:$0xff]  ;;  %v977_v36 = vld [vmem:[#allocation3 + $0x10] sm:$0xff] }
 0x114   : > { %946 = vst.msk [vmem:[#allocation3 + $0x18] sm:$0xff] %vm271_vm2, %v930_v28  ;;  %v916_v29 = vmul.f32 %v2628_v3, %v853_v41  ;;  %1525 = vperm.xlu1 %2116, %v2386_v44   ;;  %949 = vst.msk [vmem:[#allocation3 + $0x30] sm:$0xff] %vm271_vm2, %v933_v4  ;;  %v919_v5 = vmul.f32 %v2628_v3, %v868_v42  ;;  %1540 = vperm.xlu0 %2115, %v2389_v45   ;;  %v1638_v42 = vld [vmem:[#allocation2 + $0x7a] sm:$0xff] }
 0x116   : > { %v932_v57 = vadd.f32 %v916_v29, %v812_v50  ;;  %v935_v7 = vadd.f32 %v919_v5, %v815_v30 }
 0x117   : > { %v863_v43 = vpop.permute.xlu1 %862  ;;  %v878_v44 = vpop.permute.xlu0 %877  ;;  %v979_v29 = vld [vmem:[#allocation3 + $0x20] sm:$0xff] }
 0x118   : > { %948 = vst.msk [vmem:[#allocation3 + $0x28] sm:$0xff] %vm271_vm2, %v932_v57  ;;  %v918_v1 = vmul.f32 %v2628_v3, %v863_v43  ;;  %1535 = vperm.xlu1 %2116, %v2392_v46   ;;  %951 = vst.msk [vmem:[#allocation3 + $0x40] sm:$0xff] %vm271_vm2, %v935_v7  ;;  %v921_v58 = vmul.f32 %v2628_v3, %v878_v44  ;;  %1550 = vperm.xlu0 %2115, %v2395_v47   ;;  %v819_v47 = vld [vmem:[#allocation3 + $0x60] sm:$0xff] }
 0x119   : > { %v1637_v7 = vld [vmem:[#allocation2 + $0x6a] sm:$0xff] }
 0x11a   : > { %v934_v31 = vadd.f32 %v918_v1, %v814_v9  ;;  %v937_v10 = vadd.f32 %v921_v58, %v817_v51  ;;  %v1640_v58 = vld [vmem:[#allocation2 + $0x92] sm:$0xff] }
 0x11b   : > { %v873_v45 = vpop.permute.xlu1 %872  ;;  %v888_v46 = vpop.permute.xlu0 %887  ;;  %v978_v30 = vld [vmem:[#allocation3 + $0x18] sm:$0xff]  ;;  %v981_v44 = vld [vmem:[#allocation3 + $0x30] sm:$0xff] }
 0x11c   : > { %950 = vst.msk [vmem:[#allocation3 + $0x38] sm:$0xff] %vm271_vm2, %v934_v31  ;;  %v920_v32 = vmul.f32 %v2628_v3, %v873_v45  ;;  %1545 = vperm.xlu1 %2116, %v2398_v48   ;;  %953 = vst.msk [vmem:[#allocation3 + $0x50] sm:$0xff] %vm271_vm2, %v937_v10  ;;  %v923_v17 = vmul.f32 %v2628_v3, %v888_v46  ;;  %1560 = vperm.xlu0 %2115, %v2506_v8   ;;  %v818_v48 = vld [vmem:[#allocation3 + $0x58] sm:$0xff]  ;;  %v2678_v8 = vld [vmem:[%s2998_s2 + $0x4] ss:$0 sm:$0xff] }
 0x11e   : > { %v936_v59 = vadd.f32 %v920_v32, %v816_v21  ;;  %v939_v34 = vadd.f32 %v923_v17, %v819_v47  ;;  %v1639_v21 = vld [vmem:[#allocation2 + $0x82] sm:$0xff]  ;;  %v1642_v47 = vld [vmem:[#allocation2 + $0xaa] sm:$0xff] }
 0x11f   : > { %v883_v2 = vpop.permute.xlu1 %882  ;;  %v898_v60 = vpop.permute.xlu0 %897  ;;  %v980_v10 = vld [vmem:[#allocation3 + $0x28] sm:$0xff] }
 0x120   : > { %952 = vst.msk [vmem:[#allocation3 + $0x48] sm:$0xff] %vm271_vm2, %v936_v59  ;;  %v922_v13 = vmul.f32 %v2628_v3, %v883_v2  ;;  %1555 = vperm.xlu1 %2116, %v1475_v11   ;;  %955 = vst.msk [vmem:[#allocation3 + $0x60] sm:$0xff] %vm271_vm2, %v939_v34  ;;  %v925_v14 = vmul.f32 %v2628_v3, %v898_v60  ;;  %1570 = vperm.xlu0 %2115, %v1478_v12   ;;  %v983_v59 = vld [vmem:[#allocation3 + $0x40] sm:$0xff] }
 0x122   : > { %v938_v23 = vadd.f32 %v922_v13, %v818_v48  ;;  %v941_v61 = vadd.f32 %v925_v14, %v821_v15  ;;  %v1641_v48 = vld [vmem:[#allocation2 + $0x9a] sm:$0xff] }
 0x123   : > { %v893_v53 = vpop.permute.xlu1 %892  ;;  %v996_v6 = vpop.permute.xlu0 %995  ;;  %v982_v34 = vld [vmem:[#allocation3 + $0x38] sm:$0xff]  ;;  %v985_v14 = vld [vmem:[#allocation3 + $0x50] sm:$0xff] }
 0x124   : > { %954 = vst.msk [vmem:[#allocation3 + $0x58] sm:$0xff] %vm271_vm2, %v938_v23  ;;  %v924_v18 = vmul.f32 %v2628_v3, %v893_v53  ;;  %1565 = vperm.xlu1 %2116, %v2522_v22   ;;  %957 = vst.msk [vmem:[#allocation3 + $0x70] sm:$0xff] %vm271_vm2, %v941_v61  ;;  %v1079_v54 = vmul.f32 %v2678_v8, %v996_v6  ;;  %1668 = vperm.xlu0 %2115, %v1632_v24  }
 0x126   : > { %v940_v62 = vadd.f32 %v924_v18, %v820_v19  ;;  %v1095_v55 = vadd.f32 %v1079_v54, %v975_v20  ;;  %v1643_v19 = vld [vmem:[#allocation2 + $0xb2] sm:$0xff]  ;;  %v1646_v20 = vld [vmem:[#allocation2 + $0xda] sm:$0xff] }
 0x127   : > { %v903_v37 = vpop.permute.xlu1 %902  ;;  %v1006_v22 = vpop.permute.xlu0 %1005  ;;  %v984_v61 = vld [vmem:[#allocation3 + $0x48] sm:$0xff] }
 0x128   : > { %956 = vst.msk [vmem:[#allocation3 + $0x68] sm:$0xff] %vm271_vm2, %v940_v62  ;;  %v926_v33 = vmul.f32 %v2628_v3, %v903_v37  ;;  %1575 = vperm.xlu1 %2116, %v1479_v25   ;;  %1111 = vst.msk [vmem:[#allocation3] sm:$0xff] %vm271_vm2, %v1095_v55  ;;  %v1081_v39 = vmul.f32 %v2678_v8, %v1006_v22  ;;  %1678 = vperm.xlu0 %2115, %v1634_v26   ;;  %v976_v3 = vld [vmem:[#allocation3 + $0x8] sm:$0xff]  ;;  %v987_v62 = vld [vmem:[#allocation3 + $0x60] sm:$0xff] }
 0x12a   : > { %v942_v27 = vadd.f32 %v926_v33, %v822_v63  ;;  %v1097_v40 = vadd.f32 %v1081_v39, %v977_v36 }
 0x12b   : > { %v1001_v0 = vpop.permute.xlu1 %1000  ;;  %v1016_v49 = vpop.permute.xlu0 %1015  ;;  %v986_v55 = vld [vmem:[#allocation3 + $0x58] sm:$0xff] }
 0x12c   : > { %958 = vst.msk [vmem:[#allocation3 + $0x78] sm:$0xff] %vm271_vm2, %v942_v27  ;;  %v1080_v28 = vmul.f32 %v2678_v8, %v1001_v0  ;;  %1673 = vperm.xlu1 %2116, %v1633_v35   ;;  %1113 = vst.msk [vmem:[#allocation3 + $0x10] sm:$0xff] %vm271_vm2, %v1097_v40  ;;  %v1083_v4 = vmul.f32 %v2678_v8, %v1016_v49  ;;  %1688 = vperm.xlu0 %2115, %v1636_v38   ;;  %v989_v35 = vld [vmem:[#allocation3 + $0x70] sm:$0xff] }
 0x12d   : > { %v1647_v40 = vld [vmem:[#allocation2 + $0xe2] sm:$0xff] }
 0x12e   : > { %v1096_v41 = vadd.f32 %v1080_v28, %v976_v3  ;;  %v1099_v57 = vadd.f32 %v1083_v4, %v979_v29 }
 0x12f   : > { %v1011_v50 = vpop.permute.xlu1 %1010  ;;  %v1026_v43 = vpop.permute.xlu0 %1025  ;;  %v988_v0 = vld [vmem:[#allocation3 + $0x68] sm:$0xff]  ;;  %v1143_v49 = vld [vmem:[#allocation3] sm:$0xff] }
 0x130   : > { %1112 = vst.msk [vmem:[#allocation3 + $0x8] sm:$0xff] %vm271_vm2, %v1096_v41  ;;  %v1082_v5 = vmul.f32 %v2678_v8, %v1011_v50  ;;  %1683 = vperm.xlu1 %2116, %v1635_v52   ;;  %1115 = vst.msk [vmem:[#allocation3 + $0x20] sm:$0xff] %vm271_vm2, %v1099_v57  ;;  %v1085_v9 = vmul.f32 %v2678_v8, %v1026_v43  ;;  %1698 = vperm.xlu0 %2115, %v1638_v42  }
 0x132   : > { %v1098_v1 = vadd.f32 %v1082_v5, %v978_v30  ;;  %v1101_v51 = vadd.f32 %v1085_v9, %v981_v44 }
 0x133   : > { %v1021_v31 = vpop.permute.xlu1 %1020  ;;  %v1036_v32 = vpop.permute.xlu0 %1035  ;;  %v990_v29 = vld [vmem:[#allocation3 + $0x78] sm:$0xff]  ;;  %v1145_v57 = vld [vmem:[#allocation3 + $0x10] sm:$0xff] }
 0x134   : > { %1114 = vst.msk [vmem:[#allocation3 + $0x18] sm:$0xff] %vm271_vm2, %v1098_v1  ;;  %v1084_v45 = vmul.f32 %v2678_v8, %v1021_v31  ;;  %1693 = vperm.xlu1 %2116, %v1637_v7   ;;  %1117 = vst.msk [vmem:[#allocation3 + $0x30] sm:$0xff] %vm271_vm2, %v1101_v51  ;;  %v1087_v11 = vmul.f32 %v2678_v8, %v1036_v32  ;;  %1708 = vperm.xlu0 %2115, %v1640_v58  }
 0x136   : > { %v1100_v46 = vadd.f32 %v1084_v45, %v980_v10  ;;  %v1103_v2 = vadd.f32 %v1087_v11, %v983_v59 }
 0x137   : > { %v1031_v17 = vpop.permute.xlu1 %1030  ;;  %v1046_v13 = vpop.permute.xlu0 %1045  ;;  %v1144_v7 = vld [vmem:[#allocation3 + $0x8] sm:$0xff]  ;;  %v1147_v44 = vld [vmem:[#allocation3 + $0x20] sm:$0xff] }
 0x138   : > { %1116 = vst.msk [vmem:[#allocation3 + $0x28] sm:$0xff] %vm271_vm2, %v1100_v46  ;;  %v1086_v12 = vmul.f32 %v2678_v8, %v1031_v17  ;;  %1703 = vperm.xlu1 %2116, %v1639_v21   ;;  %1119 = vst.msk [vmem:[#allocation3 + $0x40] sm:$0xff] %vm271_vm2, %v1103_v2  ;;  %v1089_v23 = vmul.f32 %v2678_v8, %v1046_v13  ;;  %1718 = vperm.xlu0 %2115, %v1642_v47  }
 0x13a   : > { %v1102_v60 = vadd.f32 %v1086_v12, %v982_v34  ;;  %v1105_v53 = vadd.f32 %v1089_v23, %v985_v14 }
 0x13b   : > { %v1041_v15 = vpop.permute.xlu1 %1040  ;;  %v1056_v18 = vpop.permute.xlu0 %1055  ;;  %v1146_v45 = vld [vmem:[#allocation3 + $0x18] sm:$0xff]  ;;  %v1149_v46 = vld [vmem:[#allocation3 + $0x30] sm:$0xff] }
 0x13c   : > { %1118 = vst.msk [vmem:[#allocation3 + $0x38] sm:$0xff] %vm271_vm2, %v1102_v60  ;;  %v1088_v24 = vmul.f32 %v2678_v8, %v1041_v15  ;;  %1713 = vperm.xlu1 %2116, %v1641_v48   ;;  %1121 = vst.msk [vmem:[#allocation3 + $0x50] sm:$0xff] %vm271_vm2, %v1105_v53  ;;  %v1091_v25 = vmul.f32 %v2678_v8, %v1056_v18  ;;  %1728 = vperm.xlu0 %2115, %v2563_v16   ;;  %v2717_v16 = vld [vmem:[%s2998_s2 + $0x5] ss:$0 sm:$0xff] }
 0x13e   : > { %v1104_v6 = vadd.f32 %v1088_v24, %v984_v61  ;;  %v1107_v37 = vadd.f32 %v1091_v25, %v987_v62 }
 0x13f   : > { %v1051_v54 = vpop.permute.xlu1 %1050  ;;  %v1066_v33 = vpop.permute.xlu0 %1065  ;;  %v1148_v47 = vld [vmem:[#allocation3 + $0x28] sm:$0xff]  ;;  %v1151_v13 = vld [vmem:[#allocation3 + $0x40] sm:$0xff] }
 0x140   : > { %1120 = vst.msk [vmem:[#allocation3 + $0x48] sm:$0xff] %vm271_vm2, %v1104_v6  ;;  %v1090_v26 = vmul.f32 %v2678_v8, %v1051_v54  ;;  %1723 = vperm.xlu1 %2116, %v1643_v19   ;;  %1123 = vst.msk [vmem:[#allocation3 + $0x60] sm:$0xff] %vm271_vm2, %v1107_v37  ;;  %v1093_v22 = vmul.f32 %v2678_v8, %v1066_v33  ;;  %1738 = vperm.xlu0 %2115, %v1646_v20  }
 0x142   : > { %v1106_v63 = vadd.f32 %v1090_v26, %v986_v55  ;;  %v1109_v39 = vadd.f32 %v1093_v22, %v989_v35 }
 0x143   : > { %v1061_v27 = vpop.permute.xlu1 %1060  ;;  %v1164_v38 = vpop.permute.xlu0 %1163  ;;  %v1150_v14 = vld [vmem:[#allocation3 + $0x38] sm:$0xff]  ;;  %v1153_v61 = vld [vmem:[#allocation3 + $0x50] sm:$0xff] }
 0x144   : > { %1122 = vst.msk [vmem:[#allocation3 + $0x58] sm:$0xff] %vm271_vm2, %v1106_v63  ;;  %v1092_v36 = vmul.f32 %v2678_v8, %v1061_v27  ;;  %1733 = vperm.xlu1 %2116, %v2579_v56   ;;  %1125 = vst.msk [vmem:[#allocation3 + $0x70] sm:$0xff] %vm271_vm2, %v1109_v39  ;;  %v1247_v3 = vmul.f32 %v2717_v16, %v1164_v38 }
 0x146   : > { %v1108_v28 = vadd.f32 %v1092_v36, %v988_v0  ;;  %v1263_v41 = vadd.f32 %v1247_v3, %v1143_v49  ;;  %v2755_v0 = vld [vmem:[%s2998_s2 + $0x6] ss:$0 sm:$0xff] }
 0x147   : > { %v1071_v52 = vpop.permute.xlu1 %1070  ;;  %v1174_v50 = vpop.permute.xlu0 %1173  ;;  %v1152_v25 = vld [vmem:[#allocation3 + $0x48] sm:$0xff]  ;;  %v1155_v37 = vld [vmem:[#allocation3 + $0x60] sm:$0xff] }
 0x148   : > { %1124 = vst.msk [vmem:[#allocation3 + $0x68] sm:$0xff] %vm271_vm2, %v1108_v28  ;;  %v1094_v4 = vmul.f32 %v2678_v8, %v1071_v52  ;;  %1743 = vperm.xlu1 %2116, %v1647_v40   ;;  %1279 = vst.msk [vmem:[#allocation3] sm:$0xff] %vm271_vm2, %v1263_v41  ;;  %v1249_v42 = vmul.f32 %v2717_v16, %v1174_v50 }
 0x14a   : > { %v1110_v56 = vadd.f32 %v1094_v4, %v990_v29  ;;  %v1265_v30 = vadd.f32 %v1249_v42, %v1145_v57 }
 0x14b   : > { %v1169_v5 = vpop.permute.xlu1 %1168  ;;  %v1184_v1 = vpop.permute.xlu0 %1183  ;;  %v1154_v63 = vld [vmem:[#allocation3 + $0x58] sm:$0xff]  ;;  %v1157_v39 = vld [vmem:[#allocation3 + $0x70] sm:$0xff] }
 0x14c   : > { %1126 = vst.msk [vmem:[#allocation3 + $0x78] sm:$0xff] %vm271_vm2, %v1110_v56  ;;  %v1248_v43 = vmul.f32 %v2717_v16, %v1169_v5  ;;  %1281 = vst.msk [vmem:[#allocation3 + $0x10] sm:$0xff] %vm271_vm2, %v1265_v30  ;;  %v1251_v9 = vmul.f32 %v2717_v16, %v1184_v1 }
 0x14e   : > { %v1264_v8 = vadd.f32 %v1248_v43, %v1144_v7  ;;  %v1267_v58 = vadd.f32 %v1251_v9, %v1147_v44 }
 0x14f   : > { %v1179_v31 = vpop.permute.xlu1 %1178  ;;  %v1194_v10 = vpop.permute.xlu0 %1193  ;;  %v1156_v28 = vld [vmem:[#allocation3 + $0x68] sm:$0xff]  ;;  %v1312_v41 = vld [vmem:[#allocation3] sm:$0xff] }
 0x150   : > { %1280 = vst.msk [vmem:[#allocation3 + $0x8] sm:$0xff] %vm271_vm2, %v1264_v8  ;;  %v1250_v51 = vmul.f32 %v2717_v16, %v1179_v31  ;;  %1283 = vst.msk [vmem:[#allocation3 + $0x20] sm:$0xff] %vm271_vm2, %v1267_v58  ;;  %v1253_v21 = vmul.f32 %v2717_v16, %v1194_v10 }
 0x152   : > { %v1266_v32 = vadd.f32 %v1250_v51, %v1146_v45  ;;  %v1269_v59 = vadd.f32 %v1253_v21, %v1149_v46 }
 0x153   : > { %v1189_v11 = vpop.permute.xlu1 %1188  ;;  %v1204_v2 = vpop.permute.xlu0 %1203  ;;  %v1158_v56 = vld [vmem:[#allocation3 + $0x78] sm:$0xff]  ;;  %v1314_v30 = vld [vmem:[#allocation3 + $0x10] sm:$0xff] }
 0x154   : > { %1282 = vst.msk [vmem:[#allocation3 + $0x18] sm:$0xff] %vm271_vm2, %v1266_v32  ;;  %v1252_v17 = vmul.f32 %v2717_v16, %v1189_v11  ;;  %1285 = vst.msk [vmem:[#allocation3 + $0x30] sm:$0xff] %vm271_vm2, %v1269_v59  ;;  %v1255_v34 = vmul.f32 %v2717_v16, %v1204_v2 }
 0x156   : > { %v1268_v12 = vadd.f32 %v1252_v17, %v1148_v47  ;;  %v1271_v60 = vadd.f32 %v1255_v34, %v1151_v13 }
 0x157   : > { %v1199_v48 = vpop.permute.xlu1 %1198  ;;  %v1214_v15 = vpop.permute.xlu0 %1213  ;;  %v1313_v8 = vld [vmem:[#allocation3 + $0x8] sm:$0xff]  ;;  %v1316_v31 = vld [vmem:[#allocation3 + $0x20] sm:$0xff] }
 0x158   : > { %1284 = vst.msk [vmem:[#allocation3 + $0x28] sm:$0xff] %vm271_vm2, %v1268_v12  ;;  %v1254_v23 = vmul.f32 %v2717_v16, %v1199_v48  ;;  %1287 = vst.msk [vmem:[#allocation3 + $0x40] sm:$0xff] %vm271_vm2, %v1271_v60  ;;  %v1257_v24 = vmul.f32 %v2717_v16, %v1214_v15 }
 0x15a   : > { %v1270_v53 = vadd.f32 %v1254_v23, %v1150_v14  ;;  %v1273_v19 = vadd.f32 %v1257_v24, %v1153_v61 }
 0x15b   : > { %v1209_v18 = vpop.permute.xlu1 %1208  ;;  %v1224_v62 = vpop.permute.xlu0 %1223  ;;  %v1315_v10 = vld [vmem:[#allocation3 + $0x18] sm:$0xff]  ;;  %v1318_v11 = vld [vmem:[#allocation3 + $0x30] sm:$0xff] }
 0x15c   : > { %1286 = vst.msk [vmem:[#allocation3 + $0x38] sm:$0xff] %vm271_vm2, %v1270_v53  ;;  %v1256_v6 = vmul.f32 %v2717_v16, %v1209_v18  ;;  %1289 = vst.msk [vmem:[#allocation3 + $0x50] sm:$0xff] %vm271_vm2, %v1273_v19  ;;  %v1259_v20 = vmul.f32 %v2717_v16, %v1224_v62 }
 0x15e   : > { %v1272_v54 = vadd.f32 %v1256_v6, %v1152_v25  ;;  %v1275_v55 = vadd.f32 %v1259_v20, %v1155_v37 }
 0x15f   : > { %v1219_v26 = vpop.permute.xlu1 %1218  ;;  %v1234_v22 = vpop.permute.xlu0 %1233  ;;  %v1317_v2 = vld [vmem:[#allocation3 + $0x28] sm:$0xff]  ;;  %v1320_v48 = vld [vmem:[#allocation3 + $0x40] sm:$0xff] }
 0x160   : > { %1288 = vst.msk [vmem:[#allocation3 + $0x48] sm:$0xff] %vm271_vm2, %v1272_v54  ;;  %v1258_v33 = vmul.f32 %v2717_v16, %v1219_v26  ;;  %1291 = vst.msk [vmem:[#allocation3 + $0x60] sm:$0xff] %vm271_vm2, %v1275_v55  ;;  %v1261_v27 = vmul.f32 %v2717_v16, %v1234_v22 }
 0x162   : > { %v1274_v35 = vadd.f32 %v1258_v33, %v1154_v63  ;;  %v1277_v38 = vadd.f32 %v1261_v27, %v1157_v39 }
 0x163   : > { %v1229_v36 = vpop.permute.xlu1 %1228  ;;  %v1333_v3 = vpop.permute.xlu0 %1332  ;;  %v1319_v15 = vld [vmem:[#allocation3 + $0x38] sm:$0xff]  ;;  %v1322_v18 = vld [vmem:[#allocation3 + $0x50] sm:$0xff] }
 0x164   : > { %1290 = vst.msk [vmem:[#allocation3 + $0x58] sm:$0xff] %vm271_vm2, %v1274_v35  ;;  %v1260_v40 = vmul.f32 %v2717_v16, %v1229_v36  ;;  %1293 = vst.msk [vmem:[#allocation3 + $0x70] sm:$0xff] %vm271_vm2, %v1277_v38  ;;  %v1416_v52 = vmul.f32 %v2755_v0, %v1333_v3 }
 0x166   : > { %v1276_v49 = vadd.f32 %v1260_v40, %v1156_v28  ;;  %v1432_v29 = vadd.f32 %v1416_v52, %v1312_v41  ;;  %v2792_v40 = vld [vmem:[%s2998_s2 + $0x7] ss:$0 sm:$0xff] }
 0x167   : > { %v1239_v4 = vpop.permute.xlu1 %1238  ;;  %v1343_v42 = vpop.permute.xlu0 %1342  ;;  %v1321_v62 = vld [vmem:[#allocation3 + $0x48] sm:$0xff]  ;;  %v1324_v26 = vld [vmem:[#allocation3 + $0x60] sm:$0xff] }
 0x168   : > { %1292 = vst.msk [vmem:[#allocation3 + $0x68] sm:$0xff] %vm271_vm2, %v1276_v49  ;;  %v1262_v50 = vmul.f32 %v2717_v16, %v1239_v4  ;;  %1448 = vst.msk [vmem:[#allocation3] sm:$0xff] %vm271_vm2, %v1432_v29  ;;  %v1418_v5 = vmul.f32 %v2755_v0, %v1343_v42 }
 0x16a   : > { %v1278_v57 = vadd.f32 %v1262_v50, %v1158_v56  ;;  %v1434_v7 = vadd.f32 %v1418_v5, %v1314_v30 }
 0x16b   : > { %v1338_v43 = vpop.permute.xlu1 %1337  ;;  %v1353_v9 = vpop.permute.xlu0 %1352  ;;  %v1323_v22 = vld [vmem:[#allocation3 + $0x58] sm:$0xff]  ;;  %v1326_v36 = vld [vmem:[#allocation3 + $0x70] sm:$0xff] }
 0x16c   : > { %1294 = vst.msk [vmem:[#allocation3 + $0x78] sm:$0xff] %vm271_vm2, %v1278_v57  ;;  %v1417_v1 = vmul.f32 %v2755_v0, %v1338_v43  ;;  %1450 = vst.msk [vmem:[#allocation3 + $0x10] sm:$0xff] %vm271_vm2, %v1434_v7  ;;  %v1420_v16 = vmul.f32 %v2755_v0, %v1353_v9 }
 0x16e   : > { %v1433_v44 = vadd.f32 %v1417_v1, %v1313_v8  ;;  %v1436_v51 = vadd.f32 %v1420_v16, %v1316_v31 }
 0x16f   : > { %v1348_v58 = vpop.permute.xlu1 %1347  ;;  %v1363_v32 = vpop.permute.xlu0 %1362  ;;  %v1325_v49 = vld [vmem:[#allocation3 + $0x68] sm:$0xff]  ;;  %v1480_v29 = vld [vmem:[#allocation3] sm:$0xff] }
 0x170   : > { %1449 = vst.msk [vmem:[#allocation3 + $0x8] sm:$0xff] %vm271_vm2, %v1433_v44  ;;  %v1419_v45 = vmul.f32 %v2755_v0, %v1348_v58  ;;  %1452 = vst.msk [vmem:[#allocation3 + $0x20] sm:$0xff] %vm271_vm2, %v1436_v51  ;;  %v1422_v46 = vmul.f32 %v2755_v0, %v1363_v32 }
 0x172   : > { %v1435_v21 = vadd.f32 %v1419_v45, %v1315_v10  ;;  %v1438_v17 = vadd.f32 %v1422_v46, %v1318_v11 }
 0x173   : > { %v1358_v59 = vpop.permute.xlu1 %1357  ;;  %v1373_v12 = vpop.permute.xlu0 %1372  ;;  %v1327_v57 = vld [vmem:[#allocation3 + $0x78] sm:$0xff]  ;;  %v1482_v7 = vld [vmem:[#allocation3 + $0x10] sm:$0xff] }
 0x174   : > { %1451 = vst.msk [vmem:[#allocation3 + $0x18] sm:$0xff] %vm271_vm2, %v1435_v21  ;;  %v1421_v47 = vmul.f32 %v2755_v0, %v1358_v59  ;;  %1454 = vst.msk [vmem:[#allocation3 + $0x30] sm:$0xff] %vm271_vm2, %v1438_v17  ;;  %v1424_v13 = vmul.f32 %v2755_v0, %v1373_v12 }
 0x176   : > { %v1437_v34 = vadd.f32 %v1421_v47, %v1317_v2  ;;  %v1440_v23 = vadd.f32 %v1424_v13, %v1320_v48 }
 0x177   : > { %v1368_v60 = vpop.permute.xlu1 %1367  ;;  %v1383_v53 = vpop.permute.xlu0 %1382  ;;  %v1481_v44 = vld [vmem:[#allocation3 + $0x8] sm:$0xff]  ;;  %v1484_v58 = vld [vmem:[#allocation3 + $0x20] sm:$0xff] }
 0x178   : > { %1453 = vst.msk [vmem:[#allocation3 + $0x28] sm:$0xff] %vm271_vm2, %v1437_v34  ;;  %v1423_v14 = vmul.f32 %v2755_v0, %v1368_v60  ;;  %1456 = vst.msk [vmem:[#allocation3 + $0x40] sm:$0xff] %vm271_vm2, %v1440_v23  ;;  %v1426_v61 = vmul.f32 %v2755_v0, %v1383_v53 }
 0x17a   : > { %v1439_v24 = vadd.f32 %v1423_v14, %v1319_v15  ;;  %v1442_v6 = vadd.f32 %v1426_v61, %v1322_v18 }
 0x17b   : > { %v1378_v19 = vpop.permute.xlu1 %1377  ;;  %v1393_v54 = vpop.permute.xlu0 %1392  ;;  %v1483_v32 = vld [vmem:[#allocation3 + $0x18] sm:$0xff]  ;;  %v1486_v59 = vld [vmem:[#allocation3 + $0x30] sm:$0xff] }
 0x17c   : > { %1455 = vst.msk [vmem:[#allocation3 + $0x38] sm:$0xff] %vm271_vm2, %v1439_v24  ;;  %v1425_v25 = vmul.f32 %v2755_v0, %v1378_v19  ;;  %1458 = vst.msk [vmem:[#allocation3 + $0x50] sm:$0xff] %vm271_vm2, %v1442_v6  ;;  %v1428_v37 = vmul.f32 %v2755_v0, %v1393_v54 }
 0x17e   : > { %v1441_v20 = vadd.f32 %v1425_v25, %v1321_v62  ;;  %v1444_v33 = vadd.f32 %v1428_v37, %v1324_v26 }
 0x17f   : > { %v1388_v55 = vpop.permute.xlu1 %1387  ;;  %v1403_v35 = vpop.permute.xlu0 %1402  ;;  %v1485_v12 = vld [vmem:[#allocation3 + $0x28] sm:$0xff]  ;;  %v1488_v60 = vld [vmem:[#allocation3 + $0x40] sm:$0xff] }
 0x180   : > { %1457 = vst.msk [vmem:[#allocation3 + $0x48] sm:$0xff] %vm271_vm2, %v1441_v20  ;;  %v1427_v63 = vmul.f32 %v2755_v0, %v1388_v55  ;;  %1460 = vst.msk [vmem:[#allocation3 + $0x60] sm:$0xff] %vm271_vm2, %v1444_v33  ;;  %v1430_v39 = vmul.f32 %v2755_v0, %v1403_v35 }
 0x182   : > { %v1443_v27 = vadd.f32 %v1427_v63, %v1323_v22  ;;  %v1446_v28 = vadd.f32 %v1430_v39, %v1326_v36 }
 0x183   : > { %v1398_v38 = vpop.permute.xlu1 %1397  ;;  %v1501_v52 = vpop.permute.xlu0 %1500  ;;  %v1487_v53 = vld [vmem:[#allocation3 + $0x38] sm:$0xff]  ;;  %v1490_v19 = vld [vmem:[#allocation3 + $0x50] sm:$0xff] }
 0x184   : > { %1459 = vst.msk [vmem:[#allocation3 + $0x58] sm:$0xff] %vm271_vm2, %v1443_v27  ;;  %v1429_v3 = vmul.f32 %v2755_v0, %v1398_v38  ;;  %1462 = vst.msk [vmem:[#allocation3 + $0x70] sm:$0xff] %vm271_vm2, %v1446_v28  ;;  %v1584_v4 = vmul.f32 %v2792_v40, %v1501_v52 }
 0x186   : > { %v1445_v41 = vadd.f32 %v1429_v3, %v1325_v49  ;;  %v1600_v56 = vadd.f32 %v1584_v4, %v1480_v29  ;;  %v2829_v3 = vld [vmem:[%s2998_s2 + $0x8] ss:$0 sm:$0xff] }
 0x187   : > { %v1408_v50 = vpop.permute.xlu1 %1407  ;;  %v1511_v5 = vpop.permute.xlu0 %1510  ;;  %v1489_v54 = vld [vmem:[#allocation3 + $0x48] sm:$0xff]  ;;  %v1492_v55 = vld [vmem:[#allocation3 + $0x60] sm:$0xff] }
 0x188   : > { %1461 = vst.msk [vmem:[#allocation3 + $0x68] sm:$0xff] %vm271_vm2, %v1445_v41  ;;  %v1431_v42 = vmul.f32 %v2755_v0, %v1408_v50  ;;  %1616 = vst.msk [vmem:[#allocation3] sm:$0xff] %vm271_vm2, %v1600_v56  ;;  %v1586_v43 = vmul.f32 %v2792_v40, %v1511_v5 }
 0x18a   : > { %v1447_v30 = vadd.f32 %v1431_v42, %v1327_v57  ;;  %v1602_v8 = vadd.f32 %v1586_v43, %v1482_v7 }
 0x18b   : > { %v1506_v1 = vpop.permute.xlu1 %1505  ;;  %v1521_v16 = vpop.permute.xlu0 %1520  ;;  %v1491_v35 = vld [vmem:[#allocation3 + $0x58] sm:$0xff]  ;;  %v1494_v38 = vld [vmem:[#allocation3 + $0x70] sm:$0xff] }
 0x18c   : > { %1463 = vst.msk [vmem:[#allocation3 + $0x78] sm:$0xff] %vm271_vm2, %v1447_v30  ;;  %v1585_v9 = vmul.f32 %v2792_v40, %v1506_v1  ;;  %1618 = vst.msk [vmem:[#allocation3 + $0x10] sm:$0xff] %vm271_vm2, %v1602_v8  ;;  %v1588_v0 = vmul.f32 %v2792_v40, %v1521_v16 }
 0x18e   : > { %v1601_v31 = vadd.f32 %v1585_v9, %v1481_v44  ;;  %v1604_v45 = vadd.f32 %v1588_v0, %v1484_v58 }
 0x18f   : > { %v1516_v51 = vpop.permute.xlu1 %1515  ;;  %v1531_v21 = vpop.permute.xlu0 %1530  ;;  %v1493_v41 = vld [vmem:[#allocation3 + $0x68] sm:$0xff]  ;;  %v1648_v56 = vld [vmem:[#allocation3] sm:$0xff] }
 0x190   : > { %1617 = vst.msk [vmem:[#allocation3 + $0x8] sm:$0xff] %vm271_vm2, %v1601_v31  ;;  %v1587_v10 = vmul.f32 %v2792_v40, %v1516_v51  ;;  %1620 = vst.msk [vmem:[#allocation3 + $0x20] sm:$0xff] %vm271_vm2, %v1604_v45  ;;  %v1590_v11 = vmul.f32 %v2792_v40, %v1531_v21  ;;  %v1878_v31 = vlaneseq  ;;  %v2849_v45 = vld [vmem:[%s2999_s3] ss:$0 sm:$0xff] }
 0x192   : > { %v1603_v46 = vadd.f32 %v1587_v10, %v1483_v32  ;;  %v1606_v47 = vadd.f32 %v1590_v11, %v1486_v59  ;;  %v2856_v11 = vld [vmem:[%s3000_s4] ss:$0 sm:$0xff]  ;;  %v1879_v59 = vshrl.u32 %v1878_v31, 7 }
 0x193   : > { %v1526_v17 = vpop.permute.xlu1 %1525  ;;  %v1541_v34 = vpop.permute.xlu0 %1540  ;;  %v1495_v30 = vld [vmem:[#allocation3 + $0x78] sm:$0xff]  ;;  %v1650_v8 = vld [vmem:[#allocation3 + $0x10] sm:$0xff] }
 0x194   : > { %1619 = vst.msk [vmem:[#allocation3 + $0x18] sm:$0xff] %vm271_vm2, %v1603_v46  ;;  %v1589_v2 = vmul.f32 %v2792_v40, %v1526_v17  ;;  %1622 = vst.msk [vmem:[#allocation3 + $0x30] sm:$0xff] %vm271_vm2, %v1606_v47  ;;  %v1592_v48 = vmul.f32 %v2792_v40, %v1541_v34 }
 0x196   : > { %v1605_v13 = vadd.f32 %v1589_v2, %v1485_v12  ;;  %v1608_v14 = vadd.f32 %v1592_v48, %v1488_v60  ;;  %v1881_v12 = vstv %s2838_s22 }
 0x197   : > { %v1536_v23 = vpop.permute.xlu1 %1535  ;;  %v1551_v24 = vpop.permute.xlu0 %1550  ;;  %v1649_v0 = vld [vmem:[#allocation3 + $0x8] sm:$0xff]  ;;  %v1652_v10 = vld [vmem:[#allocation3 + $0x20] sm:$0xff]  ;;  %vm2866_vm3 = vcmp.lt.s32.totalorder %v1879_v59, %v1881_v12 }
 0x198   : > { %1621 = vst.msk [vmem:[#allocation3 + $0x28] sm:$0xff] %vm271_vm2, %v1605_v13  ;;  %v1591_v15 = vmul.f32 %v2792_v40, %v1536_v23  ;;  %1624 = vst.msk [vmem:[#allocation3 + $0x40] sm:$0xff] %vm271_vm2, %v1608_v14  ;;  %v1594_v18 = vmul.f32 %v2792_v40, %v1551_v24 }
 0x19a   : > { %v1607_v61 = vadd.f32 %v1591_v15, %v1487_v53  ;;  %v1610_v25 = vadd.f32 %v1594_v18, %v1490_v19 }
 0x19b   : > { %v1546_v6 = vpop.permute.xlu1 %1545  ;;  %v1561_v20 = vpop.permute.xlu0 %1560  ;;  %v1651_v47 = vld [vmem:[#allocation3 + $0x18] sm:$0xff]  ;;  %v1654_v60 = vld [vmem:[#allocation3 + $0x30] sm:$0xff] }
 0x19c   : > { %1623 = vst.msk [vmem:[#allocation3 + $0x38] sm:$0xff] %vm271_vm2, %v1607_v61  ;;  %v1593_v62 = vmul.f32 %v2792_v40, %v1546_v6  ;;  %1626 = vst.msk [vmem:[#allocation3 + $0x50] sm:$0xff] %vm271_vm2, %v1610_v25  ;;  %v1596_v26 = vmul.f32 %v2792_v40, %v1561_v20  ;;  %v1880_v20 = vadd.s32 8, %v1879_v59 }
 0x19e   : > { %v1609_v37 = vadd.f32 %v1593_v62, %v1489_v54  ;;  %v1612_v63 = vadd.f32 %v1596_v26, %v1492_v55  ;;  %vm2890_vm5 = vcmp.lt.s32.totalorder %v1880_v20, %v1881_v12 }
 0x19f   : > { %v1556_v33 = vpop.permute.xlu1 %1555  ;;  %v1571_v27 = vpop.permute.xlu0 %1570  ;;  %v1653_v18 = vld [vmem:[#allocation3 + $0x28] sm:$0xff]  ;;  %v1656_v26 = vld [vmem:[#allocation3 + $0x40] sm:$0xff] }
 0x1a0   : > { %1625 = vst.msk [vmem:[#allocation3 + $0x48] sm:$0xff] %vm271_vm2, %v1609_v37  ;;  %v1595_v22 = vmul.f32 %v2792_v40, %v1556_v33  ;;  %1628 = vst.msk [vmem:[#allocation3 + $0x60] sm:$0xff] %vm271_vm2, %v1612_v63  ;;  %v1598_v36 = vmul.f32 %v2792_v40, %v1571_v27 }
 0x1a2   : > { %v1611_v39 = vadd.f32 %v1595_v22, %v1491_v35  ;;  %v1614_v49 = vadd.f32 %v1598_v36, %v1494_v38 }
 0x1a3   : > { %v1566_v28 = vpop.permute.xlu1 %1565  ;;  %v1669_v4 = vpop.permute.xlu0 %1668 }
 0x1a4   : > { %1627 = vst.msk [vmem:[#allocation3 + $0x58] sm:$0xff] %vm271_vm2, %v1611_v39  ;;  %v1597_v52 = vmul.f32 %v2792_v40, %v1566_v28  ;;  %1630 = vst.msk [vmem:[#allocation3 + $0x70] sm:$0xff] %vm271_vm2, %v1614_v49  ;;  %v1752_v50 = vmul.f32 %v2829_v3, %v1669_v4 }
 0x1a6   : > { %v1613_v29 = vadd.f32 %v1597_v52, %v1493_v41  ;;  %v1768_v57 = vadd.f32 %v1752_v50, %v1648_v56  ;;  %v1655_v41 = vld [vmem:[#allocation3 + $0x38] sm:$0xff] }
 0x1a7   : > { %v1576_v42 = vpop.permute.xlu1 %1575  ;;  %v1679_v43 = vpop.permute.xlu0 %1678 }
 0x1a8   : > { %1629 = vst.msk [vmem:[#allocation3 + $0x68] sm:$0xff] %vm271_vm2, %v1613_v29  ;;  %v1599_v5 = vmul.f32 %v2792_v40, %v1576_v42  ;;  %1784 = vst.msk [vmem:[#allocation3] sm:$0xff] %vm271_vm2, %v1768_v57  ;;  %v1754_v1 = vmul.f32 %v2829_v3, %v1679_v43 }
 0x1aa   : > { %v1615_v7 = vadd.f32 %v1599_v5, %v1495_v30  ;;  %v1770_v44 = vadd.f32 %v1754_v1, %v1650_v8 }
 0x1ab   : > { %v1674_v9 = vpop.permute.xlu1 %1673  ;;  %v1689_v40 = vpop.permute.xlu0 %1688 }
 0x1ac   : > { %1631 = vst.msk [vmem:[#allocation3 + $0x78] sm:$0xff] %vm271_vm2, %v1615_v7  ;;  %v1753_v16 = vmul.f32 %v2829_v3, %v1674_v9  ;;  %1786 = vst.msk [vmem:[#allocation3 + $0x10] sm:$0xff] %vm271_vm2, %v1770_v44  ;;  %v1756_v51 = vmul.f32 %v2829_v3, %v1689_v40  ;;  %v1658_v7 = vld [vmem:[#allocation3 + $0x50] sm:$0xff] }
 0x1ae   : > { %v1769_v58 = vadd.f32 %v1753_v16, %v1649_v0  ;;  %v1772_v21 = vadd.f32 %v1756_v51, %v1652_v10  ;;  %v1657_v51 = vld [vmem:[#allocation3 + $0x48] sm:$0xff] }
 0x1af   : > { %v1684_v32 = vpop.permute.xlu1 %1683  ;;  %v1800_v17 = vld [vmem:[#allocation3] sm:$0xff]  ;;  %v1699_v2 = vpop.permute.xlu0 %1698 }
 0x1b0   : > { %1785 = vst.msk [vmem:[#allocation3 + $0x8] sm:$0xff] %vm271_vm2, %v1769_v58  ;;  %v1755_v46 = vmul.f32 %v2829_v3, %v1684_v32  ;;  %v1823_v34 = vmul.f32 %v2849_v45, %v1800_v17  ;;  %1788 = vst.msk [vmem:[#allocation3 + $0x20] sm:$0xff] %vm271_vm2, %v1772_v21  ;;  %v1758_v48 = vmul.f32 %v2829_v3, %v1699_v2 }
 0x1b2   : > { %v1771_v13 = vadd.f32 %v1755_v46, %v1651_v47  ;;  %v1846_v14 = vadd.f32 %v2856_v11, %v1823_v34  ;;  %v1774_v15 = vadd.f32 %v1758_v48, %v1654_v60  ;;  %v1660_v34 = vld [vmem:[#allocation3 + $0x60] sm:$0xff] }
 0x1b3   : > { %v1694_v23 = vpop.permute.xlu1 %1693  ;;  %v1802_v61 = vld [vmem:[#allocation3 + $0x10] sm:$0xff]  ;;  %v1709_v19 = vpop.permute.xlu0 %1708 }
 0x1b4   : > { %1787 = vst.msk [vmem:[#allocation3 + $0x18] sm:$0xff] %vm271_vm2, %v1771_v13  ;;  %v1757_v53 = vmul.f32 %v2829_v3, %v1694_v23  ;;  %v1862_v6 = vmax.f32 %v1846_v14, 0.0  ;;  %v1825_v25 = vmul.f32 %v2849_v45, %v1802_v61  ;;  %1790 = vst.msk [vmem:[#allocation3 + $0x30] sm:$0xff] %vm271_vm2, %v1774_v15  ;;  %v1760_v54 = vmul.f32 %v2829_v3, %v1709_v19  ;;  %v1659_v19 = vld [vmem:[#allocation3 + $0x58] sm:$0xff] }
 0x1b6   : > { %v1773_v62 = vadd.f32 %v1757_v53, %v1653_v18  ;;  %v1888_v33 = vsel %vm2866_vm3, %v1862_v6, 0.0  ;;  %v1848_v63 = vadd.f32 %v2856_v11, %v1825_v25  ;;  %v1776_v35 = vadd.f32 %v1760_v54, %v1656_v26 }
 0x1b7   : > { %v1801_v37 = vld [vmem:[#allocation3 + $0x8] sm:$0xff]  ;;  %v1704_v55 = vpop.permute.xlu1 %1703  ;;  %v2088_v27 = vpack.c.bf16 %v1888_v33, %v1888_v33  ;;  %v1804_v39 = vld [vmem:[#allocation3 + $0x20] sm:$0xff]  ;;  %v1719_v38 = vpop.permute.xlu0 %1718  ;;  %v1662_v33 = vld [vmem:[#allocation3 + $0x70] sm:$0xff] }
 0x1b8   : > { %v1824_v22 = vmul.f32 %v2849_v45, %v1801_v37  ;;  %1789 = vst.msk [vmem:[#allocation3 + $0x28] sm:$0xff] %vm271_vm2, %v1773_v62  ;;  %v1759_v36 = vmul.f32 %v2829_v3, %v1704_v55  ;;  %v1864_v28 = vmax.f32 %v1848_v63, 0.0  ;;  %v1827_v52 = vmul.f32 %v2849_v45, %v1804_v39  ;;  %1792 = vst.msk [vmem:[#allocation3 + $0x40] sm:$0xff] %vm271_vm2, %v1776_v35  ;;  %v1661_v39 = vld [vmem:[#allocation3 + $0x68] sm:$0xff] }
 0x1b9   : > { %v1762_v4 = vmul.f32 %v2829_v3, %v1719_v38  ;;  %1969 = vst.msk [vmem:[%s2876_s30] sm:$0xf] %vm1968_vm4, %v2088_v27 }
 0x1ba   : > { %v1847_v49 = vadd.f32 %v2856_v11, %v1824_v22  ;;  %v1775_v56 = vadd.f32 %v1759_v36, %v1655_v41  ;;  %v1890_v57 = vsel %vm2866_vm3, %v1864_v28, 0.0  ;;  %v1850_v30 = vadd.f32 %v2856_v11, %v1827_v52 }
 0x1bb   : > { %v1803_v50 = vld [vmem:[#allocation3 + $0x18] sm:$0xff]  ;;  %v1714_v42 = vpop.permute.xlu1 %1713  ;;  %v2090_v1 = vpack.c.bf16 %v1890_v57, %v1890_v57  ;;  %v1806_v8 = vld [vmem:[#allocation3 + $0x30] sm:$0xff]  ;;  %v1778_v9 = vadd.f32 %v1762_v4, %v1658_v7  ;;  %v1729_v16 = vpop.permute.xlu0 %1728 }
 0x1bc   : > { %v1863_v5 = vmax.f32 %v1847_v49, 0.0  ;;  %v1826_v43 = vmul.f32 %v2849_v45, %v1803_v50  ;;  %1791 = vst.msk [vmem:[#allocation3 + $0x38] sm:$0xff] %vm271_vm2, %v1775_v56  ;;  %v1761_v44 = vmul.f32 %v2829_v3, %v1714_v42  ;;  %v1866_v0 = vmax.f32 %v1850_v30, 0.0 }
 0x1bd   : > { %v1829_v58 = vmul.f32 %v2849_v45, %v1806_v8  ;;  %1971 = vst.msk [vmem:[%s2876_s30 + $0x8] sm:$0xf] %vm1968_vm4, %v2090_v1  ;;  %v1764_v46 = vmul.f32 %v2829_v3, %v1729_v16  ;;  %v1663_v1 = vld [vmem:[#allocation3 + $0x78] sm:$0xff] }
 0x1be   : > { %v1889_v31 = vsel %vm2890_vm5, %v1863_v5, 0.0  ;;  %v1849_v40 = vadd.f32 %v2856_v11, %v1826_v43  ;;  %1794 = vst.msk [vmem:[#allocation3 + $0x50] sm:$0xff] %vm271_vm2, %v1778_v9  ;;  %v1777_v21 = vadd.f32 %v1761_v44, %v1657_v51  ;;  %v1892_v17 = vsel %vm2866_vm3, %v1866_v0, 0.0 }
 0x1bf   : > { %v2089_v10 = vpack.c.bf16 %v1889_v31, %v1889_v31  ;;  %v1805_v32 = vld [vmem:[#allocation3 + $0x28] sm:$0xff]  ;;  %v1724_v59 = vpop.permute.xlu1 %1723  ;;  %v1852_v2 = vadd.f32 %v2856_v11, %v1829_v58  ;;  %v2092_v13 = vpack.c.bf16 %v1892_v17, %v1892_v17  ;;  %v1808_v48 = vld [vmem:[#allocation3 + $0x40] sm:$0xff]  ;;  %v1780_v60 = vadd.f32 %v1764_v46, %v1660_v34  ;;  %v1739_v14 = vpop.permute.xlu0 %1738 }
 0x1c0   : > { %v1865_v47 = vmax.f32 %v1849_v40, 0.0  ;;  %v1828_v12 = vmul.f32 %v2849_v45, %v1805_v32  ;;  %1793 = vst.msk [vmem:[#allocation3 + $0x48] sm:$0xff] %vm271_vm2, %v1777_v21  ;;  %v1763_v23 = vmul.f32 %v2829_v3, %v1724_v59  ;;  %v1831_v18 = vmul.f32 %v2849_v45, %v1808_v48 }
 0x1c1   : > { %1970 = vst.msk [vmem:[%s2876_s30 + $0x4] sm:$0xf] %vm1968_vm4, %v2089_v10  ;;  %v1868_v53 = vmax.f32 %v1852_v2, 0.0  ;;  %1973 = vst.msk [vmem:[%s2876_s30 + $0x10] sm:$0xf] %vm1968_vm4, %v2092_v13  ;;  %v1766_v62 = vmul.f32 %v2829_v3, %v1739_v14 }
 0x1c2   : > { %v1891_v15 = vsel %vm2890_vm5, %v1865_v47, 0.0  ;;  %v1851_v61 = vadd.f32 %v2856_v11, %v1828_v12  ;;  %1796 = vst.msk [vmem:[#allocation3 + $0x60] sm:$0xff] %vm271_vm2, %v1780_v60  ;;  %v1779_v25 = vadd.f32 %v1763_v23, %v1659_v19  ;;  %v1854_v26 = vadd.f32 %v2856_v11, %v1831_v18 }
 0x1c3   : > { %v2091_v6 = vpack.c.bf16 %v1891_v15, %v1891_v15  ;;  %v1734_v54 = vpop.permute.xlu1 %1733  ;;  %v1894_v20 = vsel %vm2866_vm3, %v1868_v53, 0.0  ;;  %v1807_v55 = vld [vmem:[#allocation3 + $0x38] sm:$0xff]  ;;  %v1782_v27 = vadd.f32 %v1766_v62, %v1662_v33 }
 0x1c4   : > { %v1867_v37 = vmax.f32 %v1851_v61, 0.0  ;;  %v1765_v63 = vmul.f32 %v2829_v3, %v1734_v54  ;;  %v2094_v22 = vpack.c.bf16 %v1894_v20, %v1894_v20  ;;  %v1830_v35 = vmul.f32 %v2849_v45, %v1807_v55  ;;  %1795 = vst.msk [vmem:[#allocation3 + $0x58] sm:$0xff] %vm271_vm2, %v1779_v25 }
 0x1c5   : > { %1972 = vst.msk [vmem:[%s2876_s30 + $0xc] sm:$0xf] %vm1968_vm4, %v2091_v6  ;;  %v1870_v38 = vmax.f32 %v1854_v26, 0.0  ;;  %v1810_v28 = vld [vmem:[#allocation3 + $0x50] sm:$0xff] }
 0x1c6   : > { %v1893_v36 = vsel %vm2890_vm5, %v1867_v37, 0.0  ;;  %v1781_v49 = vadd.f32 %v1765_v63, %v1661_v39  ;;  %1975 = vst.msk [vmem:[%s2876_s30 + $0x18] sm:$0xf] %vm1968_vm4, %v2094_v22  ;;  %v1853_v41 = vadd.f32 %v2856_v11, %v1830_v35  ;;  %v1833_v4 = vmul.f32 %v2849_v45, %v1810_v28 }
 0x1c7   : > { %v2093_v52 = vpack.c.bf16 %v1893_v36, %v1893_v36  ;;  %1798 = vst.msk [vmem:[#allocation3 + $0x70] sm:$0xff] %vm271_vm2, %v1782_v27  ;;  %v1744_v50 = vpop.permute.xlu1 %1743  ;;  %v1896_v56 = vsel %vm2866_vm3, %v1870_v38, 0.0  ;;  %v1809_v42 = vld [vmem:[#allocation3 + $0x48] sm:$0xff] }
 0x1c8   : > { %1797 = vst.msk [vmem:[#allocation3 + $0x68] sm:$0xff] %vm271_vm2, %v1781_v49  ;;  %v1767_v57 = vmul.f32 %v2829_v3, %v1744_v50  ;;  %v2096_v5 = vpack.c.bf16 %v1896_v56, %v1896_v56  ;;  %v1869_v30 = vmax.f32 %v1853_v41, 0.0  ;;  %v1856_v43 = vadd.f32 %v2856_v11, %v1833_v4 }
 0x1c9   : > { %1974 = vst.msk [vmem:[%s2876_s30 + $0x14] sm:$0xf] %vm1968_vm4, %v2093_v52  ;;  %v1832_v7 = vmul.f32 %v2849_v45, %v1809_v42  ;;  %v1812_v8 = vld [vmem:[#allocation3 + $0x60] sm:$0xff] }
 0x1ca   : > { %v1783_v9 = vadd.f32 %v1767_v57, %v1663_v1  ;;  %1977 = vst.msk [vmem:[%s2876_s30 + $0x20] sm:$0xf] %vm1968_vm4, %v2096_v5  ;;  %v1895_v44 = vsel %vm2890_vm5, %v1869_v30, 0.0  ;;  %v1872_v16 = vmax.f32 %v1856_v43, 0.0  ;;  %v1835_v31 = vmul.f32 %v2849_v45, %v1812_v8 }
 0x1cb   : > { %v1855_v3 = vadd.f32 %v2856_v11, %v1832_v7  ;;  %v2095_v0 = vpack.c.bf16 %v1895_v44, %v1895_v44  ;;  %v1811_v40 = vld [vmem:[#allocation3 + $0x58] sm:$0xff] }
 0x1cc   : > { %1799 = vst.msk [vmem:[#allocation3 + $0x78] sm:$0xff] %vm271_vm2, %v1783_v9  ;;  %v1898_v58 = vsel %vm2866_vm3, %v1872_v16, 0.0  ;;  %v1858_v10 = vadd.f32 %v2856_v11, %v1835_v31  ;;  %v1834_v32 = vmul.f32 %v2849_v45, %v1811_v40 }
 0x1cd   : > { %v1871_v51 = vmax.f32 %v1855_v3, 0.0  ;;  %1976 = vst.msk [vmem:[%s2876_s30 + $0x1c] sm:$0xf] %vm1968_vm4, %v2095_v0  ;;  %v2098_v21 = vpack.c.bf16 %v1898_v58, %v1898_v58 }
 0x1ce   : > { %v1814_v46 = vld [vmem:[#allocation3 + $0x70] sm:$0xff]  ;;  %v1874_v17 = vmax.f32 %v1858_v10, 0.0  ;;  %v1857_v47 = vadd.f32 %v2856_v11, %v1834_v32 }
 0x1cf   : > { %v1897_v59 = vsel %vm2890_vm5, %v1871_v51, 0.0  ;;  %v1837_v2 = vmul.f32 %v2849_v45, %v1814_v46  ;;  %v1813_v12 = vld [vmem:[#allocation3 + $0x68] sm:$0xff]  ;;  %1979 = vst.msk [vmem:[%s2876_s30 + $0x28] sm:$0xf] %vm1968_vm4, %v2098_v21 }
 0x1d0   : > { %v2097_v34 = vpack.c.bf16 %v1897_v59, %v1897_v59  ;;  %v1836_v13 = vmul.f32 %v2849_v45, %v1813_v12  ;;  %v1900_v48 = vsel %vm2866_vm3, %v1874_v17, 0.0  ;;  %v1873_v60 = vmax.f32 %v1857_v47, 0.0 }
 0x1d1   : > { %v1860_v23 = vadd.f32 %v2856_v11, %v1837_v2  ;;  %v2100_v14 = vpack.c.bf16 %v1900_v48, %v1900_v48 }
 0x1d2   : > { %1978 = vst.msk [vmem:[%s2876_s30 + $0x24] sm:$0xf] %vm1968_vm4, %v2097_v34  ;;  %v1859_v15 = vadd.f32 %v2856_v11, %v1836_v13  ;;  %v1899_v53 = vsel %vm2890_vm5, %v1873_v60, 0.0 }
 0x1d3   : > { %v1876_v61 = vmax.f32 %v1860_v23, 0.0  ;;  %v1815_v18 = vld [vmem:[#allocation3 + $0x78] sm:$0xff]  ;;  %1981 = vst.msk [vmem:[%s2876_s30 + $0x30] sm:$0xf] %vm1968_vm4, %v2100_v14  ;;  %v2099_v19 = vpack.c.bf16 %v1899_v53, %v1899_v53 }
 0x1d4   : > { %v1875_v6 = vmax.f32 %v1859_v15, 0.0  ;;  %v1838_v25 = vmul.f32 %v2849_v45, %v1815_v18 }
 0x1d5   : > { %v1902_v62 = vsel %vm2866_vm3, %v1876_v61, 0.0  ;;  %1980 = vst.msk [vmem:[%s2876_s30 + $0x2c] sm:$0xf] %vm1968_vm4, %v2099_v19 }
 0x1d6   : > { %v2102_v54 = vpack.c.bf16 %v1902_v62, %v1902_v62  ;;  %v1901_v20 = vsel %vm2890_vm5, %v1875_v6, 0.0  ;;  %v1861_v37 = vadd.f32 %v2856_v11, %v1838_v25 }
 0x1d7   : > { %v2101_v26 = vpack.c.bf16 %v1901_v20, %v1901_v20 }
 0x1d8   : > { %1983 = vst.msk [vmem:[%s2876_s30 + $0x38] sm:$0xf] %vm1968_vm4, %v2102_v54  ;;  %v1877_v55 = vmax.f32 %v1861_v37, 0.0 }
 0x1d9   : > { %1982 = vst.msk [vmem:[%s2876_s30 + $0x34] sm:$0xf] %vm1968_vm4, %v2101_v26 }
 0x1da   : > { %v1903_v45 = vsel %vm2890_vm5, %v1877_v55, 0.0 }
 0x1db   : > { %v2103_v33 = vpack.c.bf16 %v1903_v45, %v1903_v45 }
 0x1dd   : > { %1984 = vst.msk [vmem:[%s2876_s30 + $0x3c] sm:$0xf] %vm1968_vm4, %v2103_v33 }
 0x1de PF: > { %s21_s23 = sadd.s32 1, %s2137_s23  }
 0x1df   : > { %p18_p9 = scmp.ge.s32.totalorder %s21_s23, 4  }
 0x1e1   :  { %20 = sbr.rel (!%p18_p9) target bundleno = 16 (0x10), region = 76 }

// kernel: mask_cnn_forward.6
= control target key start
LH: loop header
LB: loop body
LE: loop exit
PB: predicated region body
PF: predicated region fallthrough
CT: control target
= control target key end

     0   :  { %s2437_s0 = inlined_call_operand.vmem [shape: s32[2], index: 0, kind: input, shape index: {}]   ;;  %s2438_s1 = inlined_call_operand.vmem [shape: bf16[2,4,8,64], index: 1, kind: input, shape index: {}]   ;;  %s2439_s2 = inlined_call_operand.vmem [shape: bf16[3,3,64,128], index: 2, kind: input, shape index: {}]   ;;  %s2440_s3 = inlined_call_operand.vmem [shape: f32[1,128], index: 3, kind: input, shape index: {}]   ;;  %s2441_s4 = inlined_call_operand.vmem [shape: f32[1,128], index: 4, kind: input, shape index: {}]   ;;  %s2442_s5 = inlined_call_operand.vmem [shape: bf16[2,32,128], index: 5, kind: output, shape index: {}]  }
   0x1   :  { %s10_s20 = sshll.u32 %s2437_s0, 4  ;;  %s11_s20 = int_to_ptr.vmem [resolvable:$true] %s10_s20 }
   0x2   :  { %s2116_s21 = scalar_lea.vmem %s11_s20, 16  ;;  %p2121_p1 = scmp.lt.s32.totalorder %s11_s20, %s11_s20 }
   0x3   :  { %p2117_p0 = scmp.ne.s32.totalorder %s11_s20, %s2116_s21  ;;  %p2122_p2 = scmp.lt.s32.totalorder %s2116_s21, %s2116_s21 }
   0x5   :  { %p2123_p3 = por %p2122_p2, %p2121_p1 }
   0x7   :  { %p2124_p4 = pnand %p2123_p3, %p2117_p0 }
   0x9   :  { %2127 = shalt.err (!%p2124_p4)  }
   0xa   :  { %s2138_s22 = smov [#allocation5]  }
   0xb   :  { %13 = dma.vmem_to_smem %s11_s20, 16, %s2138_s22, [#allocation4] }
   0xc   :  { %2132 = dma.done.wait [#allocation4], 16 }
   0xd   :  { %2133 = vsyncadd [#allocation4], 4294967280 }
   0xe   :  { %15 = sfence }
   0xf   :  { %s2173_s23 = smov 0  }
  0x10 LB: > { %s2179_s0 = sadd.s32 4294967295, %s2136_s23   ;;  %p1692_p5 = scmp.ge.s32.totalorder %s2136_s23, 1  ;;  %s2136_s23 = sphi %s2173_s23, %s21_s23  }
  0x11   : > { %p169_p6 = scmp.lt.s32.totalorder %s2136_s23, 3 }
  0x13   : > { %p170_p7 = pnand %p1692_p5, %p169_p6 }
  0x14   : > { %v2074_v0 = vld [vmem:[%s2439_s2] sm:$0xff] (!%p170_p7)   ;;  %p195_p8 = scmp.lt.s32.totalorder (!%p170_p7), %s2179_s0, 1  ;;  %v2075_v1 = vld [vmem:[%s2439_s2 + $0x8] sm:$0xff] (!%p170_p7)   ;;  %vm207_vm0 = vcmask (!%p170_p7), 519168   ;;  %v2076_v3 = vld [vmem:[%s2439_s2 + $0x10] sm:$0xff] (!%p170_p7)   ;;  %v2139_v4 = vmov (!%p170_p7), 0  }
  0x15   : > { %173 = sbr.rel (%p170_p7) target bundleno = 354 (0x162), region = 36  ;;  %1924 = vmatprep.subr.bf16.mxu1 (!%p170_p7), %v2074_v0  ;;  %v2077_v2 = vld [vmem:[%s2439_s2 + $0x80] sm:$0xff] (!%p170_p7)   ;;  %208 = vst.msk [vmem:[#allocation2] sm:$0xf] (!%p170_p7), %vm207_vm0, %v2139_v4  ;;  %211 = vst.msk [vmem:[#allocation2 + $0x8] sm:$0xf] (!%p170_p7), %vm207_vm0, %v2139_v4 }
  0x16   : > { %1925 = vmatpush3.bf16.msra.mxu1 (!%p170_p7), %v2074_v0  ;;  %217 = vst.msk [vmem:[#allocation2 + $0x20] sm:$0xf] (!%p170_p7), %vm207_vm0, %v2139_v4  ;;  %213 = vst.msk [vmem:[#allocation2 + $0x10] sm:$0xf] (!%p170_p7), %vm207_vm0, %v2139_v4  ;;  %1972 = vmatprep.subr.bf16.mxu0 (!%p170_p7), %v2077_v2  ;;  %v2079_v5 = vld [vmem:[%s2439_s2 + $0x88] sm:$0xff] (!%p170_p7)   ;;  %v2078_v12 = vld [vmem:[%s2439_s2 + $0x18] sm:$0xff] (!%p170_p7)  }
  0x17   : > { %1926 = vmatprep.subr.bf16.mxu1 (!%p170_p7), %v2075_v1  ;;  %215 = vst.msk [vmem:[#allocation2 + $0x18] sm:$0xf] (!%p170_p7), %vm207_vm0, %v2139_v4  ;;  %219 = vst.msk [vmem:[#allocation2 + $0x28] sm:$0xf] (!%p170_p7), %vm207_vm0, %v2139_v4  ;;  %1973 = vmatpush3.bf16.msra.mxu0 (!%p170_p7), %v2077_v2  ;;  %vm267_vm1 = vsmask.f32 (!%p170_p7), 7938 }
  0x18   : > { %1974 = vmatprep.subr.bf16.mxu0 (!%p170_p7), %v2079_v5  ;;  %vm209_vm2 = vcmask (!%p170_p7), 516096   ;;  %vm2227_vm3 = vmand (!%p170_p7), %vm207_vm0, %vm267_vm1  ;;  %v2235_v26 = vld [vmem:[%s2439_s2 + $0x20] sm:$0xff] (!%p170_p7)   ;;  %v2083_v30 = vld [vmem:[%s2439_s2 + $0x90] sm:$0xff] (!%p170_p7)   ;;  %vm273_vm4 = vsmask.f32 (!%p170_p7), 256  ;;  %vm350_vm7 = vcmask (!%p170_p7), 523264  }
  0x19   : > { %212 = vst.msk [vmem:[#allocation2 + $0xc] sm:$0x1] (!%p170_p7), %vm209_vm2, %v2139_v4  ;;  %214 = vst.msk [vmem:[#allocation2 + $0x14] sm:$0x1] (!%p170_p7), %vm209_vm2, %v2139_v4  ;;  %v2085_v38 = vld [vmem:[%s2439_s2 + $0x98] sm:$0xff] (!%p170_p7)   ;;  %v2255_v43 = vld [vmem:[%s2439_s2 + $0xa0] sm:$0xff] (!%p170_p7)  }
  0x1a   : > { %1927 = vmatpush3.bf16.msra.mxu1 (!%p170_p7), %v2075_v1  ;;  %210 = vst.msk [vmem:[#allocation2 + $0x4] sm:$0x1] (!%p170_p7), %vm209_vm2, %v2139_v4  ;;  %216 = vst.msk [vmem:[#allocation2 + $0x1c] sm:$0x1] (!%p170_p7), %vm209_vm2, %v2139_v4  ;;  %vm422_vm6 = vsmask.f32 (!%p170_p7), 3328 }
  0x1b   : > { %1928 = vmatprep.subr.bf16.mxu1 (!%p170_p7), %v2076_v3  ;;  %218 = vst.msk [vmem:[#allocation2 + $0x24] sm:$0x1] (!%p170_p7), %vm209_vm2, %v2139_v4  ;;  %220 = vst.msk [vmem:[#allocation2 + $0x2c] sm:$0x1] (!%p170_p7), %vm209_vm2, %v2139_v4  ;;  %1975 = vmatpush3.bf16.msra.mxu0 (!%p170_p7), %v2079_v5  ;;  %vm423_vm8 = vsmask.f32 (!%p170_p7), 7440 }
  0x1c   : > { %s2191_s28 = scalar_select %p195_p8, %s2179_s0, 1  ;;  %v269_v24 = vld [vmem:[#allocation2 + $0x8] sm:$0xf]  ;;  %1976 = vmatprep.subr.bf16.mxu0 %v2083_v30  ;;  %vm274_vm5 = vmand %vm209_vm2, %vm273_vm4  ;;  %vm603_vm10 = vcmask 1042432   ;;  %vm604_vm11 = vcmask 1046532  }
  0x1d   : > { %v290_v25 = vld [vmem:[#allocation2 + $0x20] sm:$0xf]  ;;  %v278_v29 = vld [vmem:[#allocation2 + $0x10] sm:$0xf]  ;;  %v2084_v54 = vld [vmem:[%s2439_s2 + $0x28] sm:$0xff]   ;;  %s206_s10 = sld [smem:[#allocation5 + %s2179_s0]] }
  0x1e   : > { %s1853_s8 = sshll.u32 %s2191_s28, 4  ;;  %1929 = vmatpush3.bf16.msra.mxu1 %v2076_v3  ;;  %v284_v34 = vld [vmem:[#allocation2 + $0x18] sm:$0xf]  ;;  %vm2271_vm9 = vmor %vm422_vm6, %vm423_vm8 }
  0x1f   : > { %s199_s13 = scalar_lea.vmem %s2438_s1, %s1853_s8  ;;  %1930 = vmatprep.subr.bf16.mxu1 %v2078_v12  ;;  %1977 = vmatpush3.bf16.msra.mxu0 %v2083_v30  ;;  %vm2307_vm12 = vmor %vm603_vm10, %vm604_vm11  ;;  %s204_s16 = scalar_lea.vmem %s2442_s5, %s1853_s8 }
  0x20   : > { %v221_v6 = vld [vmem:[%s199_s13] sm:$0xf]  ;;  %v224_v7 = vld [vmem:[%s199_s13 + $0xc] sm:$0xf]  ;;  %v222_v13 = vld [vmem:[%s199_s13 + $0x4] sm:$0xf]  ;;  %1978 = vmatprep.subr.bf16.mxu0 %v2085_v38 }
  0x21   : > { %v226_v8 = vshrl.u32 %v221_v6, 16  ;;  %v229_v9 = vshll.u32 %v221_v6, 16  ;;  %v250_v10 = vshrl.u32 %v224_v7, 16  ;;  %v253_v11 = vshll.u32 %v224_v7, 16  ;;  %v223_v16 = vld [vmem:[%s199_s13 + $0x8] sm:$0xf] }
  0x22   : > { %v234_v17 = vshrl.u32 %v222_v13, 16  ;;  %v237_v18 = vshll.u32 %v222_v13, 16  ;;  %v242_v20 = vshrl.u32 %v223_v16, 16  ;;  %v245_v21 = vshll.u32 %v223_v16, 16  ;;  %1931 = vmatpush3.bf16.msra.mxu1 %v2078_v12  ;;  %v275_v42 = vld [vmem:[#allocation2 + $0xc] sm:$0x1] }
  0x23   : > { %v228_v14 = vrot.slane %v226_v8, 7  ;;  %v2217_v15 = vrot.slane %v250_v10, 7  ;;  %1936 = vmatprep.subr.bf16.mxu1 %v2235_v26  ;;  %v281_v44 = vld [vmem:[#allocation2 + $0x14] sm:$0x1]  ;;  %1979 = vmatpush3.bf16.msra.mxu0 %v2085_v38  ;;  %v287_v48 = vld [vmem:[#allocation2 + $0x1c] sm:$0x1] }
  0x24   : > { %v236_v27 = vrot.slane %v234_v17, 7  ;;  %v244_v28 = vrot.slane %v242_v20, 7  ;;  %v293_v49 = vld [vmem:[#allocation2 + $0x24] sm:$0x1]  ;;  %1984 = vmatprep.subr.bf16.mxu0 %v2255_v43  ;;  %v2086_v10 = vld [vmem:[%s2439_s2 + $0x30] sm:$0xff]  }
  0x25   : > { %v231_v22 = vor.u32 %v229_v9, %v228_v14  ;;  %v255_v23 = vor.u32 %v253_v11, %v2217_v15  ;;  %v232_v35 = vrot.slane %v228_v14, 4  ;;  %v256_v47 = vrot.slane %v2217_v15, 4  ;;  %v415_v30 = vld [vmem:[#allocation2 + $0x4] sm:$0x1]  ;;  %v2114_v15 = vld [vmem:[%s2439_s2 + $0x110] sm:$0xff]  }
  0x26   : > { %v239_v33 = vor.u32 %v237_v18, %v236_v27  ;;  %v247_v36 = vor.u32 %v245_v21, %v244_v28  ;;  %v240_v39 = vrot.slane %v236_v27, 4  ;;  %v248_v40 = vrot.slane %v244_v28, 4 }
  0x27   : > { %v270_v31 = vsel %vm2227_vm3, %v231_v22, %v269_v24  ;;  %v291_v32 = vsel %vm2227_vm3, %v255_v23, %v290_v25  ;;  %v276_v45 = vsel %vm274_vm5, %v232_v35, %v275_v42  ;;  %v294_v51 = vsel %vm274_vm5, %v256_v47, %v293_v49  ;;  %v414_v25 = vld [vmem:[#allocation2] sm:$0xf]  ;;  %v2089_v49 = vld [vmem:[%s2439_s2 + $0xa8] sm:$0xff]  }
  0x28   : > { %271 = vst [vmem:[#allocation2 + $0x8] sm:$0xf] %v270_v31  ;;  %292 = vst [vmem:[#allocation2 + $0x20] sm:$0xf] %v291_v32  ;;  %v279_v37 = vsel %vm2227_vm3, %v239_v33, %v278_v29  ;;  %v285_v41 = vsel %vm2227_vm3, %v247_v36, %v284_v34  ;;  %v282_v46 = vsel %vm274_vm5, %v240_v39, %v281_v44  ;;  %v2088_v29 = vld [vmem:[%s2439_s2 + $0x38] sm:$0xff]   ;;  %v426_v31 = vshrl.u32 %v414_v25, 16 }
  0x29   : > { %280 = vst [vmem:[#allocation2 + $0x10] sm:$0xf] %v279_v37  ;;  %286 = vst [vmem:[#allocation2 + $0x18] sm:$0xf] %v285_v41  ;;  %v288_v50 = vsel %vm274_vm5, %v248_v40, %v287_v48  ;;  %v429_v37 = vshll.u32 %v414_v25, 16  ;;  %v435_v41 = vshll.u32 %v415_v30, 16 }
  0x2a   : > { %277 = vst [vmem:[#allocation2 + $0xc] sm:$0x1] %v276_v45  ;;  %283 = vst [vmem:[#allocation2 + $0x14] sm:$0x1] %v282_v46  ;;  %v428_v40 = vrot.slane %v426_v31, 4  ;;  %v2093_v31 = vld [vmem:[%s2439_s2 + $0xb8] sm:$0xff]  }
  0x2b   : > { %289 = vst [vmem:[#allocation2 + $0x1c] sm:$0x1] %v288_v50  ;;  %295 = vst [vmem:[#allocation2 + $0x24] sm:$0x1] %v294_v51  ;;  %v431_v45 = vrot.slane %v429_v37, 5  ;;  %v437_v50 = vrot.slane %v435_v41, 5 }
  0x2f   : > { %v2080_v52 = vld [vmem:[#allocation2] ss:$8 sps:$4 sm:$0xff]  }
  0x30   : > { %v842_v53 = vld [vmem:[#allocation2 + $0x8] sm:$0xf]  ;;  %v848_v57 = vld [vmem:[#allocation2 + $0x20] sm:$0xf]  ;;  %1932 = vmatprep.mubr.msk.bf16.mxu1 %vm350_vm7, %v2080_v52  ;;  %v844_v58 = vld [vmem:[#allocation2 + $0x10] sm:$0xf] }
  0x31   : > { %v851_v55 = vshrl.u32 %v842_v53, 16  ;;  %v854_v56 = vshll.u32 %v842_v53, 16  ;;  %v893_v59 = vshrl.u32 %v848_v57, 16  ;;  %v896_v60 = vshll.u32 %v848_v57, 16  ;;  %v2082_v61 = vld [vmem:[#allocation2 + $0x10] ss:$8 sps:$4 sm:$0xff]  }
  0x32   : > { %v865_v0 = vshrl.u32 %v844_v58, 16  ;;  %v868_v1 = vshll.u32 %v844_v58, 16  ;;  %v846_v2 = vld [vmem:[#allocation2 + $0x18] sm:$0xf]  ;;  %1933 = vmatmul.mubr.msk.bf16.vlgmr.msra.gmra.mrb[0].mxu1 %vm350_vm7, %v2082_v61  ;;  %v843_v5 = vld [vmem:[#allocation2 + $0xc] sm:$0x1] }
  0x33   : > { %v853_v62 = vrot.slane %v851_v55, 4  ;;  %v856_v63 = vrot.slane %v854_v56, 5  ;;  %v895_v3 = vrot.slane %v893_v59, 4  ;;  %v898_v4 = vrot.slane %v896_v60, 5  ;;  %v845_v6 = vld [vmem:[#allocation2 + $0x14] sm:$0x1]  ;;  %1937 = vmatpush3.bf16.msra.mxu1 %v2235_v26 }
  0x34   : > { %v879_v8 = vshrl.u32 %v846_v2, 16  ;;  %v882_v9 = vshll.u32 %v846_v2, 16  ;;  %v860_v11 = vshll.u32 %v843_v5, 16  ;;  %v867_v12 = vrot.slane %v865_v0, 4  ;;  %1938 = vmatprep.subr.bf16.mxu1 %v2084_v54  ;;  %v847_v17 = vld [vmem:[#allocation2 + $0x1c] sm:$0x1] }
  0x35   : > { %v857_v7 = vor.u32 %v856_v63, %v853_v62  ;;  %v870_v13 = vrot.slane %v868_v1, 5  ;;  %v874_v14 = vshll.u32 %v845_v6, 16  ;;  %v849_v18 = vld [vmem:[#allocation2 + $0x24] sm:$0x1]  ;;  %v899_v20 = vor.u32 %v898_v4, %v895_v3  ;;  %v416_v35 = vld [vmem:[#allocation2 + $0x8] sm:$0xf] }
  0x36   : > { %v881_v19 = vrot.slane %v879_v8, 4  ;;  %v862_v21 = vrot.slane %v860_v11, 5  ;;  %v884_v24 = vrot.slane %v882_v9, 5  ;;  %v888_v26 = vshll.u32 %v847_v17, 16  ;;  %v417_v36 = vld [vmem:[#allocation2 + $0xc] sm:$0x1] }
  0x37   : > { %v858_v16 = vrot.slane %v857_v7, 4  ;;  %v871_v22 = vor.u32 %v870_v13, %v867_v12  ;;  %v876_v23 = vrot.slane %v874_v14, 5  ;;  %v900_v27 = vrot.slane %v899_v20, 4  ;;  %1939 = vmatpush3.bf16.msra.mxu1 %v2084_v54  ;;  %v418_v52 = vld [vmem:[#allocation2 + $0x10] sm:$0xf]  ;;  %v2293_v62 = vld [vmem:[%s2439_s2 + $0x40] sm:$0xff]  }
  0x38   : > { %v902_v28 = vshll.u32 %v849_v18, 16  ;;  %v885_v34 = vor.u32 %v884_v24, %v881_v19  ;;  %1940 = vmatprep.subr.bf16.mxu1 %v2086_v10  ;;  %v890_v38 = vrot.slane %v888_v26, 5  ;;  %v440_v46 = vshrl.u32 %v416_v35, 16  ;;  %v419_v53 = vld [vmem:[#allocation2 + $0x14] sm:$0x1] }
  0x39   : > { %v863_v32 = vsel %vm2271_vm9, %v858_v16, %v862_v21  ;;  %v872_v33 = vrot.slane %v871_v22, 4  ;;  %v443_v51 = vshll.u32 %v416_v35, 16  ;;  %v432_v55 = vor.u32 %v431_v45, %v428_v40  ;;  %v420_v58 = vld [vmem:[#allocation2 + $0x18] sm:$0xf]  ;;  %v421_v59 = vld [vmem:[#allocation2 + $0x1c] sm:$0x1] }
  0x3a   : > { %v904_v39 = vrot.slane %v902_v28, 5  ;;  %v886_v44 = vrot.slane %v885_v34, 4  ;;  %v442_v56 = vrot.slane %v440_v46, 4  ;;  %v449_v57 = vshll.u32 %v417_v36, 16  ;;  %v2091_v12 = vld [vmem:[%s2439_s2 + $0xb0] sm:$0xff]   ;;  %v2092_v34 = vld [vmem:[%s2439_s2 + $0x48] sm:$0xff]  }
  0x3b   : > { %v877_v42 = vsel %vm2271_vm9, %v872_v33, %v876_v23  ;;  %1941 = vmatpush3.bf16.msra.mxu1 %v2086_v10  ;;  %v445_v61 = vrot.slane %v443_v51, 5  ;;  %v454_v63 = vshrl.u32 %v418_v52, 16  ;;  %v457_v0 = vshll.u32 %v418_v52, 16  ;;  %v1012_v22 = vld [vmem:[#allocation2 + $0x8] sm:$0xe]  ;;  %v2095_v40 = vld [vmem:[%s2439_s2 + $0xc0] sm:$0xff]  }
  0x3c   : > { %v1765_v47 = vcombine.low %v863_v32, %v877_v42  ;;  %v905_v48 = vsel %vm2271_vm9, %v900_v27, %v904_v39  ;;  %v891_v54 = vsel %vm2271_vm9, %v886_v44, %v890_v38  ;;  %1942 = vmatprep.subr.bf16.mxu1 %v2088_v29  ;;  %v433_v1 = vrot.slane %v432_v55, 4  ;;  %v1013_v23 = vld [vmem:[#allocation2 + $0xc] sm:$0x1]  ;;  %v1014_v25 = vld [vmem:[#allocation2 + $0x10] sm:$0xe] }
  0x3d   : > { %v1766_v60 = vcombine.low %v891_v54, %v905_v48  ;;  %v451_v2 = vrot.slane %v449_v57, 5  ;;  %v463_v3 = vshll.u32 %v419_v53, 16  ;;  %v468_v4 = vshrl.u32 %v420_v58, 16  ;;  %v1015_v26 = vld [vmem:[#allocation2 + $0x14] sm:$0x1] }
  0x3e   : > { %1980 = vmatprep.mubr.msk.bf16.mxu0 %vm350_vm7, %v1765_v47  ;;  %v446_v5 = vor.u32 %v445_v61, %v442_v56  ;;  %v456_v6 = vrot.slane %v454_v63, 4  ;;  %v459_v7 = vrot.slane %v457_v0, 5  ;;  %v471_v8 = vshll.u32 %v420_v58, 16  ;;  %v1016_v36 = vld [vmem:[#allocation2 + $0x18] sm:$0xe]  ;;  %v2094_v56 = vld [vmem:[%s2439_s2 + $0x50] sm:$0xff]  }
  0x3f   : > { %1981 = vmatmul.mubr.msk.bf16.vlgmr.msra.gmra.mrb[0].mxu0 %vm350_vm7, %v1766_v60  ;;  %1943 = vmatpush3.bf16.msra.mxu1 %v2088_v29  ;;  %v465_v9 = vrot.slane %v463_v3, 5  ;;  %v470_v10 = vrot.slane %v468_v4, 4  ;;  %v477_v11 = vshll.u32 %v421_v59, 16  ;;  %v438_v13 = vsel %vm2271_vm9, %v433_v1, %v437_v50  ;;  %v1017_v37 = vld [vmem:[#allocation2 + $0x1c] sm:$0x1]  ;;  %v2097_v61 = vld [vmem:[%s2439_s2 + $0xc8] sm:$0xff]  }
  0x40   : > { %1985 = vmatpush3.bf16.msra.mxu0 %v2255_v43  ;;  %v447_v14 = vrot.slane %v446_v5, 4  ;;  %1948 = vmatprep.subr.bf16.mxu1 %v2293_v62  ;;  %v460_v16 = vor.u32 %v459_v7, %v456_v6  ;;  %v473_v17 = vrot.slane %v471_v8, 5  ;;  %v1773_v27 = vrot.slane %v1012_v22, 9  ;;  %v1018_v41 = vld [vmem:[#allocation2 + $0x20] sm:$0xe]  ;;  %v2096_v4 = vld [vmem:[%s2439_s2 + $0x58] sm:$0xff]  }
  0x41   : > { %1986 = vmatprep.subr.bf16.mxu0 %v2089_v49  ;;  %v479_v20 = vrot.slane %v477_v11, 5  ;;  %v1030_v28 = vrot.slane %v1013_v23, 5  ;;  %v1774_v32 = vrot.slane %v1014_v25, 9  ;;  %v1034_v33 = vrot.slane %v1015_v26, 5  ;;  %v1019_v42 = vld [vmem:[#allocation2 + $0x24] sm:$0x1] }
  0x42   : > { %v452_v43 = vsel %vm2271_vm9, %v447_v14, %v451_v2  ;;  %v461_v18 = vrot.slane %v460_v16, 4  ;;  %v474_v19 = vor.u32 %v473_v17, %v470_v10  ;;  %v1775_v44 = vrot.slane %v1016_v36, 9  ;;  %v587_v51 = vld [vmem:[#allocation2] sm:$0xe]  ;;  %v588_v53 = vld [vmem:[#allocation2 + $0x4] sm:$0x1] }
  0x43   : > { %v1713_v24 = vcombine.low %v438_v13, %v452_v43  ;;  %v1031_v35 = vsel %vm2307_vm12, %v1773_v27, %v1030_v28  ;;  %v1035_v39 = vsel %vm2307_vm12, %v1774_v32, %v1034_v33  ;;  %v1038_v45 = vrot.slane %v1017_v37, 5  ;;  %v589_v54 = vld [vmem:[#allocation2 + $0x8] sm:$0xe]  ;;  %v590_v55 = vld [vmem:[#allocation2 + $0xc] sm:$0x1]  ;;  %v2099_v11 = vld [vmem:[%s2439_s2 + $0xd0] sm:$0xff]  }
  0x44   : > { %1987 = vmatpush3.bf16.msra.mxu0 %v2089_v49  ;;  %v466_v29 = vsel %vm2271_vm9, %v461_v18, %v465_v9  ;;  %v475_v30 = vrot.slane %v474_v19, 4  ;;  %v1785_v47 = vcombine.low %v1031_v35, %v1035_v39  ;;  %v1776_v48 = vrot.slane %v1018_v41, 9  ;;  %v591_v0 = vld [vmem:[#allocation2 + $0x10] sm:$0xe]  ;;  %v592_v1 = vld [vmem:[#allocation2 + $0x14] sm:$0x1] }
  0x45   : > { %1988 = vmatprep.subr.bf16.mxu0 %v2091_v12  ;;  %1944 = vmatprep.mubr.msk.bf16.mxu1 %vm350_vm7, %v1713_v24  ;;  %v1042_v49 = vrot.slane %v1019_v42, 5  ;;  %v1039_v50 = vsel %vm2307_vm12, %v1775_v44, %v1038_v45  ;;  %v1721_v58 = vrot.slane %v587_v51, 9  ;;  %v608_v59 = vrot.slane %v588_v53, 5  ;;  %v593_v2 = vld [vmem:[#allocation2 + $0x18] sm:$0xe]  ;;  %v2098_v16 = vld [vmem:[%s2439_s2 + $0x60] sm:$0xff]  }
  0x46   : > { %v480_v38 = vsel %vm2271_vm9, %v475_v30, %v479_v20  ;;  %1992 = vmatprep.mubr.msk.bf16.mxu0 %vm350_vm7, %v1785_v47  ;;  %v1722_v60 = vrot.slane %v589_v54, 9  ;;  %v612_v63 = vrot.slane %v590_v55, 5  ;;  %v594_v3 = vld [vmem:[#allocation2 + $0x1c] sm:$0x1]  ;;  %v1723_v6 = vrot.slane %v591_v0, 9  ;;  %v2100_v19 = vld [vmem:[%s2439_s2 + $0x68] sm:$0xff]  }
  0x47   : > { %v1714_v46 = vcombine.low %v466_v29, %v480_v38  ;;  %v1043_v52 = vsel %vm2307_vm12, %v1776_v48, %v1042_v49  ;;  %v616_v7 = vrot.slane %v592_v1, 5  ;;  %v1724_v9 = vrot.slane %v593_v2, 9  ;;  %v2101_v17 = vld [vmem:[%s2439_s2 + $0xd8] sm:$0xff]   ;;  %v2108_v18 = vld [vmem:[#allocation2 + $0x8] ss:$8 sps:$4 sm:$0xff]   ;;  %v2104_v20 = vld [vmem:[%s2439_s2 + $0xe0] sm:$0xff]  }
  0x48   : > { %1989 = vmatpush3.bf16.msra.mxu0 %v2091_v12  ;;  %v1786_v57 = vcombine.low %v1039_v50, %v1043_v52  ;;  %v613_v5 = vsel %vm2307_vm12, %v1722_v60, %v612_v63  ;;  %v620_v10 = vrot.slane %v594_v3, 5  ;;  %v2103_v12 = vld [vmem:[#allocation2 + $0x10] ss:$8 sps:$4 sm:$0xff]   ;;  %v2105_v23 = vld [vmem:[#allocation2 + $0x20] ss:$8 sps:$4 sm:$0xff]  }
  0x49   : > { %1990 = vmatprep.subr.bf16.mxu0 %v2093_v31  ;;  %1945 = vmatmul.mubr.msk.bf16.vlgmr.msra.gmra.mrb[0].mxu1 %vm350_vm7, %v1714_v46  ;;  %v617_v13 = vsel %vm2307_vm12, %v1723_v6, %v616_v7  ;;  %v2102_v22 = vld [vmem:[%s2439_s2 + $0x70] sm:$0xff]   ;;  %v1267_v26 = vld [vmem:[#allocation2 + $0x18] sm:$0xf]  ;;  %v1268_v27 = vld [vmem:[#allocation2 + $0x1c] sm:$0x1] }
  0x4a   : > { %1949 = vmatpush3.bf16.msra.mxu1 %v2293_v62  ;;  %v609_v62 = vsel %vm2307_vm12, %v1721_v58, %v608_v59  ;;  %v621_v14 = vsel %vm2307_vm12, %v1724_v9, %v620_v10  ;;  %v1265_v24 = vld [vmem:[#allocation2 + $0x10] sm:$0xf]  ;;  %v1266_v25 = vld [vmem:[#allocation2 + $0x14] sm:$0x1]  ;;  %v2107_v32 = vld [vmem:[%s2439_s2 + $0xe8] sm:$0xff]   ;;  %v1291_v33 = vshll.u32 %v1267_v26, 16 }
  0x4b   : > { %1950 = vmatprep.subr.bf16.mxu1 %v2092_v34  ;;  %v1733_v8 = vcombine.low %v609_v62, %v613_v5  ;;  %v1734_v43 = vcombine.low %v617_v13, %v621_v14  ;;  %v1274_v28 = vshrl.u32 %v1265_v24, 16  ;;  %v1277_v29 = vshll.u32 %v1265_v24, 16  ;;  %v1269_v39 = vld [vmem:[#allocation2 + $0x20] sm:$0xf]  ;;  %v1270_v42 = vld [vmem:[#allocation2 + $0x24] sm:$0x1] }
  0x4c   : > { %1991 = vmatpush3.bf16.msra.mxu0 %v2093_v31  ;;  %v1283_v30 = vshll.u32 %v1266_v25, 16  ;;  %v1288_v31 = vshrl.u32 %v1267_v26, 16  ;;  %v1271_v44 = vld [vmem:[#allocation2 + $0x28] sm:$0xf]  ;;  %v2106_v45 = vld [vmem:[%s2439_s2 + $0x78] sm:$0xff]   ;;  %v1302_v48 = vshrl.u32 %v1269_v39, 16 }
  0x4d   : > { %1996 = vmatprep.subr.bf16.mxu0 %v2095_v40  ;;  %1956 = vmatprep.mubr.msk.bf16.mxu1 %vm350_vm7, %v1733_v8  ;;  %v1276_v35 = vrot.slane %v1274_v28, 4  ;;  %v1279_v36 = vrot.slane %v1277_v29, 5  ;;  %v1272_v47 = vld [vmem:[#allocation2 + $0x2c] sm:$0x1]  ;;  %v1305_v49 = vshll.u32 %v1269_v39, 16  ;;  %v1311_v50 = vshll.u32 %v1270_v42, 16 }
  0x4e   : > { %1951 = vmatpush3.bf16.msra.mxu1 %v2092_v34  ;;  %v1297_v34 = vshll.u32 %v1268_v27, 16  ;;  %v1285_v37 = vrot.slane %v1283_v30, 5  ;;  %v1290_v38 = vrot.slane %v1288_v31, 4  ;;  %v2110_v51 = vld [vmem:[%s2439_s2 + $0xf0] sm:$0xff]   ;;  %v1316_v53 = vshrl.u32 %v1271_v44, 16  ;;  %v2111_v60 = vld [vmem:[%s2439_s2 + $0xf8] sm:$0xff]  }
  0x4f   : > { %1993 = vmatmul.mubr.msk.bf16.vlgmr.msra.gmra.mrb[0].mxu0 %vm350_vm7, %v1786_v57  ;;  %1952 = vmatprep.subr.bf16.mxu1 %v2094_v56  ;;  %v1280_v46 = vor.u32 %v1279_v36, %v1276_v35  ;;  %v1319_v54 = vshll.u32 %v1271_v44, 16  ;;  %v1325_v55 = vshll.u32 %v1272_v47, 16  ;;  %v1304_v57 = vrot.slane %v1302_v48, 4  ;;  %v2109_v1 = vld [vmem:[#allocation2 + $0x18] ss:$8 sps:$4 sm:$0xff]   ;;  %v2113_v25 = vld [vmem:[%s2439_s2 + $0x108] sm:$0xff]  }
  0x50   : > { %1997 = vmatpush3.bf16.msra.mxu0 %v2095_v40  ;;  %2004 = vmatprep.mubr.msk.bf16.mxu0 %vm350_vm7, %v2103_v12  ;;  %v1293_v40 = vrot.slane %v1291_v33, 5  ;;  %v1299_v41 = vrot.slane %v1297_v34, 5  ;;  %v1307_v58 = vrot.slane %v1305_v49, 5  ;;  %v1313_v59 = vrot.slane %v1311_v50, 5  ;;  %v1435_v6 = vld [vmem:[#allocation2 + $0x10] sm:$0xe] }
  0x51   : > { %1998 = vmatprep.subr.bf16.mxu0 %v2097_v61  ;;  %v1318_v63 = vrot.slane %v1316_v53, 4  ;;  %v1321_v0 = vrot.slane %v1319_v54, 5  ;;  %v1327_v62 = vrot.slane %v1325_v55, 5  ;;  %v1436_v7 = vld [vmem:[#allocation2 + $0x14] sm:$0x1]  ;;  %v1825_v12 = vrot.slane %v1435_v6, 9 }
  0x52   : > { %1953 = vmatpush3.bf16.msra.mxu1 %v2094_v56  ;;  %v1294_v52 = vor.u32 %v1293_v40, %v1290_v38  ;;  %v1281_v56 = vrot.slane %v1280_v46, 4  ;;  %v1308_v3 = vor.u32 %v1307_v58, %v1304_v57  ;;  %v1437_v8 = vld [vmem:[#allocation2 + $0x18] sm:$0xe]  ;;  %v1453_v13 = vrot.slane %v1436_v7, 5  ;;  %v1439_v26 = vld [vmem:[#allocation2 + $0x20] sm:$0xe] }
  0x53   : > { %1954 = vmatprep.subr.bf16.mxu1 %v2096_v4  ;;  %v1322_v5 = vor.u32 %v1321_v0, %v1318_v63  ;;  %v1440_v27 = vld [vmem:[#allocation2 + $0x24] sm:$0x1]  ;;  %v1441_v28 = vld [vmem:[#allocation2 + $0x28] sm:$0xe]  ;;  %v1442_v29 = vld [vmem:[#allocation2 + $0x2c] sm:$0x1]  ;;  %v1605_v57 = vstv %s206_s10 }
  0x54   : > { %1999 = vmatpush3.bf16.msra.mxu0 %v2097_v61  ;;  %v1295_v61 = vrot.slane %v1294_v52, 4  ;;  %v1286_v2 = vsel %vm2271_vm9, %v1281_v56, %v1285_v37  ;;  %v1309_v10 = vrot.slane %v1308_v3, 4  ;;  %v1827_v30 = vrot.slane %v1439_v26, 9  ;;  %v2115_v34 = vld [vmem:[%s2439_s2 + $0x118] sm:$0xff]   ;;  %v1845_v44 = vld [vmem:[%s2440_s3] ss:$0 sm:$0xff] }
  0x55   : > { %2000 = vmatprep.subr.bf16.mxu0 %v2099_v11  ;;  %v1323_v14 = vrot.slane %v1322_v5, 4  ;;  %v1461_v31 = vrot.slane %v1440_v27, 5  ;;  %v1465_v33 = vrot.slane %v1442_v29, 5  ;;  %v1846_v21 = vld [vmem:[%s2441_s4] ss:$0 sm:$0xff] }
  0x56   : > { %1955 = vmatpush3.bf16.msra.mxu1 %v2096_v4  ;;  %v1300_v4 = vsel %vm2271_vm9, %v1295_v61, %v1299_v41 }
  0x57   : > { %1960 = vmatprep.subr.bf16.mxu1 %v2098_v16  ;;  %v1817_v9 = vcombine.low %v1286_v2, %v1300_v4  ;;  %v1462_v35 = vsel %vm2307_vm12, %v1827_v30, %v1461_v31 }
  0x58   : > { %2001 = vmatpush3.bf16.msra.mxu0 %v2099_v11  ;;  %v1438_v11 = vld [vmem:[#allocation2 + $0x1c] sm:$0x1] }
  0x59   : > { %2002 = vmatprep.subr.bf16.mxu0 %v2101_v17  ;;  %1957 = vmatmul.mubr.msk.bf16.vlgmr.msra.gmra.mrb[0].mxu1 %vm350_vm7, %v1734_v43  ;;  %v1314_v43 = vsel %vm2271_vm9, %v1309_v10, %v1313_v59 }
  0x5a   : > { %1961 = vmatpush3.bf16.msra.mxu1 %v2098_v16  ;;  %1968 = vmatprep.mubr.msk.bf16.mxu1 %vm350_vm7, %v2108_v18  ;;  %v1826_v16 = vrot.slane %v1437_v8, 9  ;;  %v2112_v18 = vld [vmem:[%s2439_s2 + $0x100] sm:$0xff]  }
  0x5b   : > { %1962 = vmatprep.subr.bf16.mxu1 %v2100_v19 }
  0x5c   : > { %2003 = vmatpush3.bf16.msra.mxu0 %v2101_v17  ;;  %v1457_v17 = vrot.slane %v1438_v11, 5 }
  0x5d   : > { %2008 = vmatprep.subr.bf16.mxu0 %v2104_v20 }
  0x5e   : > { %1963 = vmatpush3.bf16.msra.mxu1 %v2100_v19  ;;  %v1328_v19 = vsel %vm2271_vm9, %v1323_v14, %v1327_v62 }
  0x5f   : > { %2005 = vmatmul.mubr.msk.bf16.vlgmr.msra.gmra.mrb[0].mxu0 %vm350_vm7, %v2105_v23  ;;  %1964 = vmatprep.subr.bf16.mxu1 %v2102_v22  ;;  %v1818_v23 = vcombine.low %v1314_v43, %v1328_v19 }
  0x60   : > { %2009 = vmatpush3.bf16.msra.mxu0 %v2104_v20  ;;  %2016 = vmatprep.mubr.msk.bf16.mxu0 %vm350_vm7, %v1817_v9  ;;  %v1454_v20 = vsel %vm2307_vm12, %v1825_v12, %v1453_v13 }
  0x61   : > { %2010 = vmatprep.subr.bf16.mxu0 %v2107_v32 }
  0x62   : > { %1965 = vmatpush3.bf16.msra.mxu1 %v2102_v22  ;;  %v1458_v22 = vsel %vm2307_vm12, %v1826_v16, %v1457_v17 }
  0x63   : > { %1966 = vmatprep.subr.bf16.mxu1 %v2106_v45  ;;  %v1837_v24 = vcombine.low %v1454_v20, %v1458_v22 }
  0x64   : > { %2011 = vmatpush3.bf16.msra.mxu0 %v2107_v32  ;;  %v1828_v32 = vrot.slane %v1441_v28, 9 }
  0x65   : > { %2012 = vmatprep.subr.bf16.mxu0 %v2110_v51 }
  0x66   : > { %1967 = vmatpush3.bf16.msra.mxu1 %v2106_v45  ;;  %v1466_v36 = vsel %vm2307_vm12, %v1828_v32, %v1465_v33  ;;  %v1603_v45 = vlaneseq }
  0x67   : > { %v1838_v37 = vcombine.low %v1462_v35, %v1466_v36 }
  0x68   : > { %2013 = vmatpush3.bf16.msra.mxu0 %v2110_v51  ;;  %v1604_v53 = vshrl.u32 %v1603_v45, 7 }
  0x69   : > { %2014 = vmatprep.subr.bf16.mxu0 %v2111_v60  ;;  %1969 = vmatmul.mubr.msk.bf16.vlgmr.msra.gmra.mrb[0].mxu1 %vm350_vm7, %v2109_v1 }
  0x6a   : > { %vm1606_vm13 = vcmp.lt.s32.totalorder %v1604_v53, %v1605_v57 }
  0x6c   : > { %2015 = vmatpush3.bf16.msra.mxu0 %v2111_v60 }
  0x6d   : > { %2020 = vmatprep.subr.bf16.mxu0 %v2112_v18 }
  0x6f   : > { %2017 = vmatmul.mubr.msk.bf16.vlgmr.msra.gmra.mrb[0].mxu0 %vm350_vm7, %v1818_v23 }
  0x70   : > { %2021 = vmatpush3.bf16.msra.mxu0 %v2112_v18  ;;  %2028 = vmatprep.mubr.msk.bf16.mxu0 %vm350_vm7, %v1837_v24 }
  0x71   : > { %2022 = vmatprep.subr.bf16.mxu0 %v2113_v25 }
  0x74   : > { %2023 = vmatpush3.bf16.msra.mxu0 %v2113_v25 }
  0x75   : > { %2024 = vmatprep.subr.bf16.mxu0 %v2114_v15 }
  0x78   : > { %2025 = vmatpush3.bf16.msra.mxu0 %v2114_v15 }
  0x79   : > { %2026 = vmatprep.subr.bf16.mxu0 %v2115_v34 }
  0x7c   : > { %2027 = vmatpush3.bf16.msra.mxu0 %v2115_v34 }
  0x7f   : > { %2029 = vmatmul.mubr.msk.bf16.vlgmr.msra.gmra.mrb[0].mxu0 %vm350_vm7, %v1838_v37 }
 0x13c   : > { %v1970_v38 = vpop.f32.mrb[0].mxu1 }
 0x13d   : > { %v819_v39 = vpop.f32.mrb[1].mxu1 }
 0x13e   : > { %v1971_v40 = vpop.f32.mrb[2].mxu1 }
 0x13f   : > { %v822_v41 = vpop.f32.mrb[3].mxu1 }
 0x152   : > { %v2030_v42 = vpop.f32.mrb[0].mxu0 }
 0x153   : > { %v2032_v46 = vadd.f32 %v2030_v42, %v1970_v38  ;;  %v1550_v47 = vpop.f32.mrb[1].mxu0 }
 0x154   : > { %v2033_v48 = vadd.f32 %v1550_v47, %v819_v39  ;;  %v2031_v49 = vpop.f32.mrb[2].mxu0 }
 0x155   : > { %v1586_v50 = vmul.f32 %v2032_v46, %v1845_v44  ;;  %v2034_v51 = vadd.f32 %v2031_v49, %v1971_v40  ;;  %v1553_v52 = vpop.f32.mrb[3].mxu0 }
 0x156   : > { %v1584_v54 = vmul.f32 %v2033_v48, %v1845_v44  ;;  %v2035_v55 = vadd.f32 %v1553_v52, %v822_v41 }
 0x157   : > { %v1597_v56 = vadd.f32 %v1846_v21, %v1586_v50  ;;  %v1587_v58 = vmul.f32 %v2034_v51, %v1845_v44 }
 0x158   : > { %v1595_v59 = vadd.f32 %v1846_v21, %v1584_v54  ;;  %v1585_v60 = vmul.f32 %v2035_v55, %v1845_v44 }
 0x159   : > { %v1601_v61 = vmax.f32 %v1597_v56, 0.0  ;;  %v1598_v63 = vadd.f32 %v1846_v21, %v1587_v58 }
 0x15a   : > { %v1599_v0 = vmax.f32 %v1595_v59, 0.0  ;;  %v1596_v62 = vadd.f32 %v1846_v21, %v1585_v60 }
 0x15b   : > { %v1602_v1 = vmax.f32 %v1598_v63, 0.0  ;;  %v1611_v3 = vsel %vm1606_vm13, %v1601_v61, 0.0 }
 0x15c   : > { %v1600_v2 = vmax.f32 %v1596_v62, 0.0  ;;  %v1609_v5 = vsel %vm1606_vm13, %v1599_v0, 0.0 }
 0x15d   : > { %v1612_v4 = vsel %vm1606_vm13, %v1602_v1, 0.0 }
 0x15e   : > { %v1867_v6 = vpack.c.bf16 %v1612_v4, %v1611_v3  ;;  %v1610_v7 = vsel %vm1606_vm13, %v1600_v2, 0.0 }
 0x15f   : > { %v1862_v8 = vpack.c.bf16 %v1610_v7, %v1609_v5 }
 0x160   : > { %1869 = vst [vmem:[%s204_s16 + $0x8] sm:$0xff] %v1867_v6  }
 0x161   : > { %1863 = vst [vmem:[%s204_s16] sm:$0xff] %v1862_v8  }
 0x162 PF: > { %s21_s23 = sadd.s32 1, %s2136_s23  }
 0x163   : > { %p18_p9 = scmp.ge.s32.totalorder %s21_s23, 4  }
 0x165   :  { %20 = sbr.rel (!%p18_p9) target bundleno = 16 (0x10), region = 76 }

// kernel: mask_cnn_forward.7
= control target key start
LH: loop header
LB: loop body
LE: loop exit
PB: predicated region body
PF: predicated region fallthrough
CT: control target
= control target key end

     0   :  { %s2961_s0 = inlined_call_operand.vmem [shape: s32[2], index: 0, kind: input, shape index: {}]   ;;  %s2962_s1 = inlined_call_operand.vmem [shape: bf16[2,4,8,128], index: 1, kind: input, shape index: {}]   ;;  %s2963_s2 = inlined_call_operand.vmem [shape: bf16[3,3,128,128], index: 2, kind: input, shape index: {}]   ;;  %s2964_s3 = inlined_call_operand.vmem [shape: f32[1,128], index: 3, kind: input, shape index: {}]   ;;  %s2965_s4 = inlined_call_operand.vmem [shape: f32[1,128], index: 4, kind: input, shape index: {}]   ;;  %s2966_s5 = inlined_call_operand.vmem [shape: f32[2,8,128], index: 5, kind: output, shape index: {}]  }
   0x1   :  { %s10_s20 = sshll.u32 %s2961_s0, 4  ;;  %s11_s20 = int_to_ptr.vmem [resolvable:$true] %s10_s20 }
   0x2   :  { %s2555_s21 = scalar_lea.vmem %s11_s20, 16  ;;  %p2560_p1 = scmp.lt.s32.totalorder %s11_s20, %s11_s20 }
   0x3   :  { %p2556_p0 = scmp.ne.s32.totalorder %s11_s20, %s2555_s21  ;;  %p2561_p2 = scmp.lt.s32.totalorder %s2555_s21, %s2555_s21 }
   0x5   :  { %p2562_p3 = por %p2561_p2, %p2560_p1 }
   0x7   :  { %p2563_p4 = pnand %p2562_p3, %p2556_p0 }
   0x9   :  { %2566 = shalt.err (!%p2563_p4)  }
   0xa   :  { %s2577_s22 = smov [#allocation6]  }
   0xb   :  { %13 = dma.vmem_to_smem %s11_s20, 16, %s2577_s22, [#allocation5] }
   0xc   :  { %2571 = dma.done.wait [#allocation5], 16 }
   0xd   :  { %2572 = vsyncadd [#allocation5], 4294967280 }
   0xe   :  { %15 = sfence }
   0xf   :  { %s2612_s23 = smov 0  }
  0x10 LB: > { %s2618_s0 = sadd.s32 4294967295, %s2575_s23   ;;  %p1925_p5 = scmp.ge.s32.totalorder %s2575_s23, 1  ;;  %s2575_s23 = sphi %s2612_s23, %s21_s23  }
  0x11   : > { %p169_p6 = scmp.lt.s32.totalorder %s2575_s23, 3 }
  0x13   : > { %p170_p7 = pnand %p1925_p5, %p169_p6 }
  0x14   : > { %v2477_v0 = vld [vmem:[%s2963_s2] sm:$0xff] (!%p170_p7)   ;;  %v2479_v2 = vld [vmem:[%s2963_s2 + $0x8] sm:$0xff] (!%p170_p7)   ;;  %p194_p8 = scmp.lt.s32.totalorder (!%p170_p7), %s2618_s0, 1  ;;  %v2578_v3 = vmov (!%p170_p7), 0   ;;  %v2481_v5 = vld [vmem:[%s2963_s2 + $0x10] sm:$0xff] (!%p170_p7)   ;;  %vm262_vm0 = vcmask (!%p170_p7), 1043456  }
  0x15   : > { %173 = sbr.rel (%p170_p7) target bundleno = 429 (0x1ad), region = 36  ;;  %v2478_v1 = vld [vmem:[%s2963_s2 + $0x100] sm:$0xff] (!%p170_p7)   ;;  %2255 = vmatprep.subr.bf16.mxu1 (!%p170_p7), %v2477_v0  ;;  %205 = vst [vmem:[#allocation2] sm:$0xf] (!%p170_p7), %v2578_v3  ;;  %207 = vst [vmem:[#allocation2 + $0x8] sm:$0xf] (!%p170_p7), %v2578_v3 }
  0x16   : > { %209 = vst [vmem:[#allocation2 + $0x10] sm:$0xf] (!%p170_p7), %v2578_v3  ;;  %213 = vst [vmem:[#allocation2 + $0x20] sm:$0xf] (!%p170_p7), %v2578_v3  ;;  %2335 = vmatprep.subr.bf16.mxu0 (!%p170_p7), %v2478_v1  ;;  %2256 = vmatpush3.bf16.msra.mxu1 (!%p170_p7), %v2477_v0  ;;  %v2480_v4 = vld [vmem:[%s2963_s2 + $0x108] sm:$0xff] (!%p170_p7)   ;;  %v2482_v6 = vld [vmem:[%s2963_s2 + $0x110] sm:$0xff] (!%p170_p7)  }
  0x17   : > { %206 = vst [vmem:[#allocation2 + $0x4] sm:$0x1] (!%p170_p7), %v2578_v3  ;;  %208 = vst [vmem:[#allocation2 + $0xc] sm:$0x1] (!%p170_p7), %v2578_v3  ;;  %2336 = vmatpush3.bf16.msra.mxu0 (!%p170_p7), %v2478_v1  ;;  %2257 = vmatprep.subr.bf16.mxu1 (!%p170_p7), %v2479_v2  ;;  %v2483_v7 = vld [vmem:[%s2963_s2 + $0x18] sm:$0xff] (!%p170_p7)   ;;  %v2485_v9 = vld [vmem:[%s2963_s2 + $0x20] sm:$0xff] (!%p170_p7)  }
  0x18   : > { %210 = vst [vmem:[#allocation2 + $0x14] sm:$0x1] (!%p170_p7), %v2578_v3  ;;  %211 = vst [vmem:[#allocation2 + $0x18] sm:$0xf] (!%p170_p7), %v2578_v3  ;;  %2337 = vmatprep.subr.bf16.mxu0 (!%p170_p7), %v2480_v4  ;;  %v2484_v8 = vld [vmem:[%s2963_s2 + $0x118] sm:$0xff] (!%p170_p7)   ;;  %v2486_v10 = vld [vmem:[%s2963_s2 + $0x120] sm:$0xff] (!%p170_p7)  }
  0x19   : > { %212 = vst [vmem:[#allocation2 + $0x1c] sm:$0x1] (!%p170_p7), %v2578_v3  ;;  %214 = vst [vmem:[#allocation2 + $0x24] sm:$0x1] (!%p170_p7), %v2578_v3  ;;  %v2487_v11 = vld [vmem:[%s2963_s2 + $0x28] sm:$0xff] (!%p170_p7)   ;;  %v2489_v20 = vld [vmem:[%s2963_s2 + $0x30] sm:$0xff] (!%p170_p7)  }
  0x1a   : > { %215 = vst [vmem:[#allocation2 + $0x28] sm:$0xf] (!%p170_p7), %v2578_v3  ;;  %216 = vst [vmem:[#allocation2 + $0x2c] sm:$0x1] (!%p170_p7), %v2578_v3  ;;  %2258 = vmatpush3.bf16.msra.mxu1 (!%p170_p7), %v2479_v2  ;;  %v2488_v15 = vld [vmem:[%s2963_s2 + $0x128] sm:$0xff] (!%p170_p7)   ;;  %v2490_v25 = vld [vmem:[%s2963_s2 + $0x130] sm:$0xff] (!%p170_p7)  }
  0x1b   : > { %2338 = vmatpush3.bf16.msra.mxu0 (!%p170_p7), %v2480_v4  ;;  %2259 = vmatprep.subr.bf16.mxu1 (!%p170_p7), %v2481_v5  ;;  %vm263_vm1 = vsmask.f32 (!%p170_p7), 7938  ;;  %vm268_vm3 = vcmask (!%p170_p7), 1040384   ;;  %vm269_vm4 = vsmask.f32 (!%p170_p7), 256  ;;  %v2491_v42 = vld [vmem:[%s2963_s2 + $0x38] sm:$0xff] (!%p170_p7)  }
  0x1c   : > { %s2644_s11 = scalar_select %p194_p8, %s2618_s0, 1  ;;  %2339 = vmatprep.subr.bf16.mxu0 %v2482_v6  ;;  %v265_v23 = vld [vmem:[#allocation2 + $0x8] sm:$0xf]  ;;  %vm2680_vm2 = vmand %vm262_vm0, %vm263_vm1  ;;  %v2492_v47 = vld [vmem:[%s2963_s2 + $0x138] sm:$0xff]   ;;  %vm445_vm6 = vsmask.f32 3328 }
  0x1d   : > { %v274_v24 = vld [vmem:[#allocation2 + $0x10] sm:$0xf]  ;;  %v286_v28 = vld [vmem:[#allocation2 + $0x20] sm:$0xf]  ;;  %vm2688_vm5 = vmand %vm268_vm3, %vm269_vm4  ;;  %vm446_vm7 = vsmask.f32 7440 }
  0x1e   : > { %s2164_s16 = sshll.u32 %s2644_s11, 4  ;;  %2260 = vmatpush3.bf16.msra.mxu1 %v2481_v5  ;;  %v271_v35 = vld [vmem:[#allocation2 + $0xc] sm:$0x1]  ;;  %v2708_v52 = vld [vmem:[%s2963_s2 + $0x40] sm:$0xff]   ;;  %vm2725_vm8 = vmor %vm445_vm6, %vm446_vm7  ;;  %vm654_vm9 = vcmask 1042432   ;;  %vm655_vm10 = vcmask 1046532  }
  0x1f   : > { %2340 = vmatpush3.bf16.msra.mxu0 %v2482_v6  ;;  %2261 = vmatprep.subr.bf16.mxu1 %v2483_v7  ;;  %s2662_s24 = scalar_lea.vmem %s2962_s1, %s2164_s16  ;;  %v277_v36 = vld [vmem:[#allocation2 + $0x14] sm:$0x1]  ;;  %v280_v50 = vld [vmem:[#allocation2 + $0x18] sm:$0xf]  ;;  %v2715_v56 = vld [vmem:[%s2963_s2 + $0x140] sm:$0xff]   ;;  %s204_s9 = sld [smem:[#allocation6 + %s2618_s0]] }
  0x20   : > { %2341 = vmatprep.subr.bf16.mxu0 %v2484_v8  ;;  %v217_v12 = vld [vmem:[%s2662_s24] sm:$0xf]  ;;  %v218_v13 = vld [vmem:[%s2662_s24 + $0x4] sm:$0xf]  ;;  %v220_v14 = vld [vmem:[%s2662_s24 + $0xc] sm:$0xf] }
  0x21   : > { %v222_v16 = vshrl.u32 %v217_v12, 16  ;;  %v225_v17 = vshll.u32 %v217_v12, 16  ;;  %v230_v18 = vshrl.u32 %v218_v13, 16  ;;  %v233_v19 = vshll.u32 %v218_v13, 16  ;;  %v219_v46 = vld [vmem:[%s2662_s24 + $0x8] sm:$0xf]  ;;  %vm2758_vm11 = vmor %vm654_vm9, %vm655_vm10 }
  0x22   : > { %2262 = vmatpush3.bf16.msra.mxu1 %v2483_v7  ;;  %v246_v21 = vshrl.u32 %v220_v14, 16  ;;  %v249_v22 = vshll.u32 %v220_v14, 16  ;;  %v238_v48 = vshrl.u32 %v219_v46, 16  ;;  %v241_v49 = vshll.u32 %v219_v46, 16  ;;  %v289_v51 = vld [vmem:[#allocation2 + $0x24] sm:$0x1] }
  0x23   : > { %2342 = vmatpush3.bf16.msra.mxu0 %v2484_v8  ;;  %2263 = vmatprep.subr.bf16.mxu1 %v2485_v9  ;;  %v224_v26 = vrot.slane %v222_v16, 7  ;;  %v232_v27 = vrot.slane %v230_v18, 7  ;;  %v283_v55 = vld [vmem:[#allocation2 + $0x1c] sm:$0x1]  ;;  %s1928_s0 = sshll.u32 %s2644_s11, 3 }
  0x24   : > { %2343 = vmatprep.subr.bf16.mxu0 %v2486_v10  ;;  %v248_v29 = vrot.slane %v246_v21, 7  ;;  %v240_v53 = vrot.slane %v238_v48, 7  ;;  %v2501_v46 = vld [vmem:[%s2963_s2 + $0x58] sm:$0xff]   ;;  %v438_v48 = vld [vmem:[#allocation2 + $0x4] sm:$0x1]  ;;  %s202_s18 = scalar_lea.vmem %s2966_s5, %s1928_s0 }
  0x25   : > { %v227_v31 = vor.u32 %v225_v17, %v224_v26  ;;  %v228_v32 = vrot.slane %v224_v26, 4  ;;  %v235_v33 = vor.u32 %v233_v19, %v232_v27  ;;  %v236_v34 = vrot.slane %v232_v27, 4  ;;  %v2497_v26 = vld [vmem:[%s2963_s2 + $0x48] sm:$0xff]   ;;  %s2161_s15 = sshll.u32 %s204_s9, 1 }
  0x26   : > { %2264 = vmatpush3.bf16.msra.mxu1 %v2485_v9  ;;  %v251_v37 = vor.u32 %v249_v22, %v248_v29  ;;  %v252_v41 = vrot.slane %v248_v29, 4  ;;  %v243_v57 = vor.u32 %v241_v49, %v240_v53  ;;  %v244_v58 = vrot.slane %v240_v53, 4 }
  0x27   : > { %2344 = vmatpush3.bf16.msra.mxu0 %v2486_v10  ;;  %2265 = vmatprep.subr.bf16.mxu1 %v2487_v11  ;;  %v266_v38 = vsel %vm2680_vm2, %v227_v31, %v265_v23  ;;  %v275_v39 = vsel %vm2680_vm2, %v235_v33, %v274_v24  ;;  %v272_v44 = vsel %vm2688_vm5, %v228_v32, %v271_v35 }
  0x28   : > { %2345 = vmatprep.subr.bf16.mxu0 %v2488_v15  ;;  %267 = vst [vmem:[#allocation2 + $0x8] sm:$0xf] %v266_v38  ;;  %v287_v43 = vsel %vm2680_vm2, %v251_v37, %v286_v28  ;;  %276 = vst [vmem:[#allocation2 + $0x10] sm:$0xf] %v275_v39  ;;  %v278_v45 = vsel %vm2688_vm5, %v236_v34, %v277_v36  ;;  %v290_v54 = vsel %vm2688_vm5, %v252_v41, %v289_v51  ;;  %v2499_v41 = vld [vmem:[%s2963_s2 + $0x50] sm:$0xff]  }
  0x29   : > { %288 = vst [vmem:[#allocation2 + $0x20] sm:$0xf] %v287_v43  ;;  %273 = vst [vmem:[#allocation2 + $0xc] sm:$0x1] %v272_v44  ;;  %v281_v61 = vsel %vm2680_vm2, %v243_v57, %v280_v50  ;;  %v284_v62 = vsel %vm2688_vm5, %v244_v58, %v283_v55  ;;  %v2498_v57 = vld [vmem:[%s2963_s2 + $0x148] sm:$0xff]  }
  0x2a   : > { %2266 = vmatpush3.bf16.msra.mxu1 %v2487_v11  ;;  %279 = vst [vmem:[#allocation2 + $0x14] sm:$0x1] %v278_v45  ;;  %291 = vst [vmem:[#allocation2 + $0x24] sm:$0x1] %v290_v54  ;;  %v458_v54 = vshll.u32 %v438_v48, 16  ;;  %v2506_v48 = vld [vmem:[%s2963_s2 + $0x168] sm:$0xff]  }
  0x2b   : > { %2346 = vmatpush3.bf16.msra.mxu0 %v2488_v15  ;;  %2267 = vmatprep.subr.bf16.mxu1 %v2489_v20  ;;  %282 = vst [vmem:[#allocation2 + $0x18] sm:$0xf] %v281_v61  ;;  %285 = vst [vmem:[#allocation2 + $0x1c] sm:$0x1] %v284_v62  ;;  %v2503_v61 = vld [vmem:[%s2963_s2 + $0x60] sm:$0xff]  }
  0x2c   : > { %2347 = vmatprep.subr.bf16.mxu0 %v2490_v25 }
  0x2e   : > { %2268 = vmatpush3.bf16.msra.mxu1 %v2489_v20  ;;  %v2548_v20 = vld [vmem:[%s2963_s2 + $0x208] sm:$0xff]  }
  0x2f   : > { %2348 = vmatpush3.bf16.msra.mxu0 %v2490_v25  ;;  %2269 = vmatprep.subr.bf16.mxu1 %v2491_v42  ;;  %v2493_v59 = vld [vmem:[#allocation2] ss:$8 sps:$4 sm:$0xff]   ;;  %v951_v0 = vld [vmem:[#allocation2 + $0x10] sm:$0xf] }
  0x30   : > { %2349 = vmatprep.subr.bf16.mxu0 %v2492_v47  ;;  %v949_v60 = vld [vmem:[#allocation2 + $0x8] sm:$0xf]  ;;  %v950_v63 = vld [vmem:[#allocation2 + $0xc] sm:$0x1]  ;;  %2271 = vmatprep.mubr.bf16.mxu1 %v2493_v59  ;;  %v972_v5 = vshrl.u32 %v951_v0, 16  ;;  %v975_v6 = vshll.u32 %v951_v0, 16 }
  0x31   : > { %v952_v1 = vld [vmem:[#allocation2 + $0x14] sm:$0x1]  ;;  %v958_v2 = vshrl.u32 %v949_v60, 16  ;;  %v961_v3 = vshll.u32 %v949_v60, 16  ;;  %v967_v4 = vshll.u32 %v950_v63, 16 }
  0x32   : > { %2270 = vmatpush3.bf16.msra.mxu1 %v2491_v42  ;;  %v981_v7 = vshll.u32 %v952_v1, 16  ;;  %v955_v8 = vld [vmem:[#allocation2 + $0x20] sm:$0xf]  ;;  %v974_v11 = vrot.slane %v972_v5, 4  ;;  %v956_v12 = vld [vmem:[#allocation2 + $0x24] sm:$0x1] }
  0x33   : > { %2350 = vmatpush3.bf16.msra.mxu0 %v2492_v47  ;;  %2275 = vmatprep.subr.bf16.mxu1 %v2708_v52  ;;  %v960_v9 = vrot.slane %v958_v2, 4  ;;  %v963_v10 = vrot.slane %v961_v3, 5  ;;  %v969_v13 = vrot.slane %v967_v4, 5  ;;  %v977_v14 = vrot.slane %v975_v6, 5  ;;  %v2496_v25 = vld [vmem:[#allocation2 + $0x10] ss:$8 sps:$4 sm:$0xff]  }
  0x34   : > { %2355 = vmatprep.subr.bf16.mxu0 %v2715_v56  ;;  %v1000_v15 = vshrl.u32 %v955_v8, 16  ;;  %v1003_v16 = vshll.u32 %v955_v8, 16  ;;  %v983_v18 = vrot.slane %v981_v7, 5  ;;  %v1009_v19 = vshll.u32 %v956_v12, 16  ;;  %v953_v28 = vld [vmem:[#allocation2 + $0x18] sm:$0xf] }
  0x35   : > { %v964_v17 = vor.u32 %v963_v10, %v960_v9  ;;  %v978_v21 = vor.u32 %v977_v14, %v974_v11  ;;  %v954_v29 = vld [vmem:[#allocation2 + $0x1c] sm:$0x1]  ;;  %2272 = vmatmul.mubr.bf16.vlgmr.msra.gmra.mrb[0].mxu1 %v2496_v25  ;;  %v986_v32 = vshrl.u32 %v953_v28, 16  ;;  %v989_v33 = vshll.u32 %v953_v28, 16  ;;  %v437_v47 = vld [vmem:[#allocation2] sm:$0xf] }
  0x36   : > { %v1002_v22 = vrot.slane %v1000_v15, 4  ;;  %v1005_v23 = vrot.slane %v1003_v16, 5  ;;  %v995_v34 = vshll.u32 %v954_v29, 16  ;;  %2276 = vmatpush3.bf16.msra.mxu1 %v2708_v52  ;;  %v1011_v36 = vrot.slane %v1009_v19, 5  ;;  %v439_v49 = vld [vmem:[#allocation2 + $0x8] sm:$0xf] }
  0x37   : > { %v965_v24 = vrot.slane %v964_v17, 4  ;;  %v979_v27 = vrot.slane %v978_v21, 4  ;;  %v988_v38 = vrot.slane %v986_v32, 4  ;;  %v991_v39 = vrot.slane %v989_v33, 5  ;;  %2277 = vmatprep.subr.bf16.mxu1 %v2497_v26  ;;  %v440_v51 = vld [vmem:[#allocation2 + $0xc] sm:$0x1] }
  0x38   : > { %v1006_v30 = vor.u32 %v1005_v23, %v1002_v22  ;;  %v997_v43 = vrot.slane %v995_v34, 5  ;;  %v449_v52 = vshrl.u32 %v437_v47, 16  ;;  %v452_v53 = vshll.u32 %v437_v47, 16  ;;  %v2500_v0 = vld [vmem:[%s2963_s2 + $0x150] sm:$0xff]   ;;  %v1147_v6 = vld [vmem:[#allocation2 + $0x8] sm:$0xe] }
  0x39   : > { %v970_v31 = vsel %vm2725_vm8, %v965_v24, %v969_v13  ;;  %v984_v35 = vsel %vm2725_vm8, %v979_v27, %v983_v18  ;;  %v992_v42 = vor.u32 %v991_v39, %v988_v38  ;;  %v463_v58 = vshrl.u32 %v439_v49, 16  ;;  %v1148_v8 = vld [vmem:[#allocation2 + $0xc] sm:$0x1]  ;;  %v1149_v9 = vld [vmem:[#allocation2 + $0x10] sm:$0xe]  ;;  %v2502_v29 = vld [vmem:[%s2963_s2 + $0x158] sm:$0xff]  }
  0x3a   : > { %v2037_v37 = vcombine.low %v970_v31, %v984_v35  ;;  %v1007_v40 = vrot.slane %v1006_v30, 4  ;;  %2278 = vmatpush3.bf16.msra.mxu1 %v2497_v26  ;;  %v466_v59 = vshll.u32 %v439_v49, 16  ;;  %v472_v60 = vshll.u32 %v440_v51, 16  ;;  %v1150_v10 = vld [vmem:[#allocation2 + $0x14] sm:$0x1]  ;;  %v2505_v11 = vld [vmem:[%s2963_s2 + $0x68] sm:$0xff]  }
  0x3b   : > { %v993_v44 = vrot.slane %v992_v42, 4  ;;  %2279 = vmatprep.subr.bf16.mxu1 %v2499_v41  ;;  %v451_v62 = vrot.slane %v449_v52, 4  ;;  %v454_v63 = vrot.slane %v452_v53, 5  ;;  %v460_v1 = vrot.slane %v458_v54, 5  ;;  %v441_v18 = vld [vmem:[#allocation2 + $0x10] sm:$0xf] }
  0x3c   : > { %2351 = vmatprep.mubr.bf16.mxu0 %v2037_v37  ;;  %v1012_v45 = vsel %vm2725_vm8, %v1007_v40, %v1011_v36  ;;  %v465_v2 = vrot.slane %v463_v58, 4  ;;  %v468_v3 = vrot.slane %v466_v59, 5  ;;  %v474_v4 = vrot.slane %v472_v60, 5  ;;  %v442_v21 = vld [vmem:[#allocation2 + $0x14] sm:$0x1]  ;;  %v2504_v40 = vld [vmem:[%s2963_s2 + $0x160] sm:$0xff]  }
  0x3d   : > { %v998_v50 = vsel %vm2725_vm8, %v993_v44, %v997_v43  ;;  %v455_v7 = vor.u32 %v454_v63, %v451_v62  ;;  %v2047_v13 = vrot.slane %v1147_v6, 9  ;;  %v1165_v14 = vrot.slane %v1148_v8, 5  ;;  %v443_v22 = vld [vmem:[#allocation2 + $0x18] sm:$0xf]  ;;  %v444_v26 = vld [vmem:[#allocation2 + $0x1c] sm:$0x1] }
  0x3e   : > { %v2038_v55 = vcombine.low %v998_v50, %v1012_v45  ;;  %2280 = vmatpush3.bf16.msra.mxu1 %v2499_v41  ;;  %v469_v12 = vor.u32 %v468_v3, %v465_v2  ;;  %v2048_v15 = vrot.slane %v1149_v9, 9  ;;  %v1169_v17 = vrot.slane %v1150_v10, 5  ;;  %v2507_v34 = vld [vmem:[%s2963_s2 + $0x70] sm:$0xff]   ;;  %v2509_v43 = vld [vmem:[%s2963_s2 + $0x78] sm:$0xff]   ;;  %v2511_v49 = vld [vmem:[%s2963_s2 + $0x80] sm:$0xff]  }
  0x3f   : > { %2281 = vmatprep.subr.bf16.mxu1 %v2501_v46  ;;  %v456_v16 = vrot.slane %v455_v7, 4  ;;  %v477_v23 = vshrl.u32 %v441_v18, 16  ;;  %v480_v27 = vshll.u32 %v441_v18, 16  ;;  %v486_v28 = vshll.u32 %v442_v21, 16  ;;  %v1151_v53 = vld [vmem:[#allocation2 + $0x18] sm:$0xe] }
  0x40   : > { %2352 = vmatmul.mubr.bf16.vlgmr.msra.gmra.mrb[0].mxu0 %v2038_v55  ;;  %v470_v19 = vrot.slane %v469_v12, 4  ;;  %v1170_v25 = vsel %vm2758_vm11, %v2048_v15, %v1169_v17  ;;  %v491_v33 = vshrl.u32 %v443_v22, 16  ;;  %v494_v37 = vshll.u32 %v443_v22, 16  ;;  %v2508_v54 = vld [vmem:[%s2963_s2 + $0x170] sm:$0xff]   ;;  %v1152_v55 = vld [vmem:[#allocation2 + $0x1c] sm:$0x1] }
  0x41   : > { %2356 = vmatpush3.bf16.msra.mxu0 %v2715_v56  ;;  %v1166_v56 = vsel %vm2758_vm11, %v2047_v13, %v1165_v14  ;;  %v461_v24 = vsel %vm2725_vm8, %v456_v16, %v460_v1  ;;  %v479_v32 = vrot.slane %v477_v23, 4  ;;  %v482_v36 = vrot.slane %v480_v27, 5  ;;  %v1153_v58 = vld [vmem:[#allocation2 + $0x20] sm:$0xe]  ;;  %v1154_v59 = vld [vmem:[#allocation2 + $0x24] sm:$0x1] }
  0x42   : > { %2357 = vmatprep.subr.bf16.mxu0 %v2498_v57  ;;  %2282 = vmatpush3.bf16.msra.mxu1 %v2501_v46  ;;  %v475_v30 = vsel %vm2725_vm8, %v470_v19, %v474_v4  ;;  %v2067_v31 = vcombine.low %v1166_v56, %v1170_v25  ;;  %v493_v38 = vrot.slane %v491_v33, 4  ;;  %v500_v39 = vshll.u32 %v444_v26, 16  ;;  %v2513_v60 = vld [vmem:[%s2963_s2 + $0x88] sm:$0xff]   ;;  %v2515_v2 = vld [vmem:[%s2963_s2 + $0x90] sm:$0xff]   ;;  %v638_v3 = vld [vmem:[#allocation2] sm:$0xe] }
  0x43   : > { %2283 = vmatprep.subr.bf16.mxu1 %v2503_v61  ;;  %v1955_v35 = vcombine.low %v461_v24, %v475_v30  ;;  %v483_v41 = vor.u32 %v482_v36, %v479_v32  ;;  %v496_v42 = vrot.slane %v494_v37, 5  ;;  %v488_v44 = vrot.slane %v486_v28, 5  ;;  %v639_v4 = vld [vmem:[#allocation2 + $0x4] sm:$0x1]  ;;  %v640_v6 = vld [vmem:[#allocation2 + $0x8] sm:$0xe] }
  0x44   : > { %2371 = vmatprep.mubr.bf16.mxu0 %v2067_v31  ;;  %v502_v47 = vrot.slane %v500_v39, 5  ;;  %v2049_v62 = vrot.slane %v1151_v53, 9  ;;  %v1173_v63 = vrot.slane %v1152_v55, 5  ;;  %v1177_v1 = vrot.slane %v1154_v59, 5  ;;  %v641_v7 = vld [vmem:[#allocation2 + $0xc] sm:$0x1] }
  0x45   : > { %2358 = vmatpush3.bf16.msra.mxu0 %v2498_v57  ;;  %2291 = vmatprep.mubr.bf16.mxu1 %v1955_v35  ;;  %v484_v45 = vrot.slane %v483_v41, 4  ;;  %v497_v46 = vor.u32 %v496_v42, %v493_v38  ;;  %v1965_v8 = vrot.slane %v638_v3, 9  ;;  %v659_v9 = vrot.slane %v639_v4, 5  ;;  %v2512_v16 = vld [vmem:[%s2963_s2 + $0x180] sm:$0xff]   ;;  %v2517_v18 = vld [vmem:[%s2963_s2 + $0x98] sm:$0xff]   ;;  %v2514_v21 = vld [vmem:[%s2963_s2 + $0x188] sm:$0xff]  }
  0x46   : > { %2359 = vmatprep.subr.bf16.mxu0 %v2500_v0  ;;  %2284 = vmatpush3.bf16.msra.mxu1 %v2503_v61  ;;  %v2510_v61 = vld [vmem:[%s2963_s2 + $0x178] sm:$0xff]   ;;  %v1966_v10 = vrot.slane %v640_v6, 9  ;;  %v1174_v12 = vsel %vm2758_vm11, %v2049_v62, %v1173_v63  ;;  %v2519_v22 = vld [vmem:[%s2963_s2 + $0xa0] sm:$0xff]   ;;  %v2516_v23 = vld [vmem:[%s2963_s2 + $0x190] sm:$0xff]  }
  0x47   : > { %2285 = vmatprep.subr.bf16.mxu1 %v2505_v11  ;;  %v498_v50 = vrot.slane %v497_v46, 4  ;;  %v489_v51 = vsel %vm2725_vm8, %v484_v45, %v488_v44  ;;  %v660_v14 = vsel %vm2758_vm11, %v1965_v8, %v659_v9  ;;  %v2528_v56 = vld [vmem:[#allocation2 + $0x10] ss:$8 sps:$4 sm:$0xff]   ;;  %v2521_v24 = vld [vmem:[%s2963_s2 + $0xa8] sm:$0xff]   ;;  %v643_v28 = vld [vmem:[#allocation2 + $0x14] sm:$0x1] }
  0x48   : > { %v2518_v25 = vld [vmem:[%s2963_s2 + $0x198] sm:$0xff]   ;;  %v642_v26 = vld [vmem:[#allocation2 + $0x10] sm:$0xe]  ;;  %v2520_v31 = vld [vmem:[%s2963_s2 + $0x1a0] sm:$0xff]   ;;  %v667_v33 = vrot.slane %v643_v28, 5 }
  0x49   : > { %2360 = vmatpush3.bf16.msra.mxu0 %v2500_v0  ;;  %v503_v52 = vsel %vm2725_vm8, %v498_v50, %v502_v47  ;;  %v2050_v0 = vrot.slane %v1153_v58, 9  ;;  %v2523_v27 = vld [vmem:[%s2963_s2 + $0xb0] sm:$0xff]   ;;  %v645_v30 = vld [vmem:[#allocation2 + $0x1c] sm:$0x1]  ;;  %v1967_v32 = vrot.slane %v642_v26, 9  ;;  %v2522_v37 = vld [vmem:[%s2963_s2 + $0x1a8] sm:$0xff]  }
  0x4a   : > { %2361 = vmatprep.subr.bf16.mxu0 %v2502_v29  ;;  %2286 = vmatpush3.bf16.msra.mxu1 %v2505_v11  ;;  %v1956_v57 = vcombine.low %v489_v51, %v503_v52  ;;  %v663_v11 = vrot.slane %v641_v7, 5  ;;  %v671_v35 = vrot.slane %v645_v30, 5  ;;  %v2525_v36 = vld [vmem:[%s2963_s2 + $0xb8] sm:$0xff]   ;;  %v1456_v38 = vld [vmem:[#allocation2 + $0x10] sm:$0xf]  ;;  %v2527_v44 = vld [vmem:[%s2963_s2 + $0xc0] sm:$0xff]  }
  0x4b   : > { %2287 = vmatprep.subr.bf16.mxu1 %v2507_v34  ;;  %v1178_v13 = vsel %vm2758_vm11, %v2050_v0, %v1177_v1  ;;  %v668_v39 = vsel %vm2758_vm11, %v1967_v32, %v667_v33  ;;  %v1457_v41 = vld [vmem:[#allocation2 + $0x14] sm:$0x1]  ;;  %v1458_v42 = vld [vmem:[#allocation2 + $0x18] sm:$0xf]  ;;  %v1465_v45 = vshrl.u32 %v1456_v38, 16  ;;  %v1468_v46 = vshll.u32 %v1456_v38, 16 }
  0x4c   : > { %v664_v15 = vsel %vm2758_vm11, %v1966_v10, %v663_v11  ;;  %v2068_v19 = vcombine.low %v1174_v12, %v1178_v13  ;;  %v1479_v47 = vshrl.u32 %v1458_v42, 16  ;;  %v2524_v53 = vld [vmem:[%s2963_s2 + $0x1b0] sm:$0xff]   ;;  %v2531_v58 = vld [vmem:[%s2963_s2 + $0xc8] sm:$0xff]   ;;  %v2526_v62 = vld [vmem:[%s2963_s2 + $0x1b8] sm:$0xff]  }
  0x4d   : > { %2362 = vmatpush3.bf16.msra.mxu0 %v2502_v29  ;;  %v1985_v17 = vcombine.low %v660_v14, %v664_v15  ;;  %v644_v29 = vld [vmem:[#allocation2 + $0x18] sm:$0xe]  ;;  %v1467_v50 = vrot.slane %v1465_v45, 4  ;;  %v1470_v51 = vrot.slane %v1468_v46, 5  ;;  %v2545_v59 = vld [vmem:[#allocation2 + $0x8] ss:$8 sps:$4 sm:$0xff]  }
  0x4e   : > { %2363 = vmatprep.subr.bf16.mxu0 %v2504_v40  ;;  %2288 = vmatpush3.bf16.msra.mxu1 %v2507_v34  ;;  %v1968_v34 = vrot.slane %v644_v29, 9  ;;  %v1481_v52 = vrot.slane %v1479_v47, 4  ;;  %v2533_v63 = vld [vmem:[%s2963_s2 + $0xd0] sm:$0xff]   ;;  %v2529_v4 = vld [vmem:[%s2963_s2 + $0x1c0] sm:$0xff]   ;;  %v2535_v8 = vld [vmem:[%s2963_s2 + $0xd8] sm:$0xff]  }
  0x4f   : > { %2289 = vmatprep.subr.bf16.mxu1 %v2509_v43  ;;  %v2530_v9 = vld [vmem:[#allocation2 + $0x20] ss:$8 sps:$4 sm:$0xff]   ;;  %v2534_v13 = vld [vmem:[%s2963_s2 + $0x1d0] sm:$0xff]   ;;  %v2536_v15 = vld [vmem:[%s2963_s2 + $0x1d8] sm:$0xff]  }
  0x50   : > { %v2532_v11 = vld [vmem:[%s2963_s2 + $0x1c8] sm:$0xff]   ;;  %v2537_v12 = vld [vmem:[%s2963_s2 + $0xe0] sm:$0xff]   ;;  %v1654_v38 = vld [vmem:[#allocation2 + $0x10] sm:$0xe] }
  0x51   : > { %2364 = vmatpush3.bf16.msra.mxu0 %v2504_v40  ;;  %v672_v40 = vsel %vm2758_vm11, %v1968_v34, %v671_v35  ;;  %v2539_v14 = vld [vmem:[%s2963_s2 + $0xe8] sm:$0xff]   ;;  %v1461_v30 = vld [vmem:[#allocation2 + $0x24] sm:$0x1]  ;;  %v2546_v32 = vld [vmem:[#allocation2 + $0x18] ss:$8 sps:$4 sm:$0xff]   ;;  %v2129_v47 = vrot.slane %v1654_v38, 9 }
  0x52   : > { %2365 = vmatprep.subr.bf16.mxu0 %v2506_v48  ;;  %2290 = vmatpush3.bf16.msra.mxu1 %v2509_v43  ;;  %v1459_v43 = vld [vmem:[#allocation2 + $0x1c] sm:$0x1]  ;;  %v2540_v29 = vld [vmem:[%s2963_s2 + $0x1e8] sm:$0xff]   ;;  %v1502_v34 = vshll.u32 %v1461_v30, 16  ;;  %v2160_v5 = vld [vmem:[%s2965_s4] ss:$0 sm:$0xff] }
  0x53   : > { %2295 = vmatprep.subr.bf16.mxu1 %v2511_v49  ;;  %v2544_v46 = vld [vmem:[%s2963_s2 + $0x1f8] sm:$0xff]  }
  0x55   : > { %2366 = vmatpush3.bf16.msra.mxu0 %v2506_v48  ;;  %2292 = vmatmul.mubr.bf16.vlgmr.msra.gmra.mrb[0].mxu1 %v1956_v57  ;;  %v1482_v48 = vshll.u32 %v1458_v42, 16  ;;  %v1488_v57 = vshll.u32 %v1459_v43, 16  ;;  %v1504_v43 = vrot.slane %v1502_v34, 5 }
  0x56   : > { %2367 = vmatprep.subr.bf16.mxu0 %v2508_v54  ;;  %2296 = vmatpush3.bf16.msra.mxu1 %v2511_v49  ;;  %v1986_v49 = vcombine.low %v668_v39, %v672_v40  ;;  %v1655_v39 = vld [vmem:[#allocation2 + $0x14] sm:$0x1]  ;;  %v1656_v40 = vld [vmem:[#allocation2 + $0x18] sm:$0xe] }
  0x57   : > { %2297 = vmatprep.subr.bf16.mxu1 %v2513_v60  ;;  %2311 = vmatprep.mubr.bf16.mxu1 %v1985_v17  ;;  %v1484_v55 = vrot.slane %v1482_v48, 5  ;;  %v1490_v3 = vrot.slane %v1488_v57, 5  ;;  %v1462_v17 = vld [vmem:[#allocation2 + $0x28] sm:$0xf]  ;;  %v1672_v48 = vrot.slane %v1655_v39, 5 }
  0x59   : > { %2368 = vmatpush3.bf16.msra.mxu0 %v2508_v54  ;;  %v1474_v54 = vshll.u32 %v1457_v41, 16  ;;  %v1657_v41 = vld [vmem:[#allocation2 + $0x1c] sm:$0x1] }
  0x5a   : > { %2369 = vmatprep.subr.bf16.mxu0 %v2510_v61  ;;  %2298 = vmatpush3.bf16.msra.mxu1 %v2513_v60  ;;  %v1471_v60 = vor.u32 %v1470_v51, %v1467_v50  ;;  %v1676_v50 = vrot.slane %v1657_v41, 5 }
  0x5b   : > { %2299 = vmatprep.subr.bf16.mxu1 %v2515_v2  ;;  %v1476_v1 = vrot.slane %v1474_v54, 5  ;;  %v1673_v54 = vsel %vm2758_vm11, %v2129_v47, %v1672_v48 }
  0x5c   : > { %v1472_v0 = vrot.slane %v1471_v60, 4  ;;  %v2550_v60 = vld [vmem:[%s2963_s2 + $0x218] sm:$0xff]  }
  0x5d   : > { %2370 = vmatpush3.bf16.msra.mxu0 %v2510_v61  ;;  %v1485_v61 = vor.u32 %v1484_v55, %v1481_v52 }
  0x5e   : > { %2375 = vmatprep.subr.bf16.mxu0 %v2512_v16  ;;  %2300 = vmatpush3.bf16.msra.mxu1 %v2515_v2  ;;  %v1477_v6 = vsel %vm2725_vm8, %v1472_v0, %v1476_v1  ;;  %v1658_v0 = vld [vmem:[#allocation2 + $0x20] sm:$0xe]  ;;  %v1659_v1 = vld [vmem:[#allocation2 + $0x24] sm:$0x1] }
  0x5f   : > { %2301 = vmatprep.subr.bf16.mxu1 %v2517_v18  ;;  %v1486_v2 = vrot.slane %v1485_v61, 4  ;;  %v2551_v61 = vld [vmem:[%s2963_s2 + $0x220] sm:$0xff]  }
  0x60   : > { %2372 = vmatmul.mubr.bf16.vlgmr.msra.gmra.mrb[0].mxu0 %v2068_v19 }
  0x61   : > { %2376 = vmatpush3.bf16.msra.mxu0 %v2512_v16  ;;  %2391 = vmatprep.mubr.bf16.mxu0 %v2528_v56  ;;  %v1491_v7 = vsel %vm2725_vm8, %v1486_v2, %v1490_v3  ;;  %v1460_v16 = vld [vmem:[#allocation2 + $0x20] sm:$0xf]  ;;  %v1660_v2 = vld [vmem:[#allocation2 + $0x28] sm:$0xe]  ;;  %v1661_v3 = vld [vmem:[#allocation2 + $0x2c] sm:$0x1] }
  0x62   : > { %2377 = vmatprep.subr.bf16.mxu0 %v2514_v21  ;;  %2302 = vmatpush3.bf16.msra.mxu1 %v2517_v18  ;;  %v2119_v10 = vcombine.low %v1477_v6, %v1491_v7  ;;  %v2541_v18 = vld [vmem:[%s2963_s2 + $0xf0] sm:$0xff]   ;;  %v1493_v19 = vshrl.u32 %v1460_v16, 16  ;;  %v1496_v56 = vshll.u32 %v1460_v16, 16  ;;  %v1680_v6 = vrot.slane %v1659_v1, 5 }
  0x63   : > { %2303 = vmatprep.subr.bf16.mxu1 %v2519_v22  ;;  %v2132_v7 = vrot.slane %v1660_v2, 9 }
  0x64   : > { %v1498_v26 = vrot.slane %v1496_v56, 5 }
  0x65   : > { %2378 = vmatpush3.bf16.msra.mxu0 %v2514_v21  ;;  %v1507_v21 = vshrl.u32 %v1462_v17, 16 }
  0x66   : > { %2379 = vmatprep.subr.bf16.mxu0 %v2516_v23  ;;  %2304 = vmatpush3.bf16.msra.mxu1 %v2519_v22  ;;  %v1510_v22 = vshll.u32 %v1462_v17, 16 }
  0x67   : > { %2305 = vmatprep.subr.bf16.mxu1 %v2521_v24 }
  0x68   : > { %v1512_v28 = vrot.slane %v1510_v22, 5 }
  0x69   : > { %2380 = vmatpush3.bf16.msra.mxu0 %v2516_v23  ;;  %v2538_v23 = vld [vmem:[%s2963_s2 + $0x1e0] sm:$0xff]  }
  0x6a   : > { %2381 = vmatprep.subr.bf16.mxu0 %v2518_v25  ;;  %2306 = vmatpush3.bf16.msra.mxu1 %v2521_v24  ;;  %v2543_v24 = vld [vmem:[%s2963_s2 + $0xf8] sm:$0xff]  }
  0x6b   : > { %2307 = vmatprep.subr.bf16.mxu1 %v2523_v27 }
  0x6d   : > { %2382 = vmatpush3.bf16.msra.mxu0 %v2518_v25  ;;  %v1495_v25 = vrot.slane %v1493_v19, 4 }
  0x6e   : > { %2383 = vmatprep.subr.bf16.mxu0 %v2520_v31  ;;  %2308 = vmatpush3.bf16.msra.mxu1 %v2523_v27  ;;  %v1509_v27 = vrot.slane %v1507_v21, 4 }
  0x6f   : > { %2309 = vmatprep.subr.bf16.mxu1 %v2525_v36  ;;  %v1499_v33 = vor.u32 %v1498_v26, %v1495_v25 }
  0x70   : > { %v1513_v35 = vor.u32 %v1512_v28, %v1509_v27 }
  0x71   : > { %2384 = vmatpush3.bf16.msra.mxu0 %v2520_v31  ;;  %v1463_v31 = vld [vmem:[#allocation2 + $0x2c] sm:$0x1]  ;;  %v1500_v42 = vrot.slane %v1499_v33, 4 }
  0x72   : > { %2385 = vmatprep.subr.bf16.mxu0 %v2522_v37  ;;  %2310 = vmatpush3.bf16.msra.mxu1 %v2525_v36  ;;  %v1516_v36 = vshll.u32 %v1463_v31, 16 }
  0x73   : > { %2315 = vmatprep.subr.bf16.mxu1 %v2527_v44  ;;  %v1505_v51 = vsel %vm2725_vm8, %v1500_v42, %v1504_v43 }
  0x74   : > { %v1518_v45 = vrot.slane %v1516_v36, 5 }
  0x75   : > { %2386 = vmatpush3.bf16.msra.mxu0 %v2522_v37  ;;  %2312 = vmatmul.mubr.bf16.vlgmr.msra.gmra.mrb[0].mxu1 %v1986_v49  ;;  %v2542_v37 = vld [vmem:[%s2963_s2 + $0x1f0] sm:$0xff]   ;;  %v2130_v49 = vrot.slane %v1656_v40, 9 }
  0x76   : > { %2387 = vmatprep.subr.bf16.mxu0 %v2524_v53  ;;  %2316 = vmatpush3.bf16.msra.mxu1 %v2527_v44  ;;  %v1514_v44 = vrot.slane %v1513_v35, 4  ;;  %v1855_v35 = vstv %s2161_s15 }
  0x77   : > { %2317 = vmatprep.subr.bf16.mxu1 %v2531_v58  ;;  %2331 = vmatprep.mubr.bf16.mxu1 %v2545_v59  ;;  %v1677_v55 = vsel %vm2758_vm11, %v2130_v49, %v1676_v50  ;;  %v2549_v59 = vld [vmem:[%s2963_s2 + $0x210] sm:$0xff]  }
  0x78   : > { %v1519_v52 = vsel %vm2725_vm8, %v1514_v44, %v1518_v45 }
  0x79   : > { %2388 = vmatpush3.bf16.msra.mxu0 %v2524_v53  ;;  %v2547_v53 = vld [vmem:[%s2963_s2 + $0x200] sm:$0xff]   ;;  %v2120_v57 = vcombine.low %v1505_v51, %v1519_v52 }
  0x7a   : > { %2389 = vmatprep.subr.bf16.mxu0 %v2526_v62  ;;  %2318 = vmatpush3.bf16.msra.mxu1 %v2531_v58  ;;  %v2149_v58 = vcombine.low %v1673_v54, %v1677_v55 }
  0x7b   : > { %2319 = vmatprep.subr.bf16.mxu1 %v2533_v63 }
  0x7d   : > { %2390 = vmatpush3.bf16.msra.mxu0 %v2526_v62  ;;  %v2552_v62 = vld [vmem:[%s2963_s2 + $0x228] sm:$0xff]  }
  0x7e   : > { %2395 = vmatprep.subr.bf16.mxu0 %v2529_v4  ;;  %2320 = vmatpush3.bf16.msra.mxu1 %v2533_v63  ;;  %v2553_v63 = vld [vmem:[%s2963_s2 + $0x230] sm:$0xff]  }
  0x7f   : > { %2321 = vmatprep.subr.bf16.mxu1 %v2535_v8 }
  0x80   : > { %2392 = vmatmul.mubr.bf16.vlgmr.msra.gmra.mrb[0].mxu0 %v2530_v9  ;;  %v2554_v9 = vld [vmem:[%s2963_s2 + $0x238] sm:$0xff]  }
  0x81   : > { %2396 = vmatpush3.bf16.msra.mxu0 %v2529_v4  ;;  %2411 = vmatprep.mubr.bf16.mxu0 %v2119_v10  ;;  %v2131_v4 = vrot.slane %v1658_v0, 9 }
  0x82   : > { %2397 = vmatprep.subr.bf16.mxu0 %v2532_v11  ;;  %2322 = vmatpush3.bf16.msra.mxu1 %v2535_v8  ;;  %v1684_v8 = vrot.slane %v1661_v3, 5 }
  0x83   : > { %2323 = vmatprep.subr.bf16.mxu1 %v2537_v12  ;;  %v1681_v10 = vsel %vm2758_vm11, %v2131_v4, %v1680_v6 }
  0x85   : > { %2398 = vmatpush3.bf16.msra.mxu0 %v2532_v11  ;;  %v1685_v11 = vsel %vm2758_vm11, %v2132_v7, %v1684_v8 }
  0x86   : > { %2399 = vmatprep.subr.bf16.mxu0 %v2534_v13  ;;  %2324 = vmatpush3.bf16.msra.mxu1 %v2537_v12  ;;  %v2150_v12 = vcombine.low %v1681_v10, %v1685_v11 }
  0x87   : > { %2325 = vmatprep.subr.bf16.mxu1 %v2539_v14 }
  0x89   : > { %2400 = vmatpush3.bf16.msra.mxu0 %v2534_v13 }
  0x8a   : > { %2401 = vmatprep.subr.bf16.mxu0 %v2536_v15  ;;  %2326 = vmatpush3.bf16.msra.mxu1 %v2539_v14 }
  0x8b   : > { %2327 = vmatprep.subr.bf16.mxu1 %v2541_v18 }
  0x8d   : > { %2402 = vmatpush3.bf16.msra.mxu0 %v2536_v15 }
  0x8e   : > { %2403 = vmatprep.subr.bf16.mxu0 %v2538_v23  ;;  %2328 = vmatpush3.bf16.msra.mxu1 %v2541_v18  ;;  %v2159_v18 = vld [vmem:[%s2964_s3] ss:$0 sm:$0xff] }
  0x8f   : > { %2329 = vmatprep.subr.bf16.mxu1 %v2543_v24 }
  0x91   : > { %2404 = vmatpush3.bf16.msra.mxu0 %v2538_v23  ;;  %v1852_v23 = vlaneseq }
  0x92   : > { %2405 = vmatprep.subr.bf16.mxu0 %v2540_v29  ;;  %2330 = vmatpush3.bf16.msra.mxu1 %v2543_v24 }
  0x95   : > { %2406 = vmatpush3.bf16.msra.mxu0 %v2540_v29  ;;  %2332 = vmatmul.mubr.bf16.vlgmr.msra.gmra.mrb[0].mxu1 %v2546_v32  ;;  %v1853_v32 = vshrl.u32 %v1852_v23, 7 }
  0x96   : > { %2407 = vmatprep.subr.bf16.mxu0 %v2542_v37 }
  0x97   : > { %vm1856_vm12 = vcmp.lt.s32.totalorder %v1853_v32, %v1855_v35 }
  0x99   : > { %2408 = vmatpush3.bf16.msra.mxu0 %v2542_v37 }
  0x9a   : > { %2409 = vmatprep.subr.bf16.mxu0 %v2544_v46 }
  0x9d   : > { %2410 = vmatpush3.bf16.msra.mxu0 %v2544_v46 }
  0x9e   : > { %2415 = vmatprep.subr.bf16.mxu0 %v2547_v53 }
  0xa0   : > { %2412 = vmatmul.mubr.bf16.vlgmr.msra.gmra.mrb[0].mxu0 %v2120_v57 }
  0xa1   : > { %2416 = vmatpush3.bf16.msra.mxu0 %v2547_v53  ;;  %2431 = vmatprep.mubr.bf16.mxu0 %v2149_v58 }
  0xa2   : > { %2417 = vmatprep.subr.bf16.mxu0 %v2548_v20 }
  0xa5   : > { %2418 = vmatpush3.bf16.msra.mxu0 %v2548_v20 }
  0xa6   : > { %2419 = vmatprep.subr.bf16.mxu0 %v2549_v59 }
  0xa9   : > { %2420 = vmatpush3.bf16.msra.mxu0 %v2549_v59 }
  0xaa   : > { %2421 = vmatprep.subr.bf16.mxu0 %v2550_v60 }
  0xad   : > { %2422 = vmatpush3.bf16.msra.mxu0 %v2550_v60 }
  0xae   : > { %2423 = vmatprep.subr.bf16.mxu0 %v2551_v61 }
  0xb1   : > { %2424 = vmatpush3.bf16.msra.mxu0 %v2551_v61 }
  0xb2   : > { %2425 = vmatprep.subr.bf16.mxu0 %v2552_v62 }
  0xb5   : > { %2426 = vmatpush3.bf16.msra.mxu0 %v2552_v62 }
  0xb6   : > { %2427 = vmatprep.subr.bf16.mxu0 %v2553_v63 }
  0xb9   : > { %2428 = vmatpush3.bf16.msra.mxu0 %v2553_v63 }
  0xba   : > { %2429 = vmatprep.subr.bf16.mxu0 %v2554_v9 }
  0xbd   : > { %2430 = vmatpush3.bf16.msra.mxu0 %v2554_v9 }
  0xc0   : > { %2432 = vmatmul.mubr.bf16.vlgmr.msra.gmra.mrb[0].mxu0 %v2150_v12 }
 0x168   : > { %v2333_v13 = vpop.f32.mrb[0].mxu1 }
 0x169   : > { %v926_v14 = vpop.f32.mrb[1].mxu1 }
 0x16a   : > { %v2334_v15 = vpop.f32.mrb[2].mxu1 }
 0x16b   : > { %v929_v16 = vpop.f32.mrb[3].mxu1 }
 0x193   : > { %v2433_v17 = vpop.f32.mrb[0].mxu0 }
 0x194   : > { %v2435_v19 = vadd.f32 %v2433_v17, %v2333_v13  ;;  %v1797_v56 = vpop.f32.mrb[1].mxu0 }
 0x195   : > { %v2436_v21 = vadd.f32 %v1797_v56, %v926_v14  ;;  %v2434_v22 = vpop.f32.mrb[2].mxu0 }
 0x196   : > { %v1833_v24 = vmul.f32 %v2435_v19, %v2159_v18  ;;  %v2437_v25 = vadd.f32 %v2434_v22, %v2334_v15  ;;  %v1800_v26 = vpop.f32.mrb[3].mxu0 }
 0x197   : > { %v1831_v27 = vmul.f32 %v2436_v21, %v2159_v18  ;;  %v2438_v28 = vadd.f32 %v1800_v26, %v929_v16 }
 0x198   : > { %v1844_v29 = vadd.f32 %v2160_v5, %v1833_v24  ;;  %v1834_v30 = vmul.f32 %v2437_v25, %v2159_v18 }
 0x199   : > { %v1842_v31 = vadd.f32 %v2160_v5, %v1831_v27  ;;  %v1832_v33 = vmul.f32 %v2438_v28, %v2159_v18 }
 0x19a   : > { %v1845_v34 = vadd.f32 %v2160_v5, %v1834_v30  ;;  %v1848_v37 = vmax.f32 %v1844_v29, 0.0 }
 0x19b   : > { %v1843_v36 = vadd.f32 %v2160_v5, %v1832_v33  ;;  %v1846_v39 = vmax.f32 %v1842_v31, 0.0 }
 0x19c   : > { %v1849_v38 = vmax.f32 %v1845_v34, 0.0 }
 0x19d   : > { %v1847_v40 = vmax.f32 %v1843_v36, 0.0 }
 0x19e   : > { %v1851_v41 = vmax.f32 %v1848_v37, %v1849_v38 }
 0x19f   : > { %v1850_v42 = vmax.f32 %v1846_v39, %v1847_v40 }
 0x1a0   : > { %v1860_v43 = vsel %vm1856_vm12, %v1851_v41, 0.0 }
 0x1a1   : > { %1862 = vst [vmem:[#allocation4 + $0x8] sm:$0xff] %v1860_v43  ;;  %v1859_v44 = vsel %vm1856_vm12, %v1850_v42, 0.0 }
 0x1a2   : > { %1861 = vst [vmem:[#allocation4] sm:$0xff] %v1859_v44 }
 0x1a9   : > { %v1863_v45 = vld [vmem:[#allocation4] ss:$2 sm:$0xff]  ;;  %v1865_v46 = vld [vmem:[#allocation4 + $0x1] ss:$2 sm:$0xff] }
 0x1aa   : > { %v1866_v47 = vmax.f32 %v1863_v45, %v1865_v46 }
 0x1ac   : > { %1867 = vst [vmem:[%s202_s18] sm:$0xff] %v1866_v47 }
 0x1ad PF: > { %s21_s23 = sadd.s32 1, %s2575_s23  }
 0x1ae   : > { %p18_p9 = scmp.ge.s32.totalorder %s21_s23, 4  }
 0x1b0   :  { %20 = sbr.rel (!%p18_p9) target bundleno = 16 (0x10), region = 77 }

// kernel: mask_cnn_forward.5
= control target key start
LH: loop header
LB: loop body
LE: loop exit
PB: predicated region body
PF: predicated region fallthrough
CT: control target
= control target key end

     0   :  { %s5451_s0 = inlined_call_operand.vmem [shape: s32[2], index: 0, kind: input, shape index: {}]   ;;  %s5452_s1 = inlined_call_operand.vmem [shape: bf16[2,8,16,64], index: 1, kind: input, shape index: {}]   ;;  %s5453_s2 = inlined_call_operand.vmem [shape: bf16[3,3,64,64], index: 2, kind: input, shape index: {}]   ;;  %s5454_s3 = inlined_call_operand.vmem [shape: f32[1,64], index: 3, kind: input, shape index: {}]   ;;  %s5455_s4 = inlined_call_operand.vmem [shape: f32[1,64], index: 4, kind: input, shape index: {}]   ;;  %s5456_s5 = inlined_call_operand.vmem [shape: bf16[2,32,64], index: 5, kind: output, shape index: {}]  }
   0x1   :  { %s10_s20 = sshll.u32 %s5451_s0, 4  ;;  %s11_s20 = int_to_ptr.vmem [resolvable:$true] %s10_s20 }
   0x2   :  { %s4495_s21 = scalar_lea.vmem %s11_s20, 16  ;;  %p4500_p1 = scmp.lt.s32.totalorder %s11_s20, %s11_s20 }
   0x3   :  { %p4496_p0 = scmp.ne.s32.totalorder %s11_s20, %s4495_s21  ;;  %p4501_p2 = scmp.lt.s32.totalorder %s4495_s21, %s4495_s21 }
   0x5   :  { %p4502_p3 = por %p4501_p2, %p4500_p1 }
   0x7   :  { %p4503_p4 = pnand %p4502_p3, %p4496_p0 }
   0x9   :  { %4506 = shalt.err (!%p4503_p4)  }
   0xa   :  { %s4517_s22 = smov [#allocation6]  }
   0xb   :  { %13 = dma.vmem_to_smem %s11_s20, 16, %s4517_s22, [#allocation5] }
   0xc   :  { %4511 = dma.done.wait [#allocation5], 16 }
   0xd   :  { %4512 = vsyncadd [#allocation5], 4294967280 }
   0xe   :  { %15 = sfence }
   0xf   :  { %s4553_s23 = smov 0  }
  0x10 LB: > { %s4559_s0 = sadd.s32 4294967295, %s4515_s23   ;;  %p3804_p5 = scmp.ge.s32.totalorder %s4515_s23, 1  ;;  %s4515_s23 = sphi %s4553_s23, %s21_s23  }
  0x11   : > { %p169_p6 = scmp.lt.s32.totalorder %s4515_s23, 3 }
  0x13   : > { %p170_p7 = pnand %p3804_p5, %p169_p6 }
  0x14   : > { %v4435_v0 = vld [vmem:[%s5453_s2] sm:$0xff] (!%p170_p7)   ;;  %p195_p8 = scmp.lt.s32.totalorder (!%p170_p7), %s4559_s0, 1  ;;  %v4436_v1 = vld [vmem:[%s5453_s2 + $0x8] sm:$0xff] (!%p170_p7)   ;;  %vm207_vm0 = vcmask (!%p170_p7), 519168   ;;  %v4437_v2 = vld [vmem:[%s5453_s2 + $0x10] sm:$0xff] (!%p170_p7)   ;;  %vm210_vm1 = vcmask (!%p170_p7), 516096  }
  0x15   : > { %173 = sbr.rel (%p170_p7) target bundleno = 477 (0x1dd), region = 36  ;;  %4416 = vmatprep.subr.bf16.mxu1 (!%p170_p7), %v4435_v0  ;;  %4200 = vmatprep.subr.bf16.mxu0 (!%p170_p7), %v4435_v0  ;;  %v4518_v3 = vmov (!%p170_p7), 0   ;;  %vm255_vm2 = vsmask.f32 (!%p170_p7), 256  ;;  %vm256_vm3 = vsmask.f32 (!%p170_p7), 4368 }
  0x16   : > { %4420 = vmatpush3.bf16.msra.mxu1 (!%p170_p7), %v4435_v0  ;;  %4201 = vmatpush3.bf16.msra.mxu0 (!%p170_p7), %v4435_v0  ;;  %221 = vst.msk [vmem:[#allocation2 + $0x30] sm:$0xf] (!%p170_p7), %vm207_vm0, %v4518_v3  ;;  %222 = vst.msk [vmem:[#allocation2 + $0x34] sm:$0xf] (!%p170_p7), %vm207_vm0, %v4518_v3  ;;  %v4438_v4 = vld [vmem:[%s5453_s2 + $0x18] sm:$0xff] (!%p170_p7)   ;;  %v4638_v26 = vld [vmem:[%s5453_s2 + $0x20] sm:$0xff] (!%p170_p7)  }
  0x17   : > { %4417 = vmatprep.subr.bf16.mxu1 (!%p170_p7), %v4436_v1  ;;  %4202 = vmatprep.subr.bf16.mxu0 (!%p170_p7), %v4436_v1  ;;  %208 = vst.msk [vmem:[#allocation2] sm:$0xf] (!%p170_p7), %vm207_vm0, %v4518_v3  ;;  %209 = vst.msk [vmem:[#allocation2 + $0x4] sm:$0xf] (!%p170_p7), %vm207_vm0, %v4518_v3  ;;  %vm420_vm4 = vsmask.f32 (!%p170_p7), 7938 }
  0x18   : > { %212 = vst.msk [vmem:[#allocation2 + $0xc] sm:$0xf] (!%p170_p7), %vm207_vm0, %v4518_v3  ;;  %213 = vst.msk [vmem:[#allocation2 + $0x10] sm:$0xf] (!%p170_p7), %vm207_vm0, %v4518_v3  ;;  %v4650_v36 = vld [vmem:[%s5453_s2 + $0x40] sm:$0xff] (!%p170_p7)   ;;  %vm480_vm7 = vcmask (!%p170_p7), 523264  }
  0x19   : > { %215 = vst.msk [vmem:[#allocation2 + $0x18] sm:$0xf] (!%p170_p7), %vm207_vm0, %v4518_v3  ;;  %216 = vst.msk [vmem:[#allocation2 + $0x1c] sm:$0xf] (!%p170_p7), %vm207_vm0, %v4518_v3  ;;  %vm778_vm9 = vsmask.f32 (!%p170_p7), 3328 }
  0x1a   : > { %218 = vst.msk [vmem:[#allocation2 + $0x24] sm:$0xf] (!%p170_p7), %vm207_vm0, %v4518_v3  ;;  %219 = vst.msk [vmem:[#allocation2 + $0x28] sm:$0xf] (!%p170_p7), %vm207_vm0, %v4518_v3  ;;  %4421 = vmatpush3.bf16.msra.mxu1 (!%p170_p7), %v4436_v1  ;;  %4203 = vmatpush3.bf16.msra.mxu0 (!%p170_p7), %v4436_v1  ;;  %vm1247_vm10 = vcmask (!%p170_p7), 1042432   ;;  %vm1248_vm12 = vcmask (!%p170_p7), 1046532  }
  0x1b   : > { %224 = vst.msk [vmem:[#allocation2 + $0x3c] sm:$0xf] (!%p170_p7), %vm207_vm0, %v4518_v3  ;;  %225 = vst.msk [vmem:[#allocation2 + $0x40] sm:$0xf] (!%p170_p7), %vm207_vm0, %v4518_v3  ;;  %4418 = vmatprep.subr.bf16.mxu1 (!%p170_p7), %v4437_v2  ;;  %4204 = vmatprep.subr.bf16.mxu0 (!%p170_p7), %v4437_v2  ;;  %vm779_vm11 = vsmask.f32 (!%p170_p7), 7440 }
  0x1c   : > { %s4571_s28 = scalar_select %p195_p8, %s4559_s0, 1  ;;  %227 = vst.msk [vmem:[#allocation2 + $0x48] sm:$0xf] %vm207_vm0, %v4518_v3  ;;  %228 = vst.msk [vmem:[#allocation2 + $0x4c] sm:$0xf] %vm207_vm0, %v4518_v3 }
  0x1d   : > { %230 = vst.msk [vmem:[#allocation2 + $0x54] sm:$0xf] %vm207_vm0, %v4518_v3  ;;  %231 = vst.msk [vmem:[#allocation2 + $0x58] sm:$0xf] %vm207_vm0, %v4518_v3  ;;  %v445_v25 = vld [vmem:[#allocation2 + $0x30] sm:$0xf] }
  0x1e   : > { %s4086_s6 = sshll.u32 %s4571_s28, 6  ;;  %233 = vst.msk [vmem:[#allocation2 + $0x60] sm:$0xf] %vm207_vm0, %v4518_v3  ;;  %234 = vst.msk [vmem:[#allocation2 + $0x64] sm:$0xf] %vm207_vm0, %v4518_v3  ;;  %4422 = vmatpush3.bf16.msra.mxu1 %v4437_v2  ;;  %4205 = vmatpush3.bf16.msra.mxu0 %v4437_v2  ;;  %v4443_v32 = vld [vmem:[#allocation2] sm:$0xff]  }
  0x1f   : > { %236 = vst.msk [vmem:[#allocation2 + $0x6c] sm:$0xf] %vm207_vm0, %v4518_v3  ;;  %237 = vst.msk [vmem:[#allocation2 + $0x70] sm:$0xf] %vm207_vm0, %v4518_v3  ;;  %s4600_s9 = scalar_lea.vmem %s5452_s1, %s4086_s6  ;;  %4419 = vmatprep.subr.bf16.mxu1 %v4438_v4  ;;  %4206 = vmatprep.subr.bf16.mxu0 %v4438_v4  ;;  %v422_v40 = vld [vmem:[#allocation2 + $0xc] sm:$0xf] }
  0x20   : > { %211 = vst.msk [vmem:[#allocation2 + $0x8] sm:$0x1] %vm210_vm1, %v4518_v3  ;;  %214 = vst.msk [vmem:[#allocation2 + $0x14] sm:$0x1] %vm210_vm1, %v4518_v3  ;;  %v245_v5 = vld [vmem:[%s4600_s9 + $0x18] sm:$0xf]  ;;  %4208 = vmatprep.mubr.msk.bf16.mxu0 %vm480_vm7, %v4443_v32 }
  0x21   : > { %217 = vst.msk [vmem:[#allocation2 + $0x20] sm:$0x1] %vm210_vm1, %v4518_v3  ;;  %220 = vst.msk [vmem:[#allocation2 + $0x2c] sm:$0x1] %vm210_vm1, %v4518_v3  ;;  %v246_v6 = vld [vmem:[%s4600_s9 + $0x1c] sm:$0xf] }
  0x22   : > { %223 = vst.msk [vmem:[#allocation2 + $0x38] sm:$0x1] %vm210_vm1, %v4518_v3  ;;  %226 = vst.msk [vmem:[#allocation2 + $0x44] sm:$0x1] %vm210_vm1, %v4518_v3  ;;  %v310_v7 = vshrl.u32 %v245_v5, 16  ;;  %v313_v8 = vshll.u32 %v245_v5, 16  ;;  %4423 = vmatpush3.bf16.msra.mxu1 %v4438_v4  ;;  %4207 = vmatpush3.bf16.msra.mxu0 %v4438_v4 }
  0x23   : > { %229 = vst.msk [vmem:[#allocation2 + $0x50] sm:$0x1] %vm210_vm1, %v4518_v3  ;;  %232 = vst.msk [vmem:[#allocation2 + $0x5c] sm:$0x1] %vm210_vm1, %v4518_v3  ;;  %v318_v9 = vshrl.u32 %v246_v6, 16  ;;  %v321_v10 = vshll.u32 %v246_v6, 16  ;;  %4224 = vmatprep.subr.bf16.mxu1 %v4638_v26  ;;  %4248 = vmatprep.subr.bf16.mxu0 %v4650_v36 }
  0x24   : > { %235 = vst.msk [vmem:[#allocation2 + $0x68] sm:$0x1] %vm210_vm1, %v4518_v3  ;;  %238 = vst.msk [vmem:[#allocation2 + $0x74] sm:$0x1] %vm210_vm1, %v4518_v3  ;;  %v247_v11 = vld [vmem:[%s4600_s9 + $0x20] sm:$0xf] }
  0x25   : > { %v248_v12 = vld [vmem:[%s4600_s9 + $0x24] sm:$0xf]  ;;  %vm4621_vm5 = vmor %vm255_vm2, %vm256_vm3  ;;  %v312_v14 = vrot.slane %v310_v7, 7  ;;  %v4625_v15 = vrot.slane %v318_v9, 7  ;;  %v327_v16 = vshrl.u32 %v247_v11, 16  ;;  %v330_v18 = vshll.u32 %v247_v11, 16 }
  0x26   : > { %vm4629_vm6 = vmand %vm207_vm0, %vm420_vm4  ;;  %v335_v19 = vshrl.u32 %v248_v12, 16  ;;  %v338_v20 = vshll.u32 %v248_v12, 16  ;;  %v239_v21 = vld [vmem:[%s4600_s9] sm:$0xf]  ;;  %v452_v27 = vld [vmem:[#allocation2 + $0x3c] sm:$0xf] }
  0x27   : > { %v315_v22 = vor.u32 %v313_v8, %v312_v14  ;;  %v316_v23 = vrot.slane %v312_v14, 4  ;;  %v323_v24 = vor.u32 %v321_v10, %v4625_v15  ;;  %v329_v28 = vrot.slane %v327_v16, 7  ;;  %v240_v33 = vld [vmem:[%s4600_s9 + $0x4] sm:$0xf]  ;;  %v249_v44 = vld [vmem:[%s4600_s9 + $0x28] sm:$0xf]  ;;  %vm4666_vm8 = vmand %vm210_vm1, %vm255_vm2 }
  0x28   : > { %v4640_v29 = vrot.slane %v335_v19, 7  ;;  %v259_v34 = vshrl.u32 %v239_v21, 16  ;;  %v262_v35 = vshll.u32 %v239_v21, 16  ;;  %v267_v42 = vshrl.u32 %v240_v33, 16  ;;  %v428_v47 = vld [vmem:[#allocation2 + $0x14] sm:$0x1]  ;;  %vm4756_vm13 = vmor %vm778_vm9, %vm779_vm11 }
  0x29   : > { %v324_v30 = vsel %vm4621_vm5, %v316_v23, %v323_v24  ;;  %v446_v31 = vsel %vm4629_vm6, %v315_v22, %v445_v25  ;;  %v332_v37 = vor.u32 %v330_v18, %v329_v28  ;;  %v333_v38 = vrot.slane %v329_v28, 4  ;;  %v250_v48 = vld [vmem:[%s4600_s9 + $0x2c] sm:$0xf]  ;;  %v459_v55 = vld [vmem:[#allocation2 + $0x48] sm:$0xf]  ;;  %vm4771_vm14 = vmor %vm1247_vm10, %vm1248_vm12  ;;  %s5321_s8 = sld [smem:[#allocation6 + %s4559_s0]] }
  0x2a   : > { %447 = vst [vmem:[#allocation2 + $0x30] sm:$0xf] %v446_v31  ;;  %448 = vst.msk [vmem:[#allocation2 + $0x34] sm:$0xf] %vm207_vm0, %v324_v30  ;;  %v340_v39 = vor.u32 %v338_v20, %v4640_v29  ;;  %v261_v41 = vrot.slane %v259_v34, 7  ;;  %v270_v43 = vshll.u32 %v240_v33, 16 }
  0x2b   : > { %v453_v46 = vsel %vm4629_vm6, %v332_v37, %v452_v27  ;;  %v344_v49 = vshrl.u32 %v249_v44, 16  ;;  %v347_v50 = vshll.u32 %v249_v44, 16  ;;  %v269_v53 = vrot.slane %v267_v42, 7  ;;  %v251_v63 = vld [vmem:[%s4600_s9 + $0x30] sm:$0xf]  ;;  %v4442_v9 = vld [vmem:[%s5453_s2 + $0x28] sm:$0xff]  }
  0x2c   : > { %v341_v45 = vsel %vm4621_vm5, %v333_v38, %v340_v39  ;;  %454 = vst [vmem:[#allocation2 + $0x3c] sm:$0xf] %v453_v46  ;;  %v264_v51 = vor.u32 %v262_v35, %v261_v41  ;;  %v265_v52 = vrot.slane %v261_v41, 4  ;;  %v352_v54 = vshrl.u32 %v250_v48, 16  ;;  %v252_v2 = vld [vmem:[%s4600_s9 + $0x34] sm:$0xf] }
  0x2d   : > { %455 = vst.msk [vmem:[#allocation2 + $0x40] sm:$0xf] %vm207_vm0, %v341_v45  ;;  %v346_v57 = vrot.slane %v344_v49, 7  ;;  %v355_v58 = vshll.u32 %v250_v48, 16  ;;  %v272_v59 = vor.u32 %v270_v43, %v269_v53  ;;  %v274_v60 = vrot.slane %v269_v53, 4  ;;  %v4446_v27 = vld [vmem:[%s5453_s2 + $0x30] sm:$0xff]  }
  0x2e   : > { %v423_v61 = vsel %vm4629_vm6, %v264_v51, %v422_v40  ;;  %v4672_v62 = vrot.slane %v352_v54, 7  ;;  %v361_v3 = vshrl.u32 %v251_v63, 16  ;;  %v364_v4 = vshll.u32 %v251_v63, 16  ;;  %v466_v16 = vld [vmem:[#allocation2 + $0x54] sm:$0xf]  ;;  %v4450_v38 = vld [vmem:[%s5453_s2 + $0x48] sm:$0xff]  }
  0x2f   : > { %424 = vst [vmem:[#allocation2 + $0xc] sm:$0xf] %v423_v61  ;;  %v349_v0 = vor.u32 %v347_v50, %v346_v57  ;;  %v350_v1 = vrot.slane %v346_v57, 4  ;;  %v273_v6 = vsel %vm4621_vm5, %v265_v52, %v272_v59  ;;  %v429_v7 = vsel %vm4666_vm8, %v274_v60, %v428_v47  ;;  %v241_v24 = vld [vmem:[%s4600_s9 + $0x8] sm:$0xf]  ;;  %v4718_v46 = vld [vmem:[%s5453_s2 + $0x38] sm:$0xff]  }
  0x30   : > { %v357_v8 = vor.u32 %v355_v58, %v4672_v62  ;;  %425 = vst.msk [vmem:[#allocation2 + $0x10] sm:$0xf] %vm207_vm0, %v273_v6  ;;  %430 = vst [vmem:[#allocation2 + $0x14] sm:$0x1] %v429_v7  ;;  %v363_v11 = vrot.slane %v361_v3, 7  ;;  %v369_v12 = vshrl.u32 %v252_v2, 16 }
  0x31   : > { %v4439_v5 = vld [vmem:[#allocation2 + $0x30] sm:$0xff]   ;;  %v460_v10 = vsel %vm4629_vm6, %v349_v0, %v459_v55  ;;  %v372_v14 = vshll.u32 %v252_v2, 16  ;;  %v325_v19 = vrot.slane %v4625_v15, 4  ;;  %v342_v25 = vrot.slane %v4640_v29, 4  ;;  %v242_v30 = vld [vmem:[%s4600_s9 + $0xc] sm:$0xf] }
  0x32   : > { %4216 = vmatprep.mubr.msk.bf16.mxu1 %vm480_vm7, %v4439_v5  ;;  %v358_v18 = vsel %vm4621_vm5, %v350_v1, %v357_v8  ;;  %461 = vst [vmem:[#allocation2 + $0x48] sm:$0xf] %v460_v10  ;;  %v366_v21 = vor.u32 %v364_v4, %v363_v11  ;;  %v367_v22 = vrot.slane %v363_v11, 4  ;;  %v4692_v23 = vrot.slane %v369_v12, 7  ;;  %v431_v37 = vld [vmem:[#allocation2 + $0x18] sm:$0xf] }
  0x33   : > { %462 = vst.msk [vmem:[#allocation2 + $0x4c] sm:$0xf] %vm207_vm0, %v358_v18  ;;  %v276_v31 = vshrl.u32 %v241_v24, 16  ;;  %v279_v32 = vshll.u32 %v241_v24, 16  ;;  %v284_v34 = vshrl.u32 %v242_v30, 16  ;;  %v287_v35 = vshll.u32 %v242_v30, 16 }
  0x34   : > { %v4441_v20 = vld [vmem:[#allocation2 + $0x3c] sm:$0xff]   ;;  %v467_v28 = vsel %vm4629_vm6, %v366_v21, %v466_v16  ;;  %v374_v33 = vor.u32 %v372_v14, %v4692_v23  ;;  %v243_v40 = vld [vmem:[%s4600_s9 + $0x10] sm:$0xf]  ;;  %v244_v41 = vld [vmem:[%s4600_s9 + $0x14] sm:$0xf]  ;;  %v359_v51 = vrot.slane %v4672_v62, 4 }
  0x35   : > { %4217 = vmatmul.mubr.msk.bf16.vlgmr.msra.gmra.mrb[0].mxu1 %vm480_vm7, %v4441_v20  ;;  %468 = vst [vmem:[#allocation2 + $0x54] sm:$0xf] %v467_v28  ;;  %v278_v39 = vrot.slane %v276_v31, 7  ;;  %v293_v44 = vshrl.u32 %v243_v40, 16  ;;  %v296_v45 = vshll.u32 %v243_v40, 16  ;;  %v301_v49 = vshrl.u32 %v244_v41, 16 }
  0x36   : > { %4225 = vmatpush3.bf16.msra.mxu1 %v4638_v26  ;;  %v375_v43 = vsel %vm4621_vm5, %v367_v22, %v374_v33  ;;  %v4712_v26 = vrot.slane %v284_v34, 7  ;;  %v304_v50 = vshll.u32 %v244_v41, 16  ;;  %v376_v53 = vrot.slane %v4692_v23, 4  ;;  %v4453_v57 = vld [vmem:[%s5453_s2 + $0x50] sm:$0xff]   ;;  %v438_v60 = vld [vmem:[#allocation2 + $0x24] sm:$0xf] }
  0x37   : > { %4226 = vmatprep.subr.bf16.mxu1 %v4442_v9  ;;  %v4444_v42 = vld [vmem:[#allocation2 + $0xc] sm:$0xff]   ;;  %469 = vst.msk [vmem:[#allocation2 + $0x58] sm:$0xf] %vm207_vm0, %v375_v43  ;;  %v281_v47 = vor.u32 %v279_v32, %v278_v39  ;;  %v282_v48 = vrot.slane %v278_v39, 4  ;;  %v295_v55 = vrot.slane %v293_v44, 7  ;;  %v4730_v59 = vrot.slane %v301_v49, 7 }
  0x38   : > { %4209 = vmatmul.mubr.msk.bf16.vlgmr.msra.gmra.mrb[0].mxu0 %vm480_vm7, %v4444_v42  ;;  %v289_v54 = vor.u32 %v287_v35, %v4712_v26  ;;  %v754_v61 = vld [vmem:[#allocation2] sm:$0xf]  ;;  %v755_v2 = vld [vmem:[#allocation2 + $0x4] sm:$0xf]  ;;  %v756_v3 = vld [vmem:[#allocation2 + $0x8] sm:$0x1] }
  0x39   : > { %4249 = vmatpush3.bf16.msra.mxu0 %v4650_v36  ;;  %v432_v58 = vsel %vm4629_vm6, %v281_v47, %v431_v37  ;;  %v298_v0 = vor.u32 %v296_v45, %v295_v55  ;;  %v299_v1 = vrot.slane %v295_v55, 4  ;;  %v782_v36 = vshrl.u32 %v754_v61, 16  ;;  %v4743_v11 = vld [vmem:[%s5453_s2 + $0x60] sm:$0xff]   ;;  %v4455_v12 = vld [vmem:[%s5453_s2 + $0x58] sm:$0xff]   ;;  %v757_v30 = vld [vmem:[#allocation2 + $0xc] sm:$0xf] }
  0x3a   : > { %4227 = vmatpush3.bf16.msra.mxu1 %v4442_v9  ;;  %v4445_v52 = vld [vmem:[#allocation2 + $0x48] sm:$0xff]   ;;  %4250 = vmatprep.subr.bf16.mxu0 %v4450_v38  ;;  %v290_v63 = vsel %vm4621_vm5, %v282_v48, %v289_v54  ;;  %433 = vst [vmem:[#allocation2 + $0x18] sm:$0xf] %v432_v58  ;;  %v291_v4 = vrot.slane %v4712_v26, 4  ;;  %v306_v5 = vor.u32 %v304_v50, %v4730_v59  ;;  %v785_v6 = vshll.u32 %v754_v61, 16  ;;  %v4461_v15 = vld [vmem:[%s5453_s2 + $0x90] sm:$0xff]  }
  0x3b   : > { %4228 = vmatprep.subr.bf16.mxu1 %v4446_v27  ;;  %4220 = vmatprep.mubr.msk.bf16.mxu1 %vm480_vm7, %v4445_v52  ;;  %434 = vst.msk [vmem:[#allocation2 + $0x1c] sm:$0xf] %vm207_vm0, %v290_v63  ;;  %v439_v7 = vsel %vm4629_vm6, %v298_v0, %v438_v60  ;;  %v784_v8 = vrot.slane %v782_v36, 4  ;;  %v791_v9 = vshll.u32 %v755_v2, 16  ;;  %v795_v10 = vshrl.u32 %v755_v2, 16  ;;  %s4079_s13 = sshll.u32 %s5321_s8, 1 }
  0x3c   : > { %v307_v14 = vsel %vm4621_vm5, %v299_v1, %v306_v5  ;;  %440 = vst [vmem:[#allocation2 + $0x24] sm:$0xf] %v439_v7  ;;  %v787_v16 = vrot.slane %v785_v6, 5  ;;  %v801_v18 = vshll.u32 %v756_v3, 16  ;;  %v308_v24 = vrot.slane %v4730_v59, 4  ;;  %s4087_s14 = sshll.u32 %s4571_s28, 4 }
  0x3d   : > { %4251 = vmatpush3.bf16.msra.mxu0 %v4450_v38  ;;  %441 = vst.msk [vmem:[#allocation2 + $0x28] sm:$0xf] %vm207_vm0, %v307_v14  ;;  %v793_v21 = vrot.slane %v791_v9, 5  ;;  %v797_v22 = vrot.slane %v795_v10, 4  ;;  %v758_v33 = vld [vmem:[#allocation2 + $0x10] sm:$0xf]  ;;  %s5404_s16 = scalar_lea.vmem %s5456_s5, %s4087_s14 }
  0x3e   : > { %4229 = vmatpush3.bf16.msra.mxu1 %v4446_v27  ;;  %v4448_v20 = vld [vmem:[#allocation2 + $0x54] sm:$0xff]   ;;  %4252 = vmatprep.subr.bf16.mxu0 %v4453_v57  ;;  %v788_v27 = vor.u32 %v787_v16, %v784_v8  ;;  %v803_v28 = vrot.slane %v801_v18, 5  ;;  %v806_v35 = vshrl.u32 %v757_v30, 16  ;;  %v809_v37 = vshll.u32 %v757_v30, 16  ;;  %v4763_v38 = vld [vmem:[%s5453_s2 + $0x80] sm:$0xff]  }
  0x3f   : > { %4230 = vmatprep.subr.bf16.mxu1 %v4718_v46  ;;  %4221 = vmatmul.mubr.msk.bf16.gmra.mrb[4].mxu1 %vm480_vm7, %v4448_v20  ;;  %v798_v32 = vor.u32 %v797_v22, %v793_v21  ;;  %v759_v34 = vld [vmem:[#allocation2 + $0x14] sm:$0x1]  ;;  %v815_v40 = vshll.u32 %v758_v33, 16  ;;  %v819_v41 = vshrl.u32 %v758_v33, 16  ;;  %v1200_v63 = vld [vmem:[#allocation2 + $0x4] sm:$0xf] }
  0x40   : > { %v789_v39 = vrot.slane %v788_v27, 4  ;;  %v825_v42 = vshll.u32 %v759_v34, 16  ;;  %v808_v45 = vrot.slane %v806_v35, 4  ;;  %v811_v47 = vrot.slane %v809_v37, 5  ;;  %v1201_v2 = vld [vmem:[#allocation2 + $0x8] sm:$0x1] }
  0x41   : > { %4253 = vmatpush3.bf16.msra.mxu0 %v4453_v57  ;;  %v799_v44 = vrot.slane %v798_v32, 4  ;;  %v817_v49 = vrot.slane %v815_v40, 5  ;;  %v821_v50 = vrot.slane %v819_v41, 4  ;;  %v1199_v57 = vld [vmem:[#allocation2] sm:$0xe]  ;;  %v1252_v3 = vrot.slane %v1200_v63, 5 }
  0x42   : > { %4231 = vmatpush3.bf16.msra.mxu1 %v4718_v46  ;;  %v4451_v43 = vld [vmem:[#allocation2 + $0x18] sm:$0xff]   ;;  %4254 = vmatprep.subr.bf16.mxu0 %v4455_v12  ;;  %v794_v48 = vsel %vm4756_vm13, %v789_v39, %v793_v21  ;;  %v827_v52 = vrot.slane %v825_v42, 5  ;;  %v812_v55 = vor.u32 %v811_v47, %v808_v45  ;;  %v3857_v0 = vrot.slane %v1199_v57, 9  ;;  %v435_v36 = vld [vmem:[#allocation2 + $0x20] sm:$0x1] }
  0x43   : > { %4272 = vmatprep.subr.bf16.mxu1 %v4743_v11  ;;  %4212 = vmatprep.mubr.msk.bf16.mxu0 %vm480_vm7, %v4451_v43  ;;  %v804_v54 = vsel %vm4756_vm13, %v799_v44, %v803_v28  ;;  %v822_v61 = vor.u32 %v821_v50, %v817_v49  ;;  %v1255_v6 = vrot.slane %v1201_v2, 5  ;;  %v436_v7 = vsel %vm4666_vm8, %v291_v4, %v435_v36  ;;  %v760_v8 = vld [vmem:[#allocation2 + $0x18] sm:$0xf]  ;;  %v761_v9 = vld [vmem:[#allocation2 + $0x1c] sm:$0xf]  ;;  %v4456_v28 = vld [vmem:[%s5453_s2 + $0x68] sm:$0xff]  }
  0x44   : > { %v4452_v58 = vld [vmem:[#allocation2 + $0x24] sm:$0xff]   ;;  %v3837_v60 = vcombine.low %v794_v48, %v804_v54  ;;  %v813_v1 = vrot.slane %v812_v55, 4  ;;  %v1254_v14 = vrot.slane %v1252_v3, 4  ;;  %437 = vst [vmem:[#allocation2 + $0x20] sm:$0x1] %v436_v7  ;;  %v830_v16 = vshrl.u32 %v760_v8, 16 }
  0x45   : > { %4255 = vmatpush3.bf16.msra.mxu0 %v4455_v12  ;;  %v823_v5 = vrot.slane %v822_v61, 4  ;;  %v1253_v12 = vsel %vm4771_vm14, %v3857_v0, %v1252_v3  ;;  %v1202_v18 = vld [vmem:[#allocation2 + $0xc] sm:$0xe]  ;;  %v1203_v20 = vld [vmem:[#allocation2 + $0x10] sm:$0xf]  ;;  %v833_v26 = vshll.u32 %v760_v8, 16 }
  0x46   : > { %4296 = vmatprep.subr.bf16.mxu0 %v4763_v38  ;;  %4213 = vmatmul.mubr.msk.bf16.gmra.mrb[4].mxu0 %vm480_vm7, %v4452_v58  ;;  %v818_v10 = vsel %vm4756_vm13, %v813_v1, %v817_v49  ;;  %v839_v22 = vshll.u32 %v761_v9, 16  ;;  %v843_v27 = vshrl.u32 %v761_v9, 16  ;;  %v1204_v4 = vld [vmem:[#allocation2 + $0x14] sm:$0x1]  ;;  %v1256_v32 = vsel %vm4771_vm14, %v1254_v14, %v1255_v6  ;;  %v442_v41 = vld [vmem:[#allocation2 + $0x2c] sm:$0x1] }
  0x47   : > { %4232 = vmatprep.mubr.msk.bf16.mxu1 %vm480_vm7, %v3837_v60  ;;  %v828_v21 = vsel %vm4756_vm13, %v823_v5, %v827_v52  ;;  %v832_v33 = vrot.slane %v830_v16, 4  ;;  %v3858_v34 = vrot.slane %v1202_v18, 9  ;;  %v3873_v35 = vcombine.low %v1253_v12, %v1256_v32  ;;  %v763_v45 = vld [vmem:[#allocation2 + $0x24] sm:$0xf]  ;;  %v764_v47 = vld [vmem:[#allocation2 + $0x28] sm:$0xf] }
  0x48   : > { %v3838_v30 = vcombine.low %v818_v10, %v828_v21  ;;  %v835_v37 = vrot.slane %v833_v26, 5  ;;  %v4796_v39 = vrot.slane %v839_v22, 5  ;;  %v845_v40 = vrot.slane %v843_v27, 4  ;;  %v1206_v5 = vld [vmem:[#allocation2 + $0x1c] sm:$0xf]  ;;  %v4459_v14 = vld [vmem:[%s5453_s2 + $0x88] sm:$0xff]  }
  0x49   : > { %v1259_v42 = vrot.slane %v1203_v20, 5  ;;  %v1262_v43 = vrot.slane %v1204_v4, 5  ;;  %v443_v44 = vsel %vm4666_vm8, %v308_v24, %v442_v41  ;;  %4256 = vmatprep.mubr.msk.bf16.mxu0 %vm480_vm7, %v3873_v35  ;;  %v854_v50 = vshrl.u32 %v763_v45, 16  ;;  %v1205_v24 = vld [vmem:[#allocation2 + $0x18] sm:$0xe] }
  0x4a   : > { %4233 = vmatmul.mubr.msk.bf16.vlgmr.msra.gmra.mrb[8].mxu1 %vm480_vm7, %v3838_v30  ;;  %v836_v48 = vor.u32 %v835_v37, %v832_v33  ;;  %v846_v49 = vor.u32 %v845_v40, %v4796_v39  ;;  %444 = vst [vmem:[#allocation2 + $0x2c] sm:$0x1] %v443_v44  ;;  %v857_v52 = vshll.u32 %v763_v45, 16  ;;  %v863_v59 = vshll.u32 %v764_v47, 16  ;;  %v449_v12 = vld [vmem:[#allocation2 + $0x38] sm:$0x1] }
  0x4b   : > { %4273 = vmatpush3.bf16.msra.mxu1 %v4743_v11  ;;  %v1260_v54 = vsel %vm4771_vm14, %v3858_v34, %v1259_v42  ;;  %v1261_v55 = vrot.slane %v1259_v42, 4  ;;  %v867_v57 = vshrl.u32 %v764_v47, 16  ;;  %v4458_v11 = vld [vmem:[%s5453_s2 + $0x70] sm:$0xff]   ;;  %v762_v58 = vld [vmem:[#allocation2 + $0x20] sm:$0x1]  ;;  %v856_v63 = vrot.slane %v854_v50, 4 }
  0x4c   : > { %4274 = vmatprep.subr.bf16.mxu1 %v4456_v28  ;;  %v837_v60 = vrot.slane %v836_v48, 4  ;;  %v847_v61 = vrot.slane %v846_v49, 4  ;;  %v859_v0 = vrot.slane %v857_v52, 5  ;;  %v849_v1 = vshll.u32 %v762_v58, 16  ;;  %v1207_v9 = vld [vmem:[#allocation2 + $0x20] sm:$0x1] }
  0x4d   : > { %v1263_v2 = vsel %vm4771_vm14, %v1261_v55, %v1262_v43  ;;  %v4813_v3 = vrot.slane %v863_v59, 5  ;;  %v869_v36 = vrot.slane %v867_v57, 4  ;;  %v3859_v10 = vrot.slane %v1205_v24, 9  ;;  %v766_v26 = vld [vmem:[#allocation2 + $0x30] sm:$0xf]  ;;  %v4460_v22 = vld [vmem:[%s5453_s2 + $0x78] sm:$0xff]  }
  0x4e   : > { %v842_v6 = vsel %vm4756_vm13, %v837_v60, %v4796_v39  ;;  %v3874_v7 = vcombine.low %v1260_v54, %v1263_v2  ;;  %v860_v8 = vor.u32 %v859_v0, %v856_v63  ;;  %v851_v16 = vrot.slane %v849_v1, 5  ;;  %v1208_v40 = vld [vmem:[#allocation2 + $0x24] sm:$0xe]  ;;  %v1209_v44 = vld [vmem:[#allocation2 + $0x28] sm:$0xf] }
  0x4f   : > { %4275 = vmatpush3.bf16.msra.mxu1 %v4456_v28  ;;  %v870_v18 = vor.u32 %v869_v36, %v4813_v3  ;;  %v1266_v20 = vrot.slane %v1206_v5, 5  ;;  %v1269_v21 = vrot.slane %v1207_v9, 5  ;;  %v450_v4 = vsel %vm4666_vm8, %v325_v19, %v449_v12  ;;  %v767_v28 = vld [vmem:[#allocation2 + $0x34] sm:$0xf]  ;;  %v4846_v50 = vld [vmem:[%s5453_s2 + $0xa0] sm:$0xff]   ;;  %v4465_v36 = vld [vmem:[%s5453_s2 + $0x98] sm:$0xff]  }
  0x50   : > { %4276 = vmatprep.subr.bf16.mxu1 %v4458_v11  ;;  %4257 = vmatmul.mubr.msk.bf16.vlgmr.msra.gmra.mrb[8].mxu0 %vm480_vm7, %v3874_v7  ;;  %v861_v27 = vrot.slane %v860_v8, 4  ;;  %v878_v30 = vshrl.u32 %v766_v26, 16  ;;  %v881_v32 = vshll.u32 %v766_v26, 16  ;;  %v852_v33 = vsel %vm4756_vm13, %v847_v61, %v851_v16  ;;  %451 = vst [vmem:[#allocation2 + $0x38] sm:$0x1] %v450_v4 }
  0x51   : > { %v765_v34 = vld [vmem:[#allocation2 + $0x2c] sm:$0x1]  ;;  %v871_v35 = vrot.slane %v870_v18, 4  ;;  %4297 = vmatpush3.bf16.msra.mxu0 %v4763_v38  ;;  %v1267_v37 = vsel %vm4771_vm14, %v3859_v10, %v1266_v20  ;;  %v1268_v39 = vrot.slane %v1266_v20, 4  ;;  %v3839_v19 = vcombine.low %v842_v6, %v852_v33  ;;  %v456_v60 = vld [vmem:[#allocation2 + $0x44] sm:$0x1] }
  0x52   : > { %v866_v41 = vsel %vm4756_vm13, %v861_v27, %v4813_v3  ;;  %v873_v42 = vshll.u32 %v765_v34, 16  ;;  %v880_v43 = vrot.slane %v878_v30, 4  ;;  %v1210_v45 = vld [vmem:[#allocation2 + $0x2c] sm:$0x1]  ;;  %4298 = vmatprep.subr.bf16.mxu0 %v4459_v14  ;;  %v883_v47 = vrot.slane %v881_v32, 5 }
  0x53   : > { %4277 = vmatpush3.bf16.msra.mxu1 %v4458_v11  ;;  %v1270_v38 = vsel %vm4771_vm14, %v1268_v39, %v1269_v21  ;;  %v887_v48 = vshll.u32 %v767_v28, 16  ;;  %v891_v49 = vshrl.u32 %v767_v28, 16  ;;  %4236 = vmatprep.mubr.msk.bf16.mxu1 %vm480_vm7, %v3839_v19  ;;  %v3860_v55 = vrot.slane %v1208_v40, 9  ;;  %v769_v2 = vld [vmem:[#allocation2 + $0x3c] sm:$0xf] }
  0x54   : > { %4278 = vmatprep.subr.bf16.mxu1 %v4460_v22  ;;  %v875_v52 = vrot.slane %v873_v42, 5  ;;  %v3875_v54 = vcombine.low %v1267_v37, %v1270_v38  ;;  %v1273_v59 = vrot.slane %v1209_v44, 5  ;;  %v884_v57 = vor.u32 %v883_v47, %v880_v43  ;;  %v770_v3 = vld [vmem:[#allocation2 + $0x40] sm:$0xf]  ;;  %v1211_v26 = vld [vmem:[#allocation2 + $0x30] sm:$0xe] }
  0x55   : > { %v889_v24 = vrot.slane %v887_v48, 5  ;;  %v893_v11 = vrot.slane %v891_v49, 4  ;;  %v1276_v58 = vrot.slane %v1210_v45, 5  ;;  %4299 = vmatpush3.bf16.msra.mxu0 %v4459_v14  ;;  %v457_v1 = vsel %vm4666_vm8, %v342_v25, %v456_v60  ;;  %v4867_v14 = vld [vmem:[%s5453_s2 + $0xc0] sm:$0xff]   ;;  %v463_v39 = vld [vmem:[#allocation2 + $0x50] sm:$0x1] }
  0x56   : > { %v876_v61 = vsel %vm4756_vm13, %v871_v35, %v875_v52  ;;  %4260 = vmatprep.mubr.msk.bf16.mxu0 %vm480_vm7, %v3875_v54  ;;  %v1274_v63 = vsel %vm4771_vm14, %v3860_v55, %v1273_v59  ;;  %v1275_v0 = vrot.slane %v1273_v59, 4  ;;  %v885_v6 = vrot.slane %v884_v57, 4  ;;  %458 = vst [vmem:[#allocation2 + $0x44] sm:$0x1] %v457_v1  ;;  %4300 = vmatprep.subr.bf16.mxu0 %v4461_v15  ;;  %v773_v42 = vld [vmem:[#allocation2 + $0x4c] sm:$0xf] }
  0x57   : > { %4279 = vmatpush3.bf16.msra.mxu1 %v4460_v22  ;;  %v3840_v5 = vcombine.low %v866_v41, %v876_v61  ;;  %v894_v7 = vor.u32 %v893_v11, %v889_v24  ;;  %v902_v8 = vshrl.u32 %v769_v2, 16  ;;  %v768_v9 = vld [vmem:[#allocation2 + $0x38] sm:$0x1]  ;;  %v905_v25 = vshll.u32 %v769_v2, 16  ;;  %v1212_v22 = vld [vmem:[#allocation2 + $0x34] sm:$0xf] }
  0x58   : > { %4320 = vmatprep.subr.bf16.mxu1 %v4846_v50  ;;  %v1277_v29 = vsel %vm4771_vm14, %v1275_v0, %v1276_v58  ;;  %v911_v10 = vshll.u32 %v770_v3, 16  ;;  %v915_v12 = vshrl.u32 %v770_v3, 16  ;;  %v890_v16 = vsel %vm4756_vm13, %v885_v6, %v889_v24  ;;  %v1213_v32 = vld [vmem:[#allocation2 + $0x38] sm:$0x1]  ;;  %v772_v41 = vld [vmem:[#allocation2 + $0x48] sm:$0xf] }
  0x59   : > { %4237 = vmatmul.mubr.msk.bf16.gmra.mrb[12].mxu1 %vm480_vm7, %v3840_v5  ;;  %v895_v18 = vrot.slane %v894_v7, 4  ;;  %v897_v20 = vshll.u32 %v768_v9, 16  ;;  %v3876_v21 = vcombine.low %v1274_v63, %v1277_v29  ;;  %4301 = vmatpush3.bf16.msra.mxu0 %v4461_v15  ;;  %v904_v27 = vrot.slane %v902_v8, 4  ;;  %v1214_v43 = vld [vmem:[#allocation2 + $0x3c] sm:$0xe] }
  0x5a   : > { %v907_v4 = vrot.slane %v905_v25, 5  ;;  %v913_v28 = vrot.slane %v911_v10, 5  ;;  %v917_v30 = vrot.slane %v915_v12, 4  ;;  %4302 = vmatprep.subr.bf16.mxu0 %v4465_v36  ;;  %v3861_v34 = vrot.slane %v1211_v26, 9  ;;  %v1215_v48 = vld [vmem:[#allocation2 + $0x40] sm:$0xf] }
  0x5b   : > { %v899_v33 = vrot.slane %v897_v20, 5  ;;  %4261 = vmatmul.mubr.msk.bf16.gmra.mrb[12].mxu0 %vm480_vm7, %v3876_v21  ;;  %v1280_v35 = vrot.slane %v1212_v22, 5  ;;  %v1283_v37 = vrot.slane %v1213_v32, 5  ;;  %v464_v15 = vsel %vm4666_vm8, %v359_v51, %v463_v39  ;;  %v470_v0 = vld [vmem:[#allocation2 + $0x5c] sm:$0x1] }
  0x5c   : > { %v908_v40 = vor.u32 %v907_v4, %v904_v27  ;;  %v918_v19 = vor.u32 %v917_v30, %v913_v28  ;;  %465 = vst [vmem:[#allocation2 + $0x50] sm:$0x1] %v464_v15  ;;  %v926_v47 = vshrl.u32 %v772_v41, 16  ;;  %v929_v55 = vshll.u32 %v772_v41, 16  ;;  %v775_v5 = vld [vmem:[#allocation2 + $0x54] sm:$0xf] }
  0x5d   : > { %v900_v44 = vsel %vm4756_vm13, %v895_v18, %v899_v33  ;;  %v1281_v45 = vsel %vm4771_vm14, %v3861_v34, %v1280_v35  ;;  %v1282_v38 = vrot.slane %v1280_v35, 4  ;;  %4303 = vmatpush3.bf16.msra.mxu0 %v4465_v36  ;;  %v771_v52 = vld [vmem:[#allocation2 + $0x44] sm:$0x1]  ;;  %v935_v24 = vshll.u32 %v773_v42, 16  ;;  %v776_v29 = vld [vmem:[#allocation2 + $0x58] sm:$0xf] }
  0x5e   : > { %v3841_v49 = vcombine.low %v890_v16, %v900_v44  ;;  %v909_v62 = vrot.slane %v908_v40, 4  ;;  %v919_v54 = vrot.slane %v918_v19, 4  ;;  %4344 = vmatprep.subr.bf16.mxu0 %v4867_v14  ;;  %v921_v51 = vshll.u32 %v771_v52, 16  ;;  %v1216_v11 = vld [vmem:[#allocation2 + $0x44] sm:$0x1] }
  0x5f   : > { %v1284_v59 = vsel %vm4771_vm14, %v1282_v38, %v1283_v37  ;;  %v928_v57 = vrot.slane %v926_v47, 4  ;;  %v931_v61 = vrot.slane %v929_v55, 5  ;;  %v939_v63 = vshrl.u32 %v773_v42, 16  ;;  %v1217_v18 = vld [vmem:[#allocation2 + $0x48] sm:$0xe] }
  0x60   : > { %4240 = vmatprep.mubr.msk.bf16.mxu1 %vm480_vm7, %v3841_v49  ;;  %v914_v58 = vsel %vm4756_vm13, %v909_v62, %v913_v28  ;;  %v3877_v60 = vcombine.low %v1281_v45, %v1284_v59  ;;  %v923_v1 = vrot.slane %v921_v51, 5  ;;  %v937_v2 = vrot.slane %v935_v24, 5  ;;  %v1218_v23 = vld [vmem:[#allocation2 + $0x4c] sm:$0xf]  ;;  %v1220_v39 = vld [vmem:[#allocation2 + $0x54] sm:$0xe] }
  0x61   : > { %v3862_v3 = vrot.slane %v1214_v43, 9  ;;  %v1287_v36 = vrot.slane %v1215_v48, 5  ;;  %v932_v6 = vor.u32 %v931_v61, %v928_v57  ;;  %v941_v7 = vrot.slane %v939_v63, 4  ;;  %v1221_v40 = vld [vmem:[#allocation2 + $0x58] sm:$0xf] }
  0x62   : > { %4264 = vmatprep.mubr.msk.bf16.mxu0 %vm480_vm7, %v3877_v60  ;;  %v1290_v8 = vrot.slane %v1216_v11, 5  ;;  %v471_v9 = vsel %vm4666_vm8, %v376_v53, %v470_v0  ;;  %v924_v25 = vsel %vm4756_vm13, %v919_v54, %v923_v1  ;;  %v950_v16 = vshrl.u32 %v775_v5, 16 }
  0x63   : > { %v1288_v10 = vsel %vm4771_vm14, %v3862_v3, %v1287_v36  ;;  %v1289_v12 = vrot.slane %v1287_v36, 4  ;;  %472 = vst [vmem:[#allocation2 + $0x5c] sm:$0x1] %v471_v9  ;;  %v3842_v20 = vcombine.low %v914_v58, %v924_v25  ;;  %v774_v21 = vld [vmem:[#allocation2 + $0x50] sm:$0x1]  ;;  %v933_v26 = vrot.slane %v932_v6, 4 }
  0x64   : > { %v942_v22 = vor.u32 %v941_v7, %v937_v2  ;;  %v953_v27 = vshll.u32 %v775_v5, 16  ;;  %v945_v4 = vshll.u32 %v774_v21, 16  ;;  %v952_v28 = vrot.slane %v950_v16, 4  ;;  %v1219_v32 = vld [vmem:[#allocation2 + $0x50] sm:$0x1] }
  0x65   : > { %v1291_v53 = vsel %vm4771_vm14, %v1289_v12, %v1290_v8  ;;  %v959_v30 = vshll.u32 %v776_v29, 16  ;;  %4241 = vmatmul.mubr.msk.bf16.gmra.mrb[16].mxu1 %vm480_vm7, %v3842_v20  ;;  %v938_v33 = vsel %vm4756_vm13, %v933_v26, %v937_v2  ;;  %v963_v41 = vshrl.u32 %v776_v29, 16  ;;  %v1790_v3 = vld [vmem:[#allocation2 + $0xc] sm:$0xf]  ;;  %v1791_v36 = vld [vmem:[#allocation2 + $0x10] sm:$0xf] }
  0x66   : > { %v943_v34 = vrot.slane %v942_v22, 4  ;;  %v3878_v35 = vcombine.low %v1288_v10, %v1291_v53  ;;  %v955_v37 = vrot.slane %v953_v27, 5  ;;  %v947_v19 = vrot.slane %v945_v4, 5  ;;  %v4462_v6 = vld [vmem:[#allocation2 + $0xc] sm:$0xff]   ;;  %v1792_v7 = vld [vmem:[#allocation2 + $0x14] sm:$0x1] }
  0x67   : > { %v961_v15 = vrot.slane %v959_v30, 5  ;;  %v3863_v42 = vrot.slane %v1217_v18, 9  ;;  %v1294_v44 = vrot.slane %v1218_v23, 5  ;;  %v1297_v45 = vrot.slane %v1219_v32, 5  ;;  %v1793_v22 = vld [vmem:[#allocation2 + $0x18] sm:$0xf] }
  0x68   : > { %4265 = vmatmul.mubr.msk.bf16.gmra.mrb[16].mxu0 %vm480_vm7, %v3878_v35  ;;  %v956_v43 = vor.u32 %v955_v37, %v952_v28  ;;  %v3864_v38 = vrot.slane %v1220_v39, 9  ;;  %v948_v47 = vsel %vm4756_vm13, %v943_v34, %v947_v19  ;;  %v965_v48 = vrot.slane %v963_v41, 4  ;;  %v1794_v4 = vld [vmem:[#allocation2 + $0x1c] sm:$0xf]  ;;  %v1795_v53 = vld [vmem:[#allocation2 + $0x20] sm:$0x1] }
  0x69   : > { %v1301_v49 = vrot.slane %v1221_v40, 5  ;;  %v3843_v52 = vcombine.low %v938_v33, %v948_v47  ;;  %v1295_v55 = vsel %vm4771_vm14, %v3863_v42, %v1294_v44  ;;  %v1296_v51 = vrot.slane %v1294_v44, 4  ;;  %v4464_v39 = vld [vmem:[#allocation2 + $0x18] sm:$0xff]  }
  0x6a   : > { %v777_v62 = vld [vmem:[#allocation2 + $0x5c] sm:$0x1]  ;;  %v957_v54 = vrot.slane %v956_v43, 4  ;;  %v966_v57 = vor.u32 %v965_v48, %v961_v15  ;;  %v1815_v8 = vshrl.u32 %v1790_v3, 16  ;;  %v1818_v9 = vshll.u32 %v1790_v3, 16  ;;  %v4466_v43 = vld [vmem:[#allocation2 + $0x24] sm:$0xff]  }
  0x6b   : > { %v1222_v59 = vld [vmem:[#allocation2 + $0x5c] sm:$0x1]  ;;  %v969_v24 = vshll.u32 %v777_v62, 16  ;;  %v1303_v11 = vrot.slane %v1301_v49, 4  ;;  %4244 = vmatprep.mubr.msk.bf16.mxu1 %vm480_vm7, %v3843_v52  ;;  %v1298_v58 = vsel %vm4771_vm14, %v1296_v51, %v1297_v45  ;;  %v1302_v60 = vsel %vm4771_vm14, %v3864_v38, %v1301_v49  ;;  %v1796_v48 = vld [vmem:[#allocation2 + $0x24] sm:$0xf] }
  0x6c   : > { %v1304_v61 = vrot.slane %v1222_v59, 5  ;;  %v962_v63 = vsel %vm4756_vm13, %v957_v54, %v961_v15  ;;  %v967_v0 = vrot.slane %v966_v57, 4  ;;  %v3879_v2 = vcombine.low %v1295_v55, %v1298_v58  ;;  %v1797_v49 = vld [vmem:[#allocation2 + $0x28] sm:$0xf]  ;;  %v1798_v54 = vld [vmem:[#allocation2 + $0x2c] sm:$0x1] }
  0x6d   : > { %v971_v1 = vrot.slane %v969_v24, 5  ;;  %v1824_v29 = vshll.u32 %v1791_v36, 16  ;;  %v1828_v12 = vshrl.u32 %v1791_v36, 16  ;;  %v1834_v16 = vshll.u32 %v1792_v7, 16  ;;  %v4467_v24 = vld [vmem:[%s5453_s2 + $0xa8] sm:$0xff]   ;;  %v4471_v7 = vld [vmem:[%s5453_s2 + $0xb0] sm:$0xff]  }
  0x6e   : > { %v1305_v5 = vsel %vm4771_vm14, %v1303_v11, %v1304_v61  ;;  %4268 = vmatprep.mubr.msk.bf16.mxu0 %vm480_vm7, %v3879_v2  ;;  %v1817_v20 = vrot.slane %v1815_v8, 4  ;;  %v1820_v21 = vrot.slane %v1818_v9, 5  ;;  %v1839_v30 = vshrl.u32 %v1793_v22, 16  ;;  %v4473_v8 = vld [vmem:[%s5453_s2 + $0xc8] sm:$0xff]  }
  0x6f   : > { %v972_v25 = vsel %vm4756_vm13, %v967_v0, %v971_v1  ;;  %v3880_v10 = vcombine.low %v1302_v60, %v1305_v5  ;;  %v1826_v26 = vrot.slane %v1824_v29, 5  ;;  %v1830_v27 = vrot.slane %v1828_v12, 4  ;;  %v1799_v1 = vld [vmem:[#allocation2 + $0x30] sm:$0xf]  ;;  %v1800_v5 = vld [vmem:[#allocation2 + $0x34] sm:$0xf] }
  0x70   : > { %v3844_v18 = vcombine.low %v962_v63, %v972_v25  ;;  %v1836_v23 = vrot.slane %v1834_v16, 5  ;;  %v1821_v28 = vor.u32 %v1820_v21, %v1817_v20  ;;  %v1842_v32 = vshll.u32 %v1793_v22, 16  ;;  %v4468_v16 = vld [vmem:[#allocation2 + $0x30] sm:$0xff]  }
  0x71   : > { %4269 = vmatmul.mubr.msk.bf16.gmra.mrb[20].mxu0 %vm480_vm7, %v3880_v10  ;;  %v1848_v33 = vshll.u32 %v1794_v4, 16  ;;  %v1831_v34 = vor.u32 %v1830_v27, %v1826_v26  ;;  %v1852_v35 = vshrl.u32 %v1794_v4, 16  ;;  %v1858_v37 = vshll.u32 %v1795_v53, 16  ;;  %v4470_v4 = vld [vmem:[#allocation2 + $0x3c] sm:$0xff]  }
  0x72   : > { %4245 = vmatmul.mubr.msk.bf16.gmra.mrb[20].mxu1 %vm480_vm7, %v3844_v18  ;;  %v1822_v40 = vrot.slane %v1821_v28, 4  ;;  %v1841_v19 = vrot.slane %v1839_v30, 4  ;;  %v1844_v15 = vrot.slane %v1842_v32, 5  ;;  %v1863_v55 = vshrl.u32 %v1796_v48, 16 }
  0x73   : > { %4280 = vmatprep.mubr.msk.bf16.mxu1 %vm480_vm7, %v4462_v6  ;;  %v1850_v41 = vrot.slane %v1848_v33, 5  ;;  %v1832_v42 = vrot.slane %v1831_v34, 4  ;;  %v1854_v44 = vrot.slane %v1852_v35, 4  ;;  %v1860_v45 = vrot.slane %v1858_v37, 5  ;;  %v1801_v6 = vld [vmem:[#allocation2 + $0x38] sm:$0x1] }
  0x74   : > { %v1827_v38 = vsel %vm4756_vm13, %v1822_v40, %v1826_v26  ;;  %v1845_v47 = vor.u32 %v1844_v15, %v1841_v19  ;;  %v1866_v51 = vshll.u32 %v1796_v48, 16  ;;  %v1872_v11 = vshll.u32 %v1797_v49, 16  ;;  %v1802_v34 = vld [vmem:[#allocation2 + $0x3c] sm:$0xf]  ;;  %v1803_v35 = vld [vmem:[#allocation2 + $0x40] sm:$0xf] }
  0x75   : > { %v1837_v52 = vsel %vm4756_vm13, %v1832_v42, %v1836_v23  ;;  %v1855_v62 = vor.u32 %v1854_v44, %v1850_v41  ;;  %v1876_v58 = vshrl.u32 %v1797_v49, 16  ;;  %v1865_v61 = vrot.slane %v1863_v55, 4  ;;  %v4475_v37 = vld [vmem:[%s5453_s2 + $0xb8] sm:$0xff]   ;;  %v1804_v19 = vld [vmem:[#allocation2 + $0x44] sm:$0x1] }
  0x76   : > { %v3929_v59 = vcombine.low %v1827_v38, %v1837_v52  ;;  %v1846_v57 = vrot.slane %v1845_v47, 4  ;;  %v1868_v63 = vrot.slane %v1866_v51, 5  ;;  %v1882_v0 = vshll.u32 %v1798_v54, 16  ;;  %v1805_v38 = vld [vmem:[#allocation2 + $0x48] sm:$0xf] }
  0x77   : > { %v1856_v60 = vrot.slane %v1855_v62, 4  ;;  %v1874_v3 = vrot.slane %v1872_v11, 5  ;;  %v1878_v36 = vrot.slane %v1876_v58, 4  ;;  %v1887_v10 = vshrl.u32 %v1799_v1, 16  ;;  %v1806_v62 = vld [vmem:[#allocation2 + $0x4c] sm:$0xf] }
  0x78   : > { %4304 = vmatprep.mubr.msk.bf16.mxu0 %vm480_vm7, %v3929_v59  ;;  %v1851_v2 = vsel %vm4756_vm13, %v1846_v57, %v1850_v41  ;;  %v1869_v29 = vor.u32 %v1868_v63, %v1865_v61  ;;  %v1884_v25 = vrot.slane %v1882_v0, 5  ;;  %v1890_v20 = vshll.u32 %v1799_v1, 16  ;;  %v1807_v59 = vld [vmem:[#allocation2 + $0x50] sm:$0x1]  ;;  %v4472_v11 = vld [vmem:[#allocation2 + $0x48] sm:$0xff]   ;;  %v4474_v1 = vld [vmem:[#allocation2 + $0x54] sm:$0xff]  }
  0x79   : > { %v1861_v9 = vsel %vm4756_vm13, %v1856_v60, %v1860_v45  ;;  %v1879_v18 = vor.u32 %v1878_v36, %v1874_v3  ;;  %v1896_v21 = vshll.u32 %v1800_v5, 16  ;;  %v1889_v22 = vrot.slane %v1887_v10, 4  ;;  %v253_v36 = vld [vmem:[%s4600_s9 + $0x38] sm:$0xf] }
  0x7a   : > { %4281 = vmatmul.mubr.msk.bf16.vlgmr.msra.gmra.mrb[24].mxu1 %vm480_vm7, %v4464_v39  ;;  %v3930_v12 = vcombine.low %v1851_v2, %v1861_v9  ;;  %v1870_v26 = vrot.slane %v1869_v29, 4  ;;  %v1900_v27 = vshrl.u32 %v1800_v5, 16  ;;  %v1906_v23 = vshll.u32 %v1801_v6, 16  ;;  %v4952_v39 = vld [vmem:[%s5453_s2 + $0xd0] sm:$0xff]   ;;  %v4968_v5 = vld [vmem:[%s5453_s2 + $0xe0] sm:$0xff]  }
  0x7b   : > { %4321 = vmatpush3.bf16.msra.mxu1 %v4846_v50  ;;  %4284 = vmatprep.mubr.msk.bf16.mxu1 %vm480_vm7, %v4466_v43  ;;  %v1880_v50 = vrot.slane %v1879_v18, 4  ;;  %v1892_v53 = vrot.slane %v1890_v20, 5  ;;  %v1898_v28 = vrot.slane %v1896_v21, 5  ;;  %v1911_v15 = vshrl.u32 %v1802_v34, 16  ;;  %v254_v29 = vld [vmem:[%s4600_s9 + $0x3c] sm:$0xf] }
  0x7c   : > { %4322 = vmatprep.subr.bf16.mxu1 %v4467_v24  ;;  %4305 = vmatmul.mubr.msk.bf16.vlgmr.msra.gmra.mrb[24].mxu0 %vm480_vm7, %v3930_v12  ;;  %v1875_v30 = vsel %vm4756_vm13, %v1870_v26, %v1874_v3  ;;  %v1902_v32 = vrot.slane %v1900_v27, 4  ;;  %v1908_v33 = vrot.slane %v1906_v23, 5  ;;  %v1914_v41 = vshll.u32 %v1802_v34, 16  ;;  %v473_v27 = vld [vmem:[#allocation2 + $0x60] sm:$0xf] }
  0x7d   : > { %4345 = vmatpush3.bf16.msra.mxu0 %v4867_v14  ;;  %v1885_v40 = vsel %vm4756_vm13, %v1880_v50, %v1884_v25  ;;  %v1893_v14 = vor.u32 %v1892_v53, %v1889_v22  ;;  %v1920_v44 = vshll.u32 %v1803_v35, 16  ;;  %v1924_v45 = vshrl.u32 %v1803_v35, 16  ;;  %v4479_v25 = vld [vmem:[%s5453_s2 + $0xd8] sm:$0xff]   ;;  %v1808_v23 = vld [vmem:[#allocation2 + $0x54] sm:$0xf] }
  0x7e   : > { %4346 = vmatprep.subr.bf16.mxu0 %v4473_v8  ;;  %v3931_v42 = vcombine.low %v1875_v30, %v1885_v40  ;;  %v1903_v43 = vor.u32 %v1902_v32, %v1898_v28  ;;  %v1913_v48 = vrot.slane %v1911_v15, 4  ;;  %v1916_v49 = vrot.slane %v1914_v41, 5  ;;  %v1809_v30 = vld [vmem:[#allocation2 + $0x58] sm:$0xf]  ;;  %v4984_v32 = vld [vmem:[%s5453_s2 + $0x100] sm:$0xff]  }
  0x7f   : > { %4323 = vmatpush3.bf16.msra.mxu1 %v4467_v24  ;;  %v1894_v47 = vrot.slane %v1893_v14, 4  ;;  %v1930_v52 = vshll.u32 %v1804_v19, 16  ;;  %v1922_v55 = vrot.slane %v1920_v44, 5  ;;  %v1926_v51 = vrot.slane %v1924_v45, 4  ;;  %v1810_v40 = vld [vmem:[#allocation2 + $0x5c] sm:$0x1] }
  0x80   : > { %4324 = vmatprep.subr.bf16.mxu1 %v4471_v7  ;;  %4308 = vmatprep.mubr.msk.bf16.mxu0 %vm480_vm7, %v3931_v42  ;;  %v1904_v54 = vrot.slane %v1903_v43, 4  ;;  %v1935_v57 = vshrl.u32 %v1805_v38, 16  ;;  %v1917_v58 = vor.u32 %v1916_v49, %v1913_v48  ;;  %v1938_v61 = vshll.u32 %v1805_v38, 16  ;;  %v477_v14 = vld [vmem:[#allocation2 + $0x68] sm:$0x1] }
  0x81   : > { %v1899_v24 = vsel %vm4756_vm13, %v1894_v47, %v1898_v28  ;;  %4347 = vmatpush3.bf16.msra.mxu0 %v4473_v8  ;;  %v1932_v60 = vrot.slane %v1930_v52, 5  ;;  %v1927_v0 = vor.u32 %v1926_v51, %v1922_v55  ;;  %v1944_v3 = vshll.u32 %v1806_v62, 16  ;;  %v2232_v42 = vld [vmem:[#allocation2 + $0xc] sm:$0xe]  ;;  %v2233_v47 = vld [vmem:[#allocation2 + $0x10] sm:$0xf] }
  0x82   : > { %4285 = vmatmul.mubr.msk.bf16.gmra.mrb[28].mxu1 %vm480_vm7, %v4468_v16  ;;  %v1909_v63 = vsel %vm4756_vm13, %v1904_v54, %v1908_v33  ;;  %v1937_v2 = vrot.slane %v1935_v57, 4  ;;  %4348 = vmatprep.subr.bf16.mxu0 %v4952_v39  ;;  %v1940_v8 = vrot.slane %v1938_v61, 5  ;;  %v1948_v9 = vshrl.u32 %v1806_v62, 16  ;;  %v2234_v54 = vld [vmem:[#allocation2 + $0x14] sm:$0x1] }
  0x83   : > { %4288 = vmatprep.mubr.msk.bf16.mxu1 %vm480_vm7, %v4470_v4  ;;  %4325 = vmatpush3.bf16.msra.mxu1 %v4471_v7  ;;  %v3932_v6 = vcombine.low %v1899_v24, %v1909_v63  ;;  %v1918_v7 = vrot.slane %v1917_v58, 4  ;;  %v1928_v10 = vrot.slane %v1927_v0, 4  ;;  %v1946_v12 = vrot.slane %v1944_v3, 5  ;;  %v2236_v61 = vld [vmem:[#allocation2 + $0x1c] sm:$0xf] }
  0x84   : > { %4326 = vmatprep.subr.bf16.mxu1 %v4475_v37  ;;  %v1954_v16 = vshll.u32 %v1807_v59, 16  ;;  %v378_v18 = vshrl.u32 %v253_v36, 16  ;;  %v1941_v21 = vor.u32 %v1940_v8, %v1937_v2  ;;  %v1950_v26 = vrot.slane %v1948_v9, 4  ;;  %v2237_v3 = vld [vmem:[#allocation2 + $0x20] sm:$0x1] }
  0x85   : > { %4309 = vmatmul.mubr.msk.bf16.gmra.mrb[28].mxu0 %vm480_vm7, %v3932_v6  ;;  %v1923_v20 = vsel %vm4756_vm13, %v1918_v7, %v1922_v55  ;;  %v381_v22 = vshll.u32 %v253_v36, 16  ;;  %v1933_v50 = vsel %vm4756_vm13, %v1928_v10, %v1932_v60  ;;  %v386_v28 = vshrl.u32 %v254_v29, 16  ;;  %v2235_v60 = vld [vmem:[#allocation2 + $0x18] sm:$0xe] }
  0x86   : > { %v1956_v4 = vrot.slane %v1954_v16, 5  ;;  %v380_v53 = vrot.slane %v378_v18, 7  ;;  %4349 = vmatpush3.bf16.msra.mxu0 %v4952_v39  ;;  %v3933_v33 = vcombine.low %v1923_v20, %v1933_v50  ;;  %v1942_v34 = vrot.slane %v1941_v21, 4  ;;  %v2239_v21 = vld [vmem:[#allocation2 + $0x28] sm:$0xf] }
  0x87   : > { %4327 = vmatpush3.bf16.msra.mxu1 %v4475_v37  ;;  %v1951_v35 = vor.u32 %v1950_v26, %v1946_v12  ;;  %v389_v37 = vshll.u32 %v254_v29, 16  ;;  %4350 = vmatprep.subr.bf16.mxu0 %v4479_v25  ;;  %v388_v15 = vrot.slane %v386_v28, 7  ;;  %v1959_v41 = vshrl.u32 %v1808_v23, 16  ;;  %v2240_v26 = vld [vmem:[#allocation2 + $0x2c] sm:$0x1] }
  0x88   : > { %4368 = vmatprep.subr.bf16.mxu1 %v4968_v5  ;;  %v383_v39 = vor.u32 %v381_v22, %v380_v53  ;;  %v384_v19 = vrot.slane %v380_v53, 4  ;;  %4312 = vmatprep.mubr.msk.bf16.mxu0 %vm480_vm7, %v3933_v33  ;;  %v1947_v43 = vsel %vm4756_vm13, %v1942_v34, %v1946_v12  ;;  %v1962_v45 = vshll.u32 %v1808_v23, 16  ;;  %v2238_v12 = vld [vmem:[#allocation2 + $0x24] sm:$0xe] }
  0x89   : > { %v1952_v44 = vrot.slane %v1951_v35, 4  ;;  %v1968_v38 = vshll.u32 %v1809_v30, 16  ;;  %v391_v48 = vor.u32 %v389_v37, %v388_v15  ;;  %v393_v49 = vrot.slane %v388_v15, 4 }
  0x8a   : > { %4289 = vmatmul.mubr.msk.bf16.gmra.mrb[32].mxu1 %vm480_vm7, %v4472_v11  ;;  %v474_v52 = vsel %vm4629_vm6, %v383_v39, %v473_v27  ;;  %v1961_v62 = vrot.slane %v1959_v41, 4  ;;  %4351 = vmatpush3.bf16.msra.mxu0 %v4479_v25  ;;  %v1964_v51 = vrot.slane %v1962_v45, 5  ;;  %v1972_v57 = vshrl.u32 %v1809_v30, 16 }
  0x8b   : > { %4292 = vmatprep.mubr.msk.bf16.mxu1 %vm480_vm7, %v4474_v1  ;;  %v1957_v55 = vsel %vm4756_vm13, %v1952_v44, %v1956_v4  ;;  %475 = vst [vmem:[#allocation2 + $0x60] sm:$0xf] %v474_v52  ;;  %v1970_v59 = vrot.slane %v1968_v38, 5  ;;  %4392 = vmatprep.subr.bf16.mxu0 %v4984_v32  ;;  %v392_v11 = vsel %vm4621_vm5, %v384_v19, %v391_v48  ;;  %v1978_v58 = vshll.u32 %v1810_v40, 16  ;;  %v2242_v48 = vld [vmem:[#allocation2 + $0x34] sm:$0xf] }
  0x8c   : > { %v3934_v24 = vcombine.low %v1947_v43, %v1957_v55  ;;  %v478_v17 = vsel %vm4666_vm8, %v393_v49, %v477_v14  ;;  %476 = vst.msk [vmem:[#allocation2 + $0x64] sm:$0xf] %vm207_vm0, %v392_v11  ;;  %v1965_v63 = vor.u32 %v1964_v51, %v1961_v62  ;;  %v1974_v0 = vrot.slane %v1972_v57, 4  ;;  %v4482_v11 = vld [vmem:[%s5453_s2 + $0xe8] sm:$0xff]  }
  0x8d   : > { %479 = vst [vmem:[#allocation2 + $0x68] sm:$0x1] %v478_v17  ;;  %v3949_v1 = vrot.slane %v2232_v42, 9  ;;  %v2282_v2 = vrot.slane %v2233_v47, 5  ;;  %v1980_v36 = vrot.slane %v1978_v58, 5  ;;  %v2285_v6 = vrot.slane %v2234_v54, 5 }
  0x8e   : > { %4313 = vmatmul.mubr.msk.bf16.gmra.mrb[32].mxu0 %vm480_vm7, %v3934_v24  ;;  %v3950_v13 = vrot.slane %v2235_v60, 9  ;;  %v2289_v7 = vrot.slane %v2236_v61, 5  ;;  %v1966_v8 = vrot.slane %v1965_v63, 4  ;;  %v1975_v9 = vor.u32 %v1974_v0, %v1970_v59  ;;  %v2241_v47 = vld [vmem:[#allocation2 + $0x30] sm:$0xe] }
  0x8f   : > { %v2284_v56 = vrot.slane %v2282_v2, 4  ;;  %v2283_v29 = vsel %vm4771_vm14, %v3949_v1, %v2282_v2  ;;  %v2292_v10 = vrot.slane %v2237_v3, 5  ;;  %v3951_v22 = vrot.slane %v2238_v12, 9  ;;  %v2243_v54 = vld [vmem:[#allocation2 + $0x38] sm:$0x1]  ;;  %v4486_v12 = vld [vmem:[%s5453_s2 + $0xf0] sm:$0xff]  }
  0x90   : > { %v2291_v25 = vrot.slane %v2289_v7, 4  ;;  %v1971_v16 = vsel %vm4756_vm13, %v1966_v8, %v1970_v59  ;;  %v1976_v18 = vrot.slane %v1975_v9, 4  ;;  %v2296_v23 = vrot.slane %v2239_v21, 5  ;;  %v2244_v0 = vld [vmem:[#allocation2 + $0x3c] sm:$0xe] }
  0x91   : > { %v2286_v20 = vsel %vm4771_vm14, %v2284_v56, %v2285_v6  ;;  %v2299_v50 = vrot.slane %v2240_v26, 5  ;;  %v2290_v42 = vsel %vm4771_vm14, %v3950_v13, %v2289_v7  ;;  %v2303_v55 = vrot.slane %v2242_v48, 5  ;;  %v2245_v1 = vld [vmem:[#allocation2 + $0x40] sm:$0xf]  ;;  %v2246_v3 = vld [vmem:[#allocation2 + $0x44] sm:$0x1] }
  0x92   : > { %v1811_v27 = vld [vmem:[#allocation2 + $0x60] sm:$0xf]  ;;  %v1981_v4 = vsel %vm4756_vm13, %v1976_v18, %v1980_v36  ;;  %v3965_v30 = vcombine.low %v2283_v29, %v2286_v20  ;;  %v2298_v37 = vrot.slane %v2296_v23, 4  ;;  %v2293_v38 = vsel %vm4771_vm14, %v2291_v25, %v2292_v10  ;;  %v4480_v7 = vld [vmem:[#allocation2 + $0x18] sm:$0xff]   ;;  %v2247_v29 = vld [vmem:[#allocation2 + $0x48] sm:$0xe] }
  0x93   : > { %v1983_v53 = vshrl.u32 %v1811_v27, 16  ;;  %v1986_v28 = vshll.u32 %v1811_v27, 16  ;;  %v4476_v33 = vld [vmem:[#allocation2 + $0x60] sm:$0xff]   ;;  %v3935_v34 = vcombine.low %v1971_v16, %v1981_v4  ;;  %v2297_v52 = vsel %vm4771_vm14, %v3951_v22, %v2296_v23  ;;  %v2248_v16 = vld [vmem:[#allocation2 + $0x4c] sm:$0xf] }
  0x94   : > { %v1812_v35 = vld [vmem:[#allocation2 + $0x64] sm:$0xf]  ;;  %v1813_v40 = vld [vmem:[#allocation2 + $0x68] sm:$0x1]  ;;  %4293 = vmatmul.mubr.msk.bf16.gmra.mrb[36].mxu1 %vm480_vm7, %v4476_v33  ;;  %v2300_v62 = vsel %vm4771_vm14, %v2298_v37, %v2299_v50  ;;  %v3952_v57 = vrot.slane %v2241_v47, 9  ;;  %v3966_v24 = vcombine.low %v2290_v42, %v2293_v38  ;;  %v2306_v58 = vrot.slane %v2243_v54, 5 }
  0x95   : > { %v1985_v14 = vrot.slane %v1983_v53, 4  ;;  %v1988_v39 = vrot.slane %v1986_v28, 5  ;;  %v1992_v19 = vshll.u32 %v1812_v35, 16  ;;  %v1996_v15 = vshrl.u32 %v1812_v35, 16  ;;  %4316 = vmatprep.mubr.msk.bf16.mxu0 %vm480_vm7, %v3935_v34  ;;  %4328 = vmatprep.mubr.msk.bf16.mxu1 %vm480_vm7, %v3965_v30  ;;  %v2249_v18 = vld [vmem:[#allocation2 + $0x50] sm:$0x1] }
  0x96   : > { %v2002_v41 = vshll.u32 %v1813_v40, 16  ;;  %v3967_v61 = vcombine.low %v2297_v52, %v2300_v62  ;;  %v2305_v63 = vrot.slane %v2303_v55, 4  ;;  %v4519_v2 = vmov 0.0   ;;  %v2250_v27 = vld [vmem:[#allocation2 + $0x54] sm:$0xe]  ;;  %v4481_v23 = vld [vmem:[#allocation2 + $0x24] sm:$0xff]  }
  0x97   : > { %v1989_v43 = vor.u32 %v1988_v39, %v1985_v14  ;;  %v1994_v44 = vrot.slane %v1992_v19, 5  ;;  %v1998_v45 = vrot.slane %v1996_v15, 4  ;;  %491 = vst.msk [vmem:[#allocation3 + $0x50] sm:$0xff] %vm480_vm7, %v4519_v2  ;;  %481 = vst.msk [vmem:[#allocation3] sm:$0xff] %vm480_vm7, %v4519_v2  ;;  %v3953_v36 = vrot.slane %v2244_v0, 9  ;;  %v4490_v33 = vld [vmem:[%s5453_s2 + $0xf8] sm:$0xff]  }
  0x98   : > { %v2004_v49 = vrot.slane %v2002_v41, 5  ;;  %482 = vst.msk [vmem:[#allocation3 + $0x8] sm:$0xff] %vm480_vm7, %v4519_v2  ;;  %483 = vst.msk [vmem:[#allocation3 + $0x10] sm:$0xff] %vm480_vm7, %v4519_v2  ;;  %v2310_v6 = vrot.slane %v2245_v1, 5  ;;  %v2313_v8 = vrot.slane %v2246_v3, 5  ;;  %v2304_v25 = vsel %vm4771_vm14, %v3952_v57, %v2303_v55  ;;  %v4484_v34 = vld [vmem:[#allocation2 + $0x30] sm:$0xff]  }
  0x99   : > { %v1990_v51 = vrot.slane %v1989_v43, 4  ;;  %v1999_v59 = vor.u32 %v1998_v45, %v1994_v44  ;;  %484 = vst.msk [vmem:[#allocation3 + $0x18] sm:$0xff] %vm480_vm7, %v4519_v2  ;;  %485 = vst.msk [vmem:[#allocation3 + $0x20] sm:$0xff] %vm480_vm7, %v4519_v2  ;;  %v2307_v10 = vsel %vm4771_vm14, %v2305_v63, %v2306_v58  ;;  %v3954_v20 = vrot.slane %v2247_v29, 9  ;;  %v2251_v53 = vld [vmem:[#allocation2 + $0x58] sm:$0xf] }
  0x9a   : > { %486 = vst.msk [vmem:[#allocation3 + $0x28] sm:$0xff] %vm480_vm7, %v4519_v2  ;;  %487 = vst.msk [vmem:[#allocation3 + $0x30] sm:$0xff] %vm480_vm7, %v4519_v2  ;;  %v2312_v56 = vrot.slane %v2310_v6, 4  ;;  %v2317_v26 = vrot.slane %v2248_v16, 5  ;;  %v2320_v22 = vrot.slane %v2249_v18, 5  ;;  %v3968_v50 = vcombine.low %v2304_v25, %v2307_v10  ;;  %v4487_v14 = vld [vmem:[%s5453_s2 + $0x108] sm:$0xff]  }
  0x9b   : > { %v1995_v17 = vsel %vm4756_vm13, %v1990_v51, %v1994_v44  ;;  %v2000_v60 = vrot.slane %v1999_v59, 4  ;;  %488 = vst.msk [vmem:[#allocation3 + $0x38] sm:$0xff] %vm480_vm7, %v4519_v2  ;;  %489 = vst.msk [vmem:[#allocation3 + $0x40] sm:$0xff] %vm480_vm7, %v4519_v2  ;;  %v2252_v28 = vld [vmem:[#allocation2 + $0x5c] sm:$0x1]  ;;  %v3955_v30 = vrot.slane %v2250_v27, 9 }
  0x9c   : > { %490 = vst.msk [vmem:[#allocation3 + $0x48] sm:$0xff] %vm480_vm7, %v4519_v2  ;;  %492 = vst.msk [vmem:[#allocation3 + $0x58] sm:$0xff] %vm480_vm7, %v4519_v2  ;;  %4329 = vmatmul.mubr.msk.bf16.vlgmr.msra.gmra.mrb[40].mxu1 %vm480_vm7, %v3966_v24  ;;  %v2314_v21 = vsel %vm4771_vm14, %v2312_v56, %v2313_v8  ;;  %v2319_v4 = vrot.slane %v2317_v26, 4  ;;  %v2324_v37 = vrot.slane %v2251_v53, 5  ;;  %v2327_v40 = vrot.slane %v2252_v28, 5  ;;  %v4485_v57 = vld [vmem:[#allocation2 + $0x3c] sm:$0xff]  }
  0x9d   : > { %493 = vst.msk [vmem:[#allocation3 + $0x60] sm:$0xff] %vm480_vm7, %v4519_v2  ;;  %494 = vst.msk [vmem:[#allocation3 + $0x68] sm:$0xff] %vm480_vm7, %v4519_v2  ;;  %v2005_v13 = vsel %vm4756_vm13, %v2000_v60, %v2004_v49  ;;  %4369 = vmatpush3.bf16.msra.mxu1 %v4968_v5  ;;  %4332 = vmatprep.mubr.msk.bf16.mxu1 %vm480_vm7, %v3967_v61  ;;  %v2311_v5 = vsel %vm4771_vm14, %v3953_v36, %v2310_v6  ;;  %v2253_v39 = vld [vmem:[#allocation2 + $0x60] sm:$0xe]  ;;  %v2254_v15 = vld [vmem:[#allocation2 + $0x64] sm:$0xf] }
  0x9e   : > { %495 = vst.msk [vmem:[#allocation3 + $0x70] sm:$0xff] %vm480_vm7, %v4519_v2  ;;  %496 = vst.msk [vmem:[#allocation3 + $0x78] sm:$0xff] %vm480_vm7, %v4519_v2  ;;  %v3936_v9 = vcombine.low %v1995_v17, %v2005_v13  ;;  %4370 = vmatprep.subr.bf16.mxu1 %v4482_v11  ;;  %v3969_v35 = vcombine.low %v2311_v5, %v2314_v21  ;;  %v2326_v19 = vrot.slane %v2324_v37, 4  ;;  %v2255_v41 = vld [vmem:[#allocation2 + $0x68] sm:$0x1]  ;;  %v3956_v42 = vrot.slane %v2253_v39, 9 }
  0x9f   : > { %v2318_v43 = vsel %vm4771_vm14, %v3954_v20, %v2317_v26  ;;  %v2321_v44 = vsel %vm4771_vm14, %v2319_v4, %v2320_v22  ;;  %v2331_v45 = vrot.slane %v2254_v15, 5  ;;  %v2334_v38 = vrot.slane %v2255_v41, 5  ;;  %v2821_v52 = vld [vmem:[#allocation2 + $0x18] sm:$0xf]  ;;  %v2822_v54 = vld [vmem:[#allocation2 + $0x1c] sm:$0xf] }
  0xa0   : > { %4317 = vmatmul.mubr.msk.bf16.gmra.mrb[36].mxu0 %vm480_vm7, %v3936_v9  ;;  %v2325_v47 = vsel %vm4771_vm14, %v3955_v30, %v2324_v37  ;;  %v2328_v48 = vsel %vm4771_vm14, %v2326_v19, %v2327_v40  ;;  %v3970_v62 = vcombine.low %v2318_v43, %v2321_v44  ;;  %v2823_v55 = vld [vmem:[#allocation2 + $0x20] sm:$0x1]  ;;  %v2846_v51 = vshrl.u32 %v2821_v52, 16  ;;  %v2824_v61 = vld [vmem:[#allocation2 + $0x24] sm:$0xf]  ;;  %v4488_v63 = vld [vmem:[#allocation2 + $0x48] sm:$0xff]  }
  0xa1   : > { %4352 = vmatprep.mubr.msk.bf16.mxu0 %vm480_vm7, %v4480_v7  ;;  %4371 = vmatpush3.bf16.msra.mxu1 %v4482_v11  ;;  %v2333_v49 = vrot.slane %v2331_v45, 4  ;;  %v2849_v59 = vshll.u32 %v2821_v52, 16  ;;  %v3971_v24 = vcombine.low %v2325_v47, %v2328_v48  ;;  %v4491_v11 = vld [vmem:[%s5453_s2 + $0x110] sm:$0xff]   ;;  %v2855_v58 = vshll.u32 %v2822_v54, 16  ;;  %v2825_v3 = vld [vmem:[#allocation2 + $0x28] sm:$0xf] }
  0xa2   : > { %4372 = vmatprep.subr.bf16.mxu1 %v4486_v12  ;;  %v2859_v17 = vshrl.u32 %v2822_v54, 16  ;;  %v2865_v60 = vshll.u32 %v2823_v55, 16  ;;  %v2848_v1 = vrot.slane %v2846_v51, 4  ;;  %v2826_v36 = vld [vmem:[#allocation2 + $0x2c] sm:$0x1]  ;;  %v2870_v8 = vshrl.u32 %v2824_v61, 16 }
  0xa3   : > { %v5088_v0 = vsel %vm4771_vm14, %v2333_v49, %v2334_v38  ;;  %v2851_v2 = vrot.slane %v2849_v59, 5  ;;  %v2857_v6 = vrot.slane %v2855_v58, 5  ;;  %v2873_v56 = vshll.u32 %v2824_v61, 16  ;;  %v4494_v10 = vld [vmem:[%s5453_s2 + $0x118] sm:$0xff]   ;;  %v3266_v43 = vld [vmem:[#allocation2 + $0x24] sm:$0xe] }
  0xa4   : > { %4333 = vmatmul.mubr.msk.bf16.gmra.mrb[44].mxu1 %vm480_vm7, %v3968_v50  ;;  %v2861_v13 = vrot.slane %v2859_v17, 4  ;;  %v2867_v7 = vrot.slane %v2865_v60, 5  ;;  %v2879_v29 = vshll.u32 %v2825_v3, 16  ;;  %v2883_v25 = vshrl.u32 %v2825_v3, 16  ;;  %v3263_v5 = vld [vmem:[#allocation2 + $0x18] sm:$0xe] }
  0xa5   : > { %4336 = vmatprep.mubr.msk.bf16.mxu1 %vm480_vm7, %v3969_v35  ;;  %4373 = vmatpush3.bf16.msra.mxu1 %v4486_v12  ;;  %v2852_v9 = vor.u32 %v2851_v2, %v2848_v1  ;;  %v2872_v18 = vrot.slane %v2870_v8, 4  ;;  %v2889_v20 = vshll.u32 %v2826_v36, 16  ;;  %v3264_v21 = vld [vmem:[#allocation2 + $0x1c] sm:$0xf]  ;;  %v2875_v22 = vrot.slane %v2873_v56, 5  ;;  %v4489_v49 = vld [vmem:[#allocation2 + $0x54] sm:$0xff]  }
  0xa6   : > { %4374 = vmatprep.subr.bf16.mxu1 %v4490_v33  ;;  %v2862_v16 = vor.u32 %v2861_v13, %v2857_v6  ;;  %v2881_v27 = vrot.slane %v2879_v29, 5  ;;  %v3265_v50 = vld [vmem:[#allocation2 + $0x20] sm:$0x1]  ;;  %v4041_v28 = vrot.slane %v3263_v5, 9  ;;  %v3313_v30 = vrot.slane %v3264_v21, 5 }
  0xa7   : > { %v2853_v26 = vrot.slane %v2852_v9, 4  ;;  %v2891_v53 = vrot.slane %v2889_v20, 5  ;;  %v2876_v35 = vor.u32 %v2875_v22, %v2872_v18  ;;  %v3316_v40 = vrot.slane %v3265_v50, 5  ;;  %v2829_v41 = vld [vmem:[#allocation2 + $0x38] sm:$0x1]  ;;  %v4492_v59 = vld [vmem:[#allocation2 + $0x60] sm:$0xff]  }
  0xa8   : > { %4353 = vmatmul.mubr.msk.bf16.vlgmr.msra.gmra.mrb[40].mxu0 %vm480_vm7, %v4481_v23  ;;  %v2885_v23 = vrot.slane %v2883_v25, 4  ;;  %v2863_v4 = vrot.slane %v2862_v16, 4  ;;  %v5105_v19 = vsel %vm4771_vm14, %v4041_v28, %v3313_v30  ;;  %v3315_v15 = vrot.slane %v3313_v30, 4  ;;  %v3267_v48 = vld [vmem:[#allocation2 + $0x28] sm:$0xf]  ;;  %v522_v31 = vld [vmem:[#allocation3 + $0x48] sm:$0xff] }
  0xa9   : > { %4393 = vmatpush3.bf16.msra.mxu0 %v4984_v32  ;;  %4356 = vmatprep.mubr.msk.bf16.mxu0 %vm480_vm7, %v4484_v34  ;;  %v5084_v32 = vsel %vm4771_vm14, %v3956_v42, %v2331_v45  ;;  %v2858_v34 = vsel %vm4756_vm13, %v2853_v26, %v2857_v6  ;;  %v2877_v45 = vrot.slane %v2876_v35, 4  ;;  %v3268_v51 = vld [vmem:[#allocation2 + $0x2c] sm:$0x1]  ;;  %v2830_v17 = vld [vmem:[#allocation2 + $0x3c] sm:$0xf]  ;;  %v4042_v2 = vrot.slane %v3266_v43, 9 }
  0xaa   : > { %4394 = vmatprep.subr.bf16.mxu0 %v4487_v14  ;;  %4375 = vmatpush3.bf16.msra.mxu1 %v4490_v33  ;;  %v3972_v12 = vcombine.low %v5084_v32, %v5088_v0  ;;  %v2827_v33 = vld [vmem:[#allocation2 + $0x30] sm:$0xf]  ;;  %v2886_v37 = vor.u32 %v2885_v23, %v2881_v27  ;;  %v2868_v39 = vsel %vm4756_vm13, %v2863_v4, %v2867_v7  ;;  %v2913_v32 = vshll.u32 %v2829_v41, 16  ;;  %v2831_v0 = vld [vmem:[#allocation2 + $0x40] sm:$0xf] }
  0xab   : > { %v2894_v42 = vshrl.u32 %v2827_v33, 16  ;;  %v4021_v44 = vcombine.low %v2858_v34, %v2868_v39  ;;  %v2897_v47 = vshll.u32 %v2827_v33, 16  ;;  %v5109_v52 = vsel %vm4771_vm14, %v3315_v15, %v3316_v40  ;;  %v2832_v7 = vld [vmem:[#allocation2 + $0x44] sm:$0x1]  ;;  %v3270_v21 = vld [vmem:[#allocation2 + $0x34] sm:$0xf] }
  0xac   : > { %4337 = vmatmul.mubr.msk.bf16.gmra.mrb[48].mxu1 %vm480_vm7, %v3970_v62  ;;  %v2887_v38 = vrot.slane %v2886_v37, 4  ;;  %v3320_v3 = vrot.slane %v3267_v48, 5  ;;  %v3323_v36 = vrot.slane %v3268_v51, 5  ;;  %v2915_v13 = vrot.slane %v2913_v32, 5  ;;  %v3271_v50 = vld [vmem:[#allocation2 + $0x38] sm:$0x1] }
  0xad   : > { %4395 = vmatpush3.bf16.msra.mxu0 %v4487_v14  ;;  %4340 = vmatprep.mubr.msk.bf16.mxu1 %vm480_vm7, %v3971_v24  ;;  %v2828_v14 = vld [vmem:[#allocation2 + $0x34] sm:$0xf]  ;;  %v2896_v62 = vrot.slane %v2894_v42, 4  ;;  %v2899_v58 = vrot.slane %v2897_v47, 5  ;;  %v2918_v8 = vshrl.u32 %v2830_v17, 16  ;;  %v2921_v9 = vshll.u32 %v2830_v17, 16 }
  0xae   : > { %4396 = vmatprep.subr.bf16.mxu0 %v4491_v11  ;;  %v2903_v54 = vshll.u32 %v2828_v14, 16  ;;  %v2907_v55 = vshrl.u32 %v2828_v14, 16  ;;  %v2892_v24 = vsel %vm4756_vm13, %v2887_v38, %v2891_v53  ;;  %v5123_v29 = vsel %vm4771_vm14, %v4042_v2, %v3320_v3  ;;  %v2833_v4 = vld [vmem:[#allocation2 + $0x48] sm:$0xf]  ;;  %v4493_v53 = vld [vmem:[#allocation2 + $0x6c] sm:$0xff]  }
  0xaf   : > { %v2900_v1 = vor.u32 %v2899_v58, %v2896_v62  ;;  %v3322_v25 = vrot.slane %v3320_v3, 4  ;;  %v2920_v18 = vrot.slane %v2918_v8, 4  ;;  %v2923_v20 = vrot.slane %v2921_v9, 5  ;;  %v2834_v35 = vld [vmem:[#allocation2 + $0x4c] sm:$0xf] }
  0xb0   : > { %4357 = vmatmul.mubr.msk.bf16.gmra.mrb[44].mxu0 %vm480_vm7, %v4485_v57  ;;  %v2882_v57 = vsel %vm4756_vm13, %v2877_v45, %v2881_v27  ;;  %v2905_v61 = vrot.slane %v2903_v54, 5  ;;  %v2931_v5 = vshrl.u32 %v2831_v0, 16  ;;  %v2937_v23 = vshll.u32 %v2832_v7, 16  ;;  %v2835_v15 = vld [vmem:[#allocation2 + $0x50] sm:$0x1] }
  0xb1   : > { %4360 = vmatprep.mubr.msk.bf16.mxu0 %vm480_vm7, %v4488_v63  ;;  %4397 = vmatpush3.bf16.msra.mxu0 %v4491_v11  ;;  %v4057_v11 = vcombine.low %v5105_v19, %v5109_v52  ;;  %v4022_v60 = vcombine.low %v2882_v57, %v2892_v24  ;;  %v2909_v63 = vrot.slane %v2907_v55, 4  ;;  %v2901_v56 = vrot.slane %v2900_v1, 4  ;;  %v3272_v45 = vld [vmem:[#allocation2 + $0x3c] sm:$0xe]  ;;  %v3273_v62 = vld [vmem:[#allocation2 + $0x40] sm:$0xf] }
  0xb2   : > { %4398 = vmatprep.subr.bf16.mxu0 %v4494_v10  ;;  %v5129_v22 = vsel %vm4771_vm14, %v3322_v25, %v3323_v36  ;;  %v2924_v33 = vor.u32 %v2923_v20, %v2920_v18  ;;  %v2933_v34 = vrot.slane %v2931_v5, 4  ;;  %v2939_v40 = vrot.slane %v2937_v23, 5  ;;  %v3274_v57 = vld [vmem:[#allocation2 + $0x44] sm:$0x1]  ;;  %v2837_v2 = vld [vmem:[#allocation2 + $0x58] sm:$0xf] }
  0xb3   : > { %v2910_v6 = vor.u32 %v2909_v63, %v2905_v61  ;;  %v2906_v26 = vsel %vm4756_vm13, %v2901_v56, %v2905_v61  ;;  %v4058_v30 = vcombine.low %v5123_v29, %v5129_v22  ;;  %v3327_v39 = vrot.slane %v3270_v21, 5  ;;  %v2836_v61 = vld [vmem:[#allocation2 + $0x54] sm:$0xf]  ;;  %v3276_v21 = vld [vmem:[#allocation2 + $0x4c] sm:$0xf] }
  0xb4   : > { %4341 = vmatmul.mubr.msk.bf16.gmra.mrb[52].mxu1 %vm480_vm7, %v3972_v12  ;;  %v3269_v12 = vld [vmem:[#allocation2 + $0x30] sm:$0xe]  ;;  %v2925_v41 = vrot.slane %v2924_v33, 4  ;;  %v3330_v43 = vrot.slane %v3271_v50, 5  ;;  %v2945_v48 = vshll.u32 %v2833_v4, 16  ;;  %v4044_v1 = vrot.slane %v3272_v45, 9 }
  0xb5   : > { %4399 = vmatpush3.bf16.msra.mxu0 %v4494_v10  ;;  %4376 = vmatprep.mubr.msk.bf16.mxu1 %vm480_vm7, %v4021_v44  ;;  %v2927_v10 = vshll.u32 %v2831_v0, 16  ;;  %v2911_v16 = vrot.slane %v2910_v6, 4  ;;  %v4043_v14 = vrot.slane %v3269_v12, 9  ;;  %v2942_v44 = vshrl.u32 %v2833_v4, 16  ;;  %v3275_v12 = vld [vmem:[#allocation2 + $0x48] sm:$0xe] }
  0xb6   : > { %v3329_v47 = vrot.slane %v3327_v39, 4  ;;  %v2947_v58 = vrot.slane %v2945_v48, 5  ;;  %v3334_v19 = vrot.slane %v3273_v62, 5  ;;  %v2966_v7 = vshrl.u32 %v2836_v61, 16  ;;  %v3277_v4 = vld [vmem:[#allocation2 + $0x50] sm:$0x1] }
  0xb7   : > { %v2929_v27 = vrot.slane %v2927_v10, 5  ;;  %v2916_v28 = vsel %vm4756_vm13, %v2911_v16, %v2915_v13  ;;  %v3328_v38 = vsel %vm4771_vm14, %v4043_v14, %v3327_v39  ;;  %v2944_v51 = vrot.slane %v2942_v44, 4  ;;  %v2838_v13 = vld [vmem:[#allocation2 + $0x5c] sm:$0x1]  ;;  %v3278_v22 = vld [vmem:[#allocation2 + $0x54] sm:$0xe] }
  0xb8   : > { %4361 = vmatmul.mubr.msk.bf16.gmra.mrb[48].mxu0 %vm480_vm7, %v4489_v49  ;;  %v4023_v37 = vcombine.low %v2906_v26, %v2916_v28  ;;  %v2951_v49 = vshll.u32 %v2834_v35, 16  ;;  %v3331_v24 = vsel %vm4771_vm14, %v3329_v47, %v3330_v43  ;;  %v2969_v8 = vshll.u32 %v2836_v61, 16  ;;  %v3279_v48 = vld [vmem:[#allocation2 + $0x58] sm:$0xf] }
  0xb9   : > { %4364 = vmatprep.mubr.msk.bf16.mxu0 %vm480_vm7, %v4492_v59  ;;  %v2934_v42 = vor.u32 %v2933_v34, %v2929_v27  ;;  %v2930_v54 = vsel %vm4756_vm13, %v2925_v41, %v2929_v27  ;;  %v2955_v59 = vshrl.u32 %v2834_v35, 16  ;;  %v4059_v32 = vcombine.low %v3328_v38, %v3331_v24  ;;  %v2841_v41 = vld [vmem:[#allocation2 + $0x68] sm:$0x1] }
  0xba   : > { %v2953_v17 = vrot.slane %v2951_v49, 5  ;;  %v2948_v36 = vor.u32 %v2947_v58, %v2944_v51  ;;  %v3335_v56 = vsel %vm4771_vm14, %v4044_v1, %v3334_v19  ;;  %v3336_v25 = vrot.slane %v3334_v19, 4  ;;  %v3280_v51 = vld [vmem:[#allocation2 + $0x5c] sm:$0x1] }
  0xbb   : > { %v2935_v55 = vrot.slane %v2934_v42, 4  ;;  %v2957_v0 = vrot.slane %v2955_v59, 4  ;;  %v2975_v10 = vshll.u32 %v2837_v2, 16  ;;  %v2968_v18 = vrot.slane %v2966_v7, 4 }
  0xbc   : > { %4377 = vmatmul.mubr.msk.bf16.vlgmr.msra.gmra.mrb[56].mxu1 %vm480_vm7, %v4022_v60  ;;  %v2961_v60 = vshll.u32 %v2835_v15, 16  ;;  %v2949_v9 = vrot.slane %v2948_v36, 4  ;;  %v2971_v20 = vrot.slane %v2969_v8, 5  ;;  %v2979_v5 = vshrl.u32 %v2837_v2, 16 }
  0xbd   : > { %4380 = vmatprep.mubr.msk.bf16.mxu1 %vm480_vm7, %v4023_v37  ;;  %v2940_v63 = vsel %vm4756_vm13, %v2935_v55, %v2939_v40  ;;  %v2958_v52 = vor.u32 %v2957_v0, %v2953_v17  ;;  %v2977_v23 = vrot.slane %v2975_v10, 5  ;;  %v2985_v50 = vshll.u32 %v2838_v13, 16  ;;  %v2840_v37 = vld [vmem:[#allocation2 + $0x64] sm:$0xf]  ;;  %v2843_v0 = vld [vmem:[#allocation2 + $0x70] sm:$0xf] }
  0xbe   : > { %v4024_v3 = vcombine.low %v2930_v54, %v2940_v63  ;;  %v2963_v6 = vrot.slane %v2961_v60, 5  ;;  %v2954_v26 = vsel %vm4756_vm13, %v2949_v9, %v2953_v17  ;;  %v2972_v34 = vor.u32 %v2971_v20, %v2968_v18  ;;  %v2842_v17 = vld [vmem:[#allocation2 + $0x6c] sm:$0xf]  ;;  %v3282_v20 = vld [vmem:[#allocation2 + $0x64] sm:$0xf] }
  0xbf   : > { %v2959_v16 = vrot.slane %v2958_v52, 4  ;;  %v2981_v35 = vrot.slane %v2979_v5, 4  ;;  %v2987_v14 = vrot.slane %v2985_v50, 5  ;;  %v4045_v39 = vrot.slane %v3275_v12, 9  ;;  %v2844_v52 = vld [vmem:[#allocation2 + $0x74] sm:$0x1] }
  0xc0   : > { %4365 = vmatmul.mubr.msk.bf16.gmra.mrb[52].mxu0 %vm480_vm7, %v4493_v53  ;;  %v2839_v53 = vld [vmem:[#allocation2 + $0x60] sm:$0xf]  ;;  %v3341_v15 = vrot.slane %v3276_v21, 5  ;;  %v2973_v42 = vrot.slane %v2972_v34, 4  ;;  %v3344_v44 = vrot.slane %v3277_v4, 5  ;;  %v2999_v47 = vshll.u32 %v2840_v37, 16 }
  0xc1   : > { %4400 = vmatprep.mubr.msk.bf16.mxu0 %vm480_vm7, %v4057_v11  ;;  %v3337_v11 = vrot.slane %v3274_v57, 5  ;;  %v2964_v28 = vsel %vm4756_vm13, %v2959_v16, %v2963_v6  ;;  %v2982_v43 = vor.u32 %v2981_v35, %v2977_v23  ;;  %v2990_v29 = vshrl.u32 %v2839_v53, 16  ;;  %v3284_v50 = vld [vmem:[#allocation2 + $0x6c] sm:$0xe]  ;;  %v3285_v34 = vld [vmem:[#allocation2 + $0x70] sm:$0xf] }
  0xc2   : > { %v4025_v40 = vcombine.low %v2954_v26, %v2964_v28  ;;  %v3343_v45 = vrot.slane %v3341_v15, 4  ;;  %v2993_v38 = vshll.u32 %v2839_v53, 16  ;;  %v2978_v49 = vsel %vm4756_vm13, %v2973_v42, %v2977_v23  ;;  %v3283_v23 = vld [vmem:[#allocation2 + $0x68] sm:$0x1]  ;;  %v3286_v35 = vld [vmem:[#allocation2 + $0x74] sm:$0x1] }
  0xc3   : > { %v3338_v27 = vsel %vm4771_vm14, %v3336_v25, %v3337_v11  ;;  %v2983_v62 = vrot.slane %v2982_v43, 4  ;;  %v2992_v54 = vrot.slane %v2990_v29, 4  ;;  %v3003_v55 = vshrl.u32 %v2840_v37, 16  ;;  %v3281_v25 = vld [vmem:[#allocation2 + $0x60] sm:$0xe] }
  0xc4   : > { %4381 = vmatmul.mubr.msk.bf16.gmra.mrb[60].mxu1 %vm480_vm7, %v4024_v3  ;;  %v4060_v33 = vcombine.low %v3335_v56, %v3338_v27  ;;  %v3345_v59 = vsel %vm4771_vm14, %v3343_v45, %v3344_v44  ;;  %v2995_v57 = vrot.slane %v2993_v38, 5  ;;  %v3001_v24 = vrot.slane %v2999_v47, 5 }
  0xc5   : > { %4384 = vmatprep.mubr.msk.bf16.mxu1 %vm480_vm7, %v4025_v40  ;;  %v3009_v58 = vshll.u32 %v2841_v41, 16  ;;  %v2988_v60 = vsel %vm4756_vm13, %v2983_v62, %v2987_v14  ;;  %v3005_v63 = vrot.slane %v3003_v55, 4  ;;  %v3348_v36 = vrot.slane %v3279_v48, 5 }
  0xc6   : > { %v4026_v1 = vcombine.low %v2978_v49, %v2988_v60  ;;  %v2996_v2 = vor.u32 %v2995_v57, %v2992_v54  ;;  %v3351_v19 = vrot.slane %v3280_v51, 5  ;;  %v3014_v11 = vshrl.u32 %v2842_v17, 16  ;;  %v523_v57 = vld [vmem:[#allocation3 + $0x50] sm:$0xff] }
  0xc7   : > { %v3011_v3 = vrot.slane %v3009_v58, 5  ;;  %v3006_v6 = vor.u32 %v3005_v63, %v3001_v24  ;;  %v3017_v13 = vshll.u32 %v2842_v17, 16  ;;  %v3350_v9 = vrot.slane %v3348_v36, 4  ;;  %v524_v17 = vld [vmem:[#allocation3 + $0x58] sm:$0xff] }
  0xc8   : > { %4401 = vmatmul.mubr.msk.bf16.vlgmr.msra.gmra.mrb[56].mxu0 %vm480_vm7, %v4058_v30  ;;  %v3342_v30 = vsel %vm4771_vm14, %v4045_v39, %v3341_v15  ;;  %v2997_v7 = vrot.slane %v2996_v2, 4  ;;  %v3023_v56 = vshll.u32 %v2843_v0, 16  ;;  %v3016_v12 = vrot.slane %v3014_v11, 4  ;;  %v514_v11 = vld [vmem:[#allocation3 + $0x8] sm:$0xff] }
  0xc9   : > { %4404 = vmatprep.mubr.msk.bf16.mxu0 %vm480_vm7, %v4059_v32  ;;  %v4061_v61 = vcombine.low %v3342_v30, %v3345_v59  ;;  %v4046_v32 = vrot.slane %v3278_v22, 9  ;;  %v3007_v10 = vrot.slane %v3006_v6, 4  ;;  %v3019_v16 = vrot.slane %v3017_v13, 5  ;;  %v516_v6 = vld [vmem:[#allocation3 + $0x18] sm:$0xff] }
  0xca   : > { %v3027_v18 = vshrl.u32 %v2843_v0, 16  ;;  %v3002_v5 = vsel %vm4756_vm13, %v2997_v7, %v3001_v24  ;;  %v3352_v21 = vsel %vm4771_vm14, %v3350_v9, %v3351_v19  ;;  %v3025_v26 = vrot.slane %v3023_v56, 5  ;;  %v521_v24 = vld [vmem:[#allocation3 + $0x40] sm:$0xff] }
  0xcb   : > { %v3349_v8 = vsel %vm4771_vm14, %v4046_v32, %v3348_v36  ;;  %v3033_v27 = vshll.u32 %v2844_v52, 16  ;;  %v3012_v4 = vsel %vm4756_vm13, %v3007_v10, %v3011_v3  ;;  %v3020_v28 = vor.u32 %v3019_v16, %v3016_v12  ;;  %v513_v3 = vld [vmem:[#allocation3] sm:$0xff]  ;;  %v528_v16 = vld [vmem:[#allocation3 + $0x78] sm:$0xff] }
  0xcc   : > { %4385 = vmatmul.mubr.msk.bf16.gmra.mrb[64].mxu1 %vm480_vm7, %v4026_v1  ;;  %v4062_v53 = vcombine.low %v3349_v8, %v3352_v21  ;;  %v4027_v37 = vcombine.low %v3002_v5, %v3012_v4  ;;  %v4047_v14 = vrot.slane %v3281_v25, 9  ;;  %v3355_v39 = vrot.slane %v3282_v20, 5  ;;  %v515_v1 = vld [vmem:[#allocation3 + $0x10] sm:$0xff]  ;;  %v525_v10 = vld [vmem:[#allocation3 + $0x60] sm:$0xff]  ;;  %v526_v5 = vld [vmem:[#allocation3 + $0x68] sm:$0xff] }
  0xcd   : > { %v3035_v40 = vrot.slane %v3033_v27, 5  ;;  %v3021_v15 = vrot.slane %v3020_v28, 4  ;;  %v3358_v42 = vrot.slane %v3283_v23, 5  ;;  %v4048_v43 = vrot.slane %v3284_v50, 9  ;;  %v527_v25 = vld [vmem:[#allocation3 + $0x70] sm:$0xff] }
  0xce   : > { %4388 = vmatprep.mubr.msk.bf16.mxu1 %vm480_vm7, %v4027_v37  ;;  %v3356_v44 = vsel %vm4771_vm14, %v4047_v14, %v3355_v39  ;;  %v3357_v29 = vrot.slane %v3355_v39, 4  ;;  %v3362_v22 = vrot.slane %v3285_v34, 5  ;;  %v3365_v30 = vrot.slane %v3286_v35, 5  ;;  %v519_v4 = vld [vmem:[#allocation3 + $0x30] sm:$0xff]  ;;  %v518_v37 = vld [vmem:[#allocation3 + $0x28] sm:$0xff] }
  0xcf   : > { %v3026_v45 = vsel %vm4756_vm13, %v3021_v15, %v3025_v26 }
  0xd0   : > { %4405 = vmatmul.mubr.msk.bf16.gmra.mrb[60].mxu0 %vm480_vm7, %v4060_v33  ;;  %v3029_v33 = vrot.slane %v3027_v18, 4  ;;  %v3359_v47 = vsel %vm4771_vm14, %v3357_v29, %v3358_v42  ;;  %v3363_v48 = vsel %vm4771_vm14, %v4048_v43, %v3362_v22  ;;  %v3364_v49 = vrot.slane %v3362_v22, 4 }
  0xd1   : > { %4408 = vmatprep.mubr.msk.bf16.mxu0 %vm480_vm7, %v4061_v61  ;;  %v4063_v54 = vcombine.low %v3356_v44, %v3359_v47 }
  0xd2   : > { %v3030_v41 = vor.u32 %v3029_v33, %v3025_v26  ;;  %v3366_v51 = vsel %vm4771_vm14, %v3364_v49, %v3365_v30  ;;  %v520_v33 = vld [vmem:[#allocation3 + $0x38] sm:$0xff] }
  0xd3   : > { %v4064_v59 = vcombine.low %v3363_v48, %v3366_v51 }
  0xd4   : > { %v3031_v38 = vrot.slane %v3030_v41, 4 }
  0xd6   : > { %v3036_v62 = vsel %vm4756_vm13, %v3031_v38, %v3035_v40 }
  0xd7   : > { %v4028_v55 = vcombine.low %v3026_v45, %v3036_v62 }
  0xd8   : > { %4409 = vmatmul.mubr.msk.bf16.gmra.mrb[64].mxu0 %vm480_vm7, %v4062_v53  ;;  %v517_v53 = vld [vmem:[#allocation3 + $0x20] sm:$0xff] }
  0xd9   : > { %4412 = vmatprep.mubr.msk.bf16.mxu0 %vm480_vm7, %v4063_v54  ;;  %4389 = vmatmul.mubr.msk.bf16.gmra.mrb[68].mxu1 %vm480_vm7, %v4028_v55 }
  0xe0   : > { %4413 = vmatmul.mubr.msk.bf16.gmra.mrb[68].mxu0 %vm480_vm7, %v4064_v59 }
 0x108   : > { %v4218_v58 = vpop.f32.mrb[0].mxu1 }
 0x109   : > { %v732_v60 = vadd.f32 %v4218_v58, %v523_v57  ;;  %v691_v61 = vpop.f32.mrb[1].mxu1 }
 0x10a   : > { %v730_v63 = vadd.f32 %v691_v61, %v521_v24  ;;  %v4219_v32 = vpop.f32.mrb[2].mxu1 }
 0x10b   : > { %748 = vst.msk [vmem:[#allocation3 + $0x50] sm:$0xff] %vm480_vm7, %v732_v60  ;;  %v733_v46 = vadd.f32 %v4219_v32, %v524_v17  ;;  %v694_v0 = vpop.f32.mrb[3].mxu1  ;;  %v4210_v36 = vpop.f32.mrb[0].mxu0 }
 0x10c   : > { %746 = vst.msk [vmem:[#allocation3 + $0x40] sm:$0xff] %vm480_vm7, %v730_v63  ;;  %v731_v2 = vadd.f32 %v694_v0, %v522_v31  ;;  %v724_v19 = vadd.f32 %v4210_v36, %v515_v1  ;;  %v659_v52 = vpop.f32.mrb[1].mxu0 }
 0x10d   : > { %749 = vst.msk [vmem:[#allocation3 + $0x58] sm:$0xff] %vm480_vm7, %v733_v46  ;;  %v722_v13 = vadd.f32 %v659_v52, %v513_v3  ;;  %v4211_v7 = vpop.f32.mrb[2].mxu0 }
 0x10e   : > { %747 = vst.msk [vmem:[#allocation3 + $0x48] sm:$0xff] %vm480_vm7, %v731_v2  ;;  %740 = vst.msk [vmem:[#allocation3 + $0x10] sm:$0xff] %vm480_vm7, %v724_v19  ;;  %v725_v8 = vadd.f32 %v4211_v7, %v516_v6  ;;  %v662_v9 = vpop.f32.mrb[3].mxu0 }
 0x10f   : > { %738 = vst.msk [vmem:[#allocation3] sm:$0xff] %vm480_vm7, %v722_v13  ;;  %v723_v56 = vadd.f32 %v662_v9, %v514_v11 }
 0x110   : > { %741 = vst.msk [vmem:[#allocation3 + $0x18] sm:$0xff] %vm480_vm7, %v725_v8 }
 0x111   : > { %739 = vst.msk [vmem:[#allocation3 + $0x8] sm:$0xff] %vm480_vm7, %v723_v56 }
 0x112   : > { %v4222_v12 = vpop.f32.mrb[4].mxu1 }
 0x113   : > { %v736_v18 = vadd.f32 %v4222_v12, %v527_v25  ;;  %v707_v20 = vpop.f32.mrb[5].mxu1 }
 0x114   : > { %v734_v21 = vadd.f32 %v707_v20, %v525_v10  ;;  %v4223_v26 = vpop.f32.mrb[6].mxu1  ;;  %v983_v20 = vld [vmem:[#allocation3 + $0x50] sm:$0xff] }
 0x115   : > { %752 = vst.msk [vmem:[#allocation3 + $0x70] sm:$0xff] %vm480_vm7, %v736_v18  ;;  %v737_v27 = vadd.f32 %v4223_v26, %v528_v16  ;;  %v710_v23 = vpop.f32.mrb[7].mxu1  ;;  %v975_v15 = vld [vmem:[#allocation3 + $0x10] sm:$0xff] }
 0x116   : > { %750 = vst.msk [vmem:[#allocation3 + $0x60] sm:$0xff] %vm480_vm7, %v734_v21  ;;  %v735_v50 = vadd.f32 %v710_v23, %v526_v5  ;;  %v973_v43 = vld [vmem:[#allocation3] sm:$0xff] }
 0x117   : > { %753 = vst.msk [vmem:[#allocation3 + $0x78] sm:$0xff] %vm480_vm7, %v737_v27  ;;  %v976_v29 = vld [vmem:[#allocation3 + $0x18] sm:$0xff]  ;;  %v981_v23 = vld [vmem:[#allocation3 + $0x40] sm:$0xff] }
 0x118   : > { %751 = vst.msk [vmem:[#allocation3 + $0x68] sm:$0xff] %vm480_vm7, %v735_v50  ;;  %v974_v45 = vld [vmem:[#allocation3 + $0x8] sm:$0xff] }
 0x119   : > { %v4214_v28 = vpop.f32.mrb[4].mxu0 }
 0x11a   : > { %v728_v34 = vadd.f32 %v4214_v28, %v519_v4  ;;  %v675_v35 = vpop.f32.mrb[5].mxu0  ;;  %v984_v28 = vld [vmem:[#allocation3 + $0x58] sm:$0xff] }
 0x11b   : > { %v726_v40 = vadd.f32 %v675_v35, %v517_v53  ;;  %v4215_v14 = vpop.f32.mrb[6].mxu0 }
 0x11c   : > { %744 = vst.msk [vmem:[#allocation3 + $0x30] sm:$0xff] %vm480_vm7, %v728_v34  ;;  %v729_v39 = vadd.f32 %v4215_v14, %v520_v33  ;;  %v678_v41 = vpop.f32.mrb[7].mxu0 }
 0x11d   : > { %742 = vst.msk [vmem:[#allocation3 + $0x20] sm:$0xff] %vm480_vm7, %v726_v40  ;;  %v727_v42 = vadd.f32 %v678_v41, %v518_v37  ;;  %v4234_v44 = vpop.f32.mrb[8].mxu1  ;;  %v982_v37 = vld [vmem:[#allocation3 + $0x48] sm:$0xff] }
 0x11e   : > { %745 = vst.msk [vmem:[#allocation3 + $0x38] sm:$0xff] %vm480_vm7, %v729_v39  ;;  %v1169_v22 = vadd.f32 %v4234_v44, %v975_v15  ;;  %v1104_v30 = vpop.f32.mrb[9].mxu1 }
 0x11f   : > { %743 = vst.msk [vmem:[#allocation3 + $0x28] sm:$0xff] %vm480_vm7, %v727_v42  ;;  %v1167_v38 = vadd.f32 %v1104_v30, %v973_v43  ;;  %v4235_v47 = vpop.f32.mrb[10].mxu1 }
 0x120   : > { %1185 = vst.msk [vmem:[#allocation3 + $0x10] sm:$0xff] %vm480_vm7, %v1169_v22  ;;  %v1170_v48 = vadd.f32 %v4235_v47, %v976_v29  ;;  %v1107_v49 = vpop.f32.mrb[11].mxu1  ;;  %v987_v22 = vld [vmem:[#allocation3 + $0x70] sm:$0xff] }
 0x121   : > { %1183 = vst.msk [vmem:[#allocation3] sm:$0xff] %vm480_vm7, %v1167_v38  ;;  %v1168_v62 = vadd.f32 %v1107_v49, %v974_v45  ;;  %v985_v49 = vld [vmem:[#allocation3 + $0x60] sm:$0xff] }
 0x122   : > { %1186 = vst.msk [vmem:[#allocation3 + $0x18] sm:$0xff] %vm480_vm7, %v1170_v48 }
 0x123   : > { %1184 = vst.msk [vmem:[#allocation3 + $0x8] sm:$0xff] %vm480_vm7, %v1168_v62  ;;  %v4258_v54 = vpop.f32.mrb[8].mxu0  ;;  %v979_v63 = vld [vmem:[#allocation3 + $0x30] sm:$0xff] }
 0x124   : > { %v1437_v55 = vpop.f32.mrb[9].mxu0  ;;  %v977_v46 = vld [vmem:[#allocation3 + $0x20] sm:$0xff] }
 0x125   : > { %v4259_v51 = vpop.f32.mrb[10].mxu0  ;;  %v980_v1 = vld [vmem:[#allocation3 + $0x38] sm:$0xff] }
 0x126   : > { %v1440_v57 = vpop.f32.mrb[11].mxu0  ;;  %v978_v36 = vld [vmem:[#allocation3 + $0x28] sm:$0xff] }
 0x127   : > { %v1308_v59 = vld [vmem:[#allocation3 + $0x10] sm:$0xff] }
 0x128   : > { %v1502_v24 = vadd.f32 %v4258_v54, %v1308_v59  ;;  %v1306_v58 = vld [vmem:[#allocation3] sm:$0xff] }
 0x129   : > { %v1500_v17 = vadd.f32 %v1437_v55, %v1306_v58  ;;  %v1309_v60 = vld [vmem:[#allocation3 + $0x18] sm:$0xff] }
 0x12a   : > { %1518 = vst.msk [vmem:[#allocation3 + $0x10] sm:$0xff] %vm480_vm7, %v1502_v24  ;;  %v1503_v61 = vadd.f32 %v4259_v51, %v1309_v60  ;;  %v1307_v31 = vld [vmem:[#allocation3 + $0x8] sm:$0xff] }
 0x12b   : > { %1516 = vst.msk [vmem:[#allocation3] sm:$0xff] %vm480_vm7, %v1500_v17  ;;  %v1501_v32 = vadd.f32 %v1440_v57, %v1307_v31  ;;  %v988_v57 = vld [vmem:[#allocation3 + $0x78] sm:$0xff] }
 0x12c   : > { %1519 = vst.msk [vmem:[#allocation3 + $0x18] sm:$0xff] %vm480_vm7, %v1503_v61  ;;  %v4238_v0 = vpop.f32.mrb[12].mxu1  ;;  %v986_v61 = vld [vmem:[#allocation3 + $0x68] sm:$0xff] }
 0x12d   : > { %1517 = vst.msk [vmem:[#allocation3 + $0x8] sm:$0xff] %vm480_vm7, %v1501_v32  ;;  %v1173_v2 = vadd.f32 %v4238_v0, %v979_v63  ;;  %v1120_v3 = vpop.f32.mrb[13].mxu1 }
 0x12e   : > { %v1171_v6 = vadd.f32 %v1120_v3, %v977_v46  ;;  %v4239_v19 = vpop.f32.mrb[14].mxu1  ;;  %v4262_v52 = vpop.f32.mrb[12].mxu0 }
 0x12f   : > { %1189 = vst.msk [vmem:[#allocation3 + $0x30] sm:$0xff] %vm480_vm7, %v1173_v2  ;;  %v1174_v11 = vadd.f32 %v4239_v19, %v980_v1  ;;  %v1123_v13 = vpop.f32.mrb[15].mxu1  ;;  %v1453_v7 = vpop.f32.mrb[13].mxu0 }
 0x130   : > { %1187 = vst.msk [vmem:[#allocation3 + $0x20] sm:$0xff] %vm480_vm7, %v1171_v6  ;;  %v1172_v8 = vadd.f32 %v1123_v13, %v978_v36  ;;  %v4263_v9 = vpop.f32.mrb[14].mxu0 }
 0x131   : > { %1190 = vst.msk [vmem:[#allocation3 + $0x38] sm:$0xff] %vm480_vm7, %v1174_v11  ;;  %v1456_v56 = vpop.f32.mrb[15].mxu0  ;;  %v1550_v32 = vld [vmem:[#allocation3 + $0x10] sm:$0xff] }
 0x132   : > { %1188 = vst.msk [vmem:[#allocation3 + $0x28] sm:$0xff] %vm480_vm7, %v1172_v8  ;;  %v1548_v1 = vld [vmem:[#allocation3] sm:$0xff] }
 0x133   : > { %v1551_v6 = vld [vmem:[#allocation3 + $0x18] sm:$0xff] }
 0x136   : > { %v1312_v25 = vld [vmem:[#allocation3 + $0x30] sm:$0xff] }
 0x137   : > { %v1506_v10 = vadd.f32 %v4262_v52, %v1312_v25  ;;  %v1310_v12 = vld [vmem:[#allocation3 + $0x20] sm:$0xff] }
 0x138   : > { %v1504_v16 = vadd.f32 %v1453_v7, %v1310_v12  ;;  %v1313_v18 = vld [vmem:[#allocation3 + $0x38] sm:$0xff]  ;;  %v4242_v5 = vpop.f32.mrb[16].mxu1  ;;  %v1549_v7 = vld [vmem:[#allocation3 + $0x8] sm:$0xff] }
 0x139   : > { %1522 = vst.msk [vmem:[#allocation3 + $0x30] sm:$0xff] %vm480_vm7, %v1506_v10  ;;  %v1507_v21 = vadd.f32 %v4263_v9, %v1313_v18  ;;  %v1311_v26 = vld [vmem:[#allocation3 + $0x28] sm:$0xff]  ;;  %v1177_v27 = vadd.f32 %v4242_v5, %v983_v20  ;;  %v1136_v50 = vpop.f32.mrb[17].mxu1 }
 0x13a   : > { %1520 = vst.msk [vmem:[#allocation3 + $0x20] sm:$0xff] %vm480_vm7, %v1504_v16  ;;  %v1505_v4 = vadd.f32 %v1456_v56, %v1311_v26  ;;  %v1175_v53 = vadd.f32 %v1136_v50, %v981_v23  ;;  %v4243_v33 = vpop.f32.mrb[18].mxu1 }
 0x13b   : > { %1523 = vst.msk [vmem:[#allocation3 + $0x38] sm:$0xff] %vm480_vm7, %v1507_v21  ;;  %v4266_v34 = vpop.f32.mrb[16].mxu0  ;;  %1193 = vst.msk [vmem:[#allocation3 + $0x50] sm:$0xff] %vm480_vm7, %v1177_v27  ;;  %v1178_v35 = vadd.f32 %v4243_v33, %v984_v28  ;;  %v1139_v40 = vpop.f32.mrb[19].mxu1 }
 0x13c   : > { %1521 = vst.msk [vmem:[#allocation3 + $0x28] sm:$0xff] %vm480_vm7, %v1505_v4  ;;  %v1469_v14 = vpop.f32.mrb[17].mxu0  ;;  %1191 = vst.msk [vmem:[#allocation3 + $0x40] sm:$0xff] %vm480_vm7, %v1175_v53  ;;  %v1176_v39 = vadd.f32 %v1139_v40, %v982_v37 }
 0x13d   : > { %v4267_v15 = vpop.f32.mrb[18].mxu0  ;;  %1194 = vst.msk [vmem:[#allocation3 + $0x58] sm:$0xff] %vm480_vm7, %v1178_v35 }
 0x13e   : > { %v1472_v41 = vpop.f32.mrb[19].mxu0  ;;  %1192 = vst.msk [vmem:[#allocation3 + $0x48] sm:$0xff] %vm480_vm7, %v1176_v39 }
 0x140   : > { %v1554_v26 = vld [vmem:[#allocation3 + $0x30] sm:$0xff] }
 0x141   : > { %v1552_v50 = vld [vmem:[#allocation3 + $0x20] sm:$0xff] }
 0x142   : > { %v1316_v42 = vld [vmem:[#allocation3 + $0x50] sm:$0xff]  ;;  %v1555_v33 = vld [vmem:[#allocation3 + $0x38] sm:$0xff] }
 0x143   : > { %v1510_v43 = vadd.f32 %v4266_v34, %v1316_v42  ;;  %v1314_v44 = vld [vmem:[#allocation3 + $0x40] sm:$0xff] }
 0x144   : > { %v4270_v29 = vpop.f32.mrb[20].mxu0  ;;  %v1508_v45 = vadd.f32 %v1469_v14, %v1314_v44  ;;  %v1317_v38 = vld [vmem:[#allocation3 + $0x58] sm:$0xff]  ;;  %v1553_v14 = vld [vmem:[#allocation3 + $0x28] sm:$0xff] }
 0x145   : > { %v4246_v30 = vpop.f32.mrb[20].mxu1  ;;  %v1485_v47 = vpop.f32.mrb[21].mxu0  ;;  %1526 = vst.msk [vmem:[#allocation3 + $0x50] sm:$0xff] %vm480_vm7, %v1510_v43  ;;  %v1511_v54 = vadd.f32 %v4267_v15, %v1317_v38  ;;  %v1315_v55 = vld [vmem:[#allocation3 + $0x48] sm:$0xff] }
 0x146   : > { %v1181_v48 = vadd.f32 %v4246_v30, %v987_v22  ;;  %v1152_v62 = vpop.f32.mrb[21].mxu1  ;;  %v4271_v51 = vpop.f32.mrb[22].mxu0  ;;  %1524 = vst.msk [vmem:[#allocation3 + $0x40] sm:$0xff] %vm480_vm7, %v1508_v45  ;;  %v1509_v58 = vadd.f32 %v1472_v41, %v1315_v55 }
 0x147   : > { %v1179_v59 = vadd.f32 %v1152_v62, %v985_v49  ;;  %v4247_v24 = vpop.f32.mrb[22].mxu1  ;;  %v1488_v17 = vpop.f32.mrb[23].mxu0  ;;  %1527 = vst.msk [vmem:[#allocation3 + $0x58] sm:$0xff] %vm480_vm7, %v1511_v54 }
 0x148   : > { %1197 = vst.msk [vmem:[#allocation3 + $0x70] sm:$0xff] %vm480_vm7, %v1181_v48  ;;  %v1182_v60 = vadd.f32 %v4247_v24, %v988_v57  ;;  %v1155_v31 = vpop.f32.mrb[23].mxu1  ;;  %1525 = vst.msk [vmem:[#allocation3 + $0x48] sm:$0xff] %vm480_vm7, %v1509_v58 }
 0x149   : > { %1195 = vst.msk [vmem:[#allocation3 + $0x60] sm:$0xff] %vm480_vm7, %v1179_v59  ;;  %v1180_v63 = vadd.f32 %v1155_v31, %v986_v61 }
 0x14a   : > { %1198 = vst.msk [vmem:[#allocation3 + $0x78] sm:$0xff] %vm480_vm7, %v1182_v60 }
 0x14b   : > { %1196 = vst.msk [vmem:[#allocation3 + $0x68] sm:$0xff] %vm480_vm7, %v1180_v63 }
 0x14c   : > { %v1558_v45 = vld [vmem:[#allocation3 + $0x50] sm:$0xff] }
 0x14d   : > { %v4282_v46 = vpop.f32.mrb[24].mxu1  ;;  %v1556_v49 = vld [vmem:[#allocation3 + $0x40] sm:$0xff] }
 0x14e   : > { %v1760_v0 = vadd.f32 %v4282_v46, %v1550_v32  ;;  %v1695_v2 = vpop.f32.mrb[25].mxu1  ;;  %v1559_v59 = vld [vmem:[#allocation3 + $0x58] sm:$0xff] }
 0x14f   : > { %v1320_v3 = vld [vmem:[#allocation3 + $0x70] sm:$0xff]  ;;  %v1758_v36 = vadd.f32 %v1695_v2, %v1548_v1  ;;  %v4283_v19 = vpop.f32.mrb[26].mxu1  ;;  %v4306_v10 = vpop.f32.mrb[24].mxu0  ;;  %v1557_v60 = vld [vmem:[#allocation3 + $0x48] sm:$0xff] }
 0x150   : > { %v1514_v52 = vadd.f32 %v4270_v29, %v1320_v3  ;;  %v1318_v11 = vld [vmem:[#allocation3 + $0x60] sm:$0xff]  ;;  %1776 = vst.msk [vmem:[#allocation3 + $0x10] sm:$0xff] %vm480_vm7, %v1760_v0  ;;  %v1761_v13 = vadd.f32 %v4283_v19, %v1551_v6  ;;  %v1698_v8 = vpop.f32.mrb[27].mxu1  ;;  %v2137_v18 = vpop.f32.mrb[25].mxu0 }
 0x151   : > { %v1512_v9 = vadd.f32 %v1485_v47, %v1318_v11  ;;  %v1321_v56 = vld [vmem:[#allocation3 + $0x78] sm:$0xff]  ;;  %1774 = vst.msk [vmem:[#allocation3] sm:$0xff] %vm480_vm7, %v1758_v36  ;;  %v1759_v25 = vadd.f32 %v1698_v8, %v1549_v7  ;;  %v4307_v5 = vpop.f32.mrb[26].mxu0 }
 0x152   : > { %1530 = vst.msk [vmem:[#allocation3 + $0x70] sm:$0xff] %vm480_vm7, %v1514_v52  ;;  %v1515_v12 = vadd.f32 %v4271_v51, %v1321_v56  ;;  %v1319_v16 = vld [vmem:[#allocation3 + $0x68] sm:$0xff]  ;;  %1777 = vst.msk [vmem:[#allocation3 + $0x18] sm:$0xff] %vm480_vm7, %v1761_v13  ;;  %v2140_v21 = vpop.f32.mrb[27].mxu0 }
 0x153   : > { %1528 = vst.msk [vmem:[#allocation3 + $0x60] sm:$0xff] %vm480_vm7, %v1512_v9  ;;  %v1513_v20 = vadd.f32 %v1488_v17, %v1319_v16  ;;  %1775 = vst.msk [vmem:[#allocation3 + $0x8] sm:$0xff] %vm480_vm7, %v1759_v25 }
 0x154   : > { %1531 = vst.msk [vmem:[#allocation3 + $0x78] sm:$0xff] %vm480_vm7, %v1515_v12 }
 0x155   : > { %1529 = vst.msk [vmem:[#allocation3 + $0x68] sm:$0xff] %vm480_vm7, %v1513_v20  ;;  %v4286_v27 = vpop.f32.mrb[28].mxu1 }
 0x156   : > { %v1764_v23 = vadd.f32 %v4286_v27, %v1554_v26  ;;  %v1711_v4 = vpop.f32.mrb[29].mxu1 }
 0x157   : > { %v2008_v53 = vld [vmem:[#allocation3 + $0x10] sm:$0xff]  ;;  %v1762_v28 = vadd.f32 %v1711_v4, %v1552_v50  ;;  %v4287_v34 = vpop.f32.mrb[30].mxu1 }
 0x158   : > { %v2202_v35 = vadd.f32 %v4306_v10, %v2008_v53  ;;  %1780 = vst.msk [vmem:[#allocation3 + $0x30] sm:$0xff] %vm480_vm7, %v1764_v23  ;;  %v2006_v37 = vld [vmem:[#allocation3] sm:$0xff]  ;;  %v1765_v40 = vadd.f32 %v4287_v34, %v1555_v33  ;;  %v1714_v39 = vpop.f32.mrb[31].mxu1  ;;  %v4310_v22 = vpop.f32.mrb[28].mxu0 }
 0x159   : > { %v2200_v15 = vadd.f32 %v2137_v18, %v2006_v37  ;;  %1778 = vst.msk [vmem:[#allocation3 + $0x20] sm:$0xff] %vm480_vm7, %v1762_v28  ;;  %v2009_v41 = vld [vmem:[#allocation3 + $0x18] sm:$0xff]  ;;  %v1763_v42 = vadd.f32 %v1714_v39, %v1553_v14  ;;  %v2153_v30 = vpop.f32.mrb[29].mxu0  ;;  %v1562_v25 = vld [vmem:[#allocation3 + $0x70] sm:$0xff] }
 0x15a   : > { %2218 = vst.msk [vmem:[#allocation3 + $0x10] sm:$0xff] %vm480_vm7, %v2202_v35  ;;  %v2203_v43 = vadd.f32 %v4307_v5, %v2009_v41  ;;  %1781 = vst.msk [vmem:[#allocation3 + $0x38] sm:$0xff] %vm480_vm7, %v1765_v40  ;;  %v2007_v44 = vld [vmem:[#allocation3 + $0x8] sm:$0xff]  ;;  %v4311_v47 = vpop.f32.mrb[30].mxu0  ;;  %v1560_v16 = vld [vmem:[#allocation3 + $0x60] sm:$0xff] }
 0x15b   : > { %2216 = vst.msk [vmem:[#allocation3] sm:$0xff] %vm480_vm7, %v2200_v15  ;;  %v2201_v29 = vadd.f32 %v2140_v21, %v2007_v44  ;;  %1779 = vst.msk [vmem:[#allocation3 + $0x28] sm:$0xff] %vm480_vm7, %v1763_v42  ;;  %v2156_v54 = vpop.f32.mrb[31].mxu0  ;;  %v1563_v5 = vld [vmem:[#allocation3 + $0x78] sm:$0xff] }
 0x15c   : > { %2219 = vst.msk [vmem:[#allocation3 + $0x18] sm:$0xff] %vm480_vm7, %v2203_v43  ;;  %v1561_v27 = vld [vmem:[#allocation3 + $0x68] sm:$0xff] }
 0x15d   : > { %2217 = vst.msk [vmem:[#allocation3 + $0x8] sm:$0xff] %vm480_vm7, %v2201_v29  ;;  %v4290_v38 = vpop.f32.mrb[32].mxu1 }
 0x15e   : > { %v1768_v48 = vadd.f32 %v4290_v38, %v1558_v45  ;;  %v1727_v62 = vpop.f32.mrb[33].mxu1 }
 0x15f   : > { %v2012_v55 = vld [vmem:[#allocation3 + $0x30] sm:$0xff]  ;;  %v1766_v51 = vadd.f32 %v1727_v62, %v1556_v49  ;;  %v4291_v57 = vpop.f32.mrb[34].mxu1 }
 0x160   : > { %v2206_v24 = vadd.f32 %v4310_v22, %v2012_v55  ;;  %1784 = vst.msk [vmem:[#allocation3 + $0x50] sm:$0xff] %vm480_vm7, %v1768_v48  ;;  %v2010_v58 = vld [vmem:[#allocation3 + $0x20] sm:$0xff]  ;;  %v1769_v17 = vadd.f32 %v4291_v57, %v1559_v59  ;;  %v1730_v61 = vpop.f32.mrb[35].mxu1 }
 0x161   : > { %v2204_v31 = vadd.f32 %v2153_v30, %v2010_v58  ;;  %1782 = vst.msk [vmem:[#allocation3 + $0x40] sm:$0xff] %vm480_vm7, %v1766_v51  ;;  %v2013_v63 = vld [vmem:[#allocation3 + $0x38] sm:$0xff]  ;;  %v1767_v32 = vadd.f32 %v1730_v61, %v1557_v60  ;;  %v4314_v2 = vpop.f32.mrb[32].mxu0  ;;  %v2338_v4 = vld [vmem:[#allocation3 + $0x10] sm:$0xff] }
 0x162   : > { %2222 = vst.msk [vmem:[#allocation3 + $0x30] sm:$0xff] %vm480_vm7, %v2206_v24  ;;  %v2207_v46 = vadd.f32 %v4311_v47, %v2013_v63  ;;  %1785 = vst.msk [vmem:[#allocation3 + $0x58] sm:$0xff] %vm480_vm7, %v1769_v17  ;;  %v2011_v0 = vld [vmem:[#allocation3 + $0x28] sm:$0xff]  ;;  %v2169_v3 = vpop.f32.mrb[33].mxu0  ;;  %v2336_v33 = vld [vmem:[#allocation3] sm:$0xff] }
 0x163   : > { %2220 = vst.msk [vmem:[#allocation3 + $0x20] sm:$0xff] %vm480_vm7, %v2204_v31  ;;  %v2205_v1 = vadd.f32 %v2156_v54, %v2011_v0  ;;  %1783 = vst.msk [vmem:[#allocation3 + $0x48] sm:$0xff] %vm480_vm7, %v1767_v32  ;;  %v4315_v36 = vpop.f32.mrb[34].mxu0  ;;  %v2339_v14 = vld [vmem:[#allocation3 + $0x18] sm:$0xff] }
 0x164   : > { %2223 = vst.msk [vmem:[#allocation3 + $0x38] sm:$0xff] %vm480_vm7, %v2207_v46  ;;  %v2172_v19 = vpop.f32.mrb[35].mxu0  ;;  %v2337_v44 = vld [vmem:[#allocation3 + $0x8] sm:$0xff] }
 0x165   : > { %2221 = vst.msk [vmem:[#allocation3 + $0x28] sm:$0xff] %vm480_vm7, %v2205_v1 }
 0x167   : > { %v2016_v6 = vld [vmem:[#allocation3 + $0x50] sm:$0xff]  ;;  %v4294_v10 = vpop.f32.mrb[36].mxu1 }
 0x168   : > { %v2210_v52 = vadd.f32 %v4314_v2, %v2016_v6  ;;  %v2014_v11 = vld [vmem:[#allocation3 + $0x40] sm:$0xff]  ;;  %v1772_v12 = vadd.f32 %v4294_v10, %v1562_v25  ;;  %v1743_v18 = vpop.f32.mrb[37].mxu1 }
 0x169   : > { %v2208_v13 = vadd.f32 %v2169_v3, %v2014_v11  ;;  %v2017_v7 = vld [vmem:[#allocation3 + $0x58] sm:$0xff]  ;;  %v1770_v20 = vadd.f32 %v1743_v18, %v1560_v16  ;;  %v4295_v21 = vpop.f32.mrb[38].mxu1  ;;  %v2342_v54 = vld [vmem:[#allocation3 + $0x30] sm:$0xff] }
 0x16a   : > { %2226 = vst.msk [vmem:[#allocation3 + $0x50] sm:$0xff] %vm480_vm7, %v2210_v52  ;;  %v2211_v8 = vadd.f32 %v4315_v36, %v2017_v7  ;;  %v2015_v9 = vld [vmem:[#allocation3 + $0x48] sm:$0xff]  ;;  %1788 = vst.msk [vmem:[#allocation3 + $0x70] sm:$0xff] %vm480_vm7, %v1772_v12  ;;  %v1773_v26 = vadd.f32 %v4295_v21, %v1563_v5  ;;  %v1746_v23 = vpop.f32.mrb[39].mxu1  ;;  %v2340_v59 = vld [vmem:[#allocation3 + $0x20] sm:$0xff] }
 0x16b   : > { %2224 = vst.msk [vmem:[#allocation3 + $0x40] sm:$0xff] %vm480_vm7, %v2208_v13  ;;  %v2209_v56 = vadd.f32 %v2172_v19, %v2015_v9  ;;  %1786 = vst.msk [vmem:[#allocation3 + $0x60] sm:$0xff] %vm480_vm7, %v1770_v20  ;;  %v1771_v50 = vadd.f32 %v1746_v23, %v1561_v27  ;;  %v2343_v60 = vld [vmem:[#allocation3 + $0x38] sm:$0xff] }
 0x16c   : > { %2227 = vst.msk [vmem:[#allocation3 + $0x58] sm:$0xff] %vm480_vm7, %v2211_v8  ;;  %1789 = vst.msk [vmem:[#allocation3 + $0x78] sm:$0xff] %vm480_vm7, %v1773_v26  ;;  %v2341_v0 = vld [vmem:[#allocation3 + $0x28] sm:$0xff] }
 0x16d   : > { %2225 = vst.msk [vmem:[#allocation3 + $0x48] sm:$0xff] %vm480_vm7, %v2209_v56  ;;  %1787 = vst.msk [vmem:[#allocation3 + $0x68] sm:$0xff] %vm480_vm7, %v1771_v50 }
 0x16f   : > { %v4330_v53 = vpop.f32.mrb[40].mxu1 }
 0x170   : > { %v2532_v28 = vadd.f32 %v4330_v53, %v2338_v4  ;;  %v2467_v34 = vpop.f32.mrb[41].mxu1 }
 0x171   : > { %v2020_v35 = vld [vmem:[#allocation3 + $0x70] sm:$0xff]  ;;  %v2530_v40 = vadd.f32 %v2467_v34, %v2336_v33  ;;  %v4331_v39 = vpop.f32.mrb[42].mxu1 }
 0x172   : > { %v2018_v41 = vld [vmem:[#allocation3 + $0x60] sm:$0xff]  ;;  %2548 = vst.msk [vmem:[#allocation3 + $0x10] sm:$0xff] %vm480_vm7, %v2532_v28  ;;  %v2533_v43 = vadd.f32 %v4331_v39, %v2339_v14  ;;  %v2470_v29 = vpop.f32.mrb[43].mxu1  ;;  %v2346_v7 = vld [vmem:[#allocation3 + $0x50] sm:$0xff] }
 0x173   : > { %v4318_v37 = vpop.f32.mrb[36].mxu0  ;;  %v2021_v30 = vld [vmem:[#allocation3 + $0x78] sm:$0xff]  ;;  %2546 = vst.msk [vmem:[#allocation3] sm:$0xff] %vm480_vm7, %v2530_v40  ;;  %v2531_v38 = vadd.f32 %v2470_v29, %v2337_v44  ;;  %v2344_v56 = vld [vmem:[#allocation3 + $0x40] sm:$0xff] }
 0x174   : > { %v2214_v15 = vadd.f32 %v4318_v37, %v2020_v35  ;;  %v2185_v42 = vpop.f32.mrb[37].mxu0  ;;  %v2019_v48 = vld [vmem:[#allocation3 + $0x68] sm:$0xff]  ;;  %2549 = vst.msk [vmem:[#allocation3 + $0x18] sm:$0xff] %vm480_vm7, %v2533_v43  ;;  %v2347_v18 = vld [vmem:[#allocation3 + $0x58] sm:$0xff] }
 0x175   : > { %v2212_v22 = vadd.f32 %v2185_v42, %v2018_v41  ;;  %v4319_v45 = vpop.f32.mrb[38].mxu0  ;;  %2547 = vst.msk [vmem:[#allocation3 + $0x8] sm:$0xff] %vm480_vm7, %v2531_v38  ;;  %v2345_v23 = vld [vmem:[#allocation3 + $0x48] sm:$0xff] }
 0x176   : > { %2230 = vst.msk [vmem:[#allocation3 + $0x70] sm:$0xff] %vm480_vm7, %v2214_v15  ;;  %v2215_v47 = vadd.f32 %v4319_v45, %v2021_v30  ;;  %v2188_v49 = vpop.f32.mrb[39].mxu0 }
 0x177   : > { %2228 = vst.msk [vmem:[#allocation3 + $0x60] sm:$0xff] %vm480_vm7, %v2212_v22  ;;  %v2213_v62 = vadd.f32 %v2188_v49, %v2019_v48  ;;  %v4334_v55 = vpop.f32.mrb[44].mxu1 }
 0x178   : > { %2231 = vst.msk [vmem:[#allocation3 + $0x78] sm:$0xff] %vm480_vm7, %v2215_v47  ;;  %v2536_v51 = vadd.f32 %v4334_v55, %v2342_v54  ;;  %v2483_v57 = vpop.f32.mrb[45].mxu1 }
 0x179   : > { %2229 = vst.msk [vmem:[#allocation3 + $0x68] sm:$0xff] %vm480_vm7, %v2213_v62  ;;  %v2581_v24 = vld [vmem:[#allocation3 + $0x10] sm:$0xff]  ;;  %v2534_v17 = vadd.f32 %v2483_v57, %v2340_v59  ;;  %v4335_v61 = vpop.f32.mrb[46].mxu1 }
 0x17a   : > { %2552 = vst.msk [vmem:[#allocation3 + $0x30] sm:$0xff] %vm480_vm7, %v2536_v51  ;;  %v2579_v63 = vld [vmem:[#allocation3] sm:$0xff]  ;;  %v2537_v46 = vadd.f32 %v4335_v61, %v2343_v60  ;;  %v2486_v1 = vpop.f32.mrb[47].mxu1 }
 0x17b   : > { %v4354_v58 = vpop.f32.mrb[40].mxu0  ;;  %2550 = vst.msk [vmem:[#allocation3 + $0x20] sm:$0xff] %vm480_vm7, %v2534_v17  ;;  %v2582_v3 = vld [vmem:[#allocation3 + $0x18] sm:$0xff]  ;;  %v2535_v6 = vadd.f32 %v2486_v1, %v2341_v0 }
 0x17c   : > { %v2791_v31 = vadd.f32 %v4354_v58, %v2581_v24  ;;  %v2726_v32 = vpop.f32.mrb[41].mxu0  ;;  %2553 = vst.msk [vmem:[#allocation3 + $0x38] sm:$0xff] %vm480_vm7, %v2537_v46  ;;  %v2580_v52 = vld [vmem:[#allocation3 + $0x8] sm:$0xff] }
 0x17d   : > { %v2789_v2 = vadd.f32 %v2726_v32, %v2579_v63  ;;  %v4355_v36 = vpop.f32.mrb[42].mxu0  ;;  %2551 = vst.msk [vmem:[#allocation3 + $0x28] sm:$0xff] %vm480_vm7, %v2535_v6  ;;  %v2350_v14 = vld [vmem:[#allocation3 + $0x70] sm:$0xff] }
 0x17e   : > { %2807 = vst.msk [vmem:[#allocation3 + $0x10] sm:$0xff] %vm480_vm7, %v2791_v31  ;;  %v2792_v19 = vadd.f32 %v4355_v36, %v2582_v3  ;;  %v2729_v11 = vpop.f32.mrb[43].mxu0  ;;  %v2348_v41 = vld [vmem:[#allocation3 + $0x60] sm:$0xff] }
 0x17f   : > { %2805 = vst.msk [vmem:[#allocation3] sm:$0xff] %vm480_vm7, %v2789_v2  ;;  %v2790_v13 = vadd.f32 %v2729_v11, %v2580_v52  ;;  %v4338_v8 = vpop.f32.mrb[48].mxu1  ;;  %v2351_v22 = vld [vmem:[#allocation3 + $0x78] sm:$0xff] }
 0x180   : > { %2808 = vst.msk [vmem:[#allocation3 + $0x18] sm:$0xff] %vm480_vm7, %v2792_v19  ;;  %v2540_v9 = vadd.f32 %v4338_v8, %v2346_v7  ;;  %v2499_v25 = vpop.f32.mrb[49].mxu1  ;;  %v2349_v49 = vld [vmem:[#allocation3 + $0x68] sm:$0xff] }
 0x181   : > { %2806 = vst.msk [vmem:[#allocation3 + $0x8] sm:$0xff] %vm480_vm7, %v2790_v13  ;;  %v2585_v10 = vld [vmem:[#allocation3 + $0x30] sm:$0xff]  ;;  %v2538_v16 = vadd.f32 %v2499_v25, %v2344_v56  ;;  %v4339_v20 = vpop.f32.mrb[50].mxu1 }
 0x182   : > { %2556 = vst.msk [vmem:[#allocation3 + $0x50] sm:$0xff] %vm480_vm7, %v2540_v9  ;;  %v2583_v21 = vld [vmem:[#allocation3 + $0x20] sm:$0xff]  ;;  %v2541_v27 = vadd.f32 %v4339_v20, %v2347_v18  ;;  %v2502_v50 = vpop.f32.mrb[51].mxu1 }
 0x183   : > { %v4358_v12 = vpop.f32.mrb[44].mxu0  ;;  %2554 = vst.msk [vmem:[#allocation3 + $0x40] sm:$0xff] %vm480_vm7, %v2538_v16  ;;  %v2586_v53 = vld [vmem:[#allocation3 + $0x38] sm:$0xff]  ;;  %v2539_v33 = vadd.f32 %v2502_v50, %v2345_v23 }
 0x184   : > { %v2795_v5 = vadd.f32 %v4358_v12, %v2585_v10  ;;  %v2742_v26 = vpop.f32.mrb[45].mxu0  ;;  %2557 = vst.msk [vmem:[#allocation3 + $0x58] sm:$0xff] %vm480_vm7, %v2541_v27  ;;  %v2584_v35 = vld [vmem:[#allocation3 + $0x28] sm:$0xff] }
 0x185   : > { %v2793_v4 = vadd.f32 %v2742_v26, %v2583_v21  ;;  %v4359_v28 = vpop.f32.mrb[46].mxu0  ;;  %2555 = vst.msk [vmem:[#allocation3 + $0x48] sm:$0xff] %vm480_vm7, %v2539_v33  ;;  %v3039_v60 = vld [vmem:[#allocation3 + $0x10] sm:$0xff] }
 0x186   : > { %2811 = vst.msk [vmem:[#allocation3 + $0x30] sm:$0xff] %vm480_vm7, %v2795_v5  ;;  %v2796_v34 = vadd.f32 %v4359_v28, %v2586_v53  ;;  %v2745_v37 = vpop.f32.mrb[47].mxu0  ;;  %v3037_v63 = vld [vmem:[#allocation3] sm:$0xff] }
 0x187   : > { %2809 = vst.msk [vmem:[#allocation3 + $0x20] sm:$0xff] %vm480_vm7, %v2793_v4  ;;  %v2794_v40 = vadd.f32 %v2745_v37, %v2584_v35  ;;  %v4342_v39 = vpop.f32.mrb[52].mxu1  ;;  %v3040_v2 = vld [vmem:[#allocation3 + $0x18] sm:$0xff] }
 0x188   : > { %2812 = vst.msk [vmem:[#allocation3 + $0x38] sm:$0xff] %vm480_vm7, %v2796_v34  ;;  %v2544_v15 = vadd.f32 %v4342_v39, %v2350_v14  ;;  %v2515_v42 = vpop.f32.mrb[53].mxu1  ;;  %v3038_v11 = vld [vmem:[#allocation3 + $0x8] sm:$0xff] }
 0x189   : > { %2810 = vst.msk [vmem:[#allocation3 + $0x28] sm:$0xff] %vm480_vm7, %v2794_v40  ;;  %v2589_v43 = vld [vmem:[#allocation3 + $0x50] sm:$0xff]  ;;  %v2542_v29 = vadd.f32 %v2515_v42, %v2348_v41  ;;  %v4343_v30 = vpop.f32.mrb[54].mxu1 }
 0x18a   : > { %2560 = vst.msk [vmem:[#allocation3 + $0x70] sm:$0xff] %vm480_vm7, %v2544_v15  ;;  %v2587_v38 = vld [vmem:[#allocation3 + $0x40] sm:$0xff]  ;;  %v2545_v48 = vadd.f32 %v4343_v30, %v2351_v22  ;;  %v2518_v62 = vpop.f32.mrb[55].mxu1  ;;  %v3679_v22 = vlaneseq  ;;  %v5331_v30 = vld [vmem:[%s5454_s3] ss:$0 sm:$0xff] }
 0x18b   : > { %v4362_v44 = vpop.f32.mrb[48].mxu0  ;;  %2558 = vst.msk [vmem:[#allocation3 + $0x60] sm:$0xff] %vm480_vm7, %v2542_v29  ;;  %v2590_v55 = vld [vmem:[#allocation3 + $0x58] sm:$0xff]  ;;  %v2543_v59 = vadd.f32 %v2518_v62, %v2349_v49 }
 0x18c   : > { %v2799_v45 = vadd.f32 %v4362_v44, %v2589_v43  ;;  %v2758_v47 = vpop.f32.mrb[49].mxu0  ;;  %2561 = vst.msk [vmem:[#allocation3 + $0x78] sm:$0xff] %vm480_vm7, %v2545_v48  ;;  %v2588_v24 = vld [vmem:[#allocation3 + $0x48] sm:$0xff] }
 0x18d   : > { %v2797_v54 = vadd.f32 %v2758_v47, %v2587_v38  ;;  %v4363_v51 = vpop.f32.mrb[50].mxu0  ;;  %2559 = vst.msk [vmem:[#allocation3 + $0x68] sm:$0xff] %vm480_vm7, %v2543_v59  ;;  %v3043_v18 = vld [vmem:[#allocation3 + $0x30] sm:$0xff]  ;;  %v5336_v47 = vld [vmem:[%s5455_s4] ss:$0 sm:$0xff]  ;;  %v5338_v59 = vshrl.u32 %v3679_v22, 7 }
 0x18e   : > { %2815 = vst.msk [vmem:[#allocation3 + $0x50] sm:$0xff] %vm480_vm7, %v2799_v45  ;;  %v2800_v57 = vadd.f32 %v4363_v51, %v2590_v55  ;;  %v2761_v58 = vpop.f32.mrb[51].mxu0  ;;  %v3041_v21 = vld [vmem:[#allocation3 + $0x20] sm:$0xff] }
 0x18f   : > { %2813 = vst.msk [vmem:[#allocation3 + $0x40] sm:$0xff] %vm480_vm7, %v2797_v54  ;;  %v2798_v17 = vadd.f32 %v2761_v58, %v2588_v24  ;;  %v4378_v61 = vpop.f32.mrb[56].mxu1  ;;  %v3044_v4 = vld [vmem:[#allocation3 + $0x38] sm:$0xff] }
 0x190   : > { %2816 = vst.msk [vmem:[#allocation3 + $0x58] sm:$0xff] %vm480_vm7, %v2800_v57  ;;  %v3233_v31 = vadd.f32 %v4378_v61, %v3039_v60  ;;  %v3168_v32 = vpop.f32.mrb[57].mxu1  ;;  %v3042_v37 = vld [vmem:[#allocation3 + $0x28] sm:$0xff] }
 0x191   : > { %2814 = vst.msk [vmem:[#allocation3 + $0x48] sm:$0xff] %vm480_vm7, %v2798_v17  ;;  %v2593_v46 = vld [vmem:[#allocation3 + $0x70] sm:$0xff]  ;;  %v3231_v1 = vadd.f32 %v3168_v32, %v3037_v63  ;;  %v4379_v3 = vpop.f32.mrb[58].mxu1 }
 0x192   : > { %v2591_v6 = vld [vmem:[#allocation3 + $0x60] sm:$0xff]  ;;  %3249 = vst.msk [vmem:[#allocation3 + $0x10] sm:$0xff] %vm480_vm7, %v3233_v31  ;;  %v3234_v52 = vadd.f32 %v4379_v3, %v3040_v2  ;;  %v3171_v13 = vpop.f32.mrb[59].mxu1 }
 0x193   : > { %v4366_v0 = vpop.f32.mrb[52].mxu0  ;;  %v2594_v8 = vld [vmem:[#allocation3 + $0x78] sm:$0xff]  ;;  %3247 = vst.msk [vmem:[#allocation3] sm:$0xff] %vm480_vm7, %v3231_v1  ;;  %v3232_v56 = vadd.f32 %v3171_v13, %v3038_v11 }
 0x194   : > { %v2803_v36 = vadd.f32 %v4366_v0, %v2593_v46  ;;  %v2774_v19 = vpop.f32.mrb[53].mxu0  ;;  %v2592_v10 = vld [vmem:[#allocation3 + $0x68] sm:$0xff]  ;;  %3250 = vst.msk [vmem:[#allocation3 + $0x18] sm:$0xff] %vm480_vm7, %v3234_v52 }
 0x195   : > { %v2801_v7 = vadd.f32 %v2774_v19, %v2591_v6  ;;  %v4367_v9 = vpop.f32.mrb[54].mxu0  ;;  %3248 = vst.msk [vmem:[#allocation3 + $0x8] sm:$0xff] %vm480_vm7, %v3232_v56  ;;  %v3047_v49 = vld [vmem:[#allocation3 + $0x50] sm:$0xff] }
 0x196   : > { %2819 = vst.msk [vmem:[#allocation3 + $0x70] sm:$0xff] %vm480_vm7, %v2803_v36  ;;  %v2804_v25 = vadd.f32 %v4367_v9, %v2594_v8  ;;  %v2777_v12 = vpop.f32.mrb[55].mxu0  ;;  %v3045_v58 = vld [vmem:[#allocation3 + $0x40] sm:$0xff] }
 0x197   : > { %2817 = vst.msk [vmem:[#allocation3 + $0x60] sm:$0xff] %vm480_vm7, %v2801_v7  ;;  %v2802_v16 = vadd.f32 %v2777_v12, %v2592_v10  ;;  %v4382_v20 = vpop.f32.mrb[60].mxu1  ;;  %v3048_v0 = vld [vmem:[#allocation3 + $0x58] sm:$0xff]  ;;  %v5351_v10 = vstv %s4079_s13 }
 0x198   : > { %2820 = vst.msk [vmem:[#allocation3 + $0x78] sm:$0xff] %vm480_vm7, %v2804_v25  ;;  %v3237_v5 = vadd.f32 %v4382_v20, %v3043_v18  ;;  %v3184_v26 = vpop.f32.mrb[61].mxu1  ;;  %v3046_v11 = vld [vmem:[#allocation3 + $0x48] sm:$0xff]  ;;  %v5358_v20 = vadd.s32 8, %v5338_v59  ;;  %vm3684_vm15 = vcmp.lt.s32.totalorder %v5338_v59, %v5351_v10 }
 0x199   : > { %2818 = vst.msk [vmem:[#allocation3 + $0x68] sm:$0xff] %vm480_vm7, %v2802_v16  ;;  %v3369_v27 = vld [vmem:[#allocation3 + $0x10] sm:$0xff]  ;;  %v3235_v50 = vadd.f32 %v3184_v26, %v3041_v21  ;;  %v4383_v53 = vpop.f32.mrb[62].mxu1 }
 0x19a   : > { %3253 = vst.msk [vmem:[#allocation3 + $0x30] sm:$0xff] %vm480_vm7, %v3237_v5  ;;  %v3367_v33 = vld [vmem:[#allocation3] sm:$0xff]  ;;  %v3238_v35 = vadd.f32 %v4383_v53, %v3044_v4  ;;  %v3187_v40 = vpop.f32.mrb[63].mxu1  ;;  %vm3685_vm1 = vcmp.lt.s32.totalorder %v5358_v20, %v5351_v10 }
 0x19b   : > { %v4402_v23 = vpop.f32.mrb[56].mxu0  ;;  %3251 = vst.msk [vmem:[#allocation3 + $0x20] sm:$0xff] %vm480_vm7, %v3235_v50  ;;  %v3370_v39 = vld [vmem:[#allocation3 + $0x18] sm:$0xff]  ;;  %v3236_v41 = vadd.f32 %v3187_v40, %v3042_v37 }
 0x19c   : > { %v3563_v28 = vadd.f32 %v4402_v23, %v3369_v27  ;;  %v3498_v34 = vpop.f32.mrb[57].mxu0  ;;  %3254 = vst.msk [vmem:[#allocation3 + $0x38] sm:$0xff] %vm480_vm7, %v3238_v35  ;;  %v3368_v43 = vld [vmem:[#allocation3 + $0x8] sm:$0xff] }
 0x19d   : > { %v3561_v14 = vadd.f32 %v3498_v34, %v3367_v33  ;;  %v4403_v15 = vpop.f32.mrb[58].mxu0  ;;  %3252 = vst.msk [vmem:[#allocation3 + $0x28] sm:$0xff] %vm480_vm7, %v3236_v41  ;;  %v3051_v22 = vld [vmem:[#allocation3 + $0x70] sm:$0xff] }
 0x19e   : > { %3579 = vst.msk [vmem:[#allocation3 + $0x10] sm:$0xff] %vm480_vm7, %v3563_v28  ;;  %v3564_v42 = vadd.f32 %v4403_v15, %v3370_v39  ;;  %v3501_v44 = vpop.f32.mrb[59].mxu0 }
 0x19f   : > { %3577 = vst.msk [vmem:[#allocation3] sm:$0xff] %vm480_vm7, %v3561_v14  ;;  %v3562_v29 = vadd.f32 %v3501_v44, %v3368_v43  ;;  %v4386_v62 = vpop.f32.mrb[64].mxu1 }
 0x1a0   : > { %3580 = vst.msk [vmem:[#allocation3 + $0x18] sm:$0xff] %vm480_vm7, %v3564_v42  ;;  %v3241_v57 = vadd.f32 %v4386_v62, %v3047_v49  ;;  %v3200_v17 = vpop.f32.mrb[65].mxu1 }
 0x1a1   : > { %3578 = vst.msk [vmem:[#allocation3 + $0x8] sm:$0xff] %vm480_vm7, %v3562_v29  ;;  %v3373_v45 = vld [vmem:[#allocation3 + $0x30] sm:$0xff]  ;;  %v3239_v32 = vadd.f32 %v3200_v17, %v3045_v58  ;;  %v4387_v1 = vpop.f32.mrb[66].mxu1 }
 0x1a2   : > { %v3371_v54 = vld [vmem:[#allocation3 + $0x20] sm:$0xff]  ;;  %3257 = vst.msk [vmem:[#allocation3 + $0x50] sm:$0xff] %vm480_vm7, %v3241_v57  ;;  %v3242_v19 = vadd.f32 %v4387_v1, %v3048_v0  ;;  %v3203_v13 = vpop.f32.mrb[67].mxu1 }
 0x1a3   : > { %v4406_v38 = vpop.f32.mrb[60].mxu0  ;;  %v3374_v60 = vld [vmem:[#allocation3 + $0x38] sm:$0xff]  ;;  %3255 = vst.msk [vmem:[#allocation3 + $0x40] sm:$0xff] %vm480_vm7, %v3239_v32  ;;  %v3240_v56 = vadd.f32 %v3203_v13, %v3046_v11 }
 0x1a4   : > { %v3567_v48 = vadd.f32 %v4406_v38, %v3373_v45  ;;  %v3514_v55 = vpop.f32.mrb[61].mxu0  ;;  %v3372_v2 = vld [vmem:[#allocation3 + $0x28] sm:$0xff]  ;;  %3258 = vst.msk [vmem:[#allocation3 + $0x58] sm:$0xff] %vm480_vm7, %v3242_v19 }
 0x1a5   : > { %v3595_v51 = vld [vmem:[#allocation3 + $0x10] sm:$0xff]  ;;  %v3565_v24 = vadd.f32 %v3514_v55, %v3371_v54  ;;  %v4407_v61 = vpop.f32.mrb[62].mxu0  ;;  %3256 = vst.msk [vmem:[#allocation3 + $0x48] sm:$0xff] %vm480_vm7, %v3240_v56 }
 0x1a6   : > { %v3618_v31 = vmul.f32 %v5331_v30, %v3595_v51  ;;  %v3593_v63 = vld [vmem:[#allocation3] sm:$0xff]  ;;  %3583 = vst.msk [vmem:[#allocation3 + $0x30] sm:$0xff] %vm480_vm7, %v3567_v48  ;;  %v3568_v46 = vadd.f32 %v4407_v61, %v3374_v60  ;;  %v3517_v3 = vpop.f32.mrb[63].mxu0 }
 0x1a7   : > { %v3616_v36 = vmul.f32 %v5331_v30, %v3593_v63  ;;  %v3596_v6 = vld [vmem:[#allocation3 + $0x18] sm:$0xff]  ;;  %3581 = vst.msk [vmem:[#allocation3 + $0x20] sm:$0xff] %vm480_vm7, %v3565_v24  ;;  %v3566_v52 = vadd.f32 %v3517_v3, %v3372_v2  ;;  %v3049_v51 = vld [vmem:[#allocation3 + $0x60] sm:$0xff]  ;;  %v3050_v2 = vld [vmem:[#allocation3 + $0x68] sm:$0xff] }
 0x1a8   : > { %v3641_v7 = vadd.f32 %v5336_v47, %v3618_v31  ;;  %v3619_v8 = vmul.f32 %v5331_v30, %v3596_v6  ;;  %v3594_v9 = vld [vmem:[#allocation3 + $0x8] sm:$0xff]  ;;  %3584 = vst.msk [vmem:[#allocation3 + $0x38] sm:$0xff] %vm480_vm7, %v3568_v46  ;;  %v3052_v31 = vld [vmem:[#allocation3 + $0x78] sm:$0xff] }
 0x1a9   : > { %v3639_v25 = vadd.f32 %v5336_v47, %v3616_v36  ;;  %v3617_v12 = vmul.f32 %v5331_v30, %v3594_v9  ;;  %3582 = vst.msk [vmem:[#allocation3 + $0x28] sm:$0xff] %vm480_vm7, %v3566_v52  ;;  %v3377_v35 = vld [vmem:[#allocation3 + $0x50] sm:$0xff] }
 0x1aa   : > { %v3657_v16 = vmax.f32 %v3641_v7, 0.0  ;;  %v3642_v18 = vadd.f32 %v5336_v47, %v3619_v8  ;;  %v3375_v42 = vld [vmem:[#allocation3 + $0x40] sm:$0xff] }
 0x1ab   : > { %v3655_v5 = vmax.f32 %v3639_v25, 0.0  ;;  %v3640_v21 = vadd.f32 %v5336_v47, %v3617_v12  ;;  %v4410_v26 = vpop.f32.mrb[64].mxu0  ;;  %v3378_v48 = vld [vmem:[#allocation3 + $0x58] sm:$0xff] }
 0x1ac   : > { %v3658_v27 = vmax.f32 %v3642_v18, 0.0  ;;  %v3530_v23 = vpop.f32.mrb[65].mxu0  ;;  %v3571_v41 = vadd.f32 %v4410_v26, %v3377_v35  ;;  %v4390_v45 = vpop.f32.mrb[68].mxu1  ;;  %v3376_v24 = vld [vmem:[#allocation3 + $0x48] sm:$0xff] }
 0x1ad   : > { %v3671_v50 = vmax.f32 %v3655_v5, %v3657_v16  ;;  %v3656_v4 = vmax.f32 %v3640_v21, 0.0  ;;  %v3599_v53 = vld [vmem:[#allocation3 + $0x30] sm:$0xff]  ;;  %v4411_v28 = vpop.f32.mrb[66].mxu0  ;;  %v3569_v38 = vadd.f32 %v3530_v23, %v3375_v42  ;;  %v3245_v55 = vadd.f32 %v4390_v45, %v3051_v22  ;;  %v3216_v57 = vpop.f32.mrb[69].mxu1 }
 0x1ae   : > { %v3622_v33 = vmul.f32 %v5331_v30, %v3599_v53  ;;  %v3597_v34 = vld [vmem:[#allocation3 + $0x20] sm:$0xff]  ;;  %v3533_v37 = vpop.f32.mrb[67].mxu0  ;;  %3587 = vst.msk [vmem:[#allocation3 + $0x50] sm:$0xff] %vm480_vm7, %v3571_v41  ;;  %v3243_v60 = vadd.f32 %v3216_v57, %v3049_v51  ;;  %v3572_v61 = vadd.f32 %v4411_v28, %v3378_v48  ;;  %v4391_v63 = vpop.f32.mrb[70].mxu1 }
 0x1af   : > { %v3690_v40 = vsel %vm3684_vm15, %v3671_v50, 0.0  ;;  %v3672_v14 = vmax.f32 %v3656_v4, %v3658_v27  ;;  %v3620_v39 = vmul.f32 %v5331_v30, %v3597_v34  ;;  %v3600_v15 = vld [vmem:[#allocation3 + $0x38] sm:$0xff]  ;;  %3585 = vst.msk [vmem:[#allocation3 + $0x40] sm:$0xff] %vm480_vm7, %v3569_v38  ;;  %3261 = vst.msk [vmem:[#allocation3 + $0x70] sm:$0xff] %vm480_vm7, %v3245_v55  ;;  %v3246_v0 = vadd.f32 %v4391_v63, %v3052_v31  ;;  %v3219_v3 = vpop.f32.mrb[71].mxu1 }
 0x1b0   : > { %3698 = vst.msk [vmem:[#allocation4] sm:$0xff] %vm480_vm7, %v3690_v40  ;;  %v3645_v43 = vadd.f32 %v5336_v47, %v3622_v33  ;;  %v3623_v44 = vmul.f32 %v5331_v30, %v3600_v15  ;;  %v3598_v29 = vld [vmem:[#allocation3 + $0x28] sm:$0xff]  ;;  %v3570_v1 = vadd.f32 %v3533_v37, %v3376_v24  ;;  %3259 = vst.msk [vmem:[#allocation3 + $0x60] sm:$0xff] %vm480_vm7, %v3243_v60 }
 0x1b1   : > { %v3691_v49 = vsel %vm3685_vm1, %v3672_v14, 0.0  ;;  %v3643_v62 = vadd.f32 %v5336_v47, %v3620_v39  ;;  %v3621_v54 = vmul.f32 %v5331_v30, %v3598_v29  ;;  %3588 = vst.msk [vmem:[#allocation3 + $0x58] sm:$0xff] %vm480_vm7, %v3572_v61  ;;  %v3244_v19 = vadd.f32 %v3219_v3, %v3050_v2  ;;  %3262 = vst.msk [vmem:[#allocation3 + $0x78] sm:$0xff] %vm480_vm7, %v3246_v0 }
 0x1b2   : > { %3699 = vst.msk [vmem:[#allocation4 + $0x8] sm:$0xff] %vm480_vm7, %v3691_v49  ;;  %v3661_v58 = vmax.f32 %v3645_v43, 0.0  ;;  %v3646_v17 = vadd.f32 %v5336_v47, %v3623_v44  ;;  %3586 = vst.msk [vmem:[#allocation3 + $0x48] sm:$0xff] %vm480_vm7, %v3570_v1 }
 0x1b3   : > { %v3659_v32 = vmax.f32 %v3643_v62, 0.0  ;;  %v3644_v46 = vadd.f32 %v5336_v47, %v3621_v54  ;;  %v4414_v36 = vpop.f32.mrb[68].mxu0  ;;  %3260 = vst.msk [vmem:[#allocation3 + $0x68] sm:$0xff] %vm480_vm7, %v3244_v19 }
 0x1b4   : > { %v3662_v6 = vmax.f32 %v3646_v17, 0.0  ;;  %v3546_v52 = vpop.f32.mrb[69].mxu0 }
 0x1b5   : > { %v3673_v11 = vmax.f32 %v3659_v32, %v3661_v58  ;;  %v3660_v13 = vmax.f32 %v3644_v46, 0.0  ;;  %v4415_v7 = vpop.f32.mrb[70].mxu0  ;;  %v3603_v25 = vld [vmem:[#allocation3 + $0x50] sm:$0xff] }
 0x1b6   : > { %v3549_v8 = vpop.f32.mrb[71].mxu0  ;;  %v3626_v5 = vmul.f32 %v5331_v30, %v3603_v25  ;;  %v3601_v21 = vld [vmem:[#allocation3 + $0x40] sm:$0xff]  ;;  %v3381_v23 = vld [vmem:[#allocation3 + $0x70] sm:$0xff] }
 0x1b7   : > { %v3692_v9 = vsel %vm3684_vm15, %v3673_v11, 0.0  ;;  %v3674_v56 = vmax.f32 %v3660_v13, %v3662_v6  ;;  %v3624_v27 = vmul.f32 %v5331_v30, %v3601_v21  ;;  %v3575_v53 = vadd.f32 %v4414_v36, %v3381_v23  ;;  %v3379_v28 = vld [vmem:[#allocation3 + $0x60] sm:$0xff] }
 0x1b8   : > { %3700 = vst.msk [vmem:[#allocation4 + $0x10] sm:$0xff] %vm480_vm7, %v3692_v9  ;;  %v3649_v50 = vadd.f32 %v5336_v47, %v3626_v5  ;;  %v3604_v4 = vld [vmem:[#allocation3 + $0x58] sm:$0xff]  ;;  %v3573_v40 = vadd.f32 %v3546_v52, %v3379_v28 }
 0x1b9   : > { %v3706_v12 = vld [vmem:[#allocation4] ss:$2 sm:$0xff]  ;;  %v3714_v16 = vld [vmem:[#allocation4 + $0x1] ss:$2 sm:$0xff]  ;;  %v3693_v18 = vsel %vm3685_vm1, %v3674_v56, 0.0  ;;  %v3647_v34 = vadd.f32 %v5336_v47, %v3624_v27  ;;  %v3627_v35 = vmul.f32 %v5331_v30, %v3604_v4  ;;  %v3382_v14 = vld [vmem:[#allocation3 + $0x78] sm:$0xff] }
 0x1ba   : > { %v3721_v26 = vmax.f32 %v3706_v12, %v3714_v16  ;;  %3701 = vst.msk [vmem:[#allocation4 + $0x18] sm:$0xff] %vm480_vm7, %v3693_v18  ;;  %v3602_v37 = vld [vmem:[#allocation3 + $0x48] sm:$0xff]  ;;  %v3665_v39 = vmax.f32 %v3649_v50, 0.0  ;;  %3591 = vst.msk [vmem:[#allocation3 + $0x70] sm:$0xff] %vm480_vm7, %v3575_v53  ;;  %v3576_v41 = vadd.f32 %v4415_v7, %v3382_v14 }
 0x1bb   : > { %v3625_v15 = vmul.f32 %v5331_v30, %v3602_v37  ;;  %v3380_v42 = vld [vmem:[#allocation3 + $0x68] sm:$0xff]  ;;  %v3663_v43 = vmax.f32 %v3647_v34, 0.0  ;;  %v3650_v44 = vadd.f32 %v5336_v47, %v3627_v35  ;;  %3589 = vst.msk [vmem:[#allocation3 + $0x60] sm:$0xff] %vm480_vm7, %v3573_v40 }
 0x1bc   : > { %v4088_v33 = vpack.c.bf16 %v3721_v26, %v3721_v26  ;;  %v3574_v29 = vadd.f32 %v3549_v8, %v3380_v42  ;;  %3592 = vst.msk [vmem:[#allocation3 + $0x78] sm:$0xff] %vm480_vm7, %v3576_v41 }
 0x1bd   : > { %v3648_v22 = vadd.f32 %v5336_v47, %v3625_v15  ;;  %v3675_v45 = vmax.f32 %v3663_v43, %v3665_v39  ;;  %v3666_v38 = vmax.f32 %v3650_v44, 0.0 }
 0x1be   : > { %3741 = vst.msk [vmem:[%s5404_s16] sm:$0xf] %vm207_vm0, %v4088_v33 }
 0x1bf   : > { %3590 = vst.msk [vmem:[#allocation3 + $0x68] sm:$0xff] %vm480_vm7, %v3574_v29  ;;  %v3664_v62 = vmax.f32 %v3648_v22, 0.0  ;;  %v3694_v55 = vsel %vm3684_vm15, %v3675_v45, 0.0 }
 0x1c0   : > { %3702 = vst.msk [vmem:[#allocation4 + $0x20] sm:$0xff] %vm480_vm7, %v3694_v55 }
 0x1c1   : > { %v3708_v48 = vld [vmem:[#allocation4 + $0x10] ss:$2 sm:$0xff]  ;;  %v3716_v49 = vld [vmem:[#allocation4 + $0x11] ss:$2 sm:$0xff]  ;;  %v3676_v51 = vmax.f32 %v3664_v62, %v3666_v38 }
 0x1c2   : > { %v3722_v54 = vmax.f32 %v3708_v48, %v3716_v49  ;;  %v3607_v24 = vld [vmem:[#allocation3 + $0x70] sm:$0xff]  ;;  %v3605_v60 = vld [vmem:[#allocation3 + $0x60] sm:$0xff] }
 0x1c3   : > { %v3695_v58 = vsel %vm3685_vm1, %v3676_v51, 0.0  ;;  %v3630_v17 = vmul.f32 %v5331_v30, %v3607_v24  ;;  %v3628_v61 = vmul.f32 %v5331_v30, %v3605_v60  ;;  %v3608_v31 = vld [vmem:[#allocation3 + $0x78] sm:$0xff] }
 0x1c4   : > { %v4089_v57 = vpack.c.bf16 %v3722_v54, %v3722_v54  ;;  %3703 = vst.msk [vmem:[#allocation4 + $0x28] sm:$0xff] %vm480_vm7, %v3695_v58  ;;  %v3631_v32 = vmul.f32 %v5331_v30, %v3608_v31 }
 0x1c5   : > { %v3653_v63 = vadd.f32 %v5336_v47, %v3630_v17  ;;  %v3651_v0 = vadd.f32 %v5336_v47, %v3628_v61 }
 0x1c6   : > { %3742 = vst.msk [vmem:[%s5404_s16 + $0x4] sm:$0xf] %vm207_vm0, %v4089_v57  ;;  %v3606_v46 = vld [vmem:[#allocation3 + $0x68] sm:$0xff]  ;;  %v3654_v3 = vadd.f32 %v5336_v47, %v3631_v32 }
 0x1c7   : > { %v3629_v1 = vmul.f32 %v5331_v30, %v3606_v46  ;;  %v3669_v2 = vmax.f32 %v3653_v63, 0.0  ;;  %v3667_v36 = vmax.f32 %v3651_v0, 0.0 }
 0x1c8   : > { %v3670_v19 = vmax.f32 %v3654_v3, 0.0 }
 0x1c9   : > { %v3652_v6 = vadd.f32 %v5336_v47, %v3629_v1  ;;  %v3677_v52 = vmax.f32 %v3667_v36, %v3669_v2 }
 0x1cb   : > { %v3668_v11 = vmax.f32 %v3652_v6, 0.0  ;;  %v3710_v13 = vld [vmem:[#allocation4 + $0x20] ss:$2 sm:$0xff]  ;;  %v3718_v7 = vld [vmem:[#allocation4 + $0x21] ss:$2 sm:$0xff]  ;;  %v3696_v9 = vsel %vm3684_vm15, %v3677_v52, 0.0 }
 0x1cc   : > { %v3723_v8 = vmax.f32 %v3710_v13, %v3718_v7  ;;  %3704 = vst.msk [vmem:[#allocation4 + $0x30] sm:$0xff] %vm480_vm7, %v3696_v9 }
 0x1cd   : > { %v3678_v56 = vmax.f32 %v3668_v11, %v3670_v19 }
 0x1ce   : > { %v4090_v30 = vpack.c.bf16 %v3723_v8, %v3723_v8 }
 0x1cf   : > { %v3697_v25 = vsel %vm3685_vm1, %v3678_v56, 0.0 }
 0x1d0   : > { %3705 = vst.msk [vmem:[#allocation4 + $0x38] sm:$0xff] %vm480_vm7, %v3697_v25 }
 0x1d1   : > { %3743 = vst.msk [vmem:[%s5404_s16 + $0x8] sm:$0xf] %vm207_vm0, %v4090_v30 }
 0x1d7   : > { %v3712_v47 = vld [vmem:[#allocation4 + $0x30] ss:$2 sm:$0xff]  ;;  %v3720_v12 = vld [vmem:[#allocation4 + $0x31] ss:$2 sm:$0xff] }
 0x1d8   : > { %v3724_v16 = vmax.f32 %v3712_v47, %v3720_v12 }
 0x1da   : > { %v4091_v18 = vpack.c.bf16 %v3724_v16, %v3724_v16 }
 0x1dc   : > { %3744 = vst.msk [vmem:[%s5404_s16 + $0xc] sm:$0xf] %vm207_vm0, %v4091_v18 }
 0x1dd PF: > { %s21_s23 = sadd.s32 1, %s4515_s23  }
 0x1de   : > { %p18_p9 = scmp.ge.s32.totalorder %s21_s23, 4  }
 0x1e0   :  { %20 = sbr.rel (!%p18_p9) target bundleno = 16 (0x10), region = 83 }

</bundles_post_ra>
